<compile_context>
chip_gen: v5e
topology: v5e:2x2
jax: 0.10.0
libtpu: 0.0.40
codegen_flags: <defaults>
</compile_context>

<pallas_src>
import functools

import jax
import jax.numpy as jnp
from jax.experimental import pallas as pl
from jax.experimental.pallas import tpu as pltpu


# ----------------------------------------------------------------------------
# Fused kernel: one batch element per grid step, everything VMEM-resident.
# ----------------------------------------------------------------------------
def _qnet_kernel(xe_ref, xo_ref,
                 w1_ref, b1_ref, w2_ref, b2_ref, w3_ref, b3_ref,
                 wf1_ref, bf1_ref, wf2_ref, bf2_ref,
                 o_ref, *, h1, w1, h2, w2, h3, w3):
    f32, bf16 = jnp.float32, jnp.bfloat16
    h1h, w1h = h1 // 2, w1 // 2

    xe = xe_ref[0]          # (hb, ceil(wb/2), 16*C)  even xs columns, bf16
    xo = xo_ref[0]          # (hb, wb//2,      16*C)  odd  xs columns, bf16
    b1 = b1_ref[...]        # (1, 32)  f32
    b2 = b2_ref[...]        # (1, 64)  f32
    b3 = b3_ref[...]        # (1, 64)  f32
    bf1 = bf1_ref[...]      # (1, 512) f32
    bf2 = bf2_ref[...]      # (1, A)   f32

    # ---- conv1: 8x8 / stride 4, expressed as 2x2 blocked taps over the
    #      space-to-depth input.  M dim = output-column half-index q. --------
    tap_cache = {}

    def conv1_tap(r, t):            # rows of xs at block-row r, columns 2q+t
        key = (r, t)
        if key not in tap_cache:
            if t % 2 == 0:
                tap_cache[key] = xe[r, t // 2:t // 2 + w1h, :]   # (w1h, 16C)
            else:
                tap_cache[key] = xo[r, 0:w1h, :]                 # (w1h, 16C)
        return tap_cache[key]

    # P[(a, b, p)][q, :] = relu(conv1)[2p + a, 2q + b, :]   shape (w1h, 32)
    P = {}
    for p in range(h1h):
        for a in range(2):
            for b in range(2):
                acc = None
                for i in range(2):
                    for j in range(2):
                        d = jnp.dot(conv1_tap(2 * p + a + i, b + j),
                                    w1_ref[i * 2 + j],
                                    preferred_element_type=f32)
                        acc = d if acc is None else acc + d
                P[(a, b, p)] = jnp.maximum(acc + b1, 0.0).astype(bf16)

    # ---- conv2: 4x4 / stride 2 -> 2x2 blocked taps over the parity-split
    #      conv1 output; every tap is a unit-stride row slice. --------------
    out2_rows = []                  # out2_rows[oh2][ow2, :]  shape (w2, 64)
    for oh2 in range(h2):
        acc = None
        for a in range(2):
            for b in range(2):
                for I in range(2):
                    for J in range(2):
                        tap = P[(a, b, oh2 + I)][J:J + w2, :]      # (w2, 32)
                        d = jnp.dot(tap,
                                    w2_ref[((a * 2 + b) * 2 + I) * 2 + J],
                                    preferred_element_type=f32)
                        acc = d if acc is None else acc + d
        out2_rows.append(jnp.maximum(acc + b2, 0.0).astype(bf16))

    # ---- conv3: 3x3 / stride 1 ---------------------------------------------
    out3_rows = []                  # out3_rows[p3][q3, :]  shape (w3, 64)
    for p3 in range(h3):
        acc = None
        for i in range(3):
            for j in range(3):
                tap = out2_rows[p3 + i][j:j + w3, :]               # (w3, 64)
                d = jnp.dot(tap, w3_ref[i * 3 + j],
                            preferred_element_type=f32)
                acc = d if acc is None else acc + d
        out3_rows.append(jnp.maximum(acc + b3, 0.0).astype(bf16))

    # ---- fc1 (+ReLU): PyTorch's NCHW flatten is folded into the per-position
    #      weight blocks, so no activation permutation is needed. ------------
    acc = None
    for p3 in range(h3):
        for q3 in range(w3):
            vec = out3_rows[p3][q3:q3 + 1, :]                      # (1, 64)
            d = jnp.dot(vec, wf1_ref[p3 * w3 + q3],
                        preferred_element_type=f32)
            acc = d if acc is None else acc + d
    hfc1 = jnp.maximum(acc + bf1, 0.0).astype(bf16)                # (1, 512)

    # ---- fc2 (same epilogue, no separate launch) ----------------------------
    out = jnp.dot(hfc1, wf2_ref[...], preferred_element_type=f32) + bf2
    o_ref[0] = out                                                 # (1, A) f32


# ----------------------------------------------------------------------------
# Parameter init: blocked / pre-permuted weights (bf16) + torch-layout f32
# masters for the pure-JAX reference check.
# ----------------------------------------------------------------------------
def init_qnetwork_params(state_size, action_size, seed=0):
    h, w, in_channels = state_size
    h1 = (h - 8) // 4 + 1
    w1 = (w - 8) // 4 + 1
    h2 = (h1 - 4) // 2 + 1
    w2 = (w1 - 4) // 2 + 1
    h3, w3 = h2 - 2, w2 - 2
    flat = h3 * w3 * 64

    key = jax.random.PRNGKey(seed)
    ks = jax.random.split(key, 10)

    def nrm(k_, shape, scale=0.05):
        v = scale * jax.random.normal(k_, shape, dtype=jnp.float32)
        # Round to bf16 once so kernel (bf16) and reference (f32) share
        # exactly the same weights.
        return v.astype(jnp.bfloat16).astype(jnp.float32)

    conv1_w = nrm(ks[0], (32, in_channels, 8, 8))
    conv1_b = nrm(ks[1], (32,))
    conv2_w = nrm(ks[2], (64, 32, 4, 4))
    conv2_b = nrm(ks[3], (64,))
    conv3_w = nrm(ks[4], (64, 64, 3, 3))
    conv3_b = nrm(ks[5], (64,))
    fc1_w = nrm(ks[6], (flat, 512))          # (in_features, out_features)
    fc1_b = nrm(ks[7], (512,))
    fc2_w = nrm(ks[8], (512, action_size))
    fc2_b = nrm(ks[9], (action_size,))

    c = in_channels
    # conv1 8x8/s4 -> 2x2 taps of width 16*C, tap index i*2+j,
    # per-tap feature order (dh, dw, c) matches the space-to-depth input.
    w1b = conv1_w.reshape(32, c, 2, 4, 2, 4).transpose(2, 4, 3, 5, 1, 0)
    w1b = w1b.reshape(4, 16 * c, 32)
    # conv2 4x4/s2 -> 2x2 taps over the (row,col)-parity-split conv1 output,
    # tap index ((a*2+b)*2+I)*2+J   (ki = 2I+a, kj = 2J+b).
    w2b = conv2_w.reshape(64, 32, 2, 2, 2, 2).transpose(3, 5, 2, 4, 1, 0)
    w2b = w2b.reshape(16, 32, 64)
    # conv3 3x3/s1, tap index i*3+j.
    w3b = conv3_w.transpose(2, 3, 1, 0).reshape(9, 64, 64)
    # fc1: fold torch's NCHW flatten (row = c*(h3*w3) + p3*w3 + q3) into
    # per-spatial-position 64x512 blocks.
    wf1b = fc1_w.reshape(64, h3, w3, 512).transpose(1, 2, 0, 3)
    wf1b = wf1b.reshape(h3 * w3, 64, 512)

    return {
        "w1b": w1b.astype(jnp.bfloat16), "b1": conv1_b.reshape(1, 32),
        "w2b": w2b.astype(jnp.bfloat16), "b2": conv2_b.reshape(1, 64),
        "w3b": w3b.astype(jnp.bfloat16), "b3": conv3_b.reshape(1, 64),
        "wf1b": wf1b.astype(jnp.bfloat16), "bf1": fc1_b.reshape(1, 512),
        "wf2": fc2_w.astype(jnp.bfloat16), "bf2": fc2_b.reshape(1, action_size),
        # torch-layout f32 masters, used only by the reference check
        "ref": {
            "conv1_w": conv1_w, "conv1_b": conv1_b,
            "conv2_w": conv2_w, "conv2_b": conv2_b,
            "conv3_w": conv3_w, "conv3_b": conv3_b,
            "fc1_w": fc1_w, "fc1_b": fc1_b,
            "fc2_w": fc2_w, "fc2_b": fc2_b,
        },
    }


# ----------------------------------------------------------------------------
# Forward pass: one tiny XLA input rearrangement + ONE fused pallas_call.
# ----------------------------------------------------------------------------
def qnetwork_forward(params, x_nchw):
    n, c, h, w = x_nchw.shape
    assert h % 4 == 0 and w % 4 == 0, "spatial dims must be multiples of 4"
    hb, wb = h // 4, w // 4
    h1, w1 = hb - 1, wb - 1                     # conv1 output (k=8, s=4)
    assert h1 % 2 == 0 and w1 % 2 == 0, "conv1 output must be even (stride-2 blocking)"
    h2, w2 = (h1 - 4) // 2 + 1, (w1 - 4) // 2 + 1
    h3, w3 = h2 - 2, w2 - 2
    assert h3 >= 1 and w3 >= 1

    oc1 = params["w1b"].shape[2]
    oc2 = params["w2b"].shape[2]
    oc3 = params["w3b"].shape[2]
    nf1 = params["wf1b"].shape[2]
    act = params["wf2"].shape[1]

    # Single fused XLA rearrangement of the (small) input: NCHW -> NHWC,
    # space-to-depth by conv1's stride (4), split by column parity, bf16.
    xh = jnp.transpose(x_nchw, (0, 2, 3, 1))
    xs = xh.reshape(n, hb, 4, wb, 4, c).transpose(0, 1, 3, 2, 4, 5)
    xs = xs.reshape(n, hb, wb, 16 * c).astype(jnp.bfloat16)
    xe = xs[:, :, 0::2, :]                      # (n, hb, ceil(wb/2), 16c)
    xo = xs[:, :, 1::2, :]                      # (n, hb, wb//2,      16c)
    we, wo, m1 = xe.shape[2], xo.shape[2], 16 * c

    kernel = functools.partial(_qnet_kernel,
                               h1=h1, w1=w1, h2=h2, w2=w2, h3=h3, w3=w3)

    def full(arr):
        s = tuple(arr.shape)
        return pl.BlockSpec(s, lambda nn, _s=s: (0,) * len(_s))

    flops = 2 * n * (
        (h1 * w1) * (64 * c) * oc1
        + (h2 * w2) * (16 * oc1) * oc2
        + (h3 * w3) * (9 * oc2) * oc3
        + (h3 * w3 * oc3) * nf1
        + nf1 * act)
    param_bytes = sum(
        int(params[k_].size) * params[k_].dtype.itemsize
        for k_ in ("w1b", "b1", "w2b", "b2", "w3b", "b3",
                   "wf1b", "bf1", "wf2", "bf2"))
    bytes_accessed = int(xe.size * 2 + xo.size * 2 + param_bytes + n * act * 4)

    out = pl.pallas_call(
        kernel,
        out_shape=jax.ShapeDtypeStruct((n, 1, act), jnp.float32),
        grid_spec=pltpu.PrefetchScalarGridSpec(
            num_scalar_prefetch=0,
            grid=(n,),
            in_specs=[
                pl.BlockSpec((1, hb, we, m1), lambda nn: (nn, 0, 0, 0)),
                pl.BlockSpec((1, hb, wo, m1), lambda nn: (nn, 0, 0, 0)),
                full(params["w1b"]), full(params["b1"]),
                full(params["w2b"]), full(params["b2"]),
                full(params["w3b"]), full(params["b3"]),
                full(params["wf1b"]), full(params["bf1"]),
                full(params["wf2"]), full(params["bf2"]),
            ],
            out_specs=pl.BlockSpec((1, 1, act), lambda nn: (nn, 0, 0)),
        ),
        compiler_params=pltpu.CompilerParams(
            dimension_semantics=("parallel",),      # batch split across cores
            vmem_limit_bytes=32 << 20,
        ),
        cost_estimate=pl.CostEstimate(
            flops=flops, transcendentals=0, bytes_accessed=bytes_accessed),
    )(xe, xo,
      params["w1b"], params["b1"], params["w2b"], params["b2"],
      params["w3b"], params["b3"], params["wf1b"], params["bf1"],
      params["wf2"], params["bf2"])
    return out.reshape(n, act)


# ----------------------------------------------------------------------------
# Pure-JAX f32 reference (same bf16-rounded weights) for the self-check.
# ----------------------------------------------------------------------------
def reference_forward(params, x_nchw):
    p = params["ref"]
    x = x_nchw.astype(jnp.bfloat16).astype(jnp.float32)

    def conv(xx, wt, bb, s):
        y = jax.lax.conv_general_dilated(
            xx, wt, window_strides=(s, s), padding="VALID",
            dimension_numbers=("NCHW", "OIHW", "NCHW"),
            precision=jax.lax.Precision.HIGHEST)
        return jnp.maximum(y + bb.reshape(1, -1, 1, 1), 0.0)

    x = conv(x, p["conv1_w"], p["conv1_b"], 4)
    x = conv(x, p["conv2_w"], p["conv2_b"], 2)
    x = conv(x, p["conv3_w"], p["conv3_b"], 1)
    x = x.reshape(x.shape[0], -1)                      # NCHW flatten, as torch
    x = jnp.maximum(
        jnp.dot(x, p["fc1_w"], precision=jax.lax.Precision.HIGHEST)
        + p["fc1_b"], 0.0)
    return (jnp.dot(x, p["fc2_w"], precision=jax.lax.Precision.HIGHEST)
            + p["fc2_b"])


if __name__ == "__main__":
    # 44x44 exercises the general code paths (h_out = w_out = 2), including
    # the NCHW-flatten fold for fc1, while staying tiny.
    state_size = (44, 44, 4)          # (H, W, C) as in the PyTorch __init__
    action_size = 6
    batch = 2

    params = init_qnetwork_params(state_size, action_size, seed=0)

    key = jax.random.PRNGKey(0)
    x = jax.random.normal(
        key, (batch, state_size[2], state_size[0], state_size[1]),
        dtype=jnp.float32)            # NCHW, like PyTorch

    fwd = jax.jit(qnetwork_forward)
    out = jax.block_until_ready(fwd(params, x))
    assert out.shape == (batch, action_size), out.shape
    assert bool(jnp.isfinite(out).all())

    # Numerical check against the f32 reference (identical weights); the only
    # difference is bf16 rounding of activations between layers.
    ref = jax.block_until_ready(jax.jit(reference_forward)(params, x))
    assert float(jnp.max(jnp.abs(out - ref))) < 5e-2

    print("KERNEL_OK")
</pallas_src>

<mosaic_0001>
module attributes {stable_mosaic.version = 11 : i64} {
  func.func @_qnet_kernel(%arg0: i32, %arg1: memref<1x11x6x64xbf16, #tpu.memory_space<vmem>>, %arg2: memref<1x11x5x64xbf16, #tpu.memory_space<vmem>>, %arg3: memref<4x64x32xbf16, #tpu.memory_space<vmem>>, %arg4: memref<1x32xf32, #tpu.memory_space<vmem>>, %arg5: memref<16x32x64xbf16, #tpu.memory_space<vmem>>, %arg6: memref<1x64xf32, #tpu.memory_space<vmem>>, %arg7: memref<9x64x64xbf16, #tpu.memory_space<vmem>>, %arg8: memref<1x64xf32, #tpu.memory_space<vmem>>, %arg9: memref<4x64x512xbf16, #tpu.memory_space<vmem>>, %arg10: memref<1x512xf32, #tpu.memory_space<vmem>>, %arg11: memref<512x6xbf16, #tpu.memory_space<vmem>>, %arg12: memref<1x6xf32, #tpu.memory_space<vmem>>, %arg13: memref<1x1x6xf32, #tpu.memory_space<vmem>>) attributes {dimension_semantics = [#tpu.dimension_semantics<parallel>], iteration_bounds = array<i64: 2>, scalar_prefetch = 0 : i64, scratch_operands = 0 : i64, tpu.core_type = #tpu.core_type<tc>, window_params = [{transform_indices = @transform_0, window_bounds = array<i64: 1, 11, 6, 64>}, {transform_indices = @transform_1, window_bounds = array<i64: 1, 11, 5, 64>}, {pipeline_mode = #tpu.pipeline_mode<synchronous>, transform_indices = @transform_2, window_bounds = array<i64: 4, 64, 32>}, {pipeline_mode = #tpu.pipeline_mode<synchronous>, transform_indices = @transform_3, window_bounds = array<i64: 1, 32>}, {pipeline_mode = #tpu.pipeline_mode<synchronous>, transform_indices = @transform_4, window_bounds = array<i64: 16, 32, 64>}, {pipeline_mode = #tpu.pipeline_mode<synchronous>, transform_indices = @transform_5, window_bounds = array<i64: 1, 64>}, {pipeline_mode = #tpu.pipeline_mode<synchronous>, transform_indices = @transform_6, window_bounds = array<i64: 9, 64, 64>}, {pipeline_mode = #tpu.pipeline_mode<synchronous>, transform_indices = @transform_7, window_bounds = array<i64: 1, 64>}, {pipeline_mode = #tpu.pipeline_mode<synchronous>, transform_indices = @transform_8, window_bounds = array<i64: 4, 64, 512>}, {pipeline_mode = #tpu.pipeline_mode<synchronous>, transform_indices = @transform_9, window_bounds = array<i64: 1, 512>}, {pipeline_mode = #tpu.pipeline_mode<synchronous>, transform_indices = @transform_10, window_bounds = array<i64: 512, 6>}, {pipeline_mode = #tpu.pipeline_mode<synchronous>, transform_indices = @transform_11, window_bounds = array<i64: 1, 6>}, {transform_indices = @transform_12, window_bounds = array<i64: 1, 1, 6>}]} {
    %c0 = arith.constant 0 : index
    %c0_0 = arith.constant 0 : index
    %c0_1 = arith.constant 0 : index
    %c0_2 = arith.constant 0 : index
    %0 = vector.load %arg1[%c0, %c0_0, %c0_1, %c0_2] : memref<1x11x6x64xbf16, #tpu.memory_space<vmem>>, vector<1x11x6x64xbf16>
    %1 = vector.shape_cast %0 : vector<1x11x6x64xbf16> to vector<11x6x64xbf16>
    %c0_3 = arith.constant 0 : index
    %c0_4 = arith.constant 0 : index
    %c0_5 = arith.constant 0 : index
    %c0_6 = arith.constant 0 : index
    %2 = vector.load %arg2[%c0_3, %c0_4, %c0_5, %c0_6] : memref<1x11x5x64xbf16, #tpu.memory_space<vmem>>, vector<1x11x5x64xbf16>
    %3 = vector.shape_cast %2 : vector<1x11x5x64xbf16> to vector<11x5x64xbf16>
    %c0_7 = arith.constant 0 : index
    %c0_8 = arith.constant 0 : index
    %4 = vector.load %arg4[%c0_7, %c0_8] : memref<1x32xf32, #tpu.memory_space<vmem>>, vector<1x32xf32>
    %c0_9 = arith.constant 0 : index
    %c0_10 = arith.constant 0 : index
    %5 = vector.load %arg6[%c0_9, %c0_10] : memref<1x64xf32, #tpu.memory_space<vmem>>, vector<1x64xf32>
    %c0_11 = arith.constant 0 : index
    %c0_12 = arith.constant 0 : index
    %6 = vector.load %arg8[%c0_11, %c0_12] : memref<1x64xf32, #tpu.memory_space<vmem>>, vector<1x64xf32>
    %c0_13 = arith.constant 0 : index
    %c0_14 = arith.constant 0 : index
    %7 = vector.load %arg10[%c0_13, %c0_14] : memref<1x512xf32, #tpu.memory_space<vmem>>, vector<1x512xf32>
    %c0_15 = arith.constant 0 : index
    %c0_16 = arith.constant 0 : index
    %8 = vector.load %arg12[%c0_15, %c0_16] : memref<1x6xf32, #tpu.memory_space<vmem>>, vector<1x6xf32>
    %9 = vector.extract_strided_slice %1 {offsets = [0, 0, 0], sizes = [1, 5, 64], strides = [1, 1, 1]} : vector<11x6x64xbf16> to vector<1x5x64xbf16>
    %10 = vector.shape_cast %9 : vector<1x5x64xbf16> to vector<5x64xbf16>
    %c0_17 = arith.constant 0 : index
    %c0_18 = arith.constant 0 : index
    %c0_19 = arith.constant 0 : index
    %11 = vector.load %arg3[%c0_17, %c0_18, %c0_19] : memref<4x64x32xbf16, #tpu.memory_space<vmem>>, vector<1x64x32xbf16>
    %12 = vector.shape_cast %11 : vector<1x64x32xbf16> to vector<64x32xbf16>
    %cst = arith.constant dense<0.000000e+00> : vector<5x32xf32>
    %13 = tpu.matmul %10, %12, %cst {dimension_numbers = #tpu.dot_dimension_numbers<[1], [0], [0], [1], [0, 0, 1, 1], [], []>} : vector<5x64xbf16>, vector<64x32xbf16>, vector<5x32xf32> -> vector<5x32xf32>
    %14 = vector.extract_strided_slice %3 {offsets = [0, 0, 0], sizes = [1, 5, 64], strides = [1, 1, 1]} : vector<11x5x64xbf16> to vector<1x5x64xbf16>
    %15 = vector.shape_cast %14 : vector<1x5x64xbf16> to vector<5x64xbf16>
    %c1 = arith.constant 1 : index
    %c0_20 = arith.constant 0 : index
    %c0_21 = arith.constant 0 : index
    %16 = vector.load %arg3[%c1, %c0_20, %c0_21] : memref<4x64x32xbf16, #tpu.memory_space<vmem>>, vector<1x64x32xbf16>
    %17 = vector.shape_cast %16 : vector<1x64x32xbf16> to vector<64x32xbf16>
    %cst_22 = arith.constant dense<0.000000e+00> : vector<5x32xf32>
    %18 = tpu.matmul %15, %17, %cst_22 {dimension_numbers = #tpu.dot_dimension_numbers<[1], [0], [0], [1], [0, 0, 1, 1], [], []>} : vector<5x64xbf16>, vector<64x32xbf16>, vector<5x32xf32> -> vector<5x32xf32>
    %19 = arith.addf %13, %18 : vector<5x32xf32>
    %20 = vector.extract_strided_slice %1 {offsets = [1, 0, 0], sizes = [1, 5, 64], strides = [1, 1, 1]} : vector<11x6x64xbf16> to vector<1x5x64xbf16>
    %21 = vector.shape_cast %20 : vector<1x5x64xbf16> to vector<5x64xbf16>
    %c2 = arith.constant 2 : index
    %c0_23 = arith.constant 0 : index
    %c0_24 = arith.constant 0 : index
    %22 = vector.load %arg3[%c2, %c0_23, %c0_24] : memref<4x64x32xbf16, #tpu.memory_space<vmem>>, vector<1x64x32xbf16>
    %23 = vector.shape_cast %22 : vector<1x64x32xbf16> to vector<64x32xbf16>
    %cst_25 = arith.constant dense<0.000000e+00> : vector<5x32xf32>
    %24 = tpu.matmul %21, %23, %cst_25 {dimension_numbers = #tpu.dot_dimension_numbers<[1], [0], [0], [1], [0, 0, 1, 1], [], []>} : vector<5x64xbf16>, vector<64x32xbf16>, vector<5x32xf32> -> vector<5x32xf32>
    %25 = arith.addf %19, %24 : vector<5x32xf32>
    %26 = vector.extract_strided_slice %3 {offsets = [1, 0, 0], sizes = [1, 5, 64], strides = [1, 1, 1]} : vector<11x5x64xbf16> to vector<1x5x64xbf16>
    %27 = vector.shape_cast %26 : vector<1x5x64xbf16> to vector<5x64xbf16>
    %c3 = arith.constant 3 : index
    %c0_26 = arith.constant 0 : index
    %c0_27 = arith.constant 0 : index
    %28 = vector.load %arg3[%c3, %c0_26, %c0_27] : memref<4x64x32xbf16, #tpu.memory_space<vmem>>, vector<1x64x32xbf16>
    %29 = vector.shape_cast %28 : vector<1x64x32xbf16> to vector<64x32xbf16>
    %cst_28 = arith.constant dense<0.000000e+00> : vector<5x32xf32>
    %30 = tpu.matmul %27, %29, %cst_28 {dimension_numbers = #tpu.dot_dimension_numbers<[1], [0], [0], [1], [0, 0, 1, 1], [], []>} : vector<5x64xbf16>, vector<64x32xbf16>, vector<5x32xf32> -> vector<5x32xf32>
    %31 = arith.addf %25, %30 : vector<5x32xf32>
    %32 = vector.broadcast %4 : vector<1x32xf32> to vector<5x32xf32>
    %33 = arith.addf %31, %32 : vector<5x32xf32>
    %cst_29 = arith.constant 0.000000e+00 : f32
    %34 = vector.broadcast %cst_29 : f32 to vector<5x32xf32>
    %35 = arith.maximumf %33, %34 : vector<5x32xf32>
    %36 = arith.truncf %35 : vector<5x32xf32> to vector<5x32xbf16>
    %c0_30 = arith.constant 0 : index
    %c0_31 = arith.constant 0 : index
    %c0_32 = arith.constant 0 : index
    %37 = vector.load %arg3[%c0_30, %c0_31, %c0_32] : memref<4x64x32xbf16, #tpu.memory_space<vmem>>, vector<1x64x32xbf16>
    %38 = vector.shape_cast %37 : vector<1x64x32xbf16> to vector<64x32xbf16>
    %cst_33 = arith.constant dense<0.000000e+00> : vector<5x32xf32>
    %39 = tpu.matmul %15, %38, %cst_33 {dimension_numbers = #tpu.dot_dimension_numbers<[1], [0], [0], [1], [0, 0, 1, 1], [], []>} : vector<5x64xbf16>, vector<64x32xbf16>, vector<5x32xf32> -> vector<5x32xf32>
    %40 = vector.extract_strided_slice %1 {offsets = [0, 1, 0], sizes = [1, 5, 64], strides = [1, 1, 1]} : vector<11x6x64xbf16> to vector<1x5x64xbf16>
    %41 = vector.shape_cast %40 : vector<1x5x64xbf16> to vector<5x64xbf16>
    %c1_34 = arith.constant 1 : index
    %c0_35 = arith.constant 0 : index
    %c0_36 = arith.constant 0 : index
    %42 = vector.load %arg3[%c1_34, %c0_35, %c0_36] : memref<4x64x32xbf16, #tpu.memory_space<vmem>>, vector<1x64x32xbf16>
    %43 = vector.shape_cast %42 : vector<1x64x32xbf16> to vector<64x32xbf16>
    %cst_37 = arith.constant dense<0.000000e+00> : vector<5x32xf32>
    %44 = tpu.matmul %41, %43, %cst_37 {dimension_numbers = #tpu.dot_dimension_numbers<[1], [0], [0], [1], [0, 0, 1, 1], [], []>} : vector<5x64xbf16>, vector<64x32xbf16>, vector<5x32xf32> -> vector<5x32xf32>
    %45 = arith.addf %39, %44 : vector<5x32xf32>
    %c2_38 = arith.constant 2 : index
    %c0_39 = arith.constant 0 : index
    %c0_40 = arith.constant 0 : index
    %46 = vector.load %arg3[%c2_38, %c0_39, %c0_40] : memref<4x64x32xbf16, #tpu.memory_space<vmem>>, vector<1x64x32xbf16>
    %47 = vector.shape_cast %46 : vector<1x64x32xbf16> to vector<64x32xbf16>
    %cst_41 = arith.constant dense<0.000000e+00> : vector<5x32xf32>
    %48 = tpu.matmul %27, %47, %cst_41 {dimension_numbers = #tpu.dot_dimension_numbers<[1], [0], [0], [1], [0, 0, 1, 1], [], []>} : vector<5x64xbf16>, vector<64x32xbf16>, vector<5x32xf32> -> vector<5x32xf32>
    %49 = arith.addf %45, %48 : vector<5x32xf32>
    %50 = vector.extract_strided_slice %1 {offsets = [1, 1, 0], sizes = [1, 5, 64], strides = [1, 1, 1]} : vector<11x6x64xbf16> to vector<1x5x64xbf16>
    %51 = vector.shape_cast %50 : vector<1x5x64xbf16> to vector<5x64xbf16>
    %c3_42 = arith.constant 3 : index
    %c0_43 = arith.constant 0 : index
    %c0_44 = arith.constant 0 : index
    %52 = vector.load %arg3[%c3_42, %c0_43, %c0_44] : memref<4x64x32xbf16, #tpu.memory_space<vmem>>, vector<1x64x32xbf16>
    %53 = vector.shape_cast %52 : vector<1x64x32xbf16> to vector<64x32xbf16>
    %cst_45 = arith.constant dense<0.000000e+00> : vector<5x32xf32>
    %54 = tpu.matmul %51, %53, %cst_45 {dimension_numbers = #tpu.dot_dimension_numbers<[1], [0], [0], [1], [0, 0, 1, 1], [], []>} : vector<5x64xbf16>, vector<64x32xbf16>, vector<5x32xf32> -> vector<5x32xf32>
    %55 = arith.addf %49, %54 : vector<5x32xf32>
    %56 = vector.broadcast %4 : vector<1x32xf32> to vector<5x32xf32>
    %57 = arith.addf %55, %56 : vector<5x32xf32>
    %cst_46 = arith.constant 0.000000e+00 : f32
    %58 = vector.broadcast %cst_46 : f32 to vector<5x32xf32>
    %59 = arith.maximumf %57, %58 : vector<5x32xf32>
    %60 = arith.truncf %59 : vector<5x32xf32> to vector<5x32xbf16>
    %c0_47 = arith.constant 0 : index
    %c0_48 = arith.constant 0 : index
    %c0_49 = arith.constant 0 : index
    %61 = vector.load %arg3[%c0_47, %c0_48, %c0_49] : memref<4x64x32xbf16, #tpu.memory_space<vmem>>, vector<1x64x32xbf16>
    %62 = vector.shape_cast %61 : vector<1x64x32xbf16> to vector<64x32xbf16>
    %cst_50 = arith.constant dense<0.000000e+00> : vector<5x32xf32>
    %63 = tpu.matmul %21, %62, %cst_50 {dimension_numbers = #tpu.dot_dimension_numbers<[1], [0], [0], [1], [0, 0, 1, 1], [], []>} : vector<5x64xbf16>, vector<64x32xbf16>, vector<5x32xf32> -> vector<5x32xf32>
    %c1_51 = arith.constant 1 : index
    %c0_52 = arith.constant 0 : index
    %c0_53 = arith.constant 0 : index
    %64 = vector.load %arg3[%c1_51, %c0_52, %c0_53] : memref<4x64x32xbf16, #tpu.memory_space<vmem>>, vector<1x64x32xbf16>
    %65 = vector.shape_cast %64 : vector<1x64x32xbf16> to vector<64x32xbf16>
    %cst_54 = arith.constant dense<0.000000e+00> : vector<5x32xf32>
    %66 = tpu.matmul %27, %65, %cst_54 {dimension_numbers = #tpu.dot_dimension_numbers<[1], [0], [0], [1], [0, 0, 1, 1], [], []>} : vector<5x64xbf16>, vector<64x32xbf16>, vector<5x32xf32> -> vector<5x32xf32>
    %67 = arith.addf %63, %66 : vector<5x32xf32>
    %68 = vector.extract_strided_slice %1 {offsets = [2, 0, 0], sizes = [1, 5, 64], strides = [1, 1, 1]} : vector<11x6x64xbf16> to vector<1x5x64xbf16>
    %69 = vector.shape_cast %68 : vector<1x5x64xbf16> to vector<5x64xbf16>
    %c2_55 = arith.constant 2 : index
    %c0_56 = arith.constant 0 : index
    %c0_57 = arith.constant 0 : index
    %70 = vector.load %arg3[%c2_55, %c0_56, %c0_57] : memref<4x64x32xbf16, #tpu.memory_space<vmem>>, vector<1x64x32xbf16>
    %71 = vector.shape_cast %70 : vector<1x64x32xbf16> to vector<64x32xbf16>
    %cst_58 = arith.constant dense<0.000000e+00> : vector<5x32xf32>
    %72 = tpu.matmul %69, %71, %cst_58 {dimension_numbers = #tpu.dot_dimension_numbers<[1], [0], [0], [1], [0, 0, 1, 1], [], []>} : vector<5x64xbf16>, vector<64x32xbf16>, vector<5x32xf32> -> vector<5x32xf32>
    %73 = arith.addf %67, %72 : vector<5x32xf32>
    %74 = vector.extract_strided_slice %3 {offsets = [2, 0, 0], sizes = [1, 5, 64], strides = [1, 1, 1]} : vector<11x5x64xbf16> to vector<1x5x64xbf16>
    %75 = vector.shape_cast %74 : vector<1x5x64xbf16> to vector<5x64xbf16>
    %c3_59 = arith.constant 3 : index
    %c0_60 = arith.constant 0 : index
    %c0_61 = arith.constant 0 : index
    %76 = vector.load %arg3[%c3_59, %c0_60, %c0_61] : memref<4x64x32xbf16, #tpu.memory_space<vmem>>, vector<1x64x32xbf16>
    %77 = vector.shape_cast %76 : vector<1x64x32xbf16> to vector<64x32xbf16>
    %cst_62 = arith.constant dense<0.000000e+00> : vector<5x32xf32>
    %78 = tpu.matmul %75, %77, %cst_62 {dimension_numbers = #tpu.dot_dimension_numbers<[1], [0], [0], [1], [0, 0, 1, 1], [], []>} : vector<5x64xbf16>, vector<64x32xbf16>, vector<5x32xf32> -> vector<5x32xf32>
    %79 = arith.addf %73, %78 : vector<5x32xf32>
    %80 = vector.broadcast %4 : vector<1x32xf32> to vector<5x32xf32>
    %81 = arith.addf %79, %80 : vector<5x32xf32>
    %cst_63 = arith.constant 0.000000e+00 : f32
    %82 = vector.broadcast %cst_63 : f32 to vector<5x32xf32>
    %83 = arith.maximumf %81, %82 : vector<5x32xf32>
    %84 = arith.truncf %83 : vector<5x32xf32> to vector<5x32xbf16>
    %c0_64 = arith.constant 0 : index
    %c0_65 = arith.constant 0 : index
    %c0_66 = arith.constant 0 : index
    %85 = vector.load %arg3[%c0_64, %c0_65, %c0_66] : memref<4x64x32xbf16, #tpu.memory_space<vmem>>, vector<1x64x32xbf16>
    %86 = vector.shape_cast %85 : vector<1x64x32xbf16> to vector<64x32xbf16>
    %cst_67 = arith.constant dense<0.000000e+00> : vector<5x32xf32>
    %87 = tpu.matmul %27, %86, %cst_67 {dimension_numbers = #tpu.dot_dimension_numbers<[1], [0], [0], [1], [0, 0, 1, 1], [], []>} : vector<5x64xbf16>, vector<64x32xbf16>, vector<5x32xf32> -> vector<5x32xf32>
    %c1_68 = arith.constant 1 : index
    %c0_69 = arith.constant 0 : index
    %c0_70 = arith.constant 0 : index
    %88 = vector.load %arg3[%c1_68, %c0_69, %c0_70] : memref<4x64x32xbf16, #tpu.memory_space<vmem>>, vector<1x64x32xbf16>
    %89 = vector.shape_cast %88 : vector<1x64x32xbf16> to vector<64x32xbf16>
    %cst_71 = arith.constant dense<0.000000e+00> : vector<5x32xf32>
    %90 = tpu.matmul %51, %89, %cst_71 {dimension_numbers = #tpu.dot_dimension_numbers<[1], [0], [0], [1], [0, 0, 1, 1], [], []>} : vector<5x64xbf16>, vector<64x32xbf16>, vector<5x32xf32> -> vector<5x32xf32>
    %91 = arith.addf %87, %90 : vector<5x32xf32>
    %c2_72 = arith.constant 2 : index
    %c0_73 = arith.constant 0 : index
    %c0_74 = arith.constant 0 : index
    %92 = vector.load %arg3[%c2_72, %c0_73, %c0_74] : memref<4x64x32xbf16, #tpu.memory_space<vmem>>, vector<1x64x32xbf16>
    %93 = vector.shape_cast %92 : vector<1x64x32xbf16> to vector<64x32xbf16>
    %cst_75 = arith.constant dense<0.000000e+00> : vector<5x32xf32>
    %94 = tpu.matmul %75, %93, %cst_75 {dimension_numbers = #tpu.dot_dimension_numbers<[1], [0], [0], [1], [0, 0, 1, 1], [], []>} : vector<5x64xbf16>, vector<64x32xbf16>, vector<5x32xf32> -> vector<5x32xf32>
    %95 = arith.addf %91, %94 : vector<5x32xf32>
    %96 = vector.extract_strided_slice %1 {offsets = [2, 1, 0], sizes = [1, 5, 64], strides = [1, 1, 1]} : vector<11x6x64xbf16> to vector<1x5x64xbf16>
    %97 = vector.shape_cast %96 : vector<1x5x64xbf16> to vector<5x64xbf16>
    %c3_76 = arith.constant 3 : index
    %c0_77 = arith.constant 0 : index
    %c0_78 = arith.constant 0 : index
    %98 = vector.load %arg3[%c3_76, %c0_77, %c0_78] : memref<4x64x32xbf16, #tpu.memory_space<vmem>>, vector<1x64x32xbf16>
    %99 = vector.shape_cast %98 : vector<1x64x32xbf16> to vector<64x32xbf16>
    %cst_79 = arith.constant dense<0.000000e+00> : vector<5x32xf32>
    %100 = tpu.matmul %97, %99, %cst_79 {dimension_numbers = #tpu.dot_dimension_numbers<[1], [0], [0], [1], [0, 0, 1, 1], [], []>} : vector<5x64xbf16>, vector<64x32xbf16>, vector<5x32xf32> -> vector<5x32xf32>
    %101 = arith.addf %95, %100 : vector<5x32xf32>
    %102 = vector.broadcast %4 : vector<1x32xf32> to vector<5x32xf32>
    %103 = arith.addf %101, %102 : vector<5x32xf32>
    %cst_80 = arith.constant 0.000000e+00 : f32
    %104 = vector.broadcast %cst_80 : f32 to vector<5x32xf32>
    %105 = arith.maximumf %103, %104 : vector<5x32xf32>
    %106 = arith.truncf %105 : vector<5x32xf32> to vector<5x32xbf16>
    %c0_81 = arith.constant 0 : index
    %c0_82 = arith.constant 0 : index
    %c0_83 = arith.constant 0 : index
    %107 = vector.load %arg3[%c0_81, %c0_82, %c0_83] : memref<4x64x32xbf16, #tpu.memory_space<vmem>>, vector<1x64x32xbf16>
    %108 = vector.shape_cast %107 : vector<1x64x32xbf16> to vector<64x32xbf16>
    %cst_84 = arith.constant dense<0.000000e+00> : vector<5x32xf32>
    %109 = tpu.matmul %69, %108, %cst_84 {dimension_numbers = #tpu.dot_dimension_numbers<[1], [0], [0], [1], [0, 0, 1, 1], [], []>} : vector<5x64xbf16>, vector<64x32xbf16>, vector<5x32xf32> -> vector<5x32xf32>
    %c1_85 = arith.constant 1 : index
    %c0_86 = arith.constant 0 : index
    %c0_87 = arith.constant 0 : index
    %110 = vector.load %arg3[%c1_85, %c0_86, %c0_87] : memref<4x64x32xbf16, #tpu.memory_space<vmem>>, vector<1x64x32xbf16>
    %111 = vector.shape_cast %110 : vector<1x64x32xbf16> to vector<64x32xbf16>
    %cst_88 = arith.constant dense<0.000000e+00> : vector<5x32xf32>
    %112 = tpu.matmul %75, %111, %cst_88 {dimension_numbers = #tpu.dot_dimension_numbers<[1], [0], [0], [1], [0, 0, 1, 1], [], []>} : vector<5x64xbf16>, vector<64x32xbf16>, vector<5x32xf32> -> vector<5x32xf32>
    %113 = arith.addf %109, %112 : vector<5x32xf32>
    %114 = vector.extract_strided_slice %1 {offsets = [3, 0, 0], sizes = [1, 5, 64], strides = [1, 1, 1]} : vector<11x6x64xbf16> to vector<1x5x64xbf16>
    %115 = vector.shape_cast %114 : vector<1x5x64xbf16> to vector<5x64xbf16>
    %c2_89 = arith.constant 2 : index
    %c0_90 = arith.constant 0 : index
    %c0_91 = arith.constant 0 : index
    %116 = vector.load %arg3[%c2_89, %c0_90, %c0_91] : memref<4x64x32xbf16, #tpu.memory_space<vmem>>, vector<1x64x32xbf16>
    %117 = vector.shape_cast %116 : vector<1x64x32xbf16> to vector<64x32xbf16>
    %cst_92 = arith.constant dense<0.000000e+00> : vector<5x32xf32>
    %118 = tpu.matmul %115, %117, %cst_92 {dimension_numbers = #tpu.dot_dimension_numbers<[1], [0], [0], [1], [0, 0, 1, 1], [], []>} : vector<5x64xbf16>, vector<64x32xbf16>, vector<5x32xf32> -> vector<5x32xf32>
    %119 = arith.addf %113, %118 : vector<5x32xf32>
    %120 = vector.extract_strided_slice %3 {offsets = [3, 0, 0], sizes = [1, 5, 64], strides = [1, 1, 1]} : vector<11x5x64xbf16> to vector<1x5x64xbf16>
    %121 = vector.shape_cast %120 : vector<1x5x64xbf16> to vector<5x64xbf16>
    %c3_93 = arith.constant 3 : index
    %c0_94 = arith.constant 0 : index
    %c0_95 = arith.constant 0 : index
    %122 = vector.load %arg3[%c3_93, %c0_94, %c0_95] : memref<4x64x32xbf16, #tpu.memory_space<vmem>>, vector<1x64x32xbf16>
    %123 = vector.shape_cast %122 : vector<1x64x32xbf16> to vector<64x32xbf16>
    %cst_96 = arith.constant dense<0.000000e+00> : vector<5x32xf32>
    %124 = tpu.matmul %121, %123, %cst_96 {dimension_numbers = #tpu.dot_dimension_numbers<[1], [0], [0], [1], [0, 0, 1, 1], [], []>} : vector<5x64xbf16>, vector<64x32xbf16>, vector<5x32xf32> -> vector<5x32xf32>
    %125 = arith.addf %119, %124 : vector<5x32xf32>
    %126 = vector.broadcast %4 : vector<1x32xf32> to vector<5x32xf32>
    %127 = arith.addf %125, %126 : vector<5x32xf32>
    %cst_97 = arith.constant 0.000000e+00 : f32
    %128 = vector.broadcast %cst_97 : f32 to vector<5x32xf32>
    %129 = arith.maximumf %127, %128 : vector<5x32xf32>
    %130 = arith.truncf %129 : vector<5x32xf32> to vector<5x32xbf16>
    %c0_98 = arith.constant 0 : index
    %c0_99 = arith.constant 0 : index
    %c0_100 = arith.constant 0 : index
    %131 = vector.load %arg3[%c0_98, %c0_99, %c0_100] : memref<4x64x32xbf16, #tpu.memory_space<vmem>>, vector<1x64x32xbf16>
    %132 = vector.shape_cast %131 : vector<1x64x32xbf16> to vector<64x32xbf16>
    %cst_101 = arith.constant dense<0.000000e+00> : vector<5x32xf32>
    %133 = tpu.matmul %75, %132, %cst_101 {dimension_numbers = #tpu.dot_dimension_numbers<[1], [0], [0], [1], [0, 0, 1, 1], [], []>} : vector<5x64xbf16>, vector<64x32xbf16>, vector<5x32xf32> -> vector<5x32xf32>
    %c1_102 = arith.constant 1 : index
    %c0_103 = arith.constant 0 : index
    %c0_104 = arith.constant 0 : index
    %134 = vector.load %arg3[%c1_102, %c0_103, %c0_104] : memref<4x64x32xbf16, #tpu.memory_space<vmem>>, vector<1x64x32xbf16>
    %135 = vector.shape_cast %134 : vector<1x64x32xbf16> to vector<64x32xbf16>
    %cst_105 = arith.constant dense<0.000000e+00> : vector<5x32xf32>
    %136 = tpu.matmul %97, %135, %cst_105 {dimension_numbers = #tpu.dot_dimension_numbers<[1], [0], [0], [1], [0, 0, 1, 1], [], []>} : vector<5x64xbf16>, vector<64x32xbf16>, vector<5x32xf32> -> vector<5x32xf32>
    %137 = arith.addf %133, %136 : vector<5x32xf32>
    %c2_106 = arith.constant 2 : index
    %c0_107 = arith.constant 0 : index
    %c0_108 = arith.constant 0 : index
    %138 = vector.load %arg3[%c2_106, %c0_107, %c0_108] : memref<4x64x32xbf16, #tpu.memory_space<vmem>>, vector<1x64x32xbf16>
    %139 = vector.shape_cast %138 : vector<1x64x32xbf16> to vector<64x32xbf16>
    %cst_109 = arith.constant dense<0.000000e+00> : vector<5x32xf32>
    %140 = tpu.matmul %121, %139, %cst_109 {dimension_numbers = #tpu.dot_dimension_numbers<[1], [0], [0], [1], [0, 0, 1, 1], [], []>} : vector<5x64xbf16>, vector<64x32xbf16>, vector<5x32xf32> -> vector<5x32xf32>
    %141 = arith.addf %137, %140 : vector<5x32xf32>
    %142 = vector.extract_strided_slice %1 {offsets = [3, 1, 0], sizes = [1, 5, 64], strides = [1, 1, 1]} : vector<11x6x64xbf16> to vector<1x5x64xbf16>
    %143 = vector.shape_cast %142 : vector<1x5x64xbf16> to vector<5x64xbf16>
    %c3_110 = arith.constant 3 : index
    %c0_111 = arith.constant 0 : index
    %c0_112 = arith.constant 0 : index
    %144 = vector.load %arg3[%c3_110, %c0_111, %c0_112] : memref<4x64x32xbf16, #tpu.memory_space<vmem>>, vector<1x64x32xbf16>
    %145 = vector.shape_cast %144 : vector<1x64x32xbf16> to vector<64x32xbf16>
    %cst_113 = arith.constant dense<0.000000e+00> : vector<5x32xf32>
    %146 = tpu.matmul %143, %145, %cst_113 {dimension_numbers = #tpu.dot_dimension_numbers<[1], [0], [0], [1], [0, 0, 1, 1], [], []>} : vector<5x64xbf16>, vector<64x32xbf16>, vector<5x32xf32> -> vector<5x32xf32>
    %147 = arith.addf %141, %146 : vector<5x32xf32>
    %148 = vector.broadcast %4 : vector<1x32xf32> to vector<5x32xf32>
    %149 = arith.addf %147, %148 : vector<5x32xf32>
    %cst_114 = arith.constant 0.000000e+00 : f32
    %150 = vector.broadcast %cst_114 : f32 to vector<5x32xf32>
    %151 = arith.maximumf %149, %150 : vector<5x32xf32>
    %152 = arith.truncf %151 : vector<5x32xf32> to vector<5x32xbf16>
    %c0_115 = arith.constant 0 : index
    %c0_116 = arith.constant 0 : index
    %c0_117 = arith.constant 0 : index
    %153 = vector.load %arg3[%c0_115, %c0_116, %c0_117] : memref<4x64x32xbf16, #tpu.memory_space<vmem>>, vector<1x64x32xbf16>
    %154 = vector.shape_cast %153 : vector<1x64x32xbf16> to vector<64x32xbf16>
    %cst_118 = arith.constant dense<0.000000e+00> : vector<5x32xf32>
    %155 = tpu.matmul %115, %154, %cst_118 {dimension_numbers = #tpu.dot_dimension_numbers<[1], [0], [0], [1], [0, 0, 1, 1], [], []>} : vector<5x64xbf16>, vector<64x32xbf16>, vector<5x32xf32> -> vector<5x32xf32>
    %c1_119 = arith.constant 1 : index
    %c0_120 = arith.constant 0 : index
    %c0_121 = arith.constant 0 : index
    %156 = vector.load %arg3[%c1_119, %c0_120, %c0_121] : memref<4x64x32xbf16, #tpu.memory_space<vmem>>, vector<1x64x32xbf16>
    %157 = vector.shape_cast %156 : vector<1x64x32xbf16> to vector<64x32xbf16>
    %cst_122 = arith.constant dense<0.000000e+00> : vector<5x32xf32>
    %158 = tpu.matmul %121, %157, %cst_122 {dimension_numbers = #tpu.dot_dimension_numbers<[1], [0], [0], [1], [0, 0, 1, 1], [], []>} : vector<5x64xbf16>, vector<64x32xbf16>, vector<5x32xf32> -> vector<5x32xf32>
    %159 = arith.addf %155, %158 : vector<5x32xf32>
    %160 = vector.extract_strided_slice %1 {offsets = [4, 0, 0], sizes = [1, 5, 64], strides = [1, 1, 1]} : vector<11x6x64xbf16> to vector<1x5x64xbf16>
    %161 = vector.shape_cast %160 : vector<1x5x64xbf16> to vector<5x64xbf16>
    %c2_123 = arith.constant 2 : index
    %c0_124 = arith.constant 0 : index
    %c0_125 = arith.constant 0 : index
    %162 = vector.load %arg3[%c2_123, %c0_124, %c0_125] : memref<4x64x32xbf16, #tpu.memory_space<vmem>>, vector<1x64x32xbf16>
    %163 = vector.shape_cast %162 : vector<1x64x32xbf16> to vector<64x32xbf16>
    %cst_126 = arith.constant dense<0.000000e+00> : vector<5x32xf32>
    %164 = tpu.matmul %161, %163, %cst_126 {dimension_numbers = #tpu.dot_dimension_numbers<[1], [0], [0], [1], [0, 0, 1, 1], [], []>} : vector<5x64xbf16>, vector<64x32xbf16>, vector<5x32xf32> -> vector<5x32xf32>
    %165 = arith.addf %159, %164 : vector<5x32xf32>
    %166 = vector.extract_strided_slice %3 {offsets = [4, 0, 0], sizes = [1, 5, 64], strides = [1, 1, 1]} : vector<11x5x64xbf16> to vector<1x5x64xbf16>
    %167 = vector.shape_cast %166 : vector<1x5x64xbf16> to vector<5x64xbf16>
    %c3_127 = arith.constant 3 : index
    %c0_128 = arith.constant 0 : index
    %c0_129 = arith.constant 0 : index
    %168 = vector.load %arg3[%c3_127, %c0_128, %c0_129] : memref<4x64x32xbf16, #tpu.memory_space<vmem>>, vector<1x64x32xbf16>
    %169 = vector.shape_cast %168 : vector<1x64x32xbf16> to vector<64x32xbf16>
    %cst_130 = arith.constant dense<0.000000e+00> : vector<5x32xf32>
    %170 = tpu.matmul %167, %169, %cst_130 {dimension_numbers = #tpu.dot_dimension_numbers<[1], [0], [0], [1], [0, 0, 1, 1], [], []>} : vector<5x64xbf16>, vector<64x32xbf16>, vector<5x32xf32> -> vector<5x32xf32>
    %171 = arith.addf %165, %170 : vector<5x32xf32>
    %172 = vector.broadcast %4 : vector<1x32xf32> to vector<5x32xf32>
    %173 = arith.addf %171, %172 : vector<5x32xf32>
    %cst_131 = arith.constant 0.000000e+00 : f32
    %174 = vector.broadcast %cst_131 : f32 to vector<5x32xf32>
    %175 = arith.maximumf %173, %174 : vector<5x32xf32>
    %176 = arith.truncf %175 : vector<5x32xf32> to vector<5x32xbf16>
    %c0_132 = arith.constant 0 : index
    %c0_133 = arith.constant 0 : index
    %c0_134 = arith.constant 0 : index
    %177 = vector.load %arg3[%c0_132, %c0_133, %c0_134] : memref<4x64x32xbf16, #tpu.memory_space<vmem>>, vector<1x64x32xbf16>
    %178 = vector.shape_cast %177 : vector<1x64x32xbf16> to vector<64x32xbf16>
    %cst_135 = arith.constant dense<0.000000e+00> : vector<5x32xf32>
    %179 = tpu.matmul %121, %178, %cst_135 {dimension_numbers = #tpu.dot_dimension_numbers<[1], [0], [0], [1], [0, 0, 1, 1], [], []>} : vector<5x64xbf16>, vector<64x32xbf16>, vector<5x32xf32> -> vector<5x32xf32>
    %c1_136 = arith.constant 1 : index
    %c0_137 = arith.constant 0 : index
    %c0_138 = arith.constant 0 : index
    %180 = vector.load %arg3[%c1_136, %c0_137, %c0_138] : memref<4x64x32xbf16, #tpu.memory_space<vmem>>, vector<1x64x32xbf16>
    %181 = vector.shape_cast %180 : vector<1x64x32xbf16> to vector<64x32xbf16>
    %cst_139 = arith.constant dense<0.000000e+00> : vector<5x32xf32>
    %182 = tpu.matmul %143, %181, %cst_139 {dimension_numbers = #tpu.dot_dimension_numbers<[1], [0], [0], [1], [0, 0, 1, 1], [], []>} : vector<5x64xbf16>, vector<64x32xbf16>, vector<5x32xf32> -> vector<5x32xf32>
    %183 = arith.addf %179, %182 : vector<5x32xf32>
    %c2_140 = arith.constant 2 : index
    %c0_141 = arith.constant 0 : index
    %c0_142 = arith.constant 0 : index
    %184 = vector.load %arg3[%c2_140, %c0_141, %c0_142] : memref<4x64x32xbf16, #tpu.memory_space<vmem>>, vector<1x64x32xbf16>
    %185 = vector.shape_cast %184 : vector<1x64x32xbf16> to vector<64x32xbf16>
    %cst_143 = arith.constant dense<0.000000e+00> : vector<5x32xf32>
    %186 = tpu.matmul %167, %185, %cst_143 {dimension_numbers = #tpu.dot_dimension_numbers<[1], [0], [0], [1], [0, 0, 1, 1], [], []>} : vector<5x64xbf16>, vector<64x32xbf16>, vector<5x32xf32> -> vector<5x32xf32>
    %187 = arith.addf %183, %186 : vector<5x32xf32>
    %188 = vector.extract_strided_slice %1 {offsets = [4, 1, 0], sizes = [1, 5, 64], strides = [1, 1, 1]} : vector<11x6x64xbf16> to vector<1x5x64xbf16>
    %189 = vector.shape_cast %188 : vector<1x5x64xbf16> to vector<5x64xbf16>
    %c3_144 = arith.constant 3 : index
    %c0_145 = arith.constant 0 : index
    %c0_146 = arith.constant 0 : index
    %190 = vector.load %arg3[%c3_144, %c0_145, %c0_146] : memref<4x64x32xbf16, #tpu.memory_space<vmem>>, vector<1x64x32xbf16>
    %191 = vector.shape_cast %190 : vector<1x64x32xbf16> to vector<64x32xbf16>
    %cst_147 = arith.constant dense<0.000000e+00> : vector<5x32xf32>
    %192 = tpu.matmul %189, %191, %cst_147 {dimension_numbers = #tpu.dot_dimension_numbers<[1], [0], [0], [1], [0, 0, 1, 1], [], []>} : vector<5x64xbf16>, vector<64x32xbf16>, vector<5x32xf32> -> vector<5x32xf32>
    %193 = arith.addf %187, %192 : vector<5x32xf32>
    %194 = vector.broadcast %4 : vector<1x32xf32> to vector<5x32xf32>
    %195 = arith.addf %193, %194 : vector<5x32xf32>
    %cst_148 = arith.constant 0.000000e+00 : f32
    %196 = vector.broadcast %cst_148 : f32 to vector<5x32xf32>
    %197 = arith.maximumf %195, %196 : vector<5x32xf32>
    %198 = arith.truncf %197 : vector<5x32xf32> to vector<5x32xbf16>
    %c0_149 = arith.constant 0 : index
    %c0_150 = arith.constant 0 : index
    %c0_151 = arith.constant 0 : index
    %199 = vector.load %arg3[%c0_149, %c0_150, %c0_151] : memref<4x64x32xbf16, #tpu.memory_space<vmem>>, vector<1x64x32xbf16>
    %200 = vector.shape_cast %199 : vector<1x64x32xbf16> to vector<64x32xbf16>
    %cst_152 = arith.constant dense<0.000000e+00> : vector<5x32xf32>
    %201 = tpu.matmul %161, %200, %cst_152 {dimension_numbers = #tpu.dot_dimension_numbers<[1], [0], [0], [1], [0, 0, 1, 1], [], []>} : vector<5x64xbf16>, vector<64x32xbf16>, vector<5x32xf32> -> vector<5x32xf32>
    %c1_153 = arith.constant 1 : index
    %c0_154 = arith.constant 0 : index
    %c0_155 = arith.constant 0 : index
    %202 = vector.load %arg3[%c1_153, %c0_154, %c0_155] : memref<4x64x32xbf16, #tpu.memory_space<vmem>>, vector<1x64x32xbf16>
    %203 = vector.shape_cast %202 : vector<1x64x32xbf16> to vector<64x32xbf16>
    %cst_156 = arith.constant dense<0.000000e+00> : vector<5x32xf32>
    %204 = tpu.matmul %167, %203, %cst_156 {dimension_numbers = #tpu.dot_dimension_numbers<[1], [0], [0], [1], [0, 0, 1, 1], [], []>} : vector<5x64xbf16>, vector<64x32xbf16>, vector<5x32xf32> -> vector<5x32xf32>
    %205 = arith.addf %201, %204 : vector<5x32xf32>
    %206 = vector.extract_strided_slice %1 {offsets = [5, 0, 0], sizes = [1, 5, 64], strides = [1, 1, 1]} : vector<11x6x64xbf16> to vector<1x5x64xbf16>
    %207 = vector.shape_cast %206 : vector<1x5x64xbf16> to vector<5x64xbf16>
    %c2_157 = arith.constant 2 : index
    %c0_158 = arith.constant 0 : index
    %c0_159 = arith.constant 0 : index
    %208 = vector.load %arg3[%c2_157, %c0_158, %c0_159] : memref<4x64x32xbf16, #tpu.memory_space<vmem>>, vector<1x64x32xbf16>
    %209 = vector.shape_cast %208 : vector<1x64x32xbf16> to vector<64x32xbf16>
    %cst_160 = arith.constant dense<0.000000e+00> : vector<5x32xf32>
    %210 = tpu.matmul %207, %209, %cst_160 {dimension_numbers = #tpu.dot_dimension_numbers<[1], [0], [0], [1], [0, 0, 1, 1], [], []>} : vector<5x64xbf16>, vector<64x32xbf16>, vector<5x32xf32> -> vector<5x32xf32>
    %211 = arith.addf %205, %210 : vector<5x32xf32>
    %212 = vector.extract_strided_slice %3 {offsets = [5, 0, 0], sizes = [1, 5, 64], strides = [1, 1, 1]} : vector<11x5x64xbf16> to vector<1x5x64xbf16>
    %213 = vector.shape_cast %212 : vector<1x5x64xbf16> to vector<5x64xbf16>
    %c3_161 = arith.constant 3 : index
    %c0_162 = arith.constant 0 : index
    %c0_163 = arith.constant 0 : index
    %214 = vector.load %arg3[%c3_161, %c0_162, %c0_163] : memref<4x64x32xbf16, #tpu.memory_space<vmem>>, vector<1x64x32xbf16>
    %215 = vector.shape_cast %214 : vector<1x64x32xbf16> to vector<64x32xbf16>
    %cst_164 = arith.constant dense<0.000000e+00> : vector<5x32xf32>
    %216 = tpu.matmul %213, %215, %cst_164 {dimension_numbers = #tpu.dot_dimension_numbers<[1], [0], [0], [1], [0, 0, 1, 1], [], []>} : vector<5x64xbf16>, vector<64x32xbf16>, vector<5x32xf32> -> vector<5x32xf32>
    %217 = arith.addf %211, %216 : vector<5x32xf32>
    %218 = vector.broadcast %4 : vector<1x32xf32> to vector<5x32xf32>
    %219 = arith.addf %217, %218 : vector<5x32xf32>
    %cst_165 = arith.constant 0.000000e+00 : f32
    %220 = vector.broadcast %cst_165 : f32 to vector<5x32xf32>
    %221 = arith.maximumf %219, %220 : vector<5x32xf32>
    %222 = arith.truncf %221 : vector<5x32xf32> to vector<5x32xbf16>
    %c0_166 = arith.constant 0 : index
    %c0_167 = arith.constant 0 : index
    %c0_168 = arith.constant 0 : index
    %223 = vector.load %arg3[%c0_166, %c0_167, %c0_168] : memref<4x64x32xbf16, #tpu.memory_space<vmem>>, vector<1x64x32xbf16>
    %224 = vector.shape_cast %223 : vector<1x64x32xbf16> to vector<64x32xbf16>
    %cst_169 = arith.constant dense<0.000000e+00> : vector<5x32xf32>
    %225 = tpu.matmul %167, %224, %cst_169 {dimension_numbers = #tpu.dot_dimension_numbers<[1], [0], [0], [1], [0, 0, 1, 1], [], []>} : vector<5x64xbf16>, vector<64x32xbf16>, vector<5x32xf32> -> vector<5x32xf32>
    %c1_170 = arith.constant 1 : index
    %c0_171 = arith.constant 0 : index
    %c0_172 = arith.constant 0 : index
    %226 = vector.load %arg3[%c1_170, %c0_171, %c0_172] : memref<4x64x32xbf16, #tpu.memory_space<vmem>>, vector<1x64x32xbf16>
    %227 = vector.shape_cast %226 : vector<1x64x32xbf16> to vector<64x32xbf16>
    %cst_173 = arith.constant dense<0.000000e+00> : vector<5x32xf32>
    %228 = tpu.matmul %189, %227, %cst_173 {dimension_numbers = #tpu.dot_dimension_numbers<[1], [0], [0], [1], [0, 0, 1, 1], [], []>} : vector<5x64xbf16>, vector<64x32xbf16>, vector<5x32xf32> -> vector<5x32xf32>
    %229 = arith.addf %225, %228 : vector<5x32xf32>
    %c2_174 = arith.constant 2 : index
    %c0_175 = arith.constant 0 : index
    %c0_176 = arith.constant 0 : index
    %230 = vector.load %arg3[%c2_174, %c0_175, %c0_176] : memref<4x64x32xbf16, #tpu.memory_space<vmem>>, vector<1x64x32xbf16>
    %231 = vector.shape_cast %230 : vector<1x64x32xbf16> to vector<64x32xbf16>
    %cst_177 = arith.constant dense<0.000000e+00> : vector<5x32xf32>
    %232 = tpu.matmul %213, %231, %cst_177 {dimension_numbers = #tpu.dot_dimension_numbers<[1], [0], [0], [1], [0, 0, 1, 1], [], []>} : vector<5x64xbf16>, vector<64x32xbf16>, vector<5x32xf32> -> vector<5x32xf32>
    %233 = arith.addf %229, %232 : vector<5x32xf32>
    %234 = vector.extract_strided_slice %1 {offsets = [5, 1, 0], sizes = [1, 5, 64], strides = [1, 1, 1]} : vector<11x6x64xbf16> to vector<1x5x64xbf16>
    %235 = vector.shape_cast %234 : vector<1x5x64xbf16> to vector<5x64xbf16>
    %c3_178 = arith.constant 3 : index
    %c0_179 = arith.constant 0 : index
    %c0_180 = arith.constant 0 : index
    %236 = vector.load %arg3[%c3_178, %c0_179, %c0_180] : memref<4x64x32xbf16, #tpu.memory_space<vmem>>, vector<1x64x32xbf16>
    %237 = vector.shape_cast %236 : vector<1x64x32xbf16> to vector<64x32xbf16>
    %cst_181 = arith.constant dense<0.000000e+00> : vector<5x32xf32>
    %238 = tpu.matmul %235, %237, %cst_181 {dimension_numbers = #tpu.dot_dimension_numbers<[1], [0], [0], [1], [0, 0, 1, 1], [], []>} : vector<5x64xbf16>, vector<64x32xbf16>, vector<5x32xf32> -> vector<5x32xf32>
    %239 = arith.addf %233, %238 : vector<5x32xf32>
    %240 = vector.broadcast %4 : vector<1x32xf32> to vector<5x32xf32>
    %241 = arith.addf %239, %240 : vector<5x32xf32>
    %cst_182 = arith.constant 0.000000e+00 : f32
    %242 = vector.broadcast %cst_182 : f32 to vector<5x32xf32>
    %243 = arith.maximumf %241, %242 : vector<5x32xf32>
    %244 = arith.truncf %243 : vector<5x32xf32> to vector<5x32xbf16>
    %c0_183 = arith.constant 0 : index
    %c0_184 = arith.constant 0 : index
    %c0_185 = arith.constant 0 : index
    %245 = vector.load %arg3[%c0_183, %c0_184, %c0_185] : memref<4x64x32xbf16, #tpu.memory_space<vmem>>, vector<1x64x32xbf16>
    %246 = vector.shape_cast %245 : vector<1x64x32xbf16> to vector<64x32xbf16>
    %cst_186 = arith.constant dense<0.000000e+00> : vector<5x32xf32>
    %247 = tpu.matmul %207, %246, %cst_186 {dimension_numbers = #tpu.dot_dimension_numbers<[1], [0], [0], [1], [0, 0, 1, 1], [], []>} : vector<5x64xbf16>, vector<64x32xbf16>, vector<5x32xf32> -> vector<5x32xf32>
    %c1_187 = arith.constant 1 : index
    %c0_188 = arith.constant 0 : index
    %c0_189 = arith.constant 0 : index
    %248 = vector.load %arg3[%c1_187, %c0_188, %c0_189] : memref<4x64x32xbf16, #tpu.memory_space<vmem>>, vector<1x64x32xbf16>
    %249 = vector.shape_cast %248 : vector<1x64x32xbf16> to vector<64x32xbf16>
    %cst_190 = arith.constant dense<0.000000e+00> : vector<5x32xf32>
    %250 = tpu.matmul %213, %249, %cst_190 {dimension_numbers = #tpu.dot_dimension_numbers<[1], [0], [0], [1], [0, 0, 1, 1], [], []>} : vector<5x64xbf16>, vector<64x32xbf16>, vector<5x32xf32> -> vector<5x32xf32>
    %251 = arith.addf %247, %250 : vector<5x32xf32>
    %252 = vector.extract_strided_slice %1 {offsets = [6, 0, 0], sizes = [1, 5, 64], strides = [1, 1, 1]} : vector<11x6x64xbf16> to vector<1x5x64xbf16>
    %253 = vector.shape_cast %252 : vector<1x5x64xbf16> to vector<5x64xbf16>
    %c2_191 = arith.constant 2 : index
    %c0_192 = arith.constant 0 : index
    %c0_193 = arith.constant 0 : index
    %254 = vector.load %arg3[%c2_191, %c0_192, %c0_193] : memref<4x64x32xbf16, #tpu.memory_space<vmem>>, vector<1x64x32xbf16>
    %255 = vector.shape_cast %254 : vector<1x64x32xbf16> to vector<64x32xbf16>
    %cst_194 = arith.constant dense<0.000000e+00> : vector<5x32xf32>
    %256 = tpu.matmul %253, %255, %cst_194 {dimension_numbers = #tpu.dot_dimension_numbers<[1], [0], [0], [1], [0, 0, 1, 1], [], []>} : vector<5x64xbf16>, vector<64x32xbf16>, vector<5x32xf32> -> vector<5x32xf32>
    %257 = arith.addf %251, %256 : vector<5x32xf32>
    %258 = vector.extract_strided_slice %3 {offsets = [6, 0, 0], sizes = [1, 5, 64], strides = [1, 1, 1]} : vector<11x5x64xbf16> to vector<1x5x64xbf16>
    %259 = vector.shape_cast %258 : vector<1x5x64xbf16> to vector<5x64xbf16>
    %c3_195 = arith.constant 3 : index
    %c0_196 = arith.constant 0 : index
    %c0_197 = arith.constant 0 : index
    %260 = vector.load %arg3[%c3_195, %c0_196, %c0_197] : memref<4x64x32xbf16, #tpu.memory_space<vmem>>, vector<1x64x32xbf16>
    %261 = vector.shape_cast %260 : vector<1x64x32xbf16> to vector<64x32xbf16>
    %cst_198 = arith.constant dense<0.000000e+00> : vector<5x32xf32>
    %262 = tpu.matmul %259, %261, %cst_198 {dimension_numbers = #tpu.dot_dimension_numbers<[1], [0], [0], [1], [0, 0, 1, 1], [], []>} : vector<5x64xbf16>, vector<64x32xbf16>, vector<5x32xf32> -> vector<5x32xf32>
    %263 = arith.addf %257, %262 : vector<5x32xf32>
    %264 = vector.broadcast %4 : vector<1x32xf32> to vector<5x32xf32>
    %265 = arith.addf %263, %264 : vector<5x32xf32>
    %cst_199 = arith.constant 0.000000e+00 : f32
    %266 = vector.broadcast %cst_199 : f32 to vector<5x32xf32>
    %267 = arith.maximumf %265, %266 : vector<5x32xf32>
    %268 = arith.truncf %267 : vector<5x32xf32> to vector<5x32xbf16>
    %c0_200 = arith.constant 0 : index
    %c0_201 = arith.constant 0 : index
    %c0_202 = arith.constant 0 : index
    %269 = vector.load %arg3[%c0_200, %c0_201, %c0_202] : memref<4x64x32xbf16, #tpu.memory_space<vmem>>, vector<1x64x32xbf16>
    %270 = vector.shape_cast %269 : vector<1x64x32xbf16> to vector<64x32xbf16>
    %cst_203 = arith.constant dense<0.000000e+00> : vector<5x32xf32>
    %271 = tpu.matmul %213, %270, %cst_203 {dimension_numbers = #tpu.dot_dimension_numbers<[1], [0], [0], [1], [0, 0, 1, 1], [], []>} : vector<5x64xbf16>, vector<64x32xbf16>, vector<5x32xf32> -> vector<5x32xf32>
    %c1_204 = arith.constant 1 : index
    %c0_205 = arith.constant 0 : index
    %c0_206 = arith.constant 0 : index
    %272 = vector.load %arg3[%c1_204, %c0_205, %c0_206] : memref<4x64x32xbf16, #tpu.memory_space<vmem>>, vector<1x64x32xbf16>
    %273 = vector.shape_cast %272 : vector<1x64x32xbf16> to vector<64x32xbf16>
    %cst_207 = arith.constant dense<0.000000e+00> : vector<5x32xf32>
    %274 = tpu.matmul %235, %273, %cst_207 {dimension_numbers = #tpu.dot_dimension_numbers<[1], [0], [0], [1], [0, 0, 1, 1], [], []>} : vector<5x64xbf16>, vector<64x32xbf16>, vector<5x32xf32> -> vector<5x32xf32>
    %275 = arith.addf %271, %274 : vector<5x32xf32>
    %c2_208 = arith.constant 2 : index
    %c0_209 = arith.constant 0 : index
    %c0_210 = arith.constant 0 : index
    %276 = vector.load %arg3[%c2_208, %c0_209, %c0_210] : memref<4x64x32xbf16, #tpu.memory_space<vmem>>, vector<1x64x32xbf16>
    %277 = vector.shape_cast %276 : vector<1x64x32xbf16> to vector<64x32xbf16>
    %cst_211 = arith.constant dense<0.000000e+00> : vector<5x32xf32>
    %278 = tpu.matmul %259, %277, %cst_211 {dimension_numbers = #tpu.dot_dimension_numbers<[1], [0], [0], [1], [0, 0, 1, 1], [], []>} : vector<5x64xbf16>, vector<64x32xbf16>, vector<5x32xf32> -> vector<5x32xf32>
    %279 = arith.addf %275, %278 : vector<5x32xf32>
    %280 = vector.extract_strided_slice %1 {offsets = [6, 1, 0], sizes = [1, 5, 64], strides = [1, 1, 1]} : vector<11x6x64xbf16> to vector<1x5x64xbf16>
    %281 = vector.shape_cast %280 : vector<1x5x64xbf16> to vector<5x64xbf16>
    %c3_212 = arith.constant 3 : index
    %c0_213 = arith.constant 0 : index
    %c0_214 = arith.constant 0 : index
    %282 = vector.load %arg3[%c3_212, %c0_213, %c0_214] : memref<4x64x32xbf16, #tpu.memory_space<vmem>>, vector<1x64x32xbf16>
    %283 = vector.shape_cast %282 : vector<1x64x32xbf16> to vector<64x32xbf16>
    %cst_215 = arith.constant dense<0.000000e+00> : vector<5x32xf32>
    %284 = tpu.matmul %281, %283, %cst_215 {dimension_numbers = #tpu.dot_dimension_numbers<[1], [0], [0], [1], [0, 0, 1, 1], [], []>} : vector<5x64xbf16>, vector<64x32xbf16>, vector<5x32xf32> -> vector<5x32xf32>
    %285 = arith.addf %279, %284 : vector<5x32xf32>
    %286 = vector.broadcast %4 : vector<1x32xf32> to vector<5x32xf32>
    %287 = arith.addf %285, %286 : vector<5x32xf32>
    %cst_216 = arith.constant 0.000000e+00 : f32
    %288 = vector.broadcast %cst_216 : f32 to vector<5x32xf32>
    %289 = arith.maximumf %287, %288 : vector<5x32xf32>
    %290 = arith.truncf %289 : vector<5x32xf32> to vector<5x32xbf16>
    %c0_217 = arith.constant 0 : index
    %c0_218 = arith.constant 0 : index
    %c0_219 = arith.constant 0 : index
    %291 = vector.load %arg3[%c0_217, %c0_218, %c0_219] : memref<4x64x32xbf16, #tpu.memory_space<vmem>>, vector<1x64x32xbf16>
    %292 = vector.shape_cast %291 : vector<1x64x32xbf16> to vector<64x32xbf16>
    %cst_220 = arith.constant dense<0.000000e+00> : vector<5x32xf32>
    %293 = tpu.matmul %253, %292, %cst_220 {dimension_numbers = #tpu.dot_dimension_numbers<[1], [0], [0], [1], [0, 0, 1, 1], [], []>} : vector<5x64xbf16>, vector<64x32xbf16>, vector<5x32xf32> -> vector<5x32xf32>
    %c1_221 = arith.constant 1 : index
    %c0_222 = arith.constant 0 : index
    %c0_223 = arith.constant 0 : index
    %294 = vector.load %arg3[%c1_221, %c0_222, %c0_223] : memref<4x64x32xbf16, #tpu.memory_space<vmem>>, vector<1x64x32xbf16>
    %295 = vector.shape_cast %294 : vector<1x64x32xbf16> to vector<64x32xbf16>
    %cst_224 = arith.constant dense<0.000000e+00> : vector<5x32xf32>
    %296 = tpu.matmul %259, %295, %cst_224 {dimension_numbers = #tpu.dot_dimension_numbers<[1], [0], [0], [1], [0, 0, 1, 1], [], []>} : vector<5x64xbf16>, vector<64x32xbf16>, vector<5x32xf32> -> vector<5x32xf32>
    %297 = arith.addf %293, %296 : vector<5x32xf32>
    %298 = vector.extract_strided_slice %1 {offsets = [7, 0, 0], sizes = [1, 5, 64], strides = [1, 1, 1]} : vector<11x6x64xbf16> to vector<1x5x64xbf16>
    %299 = vector.shape_cast %298 : vector<1x5x64xbf16> to vector<5x64xbf16>
    %c2_225 = arith.constant 2 : index
    %c0_226 = arith.constant 0 : index
    %c0_227 = arith.constant 0 : index
    %300 = vector.load %arg3[%c2_225, %c0_226, %c0_227] : memref<4x64x32xbf16, #tpu.memory_space<vmem>>, vector<1x64x32xbf16>
    %301 = vector.shape_cast %300 : vector<1x64x32xbf16> to vector<64x32xbf16>
    %cst_228 = arith.constant dense<0.000000e+00> : vector<5x32xf32>
    %302 = tpu.matmul %299, %301, %cst_228 {dimension_numbers = #tpu.dot_dimension_numbers<[1], [0], [0], [1], [0, 0, 1, 1], [], []>} : vector<5x64xbf16>, vector<64x32xbf16>, vector<5x32xf32> -> vector<5x32xf32>
    %303 = arith.addf %297, %302 : vector<5x32xf32>
    %304 = vector.extract_strided_slice %3 {offsets = [7, 0, 0], sizes = [1, 5, 64], strides = [1, 1, 1]} : vector<11x5x64xbf16> to vector<1x5x64xbf16>
    %305 = vector.shape_cast %304 : vector<1x5x64xbf16> to vector<5x64xbf16>
    %c3_229 = arith.constant 3 : index
    %c0_230 = arith.constant 0 : index
    %c0_231 = arith.constant 0 : index
    %306 = vector.load %arg3[%c3_229, %c0_230, %c0_231] : memref<4x64x32xbf16, #tpu.memory_space<vmem>>, vector<1x64x32xbf16>
    %307 = vector.shape_cast %306 : vector<1x64x32xbf16> to vector<64x32xbf16>
    %cst_232 = arith.constant dense<0.000000e+00> : vector<5x32xf32>
    %308 = tpu.matmul %305, %307, %cst_232 {dimension_numbers = #tpu.dot_dimension_numbers<[1], [0], [0], [1], [0, 0, 1, 1], [], []>} : vector<5x64xbf16>, vector<64x32xbf16>, vector<5x32xf32> -> vector<5x32xf32>
    %309 = arith.addf %303, %308 : vector<5x32xf32>
    %310 = vector.broadcast %4 : vector<1x32xf32> to vector<5x32xf32>
    %311 = arith.addf %309, %310 : vector<5x32xf32>
    %cst_233 = arith.constant 0.000000e+00 : f32
    %312 = vector.broadcast %cst_233 : f32 to vector<5x32xf32>
    %313 = arith.maximumf %311, %312 : vector<5x32xf32>
    %314 = arith.truncf %313 : vector<5x32xf32> to vector<5x32xbf16>
    %c0_234 = arith.constant 0 : index
    %c0_235 = arith.constant 0 : index
    %c0_236 = arith.constant 0 : index
    %315 = vector.load %arg3[%c0_234, %c0_235, %c0_236] : memref<4x64x32xbf16, #tpu.memory_space<vmem>>, vector<1x64x32xbf16>
    %316 = vector.shape_cast %315 : vector<1x64x32xbf16> to vector<64x32xbf16>
    %cst_237 = arith.constant dense<0.000000e+00> : vector<5x32xf32>
    %317 = tpu.matmul %259, %316, %cst_237 {dimension_numbers = #tpu.dot_dimension_numbers<[1], [0], [0], [1], [0, 0, 1, 1], [], []>} : vector<5x64xbf16>, vector<64x32xbf16>, vector<5x32xf32> -> vector<5x32xf32>
    %c1_238 = arith.constant 1 : index
    %c0_239 = arith.constant 0 : index
    %c0_240 = arith.constant 0 : index
    %318 = vector.load %arg3[%c1_238, %c0_239, %c0_240] : memref<4x64x32xbf16, #tpu.memory_space<vmem>>, vector<1x64x32xbf16>
    %319 = vector.shape_cast %318 : vector<1x64x32xbf16> to vector<64x32xbf16>
    %cst_241 = arith.constant dense<0.000000e+00> : vector<5x32xf32>
    %320 = tpu.matmul %281, %319, %cst_241 {dimension_numbers = #tpu.dot_dimension_numbers<[1], [0], [0], [1], [0, 0, 1, 1], [], []>} : vector<5x64xbf16>, vector<64x32xbf16>, vector<5x32xf32> -> vector<5x32xf32>
    %321 = arith.addf %317, %320 : vector<5x32xf32>
    %c2_242 = arith.constant 2 : index
    %c0_243 = arith.constant 0 : index
    %c0_244 = arith.constant 0 : index
    %322 = vector.load %arg3[%c2_242, %c0_243, %c0_244] : memref<4x64x32xbf16, #tpu.memory_space<vmem>>, vector<1x64x32xbf16>
    %323 = vector.shape_cast %322 : vector<1x64x32xbf16> to vector<64x32xbf16>
    %cst_245 = arith.constant dense<0.000000e+00> : vector<5x32xf32>
    %324 = tpu.matmul %305, %323, %cst_245 {dimension_numbers = #tpu.dot_dimension_numbers<[1], [0], [0], [1], [0, 0, 1, 1], [], []>} : vector<5x64xbf16>, vector<64x32xbf16>, vector<5x32xf32> -> vector<5x32xf32>
    %325 = arith.addf %321, %324 : vector<5x32xf32>
    %326 = vector.extract_strided_slice %1 {offsets = [7, 1, 0], sizes = [1, 5, 64], strides = [1, 1, 1]} : vector<11x6x64xbf16> to vector<1x5x64xbf16>
    %327 = vector.shape_cast %326 : vector<1x5x64xbf16> to vector<5x64xbf16>
    %c3_246 = arith.constant 3 : index
    %c0_247 = arith.constant 0 : index
    %c0_248 = arith.constant 0 : index
    %328 = vector.load %arg3[%c3_246, %c0_247, %c0_248] : memref<4x64x32xbf16, #tpu.memory_space<vmem>>, vector<1x64x32xbf16>
    %329 = vector.shape_cast %328 : vector<1x64x32xbf16> to vector<64x32xbf16>
    %cst_249 = arith.constant dense<0.000000e+00> : vector<5x32xf32>
    %330 = tpu.matmul %327, %329, %cst_249 {dimension_numbers = #tpu.dot_dimension_numbers<[1], [0], [0], [1], [0, 0, 1, 1], [], []>} : vector<5x64xbf16>, vector<64x32xbf16>, vector<5x32xf32> -> vector<5x32xf32>
    %331 = arith.addf %325, %330 : vector<5x32xf32>
    %332 = vector.broadcast %4 : vector<1x32xf32> to vector<5x32xf32>
    %333 = arith.addf %331, %332 : vector<5x32xf32>
    %cst_250 = arith.constant 0.000000e+00 : f32
    %334 = vector.broadcast %cst_250 : f32 to vector<5x32xf32>
    %335 = arith.maximumf %333, %334 : vector<5x32xf32>
    %336 = arith.truncf %335 : vector<5x32xf32> to vector<5x32xbf16>
    %c0_251 = arith.constant 0 : index
    %c0_252 = arith.constant 0 : index
    %c0_253 = arith.constant 0 : index
    %337 = vector.load %arg3[%c0_251, %c0_252, %c0_253] : memref<4x64x32xbf16, #tpu.memory_space<vmem>>, vector<1x64x32xbf16>
    %338 = vector.shape_cast %337 : vector<1x64x32xbf16> to vector<64x32xbf16>
    %cst_254 = arith.constant dense<0.000000e+00> : vector<5x32xf32>
    %339 = tpu.matmul %299, %338, %cst_254 {dimension_numbers = #tpu.dot_dimension_numbers<[1], [0], [0], [1], [0, 0, 1, 1], [], []>} : vector<5x64xbf16>, vector<64x32xbf16>, vector<5x32xf32> -> vector<5x32xf32>
    %c1_255 = arith.constant 1 : index
    %c0_256 = arith.constant 0 : index
    %c0_257 = arith.constant 0 : index
    %340 = vector.load %arg3[%c1_255, %c0_256, %c0_257] : memref<4x64x32xbf16, #tpu.memory_space<vmem>>, vector<1x64x32xbf16>
    %341 = vector.shape_cast %340 : vector<1x64x32xbf16> to vector<64x32xbf16>
    %cst_258 = arith.constant dense<0.000000e+00> : vector<5x32xf32>
    %342 = tpu.matmul %305, %341, %cst_258 {dimension_numbers = #tpu.dot_dimension_numbers<[1], [0], [0], [1], [0, 0, 1, 1], [], []>} : vector<5x64xbf16>, vector<64x32xbf16>, vector<5x32xf32> -> vector<5x32xf32>
    %343 = arith.addf %339, %342 : vector<5x32xf32>
    %344 = vector.extract_strided_slice %1 {offsets = [8, 0, 0], sizes = [1, 5, 64], strides = [1, 1, 1]} : vector<11x6x64xbf16> to vector<1x5x64xbf16>
    %345 = vector.shape_cast %344 : vector<1x5x64xbf16> to vector<5x64xbf16>
    %c2_259 = arith.constant 2 : index
    %c0_260 = arith.constant 0 : index
    %c0_261 = arith.constant 0 : index
    %346 = vector.load %arg3[%c2_259, %c0_260, %c0_261] : memref<4x64x32xbf16, #tpu.memory_space<vmem>>, vector<1x64x32xbf16>
    %347 = vector.shape_cast %346 : vector<1x64x32xbf16> to vector<64x32xbf16>
    %cst_262 = arith.constant dense<0.000000e+00> : vector<5x32xf32>
    %348 = tpu.matmul %345, %347, %cst_262 {dimension_numbers = #tpu.dot_dimension_numbers<[1], [0], [0], [1], [0, 0, 1, 1], [], []>} : vector<5x64xbf16>, vector<64x32xbf16>, vector<5x32xf32> -> vector<5x32xf32>
    %349 = arith.addf %343, %348 : vector<5x32xf32>
    %350 = vector.extract_strided_slice %3 {offsets = [8, 0, 0], sizes = [1, 5, 64], strides = [1, 1, 1]} : vector<11x5x64xbf16> to vector<1x5x64xbf16>
    %351 = vector.shape_cast %350 : vector<1x5x64xbf16> to vector<5x64xbf16>
    %c3_263 = arith.constant 3 : index
    %c0_264 = arith.constant 0 : index
    %c0_265 = arith.constant 0 : index
    %352 = vector.load %arg3[%c3_263, %c0_264, %c0_265] : memref<4x64x32xbf16, #tpu.memory_space<vmem>>, vector<1x64x32xbf16>
    %353 = vector.shape_cast %352 : vector<1x64x32xbf16> to vector<64x32xbf16>
    %cst_266 = arith.constant dense<0.000000e+00> : vector<5x32xf32>
    %354 = tpu.matmul %351, %353, %cst_266 {dimension_numbers = #tpu.dot_dimension_numbers<[1], [0], [0], [1], [0, 0, 1, 1], [], []>} : vector<5x64xbf16>, vector<64x32xbf16>, vector<5x32xf32> -> vector<5x32xf32>
    %355 = arith.addf %349, %354 : vector<5x32xf32>
    %356 = vector.broadcast %4 : vector<1x32xf32> to vector<5x32xf32>
    %357 = arith.addf %355, %356 : vector<5x32xf32>
    %cst_267 = arith.constant 0.000000e+00 : f32
    %358 = vector.broadcast %cst_267 : f32 to vector<5x32xf32>
    %359 = arith.maximumf %357, %358 : vector<5x32xf32>
    %360 = arith.truncf %359 : vector<5x32xf32> to vector<5x32xbf16>
    %c0_268 = arith.constant 0 : index
    %c0_269 = arith.constant 0 : index
    %c0_270 = arith.constant 0 : index
    %361 = vector.load %arg3[%c0_268, %c0_269, %c0_270] : memref<4x64x32xbf16, #tpu.memory_space<vmem>>, vector<1x64x32xbf16>
    %362 = vector.shape_cast %361 : vector<1x64x32xbf16> to vector<64x32xbf16>
    %cst_271 = arith.constant dense<0.000000e+00> : vector<5x32xf32>
    %363 = tpu.matmul %305, %362, %cst_271 {dimension_numbers = #tpu.dot_dimension_numbers<[1], [0], [0], [1], [0, 0, 1, 1], [], []>} : vector<5x64xbf16>, vector<64x32xbf16>, vector<5x32xf32> -> vector<5x32xf32>
    %c1_272 = arith.constant 1 : index
    %c0_273 = arith.constant 0 : index
    %c0_274 = arith.constant 0 : index
    %364 = vector.load %arg3[%c1_272, %c0_273, %c0_274] : memref<4x64x32xbf16, #tpu.memory_space<vmem>>, vector<1x64x32xbf16>
    %365 = vector.shape_cast %364 : vector<1x64x32xbf16> to vector<64x32xbf16>
    %cst_275 = arith.constant dense<0.000000e+00> : vector<5x32xf32>
    %366 = tpu.matmul %327, %365, %cst_275 {dimension_numbers = #tpu.dot_dimension_numbers<[1], [0], [0], [1], [0, 0, 1, 1], [], []>} : vector<5x64xbf16>, vector<64x32xbf16>, vector<5x32xf32> -> vector<5x32xf32>
    %367 = arith.addf %363, %366 : vector<5x32xf32>
    %c2_276 = arith.constant 2 : index
    %c0_277 = arith.constant 0 : index
    %c0_278 = arith.constant 0 : index
    %368 = vector.load %arg3[%c2_276, %c0_277, %c0_278] : memref<4x64x32xbf16, #tpu.memory_space<vmem>>, vector<1x64x32xbf16>
    %369 = vector.shape_cast %368 : vector<1x64x32xbf16> to vector<64x32xbf16>
    %cst_279 = arith.constant dense<0.000000e+00> : vector<5x32xf32>
    %370 = tpu.matmul %351, %369, %cst_279 {dimension_numbers = #tpu.dot_dimension_numbers<[1], [0], [0], [1], [0, 0, 1, 1], [], []>} : vector<5x64xbf16>, vector<64x32xbf16>, vector<5x32xf32> -> vector<5x32xf32>
    %371 = arith.addf %367, %370 : vector<5x32xf32>
    %372 = vector.extract_strided_slice %1 {offsets = [8, 1, 0], sizes = [1, 5, 64], strides = [1, 1, 1]} : vector<11x6x64xbf16> to vector<1x5x64xbf16>
    %373 = vector.shape_cast %372 : vector<1x5x64xbf16> to vector<5x64xbf16>
    %c3_280 = arith.constant 3 : index
    %c0_281 = arith.constant 0 : index
    %c0_282 = arith.constant 0 : index
    %374 = vector.load %arg3[%c3_280, %c0_281, %c0_282] : memref<4x64x32xbf16, #tpu.memory_space<vmem>>, vector<1x64x32xbf16>
    %375 = vector.shape_cast %374 : vector<1x64x32xbf16> to vector<64x32xbf16>
    %cst_283 = arith.constant dense<0.000000e+00> : vector<5x32xf32>
    %376 = tpu.matmul %373, %375, %cst_283 {dimension_numbers = #tpu.dot_dimension_numbers<[1], [0], [0], [1], [0, 0, 1, 1], [], []>} : vector<5x64xbf16>, vector<64x32xbf16>, vector<5x32xf32> -> vector<5x32xf32>
    %377 = arith.addf %371, %376 : vector<5x32xf32>
    %378 = vector.broadcast %4 : vector<1x32xf32> to vector<5x32xf32>
    %379 = arith.addf %377, %378 : vector<5x32xf32>
    %cst_284 = arith.constant 0.000000e+00 : f32
    %380 = vector.broadcast %cst_284 : f32 to vector<5x32xf32>
    %381 = arith.maximumf %379, %380 : vector<5x32xf32>
    %382 = arith.truncf %381 : vector<5x32xf32> to vector<5x32xbf16>
    %c0_285 = arith.constant 0 : index
    %c0_286 = arith.constant 0 : index
    %c0_287 = arith.constant 0 : index
    %383 = vector.load %arg3[%c0_285, %c0_286, %c0_287] : memref<4x64x32xbf16, #tpu.memory_space<vmem>>, vector<1x64x32xbf16>
    %384 = vector.shape_cast %383 : vector<1x64x32xbf16> to vector<64x32xbf16>
    %cst_288 = arith.constant dense<0.000000e+00> : vector<5x32xf32>
    %385 = tpu.matmul %345, %384, %cst_288 {dimension_numbers = #tpu.dot_dimension_numbers<[1], [0], [0], [1], [0, 0, 1, 1], [], []>} : vector<5x64xbf16>, vector<64x32xbf16>, vector<5x32xf32> -> vector<5x32xf32>
    %c1_289 = arith.constant 1 : index
    %c0_290 = arith.constant 0 : index
    %c0_291 = arith.constant 0 : index
    %386 = vector.load %arg3[%c1_289, %c0_290, %c0_291] : memref<4x64x32xbf16, #tpu.memory_space<vmem>>, vector<1x64x32xbf16>
    %387 = vector.shape_cast %386 : vector<1x64x32xbf16> to vector<64x32xbf16>
    %cst_292 = arith.constant dense<0.000000e+00> : vector<5x32xf32>
    %388 = tpu.matmul %351, %387, %cst_292 {dimension_numbers = #tpu.dot_dimension_numbers<[1], [0], [0], [1], [0, 0, 1, 1], [], []>} : vector<5x64xbf16>, vector<64x32xbf16>, vector<5x32xf32> -> vector<5x32xf32>
    %389 = arith.addf %385, %388 : vector<5x32xf32>
    %390 = vector.extract_strided_slice %1 {offsets = [9, 0, 0], sizes = [1, 5, 64], strides = [1, 1, 1]} : vector<11x6x64xbf16> to vector<1x5x64xbf16>
    %391 = vector.shape_cast %390 : vector<1x5x64xbf16> to vector<5x64xbf16>
    %c2_293 = arith.constant 2 : index
    %c0_294 = arith.constant 0 : index
    %c0_295 = arith.constant 0 : index
    %392 = vector.load %arg3[%c2_293, %c0_294, %c0_295] : memref<4x64x32xbf16, #tpu.memory_space<vmem>>, vector<1x64x32xbf16>
    %393 = vector.shape_cast %392 : vector<1x64x32xbf16> to vector<64x32xbf16>
    %cst_296 = arith.constant dense<0.000000e+00> : vector<5x32xf32>
    %394 = tpu.matmul %391, %393, %cst_296 {dimension_numbers = #tpu.dot_dimension_numbers<[1], [0], [0], [1], [0, 0, 1, 1], [], []>} : vector<5x64xbf16>, vector<64x32xbf16>, vector<5x32xf32> -> vector<5x32xf32>
    %395 = arith.addf %389, %394 : vector<5x32xf32>
    %396 = vector.extract_strided_slice %3 {offsets = [9, 0, 0], sizes = [1, 5, 64], strides = [1, 1, 1]} : vector<11x5x64xbf16> to vector<1x5x64xbf16>
    %397 = vector.shape_cast %396 : vector<1x5x64xbf16> to vector<5x64xbf16>
    %c3_297 = arith.constant 3 : index
    %c0_298 = arith.constant 0 : index
    %c0_299 = arith.constant 0 : index
    %398 = vector.load %arg3[%c3_297, %c0_298, %c0_299] : memref<4x64x32xbf16, #tpu.memory_space<vmem>>, vector<1x64x32xbf16>
    %399 = vector.shape_cast %398 : vector<1x64x32xbf16> to vector<64x32xbf16>
    %cst_300 = arith.constant dense<0.000000e+00> : vector<5x32xf32>
    %400 = tpu.matmul %397, %399, %cst_300 {dimension_numbers = #tpu.dot_dimension_numbers<[1], [0], [0], [1], [0, 0, 1, 1], [], []>} : vector<5x64xbf16>, vector<64x32xbf16>, vector<5x32xf32> -> vector<5x32xf32>
    %401 = arith.addf %395, %400 : vector<5x32xf32>
    %402 = vector.broadcast %4 : vector<1x32xf32> to vector<5x32xf32>
    %403 = arith.addf %401, %402 : vector<5x32xf32>
    %cst_301 = arith.constant 0.000000e+00 : f32
    %404 = vector.broadcast %cst_301 : f32 to vector<5x32xf32>
    %405 = arith.maximumf %403, %404 : vector<5x32xf32>
    %406 = arith.truncf %405 : vector<5x32xf32> to vector<5x32xbf16>
    %c0_302 = arith.constant 0 : index
    %c0_303 = arith.constant 0 : index
    %c0_304 = arith.constant 0 : index
    %407 = vector.load %arg3[%c0_302, %c0_303, %c0_304] : memref<4x64x32xbf16, #tpu.memory_space<vmem>>, vector<1x64x32xbf16>
    %408 = vector.shape_cast %407 : vector<1x64x32xbf16> to vector<64x32xbf16>
    %cst_305 = arith.constant dense<0.000000e+00> : vector<5x32xf32>
    %409 = tpu.matmul %351, %408, %cst_305 {dimension_numbers = #tpu.dot_dimension_numbers<[1], [0], [0], [1], [0, 0, 1, 1], [], []>} : vector<5x64xbf16>, vector<64x32xbf16>, vector<5x32xf32> -> vector<5x32xf32>
    %c1_306 = arith.constant 1 : index
    %c0_307 = arith.constant 0 : index
    %c0_308 = arith.constant 0 : index
    %410 = vector.load %arg3[%c1_306, %c0_307, %c0_308] : memref<4x64x32xbf16, #tpu.memory_space<vmem>>, vector<1x64x32xbf16>
    %411 = vector.shape_cast %410 : vector<1x64x32xbf16> to vector<64x32xbf16>
    %cst_309 = arith.constant dense<0.000000e+00> : vector<5x32xf32>
    %412 = tpu.matmul %373, %411, %cst_309 {dimension_numbers = #tpu.dot_dimension_numbers<[1], [0], [0], [1], [0, 0, 1, 1], [], []>} : vector<5x64xbf16>, vector<64x32xbf16>, vector<5x32xf32> -> vector<5x32xf32>
    %413 = arith.addf %409, %412 : vector<5x32xf32>
    %c2_310 = arith.constant 2 : index
    %c0_311 = arith.constant 0 : index
    %c0_312 = arith.constant 0 : index
    %414 = vector.load %arg3[%c2_310, %c0_311, %c0_312] : memref<4x64x32xbf16, #tpu.memory_space<vmem>>, vector<1x64x32xbf16>
    %415 = vector.shape_cast %414 : vector<1x64x32xbf16> to vector<64x32xbf16>
    %cst_313 = arith.constant dense<0.000000e+00> : vector<5x32xf32>
    %416 = tpu.matmul %397, %415, %cst_313 {dimension_numbers = #tpu.dot_dimension_numbers<[1], [0], [0], [1], [0, 0, 1, 1], [], []>} : vector<5x64xbf16>, vector<64x32xbf16>, vector<5x32xf32> -> vector<5x32xf32>
    %417 = arith.addf %413, %416 : vector<5x32xf32>
    %418 = vector.extract_strided_slice %1 {offsets = [9, 1, 0], sizes = [1, 5, 64], strides = [1, 1, 1]} : vector<11x6x64xbf16> to vector<1x5x64xbf16>
    %419 = vector.shape_cast %418 : vector<1x5x64xbf16> to vector<5x64xbf16>
    %c3_314 = arith.constant 3 : index
    %c0_315 = arith.constant 0 : index
    %c0_316 = arith.constant 0 : index
    %420 = vector.load %arg3[%c3_314, %c0_315, %c0_316] : memref<4x64x32xbf16, #tpu.memory_space<vmem>>, vector<1x64x32xbf16>
    %421 = vector.shape_cast %420 : vector<1x64x32xbf16> to vector<64x32xbf16>
    %cst_317 = arith.constant dense<0.000000e+00> : vector<5x32xf32>
    %422 = tpu.matmul %419, %421, %cst_317 {dimension_numbers = #tpu.dot_dimension_numbers<[1], [0], [0], [1], [0, 0, 1, 1], [], []>} : vector<5x64xbf16>, vector<64x32xbf16>, vector<5x32xf32> -> vector<5x32xf32>
    %423 = arith.addf %417, %422 : vector<5x32xf32>
    %424 = vector.broadcast %4 : vector<1x32xf32> to vector<5x32xf32>
    %425 = arith.addf %423, %424 : vector<5x32xf32>
    %cst_318 = arith.constant 0.000000e+00 : f32
    %426 = vector.broadcast %cst_318 : f32 to vector<5x32xf32>
    %427 = arith.maximumf %425, %426 : vector<5x32xf32>
    %428 = arith.truncf %427 : vector<5x32xf32> to vector<5x32xbf16>
    %c0_319 = arith.constant 0 : index
    %c0_320 = arith.constant 0 : index
    %c0_321 = arith.constant 0 : index
    %429 = vector.load %arg3[%c0_319, %c0_320, %c0_321] : memref<4x64x32xbf16, #tpu.memory_space<vmem>>, vector<1x64x32xbf16>
    %430 = vector.shape_cast %429 : vector<1x64x32xbf16> to vector<64x32xbf16>
    %cst_322 = arith.constant dense<0.000000e+00> : vector<5x32xf32>
    %431 = tpu.matmul %391, %430, %cst_322 {dimension_numbers = #tpu.dot_dimension_numbers<[1], [0], [0], [1], [0, 0, 1, 1], [], []>} : vector<5x64xbf16>, vector<64x32xbf16>, vector<5x32xf32> -> vector<5x32xf32>
    %c1_323 = arith.constant 1 : index
    %c0_324 = arith.constant 0 : index
    %c0_325 = arith.constant 0 : index
    %432 = vector.load %arg3[%c1_323, %c0_324, %c0_325] : memref<4x64x32xbf16, #tpu.memory_space<vmem>>, vector<1x64x32xbf16>
    %433 = vector.shape_cast %432 : vector<1x64x32xbf16> to vector<64x32xbf16>
    %cst_326 = arith.constant dense<0.000000e+00> : vector<5x32xf32>
    %434 = tpu.matmul %397, %433, %cst_326 {dimension_numbers = #tpu.dot_dimension_numbers<[1], [0], [0], [1], [0, 0, 1, 1], [], []>} : vector<5x64xbf16>, vector<64x32xbf16>, vector<5x32xf32> -> vector<5x32xf32>
    %435 = arith.addf %431, %434 : vector<5x32xf32>
    %436 = vector.extract_strided_slice %1 {offsets = [10, 0, 0], sizes = [1, 5, 64], strides = [1, 1, 1]} : vector<11x6x64xbf16> to vector<1x5x64xbf16>
    %437 = vector.shape_cast %436 : vector<1x5x64xbf16> to vector<5x64xbf16>
    %c2_327 = arith.constant 2 : index
    %c0_328 = arith.constant 0 : index
    %c0_329 = arith.constant 0 : index
    %438 = vector.load %arg3[%c2_327, %c0_328, %c0_329] : memref<4x64x32xbf16, #tpu.memory_space<vmem>>, vector<1x64x32xbf16>
    %439 = vector.shape_cast %438 : vector<1x64x32xbf16> to vector<64x32xbf16>
    %cst_330 = arith.constant dense<0.000000e+00> : vector<5x32xf32>
    %440 = tpu.matmul %437, %439, %cst_330 {dimension_numbers = #tpu.dot_dimension_numbers<[1], [0], [0], [1], [0, 0, 1, 1], [], []>} : vector<5x64xbf16>, vector<64x32xbf16>, vector<5x32xf32> -> vector<5x32xf32>
    %441 = arith.addf %435, %440 : vector<5x32xf32>
    %442 = vector.extract_strided_slice %3 {offsets = [10, 0, 0], sizes = [1, 5, 64], strides = [1, 1, 1]} : vector<11x5x64xbf16> to vector<1x5x64xbf16>
    %443 = vector.shape_cast %442 : vector<1x5x64xbf16> to vector<5x64xbf16>
    %c3_331 = arith.constant 3 : index
    %c0_332 = arith.constant 0 : index
    %c0_333 = arith.constant 0 : index
    %444 = vector.load %arg3[%c3_331, %c0_332, %c0_333] : memref<4x64x32xbf16, #tpu.memory_space<vmem>>, vector<1x64x32xbf16>
    %445 = vector.shape_cast %444 : vector<1x64x32xbf16> to vector<64x32xbf16>
    %cst_334 = arith.constant dense<0.000000e+00> : vector<5x32xf32>
    %446 = tpu.matmul %443, %445, %cst_334 {dimension_numbers = #tpu.dot_dimension_numbers<[1], [0], [0], [1], [0, 0, 1, 1], [], []>} : vector<5x64xbf16>, vector<64x32xbf16>, vector<5x32xf32> -> vector<5x32xf32>
    %447 = arith.addf %441, %446 : vector<5x32xf32>
    %448 = vector.broadcast %4 : vector<1x32xf32> to vector<5x32xf32>
    %449 = arith.addf %447, %448 : vector<5x32xf32>
    %cst_335 = arith.constant 0.000000e+00 : f32
    %450 = vector.broadcast %cst_335 : f32 to vector<5x32xf32>
    %451 = arith.maximumf %449, %450 : vector<5x32xf32>
    %452 = arith.truncf %451 : vector<5x32xf32> to vector<5x32xbf16>
    %c0_336 = arith.constant 0 : index
    %c0_337 = arith.constant 0 : index
    %c0_338 = arith.constant 0 : index
    %453 = vector.load %arg3[%c0_336, %c0_337, %c0_338] : memref<4x64x32xbf16, #tpu.memory_space<vmem>>, vector<1x64x32xbf16>
    %454 = vector.shape_cast %453 : vector<1x64x32xbf16> to vector<64x32xbf16>
    %cst_339 = arith.constant dense<0.000000e+00> : vector<5x32xf32>
    %455 = tpu.matmul %397, %454, %cst_339 {dimension_numbers = #tpu.dot_dimension_numbers<[1], [0], [0], [1], [0, 0, 1, 1], [], []>} : vector<5x64xbf16>, vector<64x32xbf16>, vector<5x32xf32> -> vector<5x32xf32>
    %c1_340 = arith.constant 1 : index
    %c0_341 = arith.constant 0 : index
    %c0_342 = arith.constant 0 : index
    %456 = vector.load %arg3[%c1_340, %c0_341, %c0_342] : memref<4x64x32xbf16, #tpu.memory_space<vmem>>, vector<1x64x32xbf16>
    %457 = vector.shape_cast %456 : vector<1x64x32xbf16> to vector<64x32xbf16>
    %cst_343 = arith.constant dense<0.000000e+00> : vector<5x32xf32>
    %458 = tpu.matmul %419, %457, %cst_343 {dimension_numbers = #tpu.dot_dimension_numbers<[1], [0], [0], [1], [0, 0, 1, 1], [], []>} : vector<5x64xbf16>, vector<64x32xbf16>, vector<5x32xf32> -> vector<5x32xf32>
    %459 = arith.addf %455, %458 : vector<5x32xf32>
    %c2_344 = arith.constant 2 : index
    %c0_345 = arith.constant 0 : index
    %c0_346 = arith.constant 0 : index
    %460 = vector.load %arg3[%c2_344, %c0_345, %c0_346] : memref<4x64x32xbf16, #tpu.memory_space<vmem>>, vector<1x64x32xbf16>
    %461 = vector.shape_cast %460 : vector<1x64x32xbf16> to vector<64x32xbf16>
    %cst_347 = arith.constant dense<0.000000e+00> : vector<5x32xf32>
    %462 = tpu.matmul %443, %461, %cst_347 {dimension_numbers = #tpu.dot_dimension_numbers<[1], [0], [0], [1], [0, 0, 1, 1], [], []>} : vector<5x64xbf16>, vector<64x32xbf16>, vector<5x32xf32> -> vector<5x32xf32>
    %463 = arith.addf %459, %462 : vector<5x32xf32>
    %464 = vector.extract_strided_slice %1 {offsets = [10, 1, 0], sizes = [1, 5, 64], strides = [1, 1, 1]} : vector<11x6x64xbf16> to vector<1x5x64xbf16>
    %465 = vector.shape_cast %464 : vector<1x5x64xbf16> to vector<5x64xbf16>
    %c3_348 = arith.constant 3 : index
    %c0_349 = arith.constant 0 : index
    %c0_350 = arith.constant 0 : index
    %466 = vector.load %arg3[%c3_348, %c0_349, %c0_350] : memref<4x64x32xbf16, #tpu.memory_space<vmem>>, vector<1x64x32xbf16>
    %467 = vector.shape_cast %466 : vector<1x64x32xbf16> to vector<64x32xbf16>
    %cst_351 = arith.constant dense<0.000000e+00> : vector<5x32xf32>
    %468 = tpu.matmul %465, %467, %cst_351 {dimension_numbers = #tpu.dot_dimension_numbers<[1], [0], [0], [1], [0, 0, 1, 1], [], []>} : vector<5x64xbf16>, vector<64x32xbf16>, vector<5x32xf32> -> vector<5x32xf32>
    %469 = arith.addf %463, %468 : vector<5x32xf32>
    %470 = vector.broadcast %4 : vector<1x32xf32> to vector<5x32xf32>
    %471 = arith.addf %469, %470 : vector<5x32xf32>
    %cst_352 = arith.constant 0.000000e+00 : f32
    %472 = vector.broadcast %cst_352 : f32 to vector<5x32xf32>
    %473 = arith.maximumf %471, %472 : vector<5x32xf32>
    %474 = arith.truncf %473 : vector<5x32xf32> to vector<5x32xbf16>
    %475 = vector.extract_strided_slice %36 {offsets = [0, 0], sizes = [4, 32], strides = [1, 1]} : vector<5x32xbf16> to vector<4x32xbf16>
    %c0_353 = arith.constant 0 : index
    %c0_354 = arith.constant 0 : index
    %c0_355 = arith.constant 0 : index
    %476 = vector.load %arg5[%c0_353, %c0_354, %c0_355] : memref<16x32x64xbf16, #tpu.memory_space<vmem>>, vector<1x32x64xbf16>
    %477 = vector.shape_cast %476 : vector<1x32x64xbf16> to vector<32x64xbf16>
    %cst_356 = arith.constant dense<0.000000e+00> : vector<4x64xf32>
    %478 = tpu.matmul %475, %477, %cst_356 {dimension_numbers = #tpu.dot_dimension_numbers<[1], [0], [0], [1], [0, 0, 1, 1], [], []>} : vector<4x32xbf16>, vector<32x64xbf16>, vector<4x64xf32> -> vector<4x64xf32>
    %479 = vector.extract_strided_slice %36 {offsets = [1, 0], sizes = [4, 32], strides = [1, 1]} : vector<5x32xbf16> to vector<4x32xbf16>
    %c1_357 = arith.constant 1 : index
    %c0_358 = arith.constant 0 : index
    %c0_359 = arith.constant 0 : index
    %480 = vector.load %arg5[%c1_357, %c0_358, %c0_359] : memref<16x32x64xbf16, #tpu.memory_space<vmem>>, vector<1x32x64xbf16>
    %481 = vector.shape_cast %480 : vector<1x32x64xbf16> to vector<32x64xbf16>
    %cst_360 = arith.constant dense<0.000000e+00> : vector<4x64xf32>
    %482 = tpu.matmul %479, %481, %cst_360 {dimension_numbers = #tpu.dot_dimension_numbers<[1], [0], [0], [1], [0, 0, 1, 1], [], []>} : vector<4x32xbf16>, vector<32x64xbf16>, vector<4x64xf32> -> vector<4x64xf32>
    %483 = arith.addf %478, %482 : vector<4x64xf32>
    %484 = vector.extract_strided_slice %130 {offsets = [0, 0], sizes = [4, 32], strides = [1, 1]} : vector<5x32xbf16> to vector<4x32xbf16>
    %c2_361 = arith.constant 2 : index
    %c0_362 = arith.constant 0 : index
    %c0_363 = arith.constant 0 : index
    %485 = vector.load %arg5[%c2_361, %c0_362, %c0_363] : memref<16x32x64xbf16, #tpu.memory_space<vmem>>, vector<1x32x64xbf16>
    %486 = vector.shape_cast %485 : vector<1x32x64xbf16> to vector<32x64xbf16>
    %cst_364 = arith.constant dense<0.000000e+00> : vector<4x64xf32>
    %487 = tpu.matmul %484, %486, %cst_364 {dimension_numbers = #tpu.dot_dimension_numbers<[1], [0], [0], [1], [0, 0, 1, 1], [], []>} : vector<4x32xbf16>, vector<32x64xbf16>, vector<4x64xf32> -> vector<4x64xf32>
    %488 = arith.addf %483, %487 : vector<4x64xf32>
    %489 = vector.extract_strided_slice %130 {offsets = [1, 0], sizes = [4, 32], strides = [1, 1]} : vector<5x32xbf16> to vector<4x32xbf16>
    %c3_365 = arith.constant 3 : index
    %c0_366 = arith.constant 0 : index
    %c0_367 = arith.constant 0 : index
    %490 = vector.load %arg5[%c3_365, %c0_366, %c0_367] : memref<16x32x64xbf16, #tpu.memory_space<vmem>>, vector<1x32x64xbf16>
    %491 = vector.shape_cast %490 : vector<1x32x64xbf16> to vector<32x64xbf16>
    %cst_368 = arith.constant dense<0.000000e+00> : vector<4x64xf32>
    %492 = tpu.matmul %489, %491, %cst_368 {dimension_numbers = #tpu.dot_dimension_numbers<[1], [0], [0], [1], [0, 0, 1, 1], [], []>} : vector<4x32xbf16>, vector<32x64xbf16>, vector<4x64xf32> -> vector<4x64xf32>
    %493 = arith.addf %488, %492 : vector<4x64xf32>
    %494 = vector.extract_strided_slice %60 {offsets = [0, 0], sizes = [4, 32], strides = [1, 1]} : vector<5x32xbf16> to vector<4x32xbf16>
    %c4 = arith.constant 4 : index
    %c0_369 = arith.constant 0 : index
    %c0_370 = arith.constant 0 : index
    %495 = vector.load %arg5[%c4, %c0_369, %c0_370] : memref<16x32x64xbf16, #tpu.memory_space<vmem>>, vector<1x32x64xbf16>
    %496 = vector.shape_cast %495 : vector<1x32x64xbf16> to vector<32x64xbf16>
    %cst_371 = arith.constant dense<0.000000e+00> : vector<4x64xf32>
    %497 = tpu.matmul %494, %496, %cst_371 {dimension_numbers = #tpu.dot_dimension_numbers<[1], [0], [0], [1], [0, 0, 1, 1], [], []>} : vector<4x32xbf16>, vector<32x64xbf16>, vector<4x64xf32> -> vector<4x64xf32>
    %498 = arith.addf %493, %497 : vector<4x64xf32>
    %499 = vector.extract_strided_slice %60 {offsets = [1, 0], sizes = [4, 32], strides = [1, 1]} : vector<5x32xbf16> to vector<4x32xbf16>
    %c5 = arith.constant 5 : index
    %c0_372 = arith.constant 0 : index
    %c0_373 = arith.constant 0 : index
    %500 = vector.load %arg5[%c5, %c0_372, %c0_373] : memref<16x32x64xbf16, #tpu.memory_space<vmem>>, vector<1x32x64xbf16>
    %501 = vector.shape_cast %500 : vector<1x32x64xbf16> to vector<32x64xbf16>
    %cst_374 = arith.constant dense<0.000000e+00> : vector<4x64xf32>
    %502 = tpu.matmul %499, %501, %cst_374 {dimension_numbers = #tpu.dot_dimension_numbers<[1], [0], [0], [1], [0, 0, 1, 1], [], []>} : vector<4x32xbf16>, vector<32x64xbf16>, vector<4x64xf32> -> vector<4x64xf32>
    %503 = arith.addf %498, %502 : vector<4x64xf32>
    %504 = vector.extract_strided_slice %152 {offsets = [0, 0], sizes = [4, 32], strides = [1, 1]} : vector<5x32xbf16> to vector<4x32xbf16>
    %c6 = arith.constant 6 : index
    %c0_375 = arith.constant 0 : index
    %c0_376 = arith.constant 0 : index
    %505 = vector.load %arg5[%c6, %c0_375, %c0_376] : memref<16x32x64xbf16, #tpu.memory_space<vmem>>, vector<1x32x64xbf16>
    %506 = vector.shape_cast %505 : vector<1x32x64xbf16> to vector<32x64xbf16>
    %cst_377 = arith.constant dense<0.000000e+00> : vector<4x64xf32>
    %507 = tpu.matmul %504, %506, %cst_377 {dimension_numbers = #tpu.dot_dimension_numbers<[1], [0], [0], [1], [0, 0, 1, 1], [], []>} : vector<4x32xbf16>, vector<32x64xbf16>, vector<4x64xf32> -> vector<4x64xf32>
    %508 = arith.addf %503, %507 : vector<4x64xf32>
    %509 = vector.extract_strided_slice %152 {offsets = [1, 0], sizes = [4, 32], strides = [1, 1]} : vector<5x32xbf16> to vector<4x32xbf16>
    %c7 = arith.constant 7 : index
    %c0_378 = arith.constant 0 : index
    %c0_379 = arith.constant 0 : index
    %510 = vector.load %arg5[%c7, %c0_378, %c0_379] : memref<16x32x64xbf16, #tpu.memory_space<vmem>>, vector<1x32x64xbf16>
    %511 = vector.shape_cast %510 : vector<1x32x64xbf16> to vector<32x64xbf16>
    %cst_380 = arith.constant dense<0.000000e+00> : vector<4x64xf32>
    %512 = tpu.matmul %509, %511, %cst_380 {dimension_numbers = #tpu.dot_dimension_numbers<[1], [0], [0], [1], [0, 0, 1, 1], [], []>} : vector<4x32xbf16>, vector<32x64xbf16>, vector<4x64xf32> -> vector<4x64xf32>
    %513 = arith.addf %508, %512 : vector<4x64xf32>
    %514 = vector.extract_strided_slice %84 {offsets = [0, 0], sizes = [4, 32], strides = [1, 1]} : vector<5x32xbf16> to vector<4x32xbf16>
    %c8 = arith.constant 8 : index
    %c0_381 = arith.constant 0 : index
    %c0_382 = arith.constant 0 : index
    %515 = vector.load %arg5[%c8, %c0_381, %c0_382] : memref<16x32x64xbf16, #tpu.memory_space<vmem>>, vector<1x32x64xbf16>
    %516 = vector.shape_cast %515 : vector<1x32x64xbf16> to vector<32x64xbf16>
    %cst_383 = arith.constant dense<0.000000e+00> : vector<4x64xf32>
    %517 = tpu.matmul %514, %516, %cst_383 {dimension_numbers = #tpu.dot_dimension_numbers<[1], [0], [0], [1], [0, 0, 1, 1], [], []>} : vector<4x32xbf16>, vector<32x64xbf16>, vector<4x64xf32> -> vector<4x64xf32>
    %518 = arith.addf %513, %517 : vector<4x64xf32>
    %519 = vector.extract_strided_slice %84 {offsets = [1, 0], sizes = [4, 32], strides = [1, 1]} : vector<5x32xbf16> to vector<4x32xbf16>
    %c9 = arith.constant 9 : index
    %c0_384 = arith.constant 0 : index
    %c0_385 = arith.constant 0 : index
    %520 = vector.load %arg5[%c9, %c0_384, %c0_385] : memref<16x32x64xbf16, #tpu.memory_space<vmem>>, vector<1x32x64xbf16>
    %521 = vector.shape_cast %520 : vector<1x32x64xbf16> to vector<32x64xbf16>
    %cst_386 = arith.constant dense<0.000000e+00> : vector<4x64xf32>
    %522 = tpu.matmul %519, %521, %cst_386 {dimension_numbers = #tpu.dot_dimension_numbers<[1], [0], [0], [1], [0, 0, 1, 1], [], []>} : vector<4x32xbf16>, vector<32x64xbf16>, vector<4x64xf32> -> vector<4x64xf32>
    %523 = arith.addf %518, %522 : vector<4x64xf32>
    %524 = vector.extract_strided_slice %176 {offsets = [0, 0], sizes = [4, 32], strides = [1, 1]} : vector<5x32xbf16> to vector<4x32xbf16>
    %c10 = arith.constant 10 : index
    %c0_387 = arith.constant 0 : index
    %c0_388 = arith.constant 0 : index
    %525 = vector.load %arg5[%c10, %c0_387, %c0_388] : memref<16x32x64xbf16, #tpu.memory_space<vmem>>, vector<1x32x64xbf16>
    %526 = vector.shape_cast %525 : vector<1x32x64xbf16> to vector<32x64xbf16>
    %cst_389 = arith.constant dense<0.000000e+00> : vector<4x64xf32>
    %527 = tpu.matmul %524, %526, %cst_389 {dimension_numbers = #tpu.dot_dimension_numbers<[1], [0], [0], [1], [0, 0, 1, 1], [], []>} : vector<4x32xbf16>, vector<32x64xbf16>, vector<4x64xf32> -> vector<4x64xf32>
    %528 = arith.addf %523, %527 : vector<4x64xf32>
    %529 = vector.extract_strided_slice %176 {offsets = [1, 0], sizes = [4, 32], strides = [1, 1]} : vector<5x32xbf16> to vector<4x32xbf16>
    %c11 = arith.constant 11 : index
    %c0_390 = arith.constant 0 : index
    %c0_391 = arith.constant 0 : index
    %530 = vector.load %arg5[%c11, %c0_390, %c0_391] : memref<16x32x64xbf16, #tpu.memory_space<vmem>>, vector<1x32x64xbf16>
    %531 = vector.shape_cast %530 : vector<1x32x64xbf16> to vector<32x64xbf16>
    %cst_392 = arith.constant dense<0.000000e+00> : vector<4x64xf32>
    %532 = tpu.matmul %529, %531, %cst_392 {dimension_numbers = #tpu.dot_dimension_numbers<[1], [0], [0], [1], [0, 0, 1, 1], [], []>} : vector<4x32xbf16>, vector<32x64xbf16>, vector<4x64xf32> -> vector<4x64xf32>
    %533 = arith.addf %528, %532 : vector<4x64xf32>
    %534 = vector.extract_strided_slice %106 {offsets = [0, 0], sizes = [4, 32], strides = [1, 1]} : vector<5x32xbf16> to vector<4x32xbf16>
    %c12 = arith.constant 12 : index
    %c0_393 = arith.constant 0 : index
    %c0_394 = arith.constant 0 : index
    %535 = vector.load %arg5[%c12, %c0_393, %c0_394] : memref<16x32x64xbf16, #tpu.memory_space<vmem>>, vector<1x32x64xbf16>
    %536 = vector.shape_cast %535 : vector<1x32x64xbf16> to vector<32x64xbf16>
    %cst_395 = arith.constant dense<0.000000e+00> : vector<4x64xf32>
    %537 = tpu.matmul %534, %536, %cst_395 {dimension_numbers = #tpu.dot_dimension_numbers<[1], [0], [0], [1], [0, 0, 1, 1], [], []>} : vector<4x32xbf16>, vector<32x64xbf16>, vector<4x64xf32> -> vector<4x64xf32>
    %538 = arith.addf %533, %537 : vector<4x64xf32>
    %539 = vector.extract_strided_slice %106 {offsets = [1, 0], sizes = [4, 32], strides = [1, 1]} : vector<5x32xbf16> to vector<4x32xbf16>
    %c13 = arith.constant 13 : index
    %c0_396 = arith.constant 0 : index
    %c0_397 = arith.constant 0 : index
    %540 = vector.load %arg5[%c13, %c0_396, %c0_397] : memref<16x32x64xbf16, #tpu.memory_space<vmem>>, vector<1x32x64xbf16>
    %541 = vector.shape_cast %540 : vector<1x32x64xbf16> to vector<32x64xbf16>
    %cst_398 = arith.constant dense<0.000000e+00> : vector<4x64xf32>
    %542 = tpu.matmul %539, %541, %cst_398 {dimension_numbers = #tpu.dot_dimension_numbers<[1], [0], [0], [1], [0, 0, 1, 1], [], []>} : vector<4x32xbf16>, vector<32x64xbf16>, vector<4x64xf32> -> vector<4x64xf32>
    %543 = arith.addf %538, %542 : vector<4x64xf32>
    %544 = vector.extract_strided_slice %198 {offsets = [0, 0], sizes = [4, 32], strides = [1, 1]} : vector<5x32xbf16> to vector<4x32xbf16>
    %c14 = arith.constant 14 : index
    %c0_399 = arith.constant 0 : index
    %c0_400 = arith.constant 0 : index
    %545 = vector.load %arg5[%c14, %c0_399, %c0_400] : memref<16x32x64xbf16, #tpu.memory_space<vmem>>, vector<1x32x64xbf16>
    %546 = vector.shape_cast %545 : vector<1x32x64xbf16> to vector<32x64xbf16>
    %cst_401 = arith.constant dense<0.000000e+00> : vector<4x64xf32>
    %547 = tpu.matmul %544, %546, %cst_401 {dimension_numbers = #tpu.dot_dimension_numbers<[1], [0], [0], [1], [0, 0, 1, 1], [], []>} : vector<4x32xbf16>, vector<32x64xbf16>, vector<4x64xf32> -> vector<4x64xf32>
    %548 = arith.addf %543, %547 : vector<4x64xf32>
    %549 = vector.extract_strided_slice %198 {offsets = [1, 0], sizes = [4, 32], strides = [1, 1]} : vector<5x32xbf16> to vector<4x32xbf16>
    %c15 = arith.constant 15 : index
    %c0_402 = arith.constant 0 : index
    %c0_403 = arith.constant 0 : index
    %550 = vector.load %arg5[%c15, %c0_402, %c0_403] : memref<16x32x64xbf16, #tpu.memory_space<vmem>>, vector<1x32x64xbf16>
    %551 = vector.shape_cast %550 : vector<1x32x64xbf16> to vector<32x64xbf16>
    %cst_404 = arith.constant dense<0.000000e+00> : vector<4x64xf32>
    %552 = tpu.matmul %549, %551, %cst_404 {dimension_numbers = #tpu.dot_dimension_numbers<[1], [0], [0], [1], [0, 0, 1, 1], [], []>} : vector<4x32xbf16>, vector<32x64xbf16>, vector<4x64xf32> -> vector<4x64xf32>
    %553 = arith.addf %548, %552 : vector<4x64xf32>
    %554 = vector.broadcast %5 : vector<1x64xf32> to vector<4x64xf32>
    %555 = arith.addf %553, %554 : vector<4x64xf32>
    %cst_405 = arith.constant 0.000000e+00 : f32
    %556 = vector.broadcast %cst_405 : f32 to vector<4x64xf32>
    %557 = arith.maximumf %555, %556 : vector<4x64xf32>
    %558 = arith.truncf %557 : vector<4x64xf32> to vector<4x64xbf16>
    %559 = vector.extract_strided_slice %130 {offsets = [0, 0], sizes = [4, 32], strides = [1, 1]} : vector<5x32xbf16> to vector<4x32xbf16>
    %c0_406 = arith.constant 0 : index
    %c0_407 = arith.constant 0 : index
    %c0_408 = arith.constant 0 : index
    %560 = vector.load %arg5[%c0_406, %c0_407, %c0_408] : memref<16x32x64xbf16, #tpu.memory_space<vmem>>, vector<1x32x64xbf16>
    %561 = vector.shape_cast %560 : vector<1x32x64xbf16> to vector<32x64xbf16>
    %cst_409 = arith.constant dense<0.000000e+00> : vector<4x64xf32>
    %562 = tpu.matmul %559, %561, %cst_409 {dimension_numbers = #tpu.dot_dimension_numbers<[1], [0], [0], [1], [0, 0, 1, 1], [], []>} : vector<4x32xbf16>, vector<32x64xbf16>, vector<4x64xf32> -> vector<4x64xf32>
    %563 = vector.extract_strided_slice %130 {offsets = [1, 0], sizes = [4, 32], strides = [1, 1]} : vector<5x32xbf16> to vector<4x32xbf16>
    %c1_410 = arith.constant 1 : index
    %c0_411 = arith.constant 0 : index
    %c0_412 = arith.constant 0 : index
    %564 = vector.load %arg5[%c1_410, %c0_411, %c0_412] : memref<16x32x64xbf16, #tpu.memory_space<vmem>>, vector<1x32x64xbf16>
    %565 = vector.shape_cast %564 : vector<1x32x64xbf16> to vector<32x64xbf16>
    %cst_413 = arith.constant dense<0.000000e+00> : vector<4x64xf32>
    %566 = tpu.matmul %563, %565, %cst_413 {dimension_numbers = #tpu.dot_dimension_numbers<[1], [0], [0], [1], [0, 0, 1, 1], [], []>} : vector<4x32xbf16>, vector<32x64xbf16>, vector<4x64xf32> -> vector<4x64xf32>
    %567 = arith.addf %562, %566 : vector<4x64xf32>
    %568 = vector.extract_strided_slice %222 {offsets = [0, 0], sizes = [4, 32], strides = [1, 1]} : vector<5x32xbf16> to vector<4x32xbf16>
    %c2_414 = arith.constant 2 : index
    %c0_415 = arith.constant 0 : index
    %c0_416 = arith.constant 0 : index
    %569 = vector.load %arg5[%c2_414, %c0_415, %c0_416] : memref<16x32x64xbf16, #tpu.memory_space<vmem>>, vector<1x32x64xbf16>
    %570 = vector.shape_cast %569 : vector<1x32x64xbf16> to vector<32x64xbf16>
    %cst_417 = arith.constant dense<0.000000e+00> : vector<4x64xf32>
    %571 = tpu.matmul %568, %570, %cst_417 {dimension_numbers = #tpu.dot_dimension_numbers<[1], [0], [0], [1], [0, 0, 1, 1], [], []>} : vector<4x32xbf16>, vector<32x64xbf16>, vector<4x64xf32> -> vector<4x64xf32>
    %572 = arith.addf %567, %571 : vector<4x64xf32>
    %573 = vector.extract_strided_slice %222 {offsets = [1, 0], sizes = [4, 32], strides = [1, 1]} : vector<5x32xbf16> to vector<4x32xbf16>
    %c3_418 = arith.constant 3 : index
    %c0_419 = arith.constant 0 : index
    %c0_420 = arith.constant 0 : index
    %574 = vector.load %arg5[%c3_418, %c0_419, %c0_420] : memref<16x32x64xbf16, #tpu.memory_space<vmem>>, vector<1x32x64xbf16>
    %575 = vector.shape_cast %574 : vector<1x32x64xbf16> to vector<32x64xbf16>
    %cst_421 = arith.constant dense<0.000000e+00> : vector<4x64xf32>
    %576 = tpu.matmul %573, %575, %cst_421 {dimension_numbers = #tpu.dot_dimension_numbers<[1], [0], [0], [1], [0, 0, 1, 1], [], []>} : vector<4x32xbf16>, vector<32x64xbf16>, vector<4x64xf32> -> vector<4x64xf32>
    %577 = arith.addf %572, %576 : vector<4x64xf32>
    %578 = vector.extract_strided_slice %152 {offsets = [0, 0], sizes = [4, 32], strides = [1, 1]} : vector<5x32xbf16> to vector<4x32xbf16>
    %c4_422 = arith.constant 4 : index
    %c0_423 = arith.constant 0 : index
    %c0_424 = arith.constant 0 : index
    %579 = vector.load %arg5[%c4_422, %c0_423, %c0_424] : memref<16x32x64xbf16, #tpu.memory_space<vmem>>, vector<1x32x64xbf16>
    %580 = vector.shape_cast %579 : vector<1x32x64xbf16> to vector<32x64xbf16>
    %cst_425 = arith.constant dense<0.000000e+00> : vector<4x64xf32>
    %581 = tpu.matmul %578, %580, %cst_425 {dimension_numbers = #tpu.dot_dimension_numbers<[1], [0], [0], [1], [0, 0, 1, 1], [], []>} : vector<4x32xbf16>, vector<32x64xbf16>, vector<4x64xf32> -> vector<4x64xf32>
    %582 = arith.addf %577, %581 : vector<4x64xf32>
    %583 = vector.extract_strided_slice %152 {offsets = [1, 0], sizes = [4, 32], strides = [1, 1]} : vector<5x32xbf16> to vector<4x32xbf16>
    %c5_426 = arith.constant 5 : index
    %c0_427 = arith.constant 0 : index
    %c0_428 = arith.constant 0 : index
    %584 = vector.load %arg5[%c5_426, %c0_427, %c0_428] : memref<16x32x64xbf16, #tpu.memory_space<vmem>>, vector<1x32x64xbf16>
    %585 = vector.shape_cast %584 : vector<1x32x64xbf16> to vector<32x64xbf16>
    %cst_429 = arith.constant dense<0.000000e+00> : vector<4x64xf32>
    %586 = tpu.matmul %583, %585, %cst_429 {dimension_numbers = #tpu.dot_dimension_numbers<[1], [0], [0], [1], [0, 0, 1, 1], [], []>} : vector<4x32xbf16>, vector<32x64xbf16>, vector<4x64xf32> -> vector<4x64xf32>
    %587 = arith.addf %582, %586 : vector<4x64xf32>
    %588 = vector.extract_strided_slice %244 {offsets = [0, 0], sizes = [4, 32], strides = [1, 1]} : vector<5x32xbf16> to vector<4x32xbf16>
    %c6_430 = arith.constant 6 : index
    %c0_431 = arith.constant 0 : index
    %c0_432 = arith.constant 0 : index
    %589 = vector.load %arg5[%c6_430, %c0_431, %c0_432] : memref<16x32x64xbf16, #tpu.memory_space<vmem>>, vector<1x32x64xbf16>
    %590 = vector.shape_cast %589 : vector<1x32x64xbf16> to vector<32x64xbf16>
    %cst_433 = arith.constant dense<0.000000e+00> : vector<4x64xf32>
    %591 = tpu.matmul %588, %590, %cst_433 {dimension_numbers = #tpu.dot_dimension_numbers<[1], [0], [0], [1], [0, 0, 1, 1], [], []>} : vector<4x32xbf16>, vector<32x64xbf16>, vector<4x64xf32> -> vector<4x64xf32>
    %592 = arith.addf %587, %591 : vector<4x64xf32>
    %593 = vector.extract_strided_slice %244 {offsets = [1, 0], sizes = [4, 32], strides = [1, 1]} : vector<5x32xbf16> to vector<4x32xbf16>
    %c7_434 = arith.constant 7 : index
    %c0_435 = arith.constant 0 : index
    %c0_436 = arith.constant 0 : index
    %594 = vector.load %arg5[%c7_434, %c0_435, %c0_436] : memref<16x32x64xbf16, #tpu.memory_space<vmem>>, vector<1x32x64xbf16>
    %595 = vector.shape_cast %594 : vector<1x32x64xbf16> to vector<32x64xbf16>
    %cst_437 = arith.constant dense<0.000000e+00> : vector<4x64xf32>
    %596 = tpu.matmul %593, %595, %cst_437 {dimension_numbers = #tpu.dot_dimension_numbers<[1], [0], [0], [1], [0, 0, 1, 1], [], []>} : vector<4x32xbf16>, vector<32x64xbf16>, vector<4x64xf32> -> vector<4x64xf32>
    %597 = arith.addf %592, %596 : vector<4x64xf32>
    %598 = vector.extract_strided_slice %176 {offsets = [0, 0], sizes = [4, 32], strides = [1, 1]} : vector<5x32xbf16> to vector<4x32xbf16>
    %c8_438 = arith.constant 8 : index
    %c0_439 = arith.constant 0 : index
    %c0_440 = arith.constant 0 : index
    %599 = vector.load %arg5[%c8_438, %c0_439, %c0_440] : memref<16x32x64xbf16, #tpu.memory_space<vmem>>, vector<1x32x64xbf16>
    %600 = vector.shape_cast %599 : vector<1x32x64xbf16> to vector<32x64xbf16>
    %cst_441 = arith.constant dense<0.000000e+00> : vector<4x64xf32>
    %601 = tpu.matmul %598, %600, %cst_441 {dimension_numbers = #tpu.dot_dimension_numbers<[1], [0], [0], [1], [0, 0, 1, 1], [], []>} : vector<4x32xbf16>, vector<32x64xbf16>, vector<4x64xf32> -> vector<4x64xf32>
    %602 = arith.addf %597, %601 : vector<4x64xf32>
    %603 = vector.extract_strided_slice %176 {offsets = [1, 0], sizes = [4, 32], strides = [1, 1]} : vector<5x32xbf16> to vector<4x32xbf16>
    %c9_442 = arith.constant 9 : index
    %c0_443 = arith.constant 0 : index
    %c0_444 = arith.constant 0 : index
    %604 = vector.load %arg5[%c9_442, %c0_443, %c0_444] : memref<16x32x64xbf16, #tpu.memory_space<vmem>>, vector<1x32x64xbf16>
    %605 = vector.shape_cast %604 : vector<1x32x64xbf16> to vector<32x64xbf16>
    %cst_445 = arith.constant dense<0.000000e+00> : vector<4x64xf32>
    %606 = tpu.matmul %603, %605, %cst_445 {dimension_numbers = #tpu.dot_dimension_numbers<[1], [0], [0], [1], [0, 0, 1, 1], [], []>} : vector<4x32xbf16>, vector<32x64xbf16>, vector<4x64xf32> -> vector<4x64xf32>
    %607 = arith.addf %602, %606 : vector<4x64xf32>
    %608 = vector.extract_strided_slice %268 {offsets = [0, 0], sizes = [4, 32], strides = [1, 1]} : vector<5x32xbf16> to vector<4x32xbf16>
    %c10_446 = arith.constant 10 : index
    %c0_447 = arith.constant 0 : index
    %c0_448 = arith.constant 0 : index
    %609 = vector.load %arg5[%c10_446, %c0_447, %c0_448] : memref<16x32x64xbf16, #tpu.memory_space<vmem>>, vector<1x32x64xbf16>
    %610 = vector.shape_cast %609 : vector<1x32x64xbf16> to vector<32x64xbf16>
    %cst_449 = arith.constant dense<0.000000e+00> : vector<4x64xf32>
    %611 = tpu.matmul %608, %610, %cst_449 {dimension_numbers = #tpu.dot_dimension_numbers<[1], [0], [0], [1], [0, 0, 1, 1], [], []>} : vector<4x32xbf16>, vector<32x64xbf16>, vector<4x64xf32> -> vector<4x64xf32>
    %612 = arith.addf %607, %611 : vector<4x64xf32>
    %613 = vector.extract_strided_slice %268 {offsets = [1, 0], sizes = [4, 32], strides = [1, 1]} : vector<5x32xbf16> to vector<4x32xbf16>
    %c11_450 = arith.constant 11 : index
    %c0_451 = arith.constant 0 : index
    %c0_452 = arith.constant 0 : index
    %614 = vector.load %arg5[%c11_450, %c0_451, %c0_452] : memref<16x32x64xbf16, #tpu.memory_space<vmem>>, vector<1x32x64xbf16>
    %615 = vector.shape_cast %614 : vector<1x32x64xbf16> to vector<32x64xbf16>
    %cst_453 = arith.constant dense<0.000000e+00> : vector<4x64xf32>
    %616 = tpu.matmul %613, %615, %cst_453 {dimension_numbers = #tpu.dot_dimension_numbers<[1], [0], [0], [1], [0, 0, 1, 1], [], []>} : vector<4x32xbf16>, vector<32x64xbf16>, vector<4x64xf32> -> vector<4x64xf32>
    %617 = arith.addf %612, %616 : vector<4x64xf32>
    %618 = vector.extract_strided_slice %198 {offsets = [0, 0], sizes = [4, 32], strides = [1, 1]} : vector<5x32xbf16> to vector<4x32xbf16>
    %c12_454 = arith.constant 12 : index
    %c0_455 = arith.constant 0 : index
    %c0_456 = arith.constant 0 : index
    %619 = vector.load %arg5[%c12_454, %c0_455, %c0_456] : memref<16x32x64xbf16, #tpu.memory_space<vmem>>, vector<1x32x64xbf16>
    %620 = vector.shape_cast %619 : vector<1x32x64xbf16> to vector<32x64xbf16>
    %cst_457 = arith.constant dense<0.000000e+00> : vector<4x64xf32>
    %621 = tpu.matmul %618, %620, %cst_457 {dimension_numbers = #tpu.dot_dimension_numbers<[1], [0], [0], [1], [0, 0, 1, 1], [], []>} : vector<4x32xbf16>, vector<32x64xbf16>, vector<4x64xf32> -> vector<4x64xf32>
    %622 = arith.addf %617, %621 : vector<4x64xf32>
    %623 = vector.extract_strided_slice %198 {offsets = [1, 0], sizes = [4, 32], strides = [1, 1]} : vector<5x32xbf16> to vector<4x32xbf16>
    %c13_458 = arith.constant 13 : index
    %c0_459 = arith.constant 0 : index
    %c0_460 = arith.constant 0 : index
    %624 = vector.load %arg5[%c13_458, %c0_459, %c0_460] : memref<16x32x64xbf16, #tpu.memory_space<vmem>>, vector<1x32x64xbf16>
    %625 = vector.shape_cast %624 : vector<1x32x64xbf16> to vector<32x64xbf16>
    %cst_461 = arith.constant dense<0.000000e+00> : vector<4x64xf32>
    %626 = tpu.matmul %623, %625, %cst_461 {dimension_numbers = #tpu.dot_dimension_numbers<[1], [0], [0], [1], [0, 0, 1, 1], [], []>} : vector<4x32xbf16>, vector<32x64xbf16>, vector<4x64xf32> -> vector<4x64xf32>
    %627 = arith.addf %622, %626 : vector<4x64xf32>
    %628 = vector.extract_strided_slice %290 {offsets = [0, 0], sizes = [4, 32], strides = [1, 1]} : vector<5x32xbf16> to vector<4x32xbf16>
    %c14_462 = arith.constant 14 : index
    %c0_463 = arith.constant 0 : index
    %c0_464 = arith.constant 0 : index
    %629 = vector.load %arg5[%c14_462, %c0_463, %c0_464] : memref<16x32x64xbf16, #tpu.memory_space<vmem>>, vector<1x32x64xbf16>
    %630 = vector.shape_cast %629 : vector<1x32x64xbf16> to vector<32x64xbf16>
    %cst_465 = arith.constant dense<0.000000e+00> : vector<4x64xf32>
    %631 = tpu.matmul %628, %630, %cst_465 {dimension_numbers = #tpu.dot_dimension_numbers<[1], [0], [0], [1], [0, 0, 1, 1], [], []>} : vector<4x32xbf16>, vector<32x64xbf16>, vector<4x64xf32> -> vector<4x64xf32>
    %632 = arith.addf %627, %631 : vector<4x64xf32>
    %633 = vector.extract_strided_slice %290 {offsets = [1, 0], sizes = [4, 32], strides = [1, 1]} : vector<5x32xbf16> to vector<4x32xbf16>
    %c15_466 = arith.constant 15 : index
    %c0_467 = arith.constant 0 : index
    %c0_468 = arith.constant 0 : index
    %634 = vector.load %arg5[%c15_466, %c0_467, %c0_468] : memref<16x32x64xbf16, #tpu.memory_space<vmem>>, vector<1x32x64xbf16>
    %635 = vector.shape_cast %634 : vector<1x32x64xbf16> to vector<32x64xbf16>
    %cst_469 = arith.constant dense<0.000000e+00> : vector<4x64xf32>
    %636 = tpu.matmul %633, %635, %cst_469 {dimension_numbers = #tpu.dot_dimension_numbers<[1], [0], [0], [1], [0, 0, 1, 1], [], []>} : vector<4x32xbf16>, vector<32x64xbf16>, vector<4x64xf32> -> vector<4x64xf32>
    %637 = arith.addf %632, %636 : vector<4x64xf32>
    %638 = vector.broadcast %5 : vector<1x64xf32> to vector<4x64xf32>
    %639 = arith.addf %637, %638 : vector<4x64xf32>
    %cst_470 = arith.constant 0.000000e+00 : f32
    %640 = vector.broadcast %cst_470 : f32 to vector<4x64xf32>
    %641 = arith.maximumf %639, %640 : vector<4x64xf32>
    %642 = arith.truncf %641 : vector<4x64xf32> to vector<4x64xbf16>
    %643 = vector.extract_strided_slice %222 {offsets = [0, 0], sizes = [4, 32], strides = [1, 1]} : vector<5x32xbf16> to vector<4x32xbf16>
    %c0_471 = arith.constant 0 : index
    %c0_472 = arith.constant 0 : index
    %c0_473 = arith.constant 0 : index
    %644 = vector.load %arg5[%c0_471, %c0_472, %c0_473] : memref<16x32x64xbf16, #tpu.memory_space<vmem>>, vector<1x32x64xbf16>
    %645 = vector.shape_cast %644 : vector<1x32x64xbf16> to vector<32x64xbf16>
    %cst_474 = arith.constant dense<0.000000e+00> : vector<4x64xf32>
    %646 = tpu.matmul %643, %645, %cst_474 {dimension_numbers = #tpu.dot_dimension_numbers<[1], [0], [0], [1], [0, 0, 1, 1], [], []>} : vector<4x32xbf16>, vector<32x64xbf16>, vector<4x64xf32> -> vector<4x64xf32>
    %647 = vector.extract_strided_slice %222 {offsets = [1, 0], sizes = [4, 32], strides = [1, 1]} : vector<5x32xbf16> to vector<4x32xbf16>
    %c1_475 = arith.constant 1 : index
    %c0_476 = arith.constant 0 : index
    %c0_477 = arith.constant 0 : index
    %648 = vector.load %arg5[%c1_475, %c0_476, %c0_477] : memref<16x32x64xbf16, #tpu.memory_space<vmem>>, vector<1x32x64xbf16>
    %649 = vector.shape_cast %648 : vector<1x32x64xbf16> to vector<32x64xbf16>
    %cst_478 = arith.constant dense<0.000000e+00> : vector<4x64xf32>
    %650 = tpu.matmul %647, %649, %cst_478 {dimension_numbers = #tpu.dot_dimension_numbers<[1], [0], [0], [1], [0, 0, 1, 1], [], []>} : vector<4x32xbf16>, vector<32x64xbf16>, vector<4x64xf32> -> vector<4x64xf32>
    %651 = arith.addf %646, %650 : vector<4x64xf32>
    %652 = vector.extract_strided_slice %314 {offsets = [0, 0], sizes = [4, 32], strides = [1, 1]} : vector<5x32xbf16> to vector<4x32xbf16>
    %c2_479 = arith.constant 2 : index
    %c0_480 = arith.constant 0 : index
    %c0_481 = arith.constant 0 : index
    %653 = vector.load %arg5[%c2_479, %c0_480, %c0_481] : memref<16x32x64xbf16, #tpu.memory_space<vmem>>, vector<1x32x64xbf16>
    %654 = vector.shape_cast %653 : vector<1x32x64xbf16> to vector<32x64xbf16>
    %cst_482 = arith.constant dense<0.000000e+00> : vector<4x64xf32>
    %655 = tpu.matmul %652, %654, %cst_482 {dimension_numbers = #tpu.dot_dimension_numbers<[1], [0], [0], [1], [0, 0, 1, 1], [], []>} : vector<4x32xbf16>, vector<32x64xbf16>, vector<4x64xf32> -> vector<4x64xf32>
    %656 = arith.addf %651, %655 : vector<4x64xf32>
    %657 = vector.extract_strided_slice %314 {offsets = [1, 0], sizes = [4, 32], strides = [1, 1]} : vector<5x32xbf16> to vector<4x32xbf16>
    %c3_483 = arith.constant 3 : index
    %c0_484 = arith.constant 0 : index
    %c0_485 = arith.constant 0 : index
    %658 = vector.load %arg5[%c3_483, %c0_484, %c0_485] : memref<16x32x64xbf16, #tpu.memory_space<vmem>>, vector<1x32x64xbf16>
    %659 = vector.shape_cast %658 : vector<1x32x64xbf16> to vector<32x64xbf16>
    %cst_486 = arith.constant dense<0.000000e+00> : vector<4x64xf32>
    %660 = tpu.matmul %657, %659, %cst_486 {dimension_numbers = #tpu.dot_dimension_numbers<[1], [0], [0], [1], [0, 0, 1, 1], [], []>} : vector<4x32xbf16>, vector<32x64xbf16>, vector<4x64xf32> -> vector<4x64xf32>
    %661 = arith.addf %656, %660 : vector<4x64xf32>
    %662 = vector.extract_strided_slice %244 {offsets = [0, 0], sizes = [4, 32], strides = [1, 1]} : vector<5x32xbf16> to vector<4x32xbf16>
    %c4_487 = arith.constant 4 : index
    %c0_488 = arith.constant 0 : index
    %c0_489 = arith.constant 0 : index
    %663 = vector.load %arg5[%c4_487, %c0_488, %c0_489] : memref<16x32x64xbf16, #tpu.memory_space<vmem>>, vector<1x32x64xbf16>
    %664 = vector.shape_cast %663 : vector<1x32x64xbf16> to vector<32x64xbf16>
    %cst_490 = arith.constant dense<0.000000e+00> : vector<4x64xf32>
    %665 = tpu.matmul %662, %664, %cst_490 {dimension_numbers = #tpu.dot_dimension_numbers<[1], [0], [0], [1], [0, 0, 1, 1], [], []>} : vector<4x32xbf16>, vector<32x64xbf16>, vector<4x64xf32> -> vector<4x64xf32>
    %666 = arith.addf %661, %665 : vector<4x64xf32>
    %667 = vector.extract_strided_slice %244 {offsets = [1, 0], sizes = [4, 32], strides = [1, 1]} : vector<5x32xbf16> to vector<4x32xbf16>
    %c5_491 = arith.constant 5 : index
    %c0_492 = arith.constant 0 : index
    %c0_493 = arith.constant 0 : index
    %668 = vector.load %arg5[%c5_491, %c0_492, %c0_493] : memref<16x32x64xbf16, #tpu.memory_space<vmem>>, vector<1x32x64xbf16>
    %669 = vector.shape_cast %668 : vector<1x32x64xbf16> to vector<32x64xbf16>
    %cst_494 = arith.constant dense<0.000000e+00> : vector<4x64xf32>
    %670 = tpu.matmul %667, %669, %cst_494 {dimension_numbers = #tpu.dot_dimension_numbers<[1], [0], [0], [1], [0, 0, 1, 1], [], []>} : vector<4x32xbf16>, vector<32x64xbf16>, vector<4x64xf32> -> vector<4x64xf32>
    %671 = arith.addf %666, %670 : vector<4x64xf32>
    %672 = vector.extract_strided_slice %336 {offsets = [0, 0], sizes = [4, 32], strides = [1, 1]} : vector<5x32xbf16> to vector<4x32xbf16>
    %c6_495 = arith.constant 6 : index
    %c0_496 = arith.constant 0 : index
    %c0_497 = arith.constant 0 : index
    %673 = vector.load %arg5[%c6_495, %c0_496, %c0_497] : memref<16x32x64xbf16, #tpu.memory_space<vmem>>, vector<1x32x64xbf16>
    %674 = vector.shape_cast %673 : vector<1x32x64xbf16> to vector<32x64xbf16>
    %cst_498 = arith.constant dense<0.000000e+00> : vector<4x64xf32>
    %675 = tpu.matmul %672, %674, %cst_498 {dimension_numbers = #tpu.dot_dimension_numbers<[1], [0], [0], [1], [0, 0, 1, 1], [], []>} : vector<4x32xbf16>, vector<32x64xbf16>, vector<4x64xf32> -> vector<4x64xf32>
    %676 = arith.addf %671, %675 : vector<4x64xf32>
    %677 = vector.extract_strided_slice %336 {offsets = [1, 0], sizes = [4, 32], strides = [1, 1]} : vector<5x32xbf16> to vector<4x32xbf16>
    %c7_499 = arith.constant 7 : index
    %c0_500 = arith.constant 0 : index
    %c0_501 = arith.constant 0 : index
    %678 = vector.load %arg5[%c7_499, %c0_500, %c0_501] : memref<16x32x64xbf16, #tpu.memory_space<vmem>>, vector<1x32x64xbf16>
    %679 = vector.shape_cast %678 : vector<1x32x64xbf16> to vector<32x64xbf16>
    %cst_502 = arith.constant dense<0.000000e+00> : vector<4x64xf32>
    %680 = tpu.matmul %677, %679, %cst_502 {dimension_numbers = #tpu.dot_dimension_numbers<[1], [0], [0], [1], [0, 0, 1, 1], [], []>} : vector<4x32xbf16>, vector<32x64xbf16>, vector<4x64xf32> -> vector<4x64xf32>
    %681 = arith.addf %676, %680 : vector<4x64xf32>
    %682 = vector.extract_strided_slice %268 {offsets = [0, 0], sizes = [4, 32], strides = [1, 1]} : vector<5x32xbf16> to vector<4x32xbf16>
    %c8_503 = arith.constant 8 : index
    %c0_504 = arith.constant 0 : index
    %c0_505 = arith.constant 0 : index
    %683 = vector.load %arg5[%c8_503, %c0_504, %c0_505] : memref<16x32x64xbf16, #tpu.memory_space<vmem>>, vector<1x32x64xbf16>
    %684 = vector.shape_cast %683 : vector<1x32x64xbf16> to vector<32x64xbf16>
    %cst_506 = arith.constant dense<0.000000e+00> : vector<4x64xf32>
    %685 = tpu.matmul %682, %684, %cst_506 {dimension_numbers = #tpu.dot_dimension_numbers<[1], [0], [0], [1], [0, 0, 1, 1], [], []>} : vector<4x32xbf16>, vector<32x64xbf16>, vector<4x64xf32> -> vector<4x64xf32>
    %686 = arith.addf %681, %685 : vector<4x64xf32>
    %687 = vector.extract_strided_slice %268 {offsets = [1, 0], sizes = [4, 32], strides = [1, 1]} : vector<5x32xbf16> to vector<4x32xbf16>
    %c9_507 = arith.constant 9 : index
    %c0_508 = arith.constant 0 : index
    %c0_509 = arith.constant 0 : index
    %688 = vector.load %arg5[%c9_507, %c0_508, %c0_509] : memref<16x32x64xbf16, #tpu.memory_space<vmem>>, vector<1x32x64xbf16>
    %689 = vector.shape_cast %688 : vector<1x32x64xbf16> to vector<32x64xbf16>
    %cst_510 = arith.constant dense<0.000000e+00> : vector<4x64xf32>
    %690 = tpu.matmul %687, %689, %cst_510 {dimension_numbers = #tpu.dot_dimension_numbers<[1], [0], [0], [1], [0, 0, 1, 1], [], []>} : vector<4x32xbf16>, vector<32x64xbf16>, vector<4x64xf32> -> vector<4x64xf32>
    %691 = arith.addf %686, %690 : vector<4x64xf32>
    %692 = vector.extract_strided_slice %360 {offsets = [0, 0], sizes = [4, 32], strides = [1, 1]} : vector<5x32xbf16> to vector<4x32xbf16>
    %c10_511 = arith.constant 10 : index
    %c0_512 = arith.constant 0 : index
    %c0_513 = arith.constant 0 : index
    %693 = vector.load %arg5[%c10_511, %c0_512, %c0_513] : memref<16x32x64xbf16, #tpu.memory_space<vmem>>, vector<1x32x64xbf16>
    %694 = vector.shape_cast %693 : vector<1x32x64xbf16> to vector<32x64xbf16>
    %cst_514 = arith.constant dense<0.000000e+00> : vector<4x64xf32>
    %695 = tpu.matmul %692, %694, %cst_514 {dimension_numbers = #tpu.dot_dimension_numbers<[1], [0], [0], [1], [0, 0, 1, 1], [], []>} : vector<4x32xbf16>, vector<32x64xbf16>, vector<4x64xf32> -> vector<4x64xf32>
    %696 = arith.addf %691, %695 : vector<4x64xf32>
    %697 = vector.extract_strided_slice %360 {offsets = [1, 0], sizes = [4, 32], strides = [1, 1]} : vector<5x32xbf16> to vector<4x32xbf16>
    %c11_515 = arith.constant 11 : index
    %c0_516 = arith.constant 0 : index
    %c0_517 = arith.constant 0 : index
    %698 = vector.load %arg5[%c11_515, %c0_516, %c0_517] : memref<16x32x64xbf16, #tpu.memory_space<vmem>>, vector<1x32x64xbf16>
    %699 = vector.shape_cast %698 : vector<1x32x64xbf16> to vector<32x64xbf16>
    %cst_518 = arith.constant dense<0.000000e+00> : vector<4x64xf32>
    %700 = tpu.matmul %697, %699, %cst_518 {dimension_numbers = #tpu.dot_dimension_numbers<[1], [0], [0], [1], [0, 0, 1, 1], [], []>} : vector<4x32xbf16>, vector<32x64xbf16>, vector<4x64xf32> -> vector<4x64xf32>
    %701 = arith.addf %696, %700 : vector<4x64xf32>
    %702 = vector.extract_strided_slice %290 {offsets = [0, 0], sizes = [4, 32], strides = [1, 1]} : vector<5x32xbf16> to vector<4x32xbf16>
    %c12_519 = arith.constant 12 : index
    %c0_520 = arith.constant 0 : index
    %c0_521 = arith.constant 0 : index
    %703 = vector.load %arg5[%c12_519, %c0_520, %c0_521] : memref<16x32x64xbf16, #tpu.memory_space<vmem>>, vector<1x32x64xbf16>
    %704 = vector.shape_cast %703 : vector<1x32x64xbf16> to vector<32x64xbf16>
    %cst_522 = arith.constant dense<0.000000e+00> : vector<4x64xf32>
    %705 = tpu.matmul %702, %704, %cst_522 {dimension_numbers = #tpu.dot_dimension_numbers<[1], [0], [0], [1], [0, 0, 1, 1], [], []>} : vector<4x32xbf16>, vector<32x64xbf16>, vector<4x64xf32> -> vector<4x64xf32>
    %706 = arith.addf %701, %705 : vector<4x64xf32>
    %707 = vector.extract_strided_slice %290 {offsets = [1, 0], sizes = [4, 32], strides = [1, 1]} : vector<5x32xbf16> to vector<4x32xbf16>
    %c13_523 = arith.constant 13 : index
    %c0_524 = arith.constant 0 : index
    %c0_525 = arith.constant 0 : index
    %708 = vector.load %arg5[%c13_523, %c0_524, %c0_525] : memref<16x32x64xbf16, #tpu.memory_space<vmem>>, vector<1x32x64xbf16>
    %709 = vector.shape_cast %708 : vector<1x32x64xbf16> to vector<32x64xbf16>
    %cst_526 = arith.constant dense<0.000000e+00> : vector<4x64xf32>
    %710 = tpu.matmul %707, %709, %cst_526 {dimension_numbers = #tpu.dot_dimension_numbers<[1], [0], [0], [1], [0, 0, 1, 1], [], []>} : vector<4x32xbf16>, vector<32x64xbf16>, vector<4x64xf32> -> vector<4x64xf32>
    %711 = arith.addf %706, %710 : vector<4x64xf32>
    %712 = vector.extract_strided_slice %382 {offsets = [0, 0], sizes = [4, 32], strides = [1, 1]} : vector<5x32xbf16> to vector<4x32xbf16>
    %c14_527 = arith.constant 14 : index
    %c0_528 = arith.constant 0 : index
    %c0_529 = arith.constant 0 : index
    %713 = vector.load %arg5[%c14_527, %c0_528, %c0_529] : memref<16x32x64xbf16, #tpu.memory_space<vmem>>, vector<1x32x64xbf16>
    %714 = vector.shape_cast %713 : vector<1x32x64xbf16> to vector<32x64xbf16>
    %cst_530 = arith.constant dense<0.000000e+00> : vector<4x64xf32>
    %715 = tpu.matmul %712, %714, %cst_530 {dimension_numbers = #tpu.dot_dimension_numbers<[1], [0], [0], [1], [0, 0, 1, 1], [], []>} : vector<4x32xbf16>, vector<32x64xbf16>, vector<4x64xf32> -> vector<4x64xf32>
    %716 = arith.addf %711, %715 : vector<4x64xf32>
    %717 = vector.extract_strided_slice %382 {offsets = [1, 0], sizes = [4, 32], strides = [1, 1]} : vector<5x32xbf16> to vector<4x32xbf16>
    %c15_531 = arith.constant 15 : index
    %c0_532 = arith.constant 0 : index
    %c0_533 = arith.constant 0 : index
    %718 = vector.load %arg5[%c15_531, %c0_532, %c0_533] : memref<16x32x64xbf16, #tpu.memory_space<vmem>>, vector<1x32x64xbf16>
    %719 = vector.shape_cast %718 : vector<1x32x64xbf16> to vector<32x64xbf16>
    %cst_534 = arith.constant dense<0.000000e+00> : vector<4x64xf32>
    %720 = tpu.matmul %717, %719, %cst_534 {dimension_numbers = #tpu.dot_dimension_numbers<[1], [0], [0], [1], [0, 0, 1, 1], [], []>} : vector<4x32xbf16>, vector<32x64xbf16>, vector<4x64xf32> -> vector<4x64xf32>
    %721 = arith.addf %716, %720 : vector<4x64xf32>
    %722 = vector.broadcast %5 : vector<1x64xf32> to vector<4x64xf32>
    %723 = arith.addf %721, %722 : vector<4x64xf32>
    %cst_535 = arith.constant 0.000000e+00 : f32
    %724 = vector.broadcast %cst_535 : f32 to vector<4x64xf32>
    %725 = arith.maximumf %723, %724 : vector<4x64xf32>
    %726 = arith.truncf %725 : vector<4x64xf32> to vector<4x64xbf16>
    %727 = vector.extract_strided_slice %314 {offsets = [0, 0], sizes = [4, 32], strides = [1, 1]} : vector<5x32xbf16> to vector<4x32xbf16>
    %c0_536 = arith.constant 0 : index
    %c0_537 = arith.constant 0 : index
    %c0_538 = arith.constant 0 : index
    %728 = vector.load %arg5[%c0_536, %c0_537, %c0_538] : memref<16x32x64xbf16, #tpu.memory_space<vmem>>, vector<1x32x64xbf16>
    %729 = vector.shape_cast %728 : vector<1x32x64xbf16> to vector<32x64xbf16>
    %cst_539 = arith.constant dense<0.000000e+00> : vector<4x64xf32>
    %730 = tpu.matmul %727, %729, %cst_539 {dimension_numbers = #tpu.dot_dimension_numbers<[1], [0], [0], [1], [0, 0, 1, 1], [], []>} : vector<4x32xbf16>, vector<32x64xbf16>, vector<4x64xf32> -> vector<4x64xf32>
    %731 = vector.extract_strided_slice %314 {offsets = [1, 0], sizes = [4, 32], strides = [1, 1]} : vector<5x32xbf16> to vector<4x32xbf16>
    %c1_540 = arith.constant 1 : index
    %c0_541 = arith.constant 0 : index
    %c0_542 = arith.constant 0 : index
    %732 = vector.load %arg5[%c1_540, %c0_541, %c0_542] : memref<16x32x64xbf16, #tpu.memory_space<vmem>>, vector<1x32x64xbf16>
    %733 = vector.shape_cast %732 : vector<1x32x64xbf16> to vector<32x64xbf16>
    %cst_543 = arith.constant dense<0.000000e+00> : vector<4x64xf32>
    %734 = tpu.matmul %731, %733, %cst_543 {dimension_numbers = #tpu.dot_dimension_numbers<[1], [0], [0], [1], [0, 0, 1, 1], [], []>} : vector<4x32xbf16>, vector<32x64xbf16>, vector<4x64xf32> -> vector<4x64xf32>
    %735 = arith.addf %730, %734 : vector<4x64xf32>
    %736 = vector.extract_strided_slice %406 {offsets = [0, 0], sizes = [4, 32], strides = [1, 1]} : vector<5x32xbf16> to vector<4x32xbf16>
    %c2_544 = arith.constant 2 : index
    %c0_545 = arith.constant 0 : index
    %c0_546 = arith.constant 0 : index
    %737 = vector.load %arg5[%c2_544, %c0_545, %c0_546] : memref<16x32x64xbf16, #tpu.memory_space<vmem>>, vector<1x32x64xbf16>
    %738 = vector.shape_cast %737 : vector<1x32x64xbf16> to vector<32x64xbf16>
    %cst_547 = arith.constant dense<0.000000e+00> : vector<4x64xf32>
    %739 = tpu.matmul %736, %738, %cst_547 {dimension_numbers = #tpu.dot_dimension_numbers<[1], [0], [0], [1], [0, 0, 1, 1], [], []>} : vector<4x32xbf16>, vector<32x64xbf16>, vector<4x64xf32> -> vector<4x64xf32>
    %740 = arith.addf %735, %739 : vector<4x64xf32>
    %741 = vector.extract_strided_slice %406 {offsets = [1, 0], sizes = [4, 32], strides = [1, 1]} : vector<5x32xbf16> to vector<4x32xbf16>
    %c3_548 = arith.constant 3 : index
    %c0_549 = arith.constant 0 : index
    %c0_550 = arith.constant 0 : index
    %742 = vector.load %arg5[%c3_548, %c0_549, %c0_550] : memref<16x32x64xbf16, #tpu.memory_space<vmem>>, vector<1x32x64xbf16>
    %743 = vector.shape_cast %742 : vector<1x32x64xbf16> to vector<32x64xbf16>
    %cst_551 = arith.constant dense<0.000000e+00> : vector<4x64xf32>
    %744 = tpu.matmul %741, %743, %cst_551 {dimension_numbers = #tpu.dot_dimension_numbers<[1], [0], [0], [1], [0, 0, 1, 1], [], []>} : vector<4x32xbf16>, vector<32x64xbf16>, vector<4x64xf32> -> vector<4x64xf32>
    %745 = arith.addf %740, %744 : vector<4x64xf32>
    %746 = vector.extract_strided_slice %336 {offsets = [0, 0], sizes = [4, 32], strides = [1, 1]} : vector<5x32xbf16> to vector<4x32xbf16>
    %c4_552 = arith.constant 4 : index
    %c0_553 = arith.constant 0 : index
    %c0_554 = arith.constant 0 : index
    %747 = vector.load %arg5[%c4_552, %c0_553, %c0_554] : memref<16x32x64xbf16, #tpu.memory_space<vmem>>, vector<1x32x64xbf16>
    %748 = vector.shape_cast %747 : vector<1x32x64xbf16> to vector<32x64xbf16>
    %cst_555 = arith.constant dense<0.000000e+00> : vector<4x64xf32>
    %749 = tpu.matmul %746, %748, %cst_555 {dimension_numbers = #tpu.dot_dimension_numbers<[1], [0], [0], [1], [0, 0, 1, 1], [], []>} : vector<4x32xbf16>, vector<32x64xbf16>, vector<4x64xf32> -> vector<4x64xf32>
    %750 = arith.addf %745, %749 : vector<4x64xf32>
    %751 = vector.extract_strided_slice %336 {offsets = [1, 0], sizes = [4, 32], strides = [1, 1]} : vector<5x32xbf16> to vector<4x32xbf16>
    %c5_556 = arith.constant 5 : index
    %c0_557 = arith.constant 0 : index
    %c0_558 = arith.constant 0 : index
    %752 = vector.load %arg5[%c5_556, %c0_557, %c0_558] : memref<16x32x64xbf16, #tpu.memory_space<vmem>>, vector<1x32x64xbf16>
    %753 = vector.shape_cast %752 : vector<1x32x64xbf16> to vector<32x64xbf16>
    %cst_559 = arith.constant dense<0.000000e+00> : vector<4x64xf32>
    %754 = tpu.matmul %751, %753, %cst_559 {dimension_numbers = #tpu.dot_dimension_numbers<[1], [0], [0], [1], [0, 0, 1, 1], [], []>} : vector<4x32xbf16>, vector<32x64xbf16>, vector<4x64xf32> -> vector<4x64xf32>
    %755 = arith.addf %750, %754 : vector<4x64xf32>
    %756 = vector.extract_strided_slice %428 {offsets = [0, 0], sizes = [4, 32], strides = [1, 1]} : vector<5x32xbf16> to vector<4x32xbf16>
    %c6_560 = arith.constant 6 : index
    %c0_561 = arith.constant 0 : index
    %c0_562 = arith.constant 0 : index
    %757 = vector.load %arg5[%c6_560, %c0_561, %c0_562] : memref<16x32x64xbf16, #tpu.memory_space<vmem>>, vector<1x32x64xbf16>
    %758 = vector.shape_cast %757 : vector<1x32x64xbf16> to vector<32x64xbf16>
    %cst_563 = arith.constant dense<0.000000e+00> : vector<4x64xf32>
    %759 = tpu.matmul %756, %758, %cst_563 {dimension_numbers = #tpu.dot_dimension_numbers<[1], [0], [0], [1], [0, 0, 1, 1], [], []>} : vector<4x32xbf16>, vector<32x64xbf16>, vector<4x64xf32> -> vector<4x64xf32>
    %760 = arith.addf %755, %759 : vector<4x64xf32>
    %761 = vector.extract_strided_slice %428 {offsets = [1, 0], sizes = [4, 32], strides = [1, 1]} : vector<5x32xbf16> to vector<4x32xbf16>
    %c7_564 = arith.constant 7 : index
    %c0_565 = arith.constant 0 : index
    %c0_566 = arith.constant 0 : index
    %762 = vector.load %arg5[%c7_564, %c0_565, %c0_566] : memref<16x32x64xbf16, #tpu.memory_space<vmem>>, vector<1x32x64xbf16>
    %763 = vector.shape_cast %762 : vector<1x32x64xbf16> to vector<32x64xbf16>
    %cst_567 = arith.constant dense<0.000000e+00> : vector<4x64xf32>
    %764 = tpu.matmul %761, %763, %cst_567 {dimension_numbers = #tpu.dot_dimension_numbers<[1], [0], [0], [1], [0, 0, 1, 1], [], []>} : vector<4x32xbf16>, vector<32x64xbf16>, vector<4x64xf32> -> vector<4x64xf32>
    %765 = arith.addf %760, %764 : vector<4x64xf32>
    %766 = vector.extract_strided_slice %360 {offsets = [0, 0], sizes = [4, 32], strides = [1, 1]} : vector<5x32xbf16> to vector<4x32xbf16>
    %c8_568 = arith.constant 8 : index
    %c0_569 = arith.constant 0 : index
    %c0_570 = arith.constant 0 : index
    %767 = vector.load %arg5[%c8_568, %c0_569, %c0_570] : memref<16x32x64xbf16, #tpu.memory_space<vmem>>, vector<1x32x64xbf16>
    %768 = vector.shape_cast %767 : vector<1x32x64xbf16> to vector<32x64xbf16>
    %cst_571 = arith.constant dense<0.000000e+00> : vector<4x64xf32>
    %769 = tpu.matmul %766, %768, %cst_571 {dimension_numbers = #tpu.dot_dimension_numbers<[1], [0], [0], [1], [0, 0, 1, 1], [], []>} : vector<4x32xbf16>, vector<32x64xbf16>, vector<4x64xf32> -> vector<4x64xf32>
    %770 = arith.addf %765, %769 : vector<4x64xf32>
    %771 = vector.extract_strided_slice %360 {offsets = [1, 0], sizes = [4, 32], strides = [1, 1]} : vector<5x32xbf16> to vector<4x32xbf16>
    %c9_572 = arith.constant 9 : index
    %c0_573 = arith.constant 0 : index
    %c0_574 = arith.constant 0 : index
    %772 = vector.load %arg5[%c9_572, %c0_573, %c0_574] : memref<16x32x64xbf16, #tpu.memory_space<vmem>>, vector<1x32x64xbf16>
    %773 = vector.shape_cast %772 : vector<1x32x64xbf16> to vector<32x64xbf16>
    %cst_575 = arith.constant dense<0.000000e+00> : vector<4x64xf32>
    %774 = tpu.matmul %771, %773, %cst_575 {dimension_numbers = #tpu.dot_dimension_numbers<[1], [0], [0], [1], [0, 0, 1, 1], [], []>} : vector<4x32xbf16>, vector<32x64xbf16>, vector<4x64xf32> -> vector<4x64xf32>
    %775 = arith.addf %770, %774 : vector<4x64xf32>
    %776 = vector.extract_strided_slice %452 {offsets = [0, 0], sizes = [4, 32], strides = [1, 1]} : vector<5x32xbf16> to vector<4x32xbf16>
    %c10_576 = arith.constant 10 : index
    %c0_577 = arith.constant 0 : index
    %c0_578 = arith.constant 0 : index
    %777 = vector.load %arg5[%c10_576, %c0_577, %c0_578] : memref<16x32x64xbf16, #tpu.memory_space<vmem>>, vector<1x32x64xbf16>
    %778 = vector.shape_cast %777 : vector<1x32x64xbf16> to vector<32x64xbf16>
    %cst_579 = arith.constant dense<0.000000e+00> : vector<4x64xf32>
    %779 = tpu.matmul %776, %778, %cst_579 {dimension_numbers = #tpu.dot_dimension_numbers<[1], [0], [0], [1], [0, 0, 1, 1], [], []>} : vector<4x32xbf16>, vector<32x64xbf16>, vector<4x64xf32> -> vector<4x64xf32>
    %780 = arith.addf %775, %779 : vector<4x64xf32>
    %781 = vector.extract_strided_slice %452 {offsets = [1, 0], sizes = [4, 32], strides = [1, 1]} : vector<5x32xbf16> to vector<4x32xbf16>
    %c11_580 = arith.constant 11 : index
    %c0_581 = arith.constant 0 : index
    %c0_582 = arith.constant 0 : index
    %782 = vector.load %arg5[%c11_580, %c0_581, %c0_582] : memref<16x32x64xbf16, #tpu.memory_space<vmem>>, vector<1x32x64xbf16>
    %783 = vector.shape_cast %782 : vector<1x32x64xbf16> to vector<32x64xbf16>
    %cst_583 = arith.constant dense<0.000000e+00> : vector<4x64xf32>
    %784 = tpu.matmul %781, %783, %cst_583 {dimension_numbers = #tpu.dot_dimension_numbers<[1], [0], [0], [1], [0, 0, 1, 1], [], []>} : vector<4x32xbf16>, vector<32x64xbf16>, vector<4x64xf32> -> vector<4x64xf32>
    %785 = arith.addf %780, %784 : vector<4x64xf32>
    %786 = vector.extract_strided_slice %382 {offsets = [0, 0], sizes = [4, 32], strides = [1, 1]} : vector<5x32xbf16> to vector<4x32xbf16>
    %c12_584 = arith.constant 12 : index
    %c0_585 = arith.constant 0 : index
    %c0_586 = arith.constant 0 : index
    %787 = vector.load %arg5[%c12_584, %c0_585, %c0_586] : memref<16x32x64xbf16, #tpu.memory_space<vmem>>, vector<1x32x64xbf16>
    %788 = vector.shape_cast %787 : vector<1x32x64xbf16> to vector<32x64xbf16>
    %cst_587 = arith.constant dense<0.000000e+00> : vector<4x64xf32>
    %789 = tpu.matmul %786, %788, %cst_587 {dimension_numbers = #tpu.dot_dimension_numbers<[1], [0], [0], [1], [0, 0, 1, 1], [], []>} : vector<4x32xbf16>, vector<32x64xbf16>, vector<4x64xf32> -> vector<4x64xf32>
    %790 = arith.addf %785, %789 : vector<4x64xf32>
    %791 = vector.extract_strided_slice %382 {offsets = [1, 0], sizes = [4, 32], strides = [1, 1]} : vector<5x32xbf16> to vector<4x32xbf16>
    %c13_588 = arith.constant 13 : index
    %c0_589 = arith.constant 0 : index
    %c0_590 = arith.constant 0 : index
    %792 = vector.load %arg5[%c13_588, %c0_589, %c0_590] : memref<16x32x64xbf16, #tpu.memory_space<vmem>>, vector<1x32x64xbf16>
    %793 = vector.shape_cast %792 : vector<1x32x64xbf16> to vector<32x64xbf16>
    %cst_591 = arith.constant dense<0.000000e+00> : vector<4x64xf32>
    %794 = tpu.matmul %791, %793, %cst_591 {dimension_numbers = #tpu.dot_dimension_numbers<[1], [0], [0], [1], [0, 0, 1, 1], [], []>} : vector<4x32xbf16>, vector<32x64xbf16>, vector<4x64xf32> -> vector<4x64xf32>
    %795 = arith.addf %790, %794 : vector<4x64xf32>
    %796 = vector.extract_strided_slice %474 {offsets = [0, 0], sizes = [4, 32], strides = [1, 1]} : vector<5x32xbf16> to vector<4x32xbf16>
    %c14_592 = arith.constant 14 : index
    %c0_593 = arith.constant 0 : index
    %c0_594 = arith.constant 0 : index
    %797 = vector.load %arg5[%c14_592, %c0_593, %c0_594] : memref<16x32x64xbf16, #tpu.memory_space<vmem>>, vector<1x32x64xbf16>
    %798 = vector.shape_cast %797 : vector<1x32x64xbf16> to vector<32x64xbf16>
    %cst_595 = arith.constant dense<0.000000e+00> : vector<4x64xf32>
    %799 = tpu.matmul %796, %798, %cst_595 {dimension_numbers = #tpu.dot_dimension_numbers<[1], [0], [0], [1], [0, 0, 1, 1], [], []>} : vector<4x32xbf16>, vector<32x64xbf16>, vector<4x64xf32> -> vector<4x64xf32>
    %800 = arith.addf %795, %799 : vector<4x64xf32>
    %801 = vector.extract_strided_slice %474 {offsets = [1, 0], sizes = [4, 32], strides = [1, 1]} : vector<5x32xbf16> to vector<4x32xbf16>
    %c15_596 = arith.constant 15 : index
    %c0_597 = arith.constant 0 : index
    %c0_598 = arith.constant 0 : index
    %802 = vector.load %arg5[%c15_596, %c0_597, %c0_598] : memref<16x32x64xbf16, #tpu.memory_space<vmem>>, vector<1x32x64xbf16>
    %803 = vector.shape_cast %802 : vector<1x32x64xbf16> to vector<32x64xbf16>
    %cst_599 = arith.constant dense<0.000000e+00> : vector<4x64xf32>
    %804 = tpu.matmul %801, %803, %cst_599 {dimension_numbers = #tpu.dot_dimension_numbers<[1], [0], [0], [1], [0, 0, 1, 1], [], []>} : vector<4x32xbf16>, vector<32x64xbf16>, vector<4x64xf32> -> vector<4x64xf32>
    %805 = arith.addf %800, %804 : vector<4x64xf32>
    %806 = vector.broadcast %5 : vector<1x64xf32> to vector<4x64xf32>
    %807 = arith.addf %805, %806 : vector<4x64xf32>
    %cst_600 = arith.constant 0.000000e+00 : f32
    %808 = vector.broadcast %cst_600 : f32 to vector<4x64xf32>
    %809 = arith.maximumf %807, %808 : vector<4x64xf32>
    %810 = arith.truncf %809 : vector<4x64xf32> to vector<4x64xbf16>
    %811 = vector.extract_strided_slice %558 {offsets = [0, 0], sizes = [2, 64], strides = [1, 1]} : vector<4x64xbf16> to vector<2x64xbf16>
    %c0_601 = arith.constant 0 : index
    %c0_602 = arith.constant 0 : index
    %c0_603 = arith.constant 0 : index
    %812 = vector.load %arg7[%c0_601, %c0_602, %c0_603] : memref<9x64x64xbf16, #tpu.memory_space<vmem>>, vector<1x64x64xbf16>
    %813 = vector.shape_cast %812 : vector<1x64x64xbf16> to vector<64x64xbf16>
    %cst_604 = arith.constant dense<0.000000e+00> : vector<2x64xf32>
    %814 = tpu.matmul %811, %813, %cst_604 {dimension_numbers = #tpu.dot_dimension_numbers<[1], [0], [0], [1], [0, 0, 1, 1], [], []>} : vector<2x64xbf16>, vector<64x64xbf16>, vector<2x64xf32> -> vector<2x64xf32>
    %815 = vector.extract_strided_slice %558 {offsets = [1, 0], sizes = [2, 64], strides = [1, 1]} : vector<4x64xbf16> to vector<2x64xbf16>
    %c1_605 = arith.constant 1 : index
    %c0_606 = arith.constant 0 : index
    %c0_607 = arith.constant 0 : index
    %816 = vector.load %arg7[%c1_605, %c0_606, %c0_607] : memref<9x64x64xbf16, #tpu.memory_space<vmem>>, vector<1x64x64xbf16>
    %817 = vector.shape_cast %816 : vector<1x64x64xbf16> to vector<64x64xbf16>
    %cst_608 = arith.constant dense<0.000000e+00> : vector<2x64xf32>
    %818 = tpu.matmul %815, %817, %cst_608 {dimension_numbers = #tpu.dot_dimension_numbers<[1], [0], [0], [1], [0, 0, 1, 1], [], []>} : vector<2x64xbf16>, vector<64x64xbf16>, vector<2x64xf32> -> vector<2x64xf32>
    %819 = arith.addf %814, %818 : vector<2x64xf32>
    %820 = vector.extract_strided_slice %558 {offsets = [2, 0], sizes = [2, 64], strides = [1, 1]} : vector<4x64xbf16> to vector<2x64xbf16>
    %c2_609 = arith.constant 2 : index
    %c0_610 = arith.constant 0 : index
    %c0_611 = arith.constant 0 : index
    %821 = vector.load %arg7[%c2_609, %c0_610, %c0_611] : memref<9x64x64xbf16, #tpu.memory_space<vmem>>, vector<1x64x64xbf16>
    %822 = vector.shape_cast %821 : vector<1x64x64xbf16> to vector<64x64xbf16>
    %cst_612 = arith.constant dense<0.000000e+00> : vector<2x64xf32>
    %823 = tpu.matmul %820, %822, %cst_612 {dimension_numbers = #tpu.dot_dimension_numbers<[1], [0], [0], [1], [0, 0, 1, 1], [], []>} : vector<2x64xbf16>, vector<64x64xbf16>, vector<2x64xf32> -> vector<2x64xf32>
    %824 = arith.addf %819, %823 : vector<2x64xf32>
    %825 = vector.extract_strided_slice %642 {offsets = [0, 0], sizes = [2, 64], strides = [1, 1]} : vector<4x64xbf16> to vector<2x64xbf16>
    %c3_613 = arith.constant 3 : index
    %c0_614 = arith.constant 0 : index
    %c0_615 = arith.constant 0 : index
    %826 = vector.load %arg7[%c3_613, %c0_614, %c0_615] : memref<9x64x64xbf16, #tpu.memory_space<vmem>>, vector<1x64x64xbf16>
    %827 = vector.shape_cast %826 : vector<1x64x64xbf16> to vector<64x64xbf16>
    %cst_616 = arith.constant dense<0.000000e+00> : vector<2x64xf32>
    %828 = tpu.matmul %825, %827, %cst_616 {dimension_numbers = #tpu.dot_dimension_numbers<[1], [0], [0], [1], [0, 0, 1, 1], [], []>} : vector<2x64xbf16>, vector<64x64xbf16>, vector<2x64xf32> -> vector<2x64xf32>
    %829 = arith.addf %824, %828 : vector<2x64xf32>
    %830 = vector.extract_strided_slice %642 {offsets = [1, 0], sizes = [2, 64], strides = [1, 1]} : vector<4x64xbf16> to vector<2x64xbf16>
    %c4_617 = arith.constant 4 : index
    %c0_618 = arith.constant 0 : index
    %c0_619 = arith.constant 0 : index
    %831 = vector.load %arg7[%c4_617, %c0_618, %c0_619] : memref<9x64x64xbf16, #tpu.memory_space<vmem>>, vector<1x64x64xbf16>
    %832 = vector.shape_cast %831 : vector<1x64x64xbf16> to vector<64x64xbf16>
    %cst_620 = arith.constant dense<0.000000e+00> : vector<2x64xf32>
    %833 = tpu.matmul %830, %832, %cst_620 {dimension_numbers = #tpu.dot_dimension_numbers<[1], [0], [0], [1], [0, 0, 1, 1], [], []>} : vector<2x64xbf16>, vector<64x64xbf16>, vector<2x64xf32> -> vector<2x64xf32>
    %834 = arith.addf %829, %833 : vector<2x64xf32>
    %835 = vector.extract_strided_slice %642 {offsets = [2, 0], sizes = [2, 64], strides = [1, 1]} : vector<4x64xbf16> to vector<2x64xbf16>
    %c5_621 = arith.constant 5 : index
    %c0_622 = arith.constant 0 : index
    %c0_623 = arith.constant 0 : index
    %836 = vector.load %arg7[%c5_621, %c0_622, %c0_623] : memref<9x64x64xbf16, #tpu.memory_space<vmem>>, vector<1x64x64xbf16>
    %837 = vector.shape_cast %836 : vector<1x64x64xbf16> to vector<64x64xbf16>
    %cst_624 = arith.constant dense<0.000000e+00> : vector<2x64xf32>
    %838 = tpu.matmul %835, %837, %cst_624 {dimension_numbers = #tpu.dot_dimension_numbers<[1], [0], [0], [1], [0, 0, 1, 1], [], []>} : vector<2x64xbf16>, vector<64x64xbf16>, vector<2x64xf32> -> vector<2x64xf32>
    %839 = arith.addf %834, %838 : vector<2x64xf32>
    %840 = vector.extract_strided_slice %726 {offsets = [0, 0], sizes = [2, 64], strides = [1, 1]} : vector<4x64xbf16> to vector<2x64xbf16>
    %c6_625 = arith.constant 6 : index
    %c0_626 = arith.constant 0 : index
    %c0_627 = arith.constant 0 : index
    %841 = vector.load %arg7[%c6_625, %c0_626, %c0_627] : memref<9x64x64xbf16, #tpu.memory_space<vmem>>, vector<1x64x64xbf16>
    %842 = vector.shape_cast %841 : vector<1x64x64xbf16> to vector<64x64xbf16>
    %cst_628 = arith.constant dense<0.000000e+00> : vector<2x64xf32>
    %843 = tpu.matmul %840, %842, %cst_628 {dimension_numbers = #tpu.dot_dimension_numbers<[1], [0], [0], [1], [0, 0, 1, 1], [], []>} : vector<2x64xbf16>, vector<64x64xbf16>, vector<2x64xf32> -> vector<2x64xf32>
    %844 = arith.addf %839, %843 : vector<2x64xf32>
    %845 = vector.extract_strided_slice %726 {offsets = [1, 0], sizes = [2, 64], strides = [1, 1]} : vector<4x64xbf16> to vector<2x64xbf16>
    %c7_629 = arith.constant 7 : index
    %c0_630 = arith.constant 0 : index
    %c0_631 = arith.constant 0 : index
    %846 = vector.load %arg7[%c7_629, %c0_630, %c0_631] : memref<9x64x64xbf16, #tpu.memory_space<vmem>>, vector<1x64x64xbf16>
    %847 = vector.shape_cast %846 : vector<1x64x64xbf16> to vector<64x64xbf16>
    %cst_632 = arith.constant dense<0.000000e+00> : vector<2x64xf32>
    %848 = tpu.matmul %845, %847, %cst_632 {dimension_numbers = #tpu.dot_dimension_numbers<[1], [0], [0], [1], [0, 0, 1, 1], [], []>} : vector<2x64xbf16>, vector<64x64xbf16>, vector<2x64xf32> -> vector<2x64xf32>
    %849 = arith.addf %844, %848 : vector<2x64xf32>
    %850 = vector.extract_strided_slice %726 {offsets = [2, 0], sizes = [2, 64], strides = [1, 1]} : vector<4x64xbf16> to vector<2x64xbf16>
    %c8_633 = arith.constant 8 : index
    %c0_634 = arith.constant 0 : index
    %c0_635 = arith.constant 0 : index
    %851 = vector.load %arg7[%c8_633, %c0_634, %c0_635] : memref<9x64x64xbf16, #tpu.memory_space<vmem>>, vector<1x64x64xbf16>
    %852 = vector.shape_cast %851 : vector<1x64x64xbf16> to vector<64x64xbf16>
    %cst_636 = arith.constant dense<0.000000e+00> : vector<2x64xf32>
    %853 = tpu.matmul %850, %852, %cst_636 {dimension_numbers = #tpu.dot_dimension_numbers<[1], [0], [0], [1], [0, 0, 1, 1], [], []>} : vector<2x64xbf16>, vector<64x64xbf16>, vector<2x64xf32> -> vector<2x64xf32>
    %854 = arith.addf %849, %853 : vector<2x64xf32>
    %855 = vector.broadcast %6 : vector<1x64xf32> to vector<2x64xf32>
    %856 = arith.addf %854, %855 : vector<2x64xf32>
    %cst_637 = arith.constant 0.000000e+00 : f32
    %857 = vector.broadcast %cst_637 : f32 to vector<2x64xf32>
    %858 = arith.maximumf %856, %857 : vector<2x64xf32>
    %859 = arith.truncf %858 : vector<2x64xf32> to vector<2x64xbf16>
    %860 = vector.extract_strided_slice %642 {offsets = [0, 0], sizes = [2, 64], strides = [1, 1]} : vector<4x64xbf16> to vector<2x64xbf16>
    %c0_638 = arith.constant 0 : index
    %c0_639 = arith.constant 0 : index
    %c0_640 = arith.constant 0 : index
    %861 = vector.load %arg7[%c0_638, %c0_639, %c0_640] : memref<9x64x64xbf16, #tpu.memory_space<vmem>>, vector<1x64x64xbf16>
    %862 = vector.shape_cast %861 : vector<1x64x64xbf16> to vector<64x64xbf16>
    %cst_641 = arith.constant dense<0.000000e+00> : vector<2x64xf32>
    %863 = tpu.matmul %860, %862, %cst_641 {dimension_numbers = #tpu.dot_dimension_numbers<[1], [0], [0], [1], [0, 0, 1, 1], [], []>} : vector<2x64xbf16>, vector<64x64xbf16>, vector<2x64xf32> -> vector<2x64xf32>
    %864 = vector.extract_strided_slice %642 {offsets = [1, 0], sizes = [2, 64], strides = [1, 1]} : vector<4x64xbf16> to vector<2x64xbf16>
    %c1_642 = arith.constant 1 : index
    %c0_643 = arith.constant 0 : index
    %c0_644 = arith.constant 0 : index
    %865 = vector.load %arg7[%c1_642, %c0_643, %c0_644] : memref<9x64x64xbf16, #tpu.memory_space<vmem>>, vector<1x64x64xbf16>
    %866 = vector.shape_cast %865 : vector<1x64x64xbf16> to vector<64x64xbf16>
    %cst_645 = arith.constant dense<0.000000e+00> : vector<2x64xf32>
    %867 = tpu.matmul %864, %866, %cst_645 {dimension_numbers = #tpu.dot_dimension_numbers<[1], [0], [0], [1], [0, 0, 1, 1], [], []>} : vector<2x64xbf16>, vector<64x64xbf16>, vector<2x64xf32> -> vector<2x64xf32>
    %868 = arith.addf %863, %867 : vector<2x64xf32>
    %869 = vector.extract_strided_slice %642 {offsets = [2, 0], sizes = [2, 64], strides = [1, 1]} : vector<4x64xbf16> to vector<2x64xbf16>
    %c2_646 = arith.constant 2 : index
    %c0_647 = arith.constant 0 : index
    %c0_648 = arith.constant 0 : index
    %870 = vector.load %arg7[%c2_646, %c0_647, %c0_648] : memref<9x64x64xbf16, #tpu.memory_space<vmem>>, vector<1x64x64xbf16>
    %871 = vector.shape_cast %870 : vector<1x64x64xbf16> to vector<64x64xbf16>
    %cst_649 = arith.constant dense<0.000000e+00> : vector<2x64xf32>
    %872 = tpu.matmul %869, %871, %cst_649 {dimension_numbers = #tpu.dot_dimension_numbers<[1], [0], [0], [1], [0, 0, 1, 1], [], []>} : vector<2x64xbf16>, vector<64x64xbf16>, vector<2x64xf32> -> vector<2x64xf32>
    %873 = arith.addf %868, %872 : vector<2x64xf32>
    %874 = vector.extract_strided_slice %726 {offsets = [0, 0], sizes = [2, 64], strides = [1, 1]} : vector<4x64xbf16> to vector<2x64xbf16>
    %c3_650 = arith.constant 3 : index
    %c0_651 = arith.constant 0 : index
    %c0_652 = arith.constant 0 : index
    %875 = vector.load %arg7[%c3_650, %c0_651, %c0_652] : memref<9x64x64xbf16, #tpu.memory_space<vmem>>, vector<1x64x64xbf16>
    %876 = vector.shape_cast %875 : vector<1x64x64xbf16> to vector<64x64xbf16>
    %cst_653 = arith.constant dense<0.000000e+00> : vector<2x64xf32>
    %877 = tpu.matmul %874, %876, %cst_653 {dimension_numbers = #tpu.dot_dimension_numbers<[1], [0], [0], [1], [0, 0, 1, 1], [], []>} : vector<2x64xbf16>, vector<64x64xbf16>, vector<2x64xf32> -> vector<2x64xf32>
    %878 = arith.addf %873, %877 : vector<2x64xf32>
    %879 = vector.extract_strided_slice %726 {offsets = [1, 0], sizes = [2, 64], strides = [1, 1]} : vector<4x64xbf16> to vector<2x64xbf16>
    %c4_654 = arith.constant 4 : index
    %c0_655 = arith.constant 0 : index
    %c0_656 = arith.constant 0 : index
    %880 = vector.load %arg7[%c4_654, %c0_655, %c0_656] : memref<9x64x64xbf16, #tpu.memory_space<vmem>>, vector<1x64x64xbf16>
    %881 = vector.shape_cast %880 : vector<1x64x64xbf16> to vector<64x64xbf16>
    %cst_657 = arith.constant dense<0.000000e+00> : vector<2x64xf32>
    %882 = tpu.matmul %879, %881, %cst_657 {dimension_numbers = #tpu.dot_dimension_numbers<[1], [0], [0], [1], [0, 0, 1, 1], [], []>} : vector<2x64xbf16>, vector<64x64xbf16>, vector<2x64xf32> -> vector<2x64xf32>
    %883 = arith.addf %878, %882 : vector<2x64xf32>
    %884 = vector.extract_strided_slice %726 {offsets = [2, 0], sizes = [2, 64], strides = [1, 1]} : vector<4x64xbf16> to vector<2x64xbf16>
    %c5_658 = arith.constant 5 : index
    %c0_659 = arith.constant 0 : index
    %c0_660 = arith.constant 0 : index
    %885 = vector.load %arg7[%c5_658, %c0_659, %c0_660] : memref<9x64x64xbf16, #tpu.memory_space<vmem>>, vector<1x64x64xbf16>
    %886 = vector.shape_cast %885 : vector<1x64x64xbf16> to vector<64x64xbf16>
    %cst_661 = arith.constant dense<0.000000e+00> : vector<2x64xf32>
    %887 = tpu.matmul %884, %886, %cst_661 {dimension_numbers = #tpu.dot_dimension_numbers<[1], [0], [0], [1], [0, 0, 1, 1], [], []>} : vector<2x64xbf16>, vector<64x64xbf16>, vector<2x64xf32> -> vector<2x64xf32>
    %888 = arith.addf %883, %887 : vector<2x64xf32>
    %889 = vector.extract_strided_slice %810 {offsets = [0, 0], sizes = [2, 64], strides = [1, 1]} : vector<4x64xbf16> to vector<2x64xbf16>
    %c6_662 = arith.constant 6 : index
    %c0_663 = arith.constant 0 : index
    %c0_664 = arith.constant 0 : index
    %890 = vector.load %arg7[%c6_662, %c0_663, %c0_664] : memref<9x64x64xbf16, #tpu.memory_space<vmem>>, vector<1x64x64xbf16>
    %891 = vector.shape_cast %890 : vector<1x64x64xbf16> to vector<64x64xbf16>
    %cst_665 = arith.constant dense<0.000000e+00> : vector<2x64xf32>
    %892 = tpu.matmul %889, %891, %cst_665 {dimension_numbers = #tpu.dot_dimension_numbers<[1], [0], [0], [1], [0, 0, 1, 1], [], []>} : vector<2x64xbf16>, vector<64x64xbf16>, vector<2x64xf32> -> vector<2x64xf32>
    %893 = arith.addf %888, %892 : vector<2x64xf32>
    %894 = vector.extract_strided_slice %810 {offsets = [1, 0], sizes = [2, 64], strides = [1, 1]} : vector<4x64xbf16> to vector<2x64xbf16>
    %c7_666 = arith.constant 7 : index
    %c0_667 = arith.constant 0 : index
    %c0_668 = arith.constant 0 : index
    %895 = vector.load %arg7[%c7_666, %c0_667, %c0_668] : memref<9x64x64xbf16, #tpu.memory_space<vmem>>, vector<1x64x64xbf16>
    %896 = vector.shape_cast %895 : vector<1x64x64xbf16> to vector<64x64xbf16>
    %cst_669 = arith.constant dense<0.000000e+00> : vector<2x64xf32>
    %897 = tpu.matmul %894, %896, %cst_669 {dimension_numbers = #tpu.dot_dimension_numbers<[1], [0], [0], [1], [0, 0, 1, 1], [], []>} : vector<2x64xbf16>, vector<64x64xbf16>, vector<2x64xf32> -> vector<2x64xf32>
    %898 = arith.addf %893, %897 : vector<2x64xf32>
    %899 = vector.extract_strided_slice %810 {offsets = [2, 0], sizes = [2, 64], strides = [1, 1]} : vector<4x64xbf16> to vector<2x64xbf16>
    %c8_670 = arith.constant 8 : index
    %c0_671 = arith.constant 0 : index
    %c0_672 = arith.constant 0 : index
    %900 = vector.load %arg7[%c8_670, %c0_671, %c0_672] : memref<9x64x64xbf16, #tpu.memory_space<vmem>>, vector<1x64x64xbf16>
    %901 = vector.shape_cast %900 : vector<1x64x64xbf16> to vector<64x64xbf16>
    %cst_673 = arith.constant dense<0.000000e+00> : vector<2x64xf32>
    %902 = tpu.matmul %899, %901, %cst_673 {dimension_numbers = #tpu.dot_dimension_numbers<[1], [0], [0], [1], [0, 0, 1, 1], [], []>} : vector<2x64xbf16>, vector<64x64xbf16>, vector<2x64xf32> -> vector<2x64xf32>
    %903 = arith.addf %898, %902 : vector<2x64xf32>
    %904 = vector.broadcast %6 : vector<1x64xf32> to vector<2x64xf32>
    %905 = arith.addf %903, %904 : vector<2x64xf32>
    %cst_674 = arith.constant 0.000000e+00 : f32
    %906 = vector.broadcast %cst_674 : f32 to vector<2x64xf32>
    %907 = arith.maximumf %905, %906 : vector<2x64xf32>
    %908 = arith.truncf %907 : vector<2x64xf32> to vector<2x64xbf16>
    %909 = vector.extract_strided_slice %859 {offsets = [0, 0], sizes = [1, 64], strides = [1, 1]} : vector<2x64xbf16> to vector<1x64xbf16>
    %c0_675 = arith.constant 0 : index
    %c0_676 = arith.constant 0 : index
    %c0_677 = arith.constant 0 : index
    %910 = vector.load %arg9[%c0_675, %c0_676, %c0_677] : memref<4x64x512xbf16, #tpu.memory_space<vmem>>, vector<1x64x512xbf16>
    %911 = vector.shape_cast %910 : vector<1x64x512xbf16> to vector<64x512xbf16>
    %cst_678 = arith.constant dense<0.000000e+00> : vector<1x512xf32>
    %912 = tpu.matmul %909, %911, %cst_678 {dimension_numbers = #tpu.dot_dimension_numbers<[1], [0], [0], [1], [0, 0, 1, 1], [], []>} : vector<1x64xbf16>, vector<64x512xbf16>, vector<1x512xf32> -> vector<1x512xf32>
    %913 = vector.extract_strided_slice %859 {offsets = [1, 0], sizes = [1, 64], strides = [1, 1]} : vector<2x64xbf16> to vector<1x64xbf16>
    %c1_679 = arith.constant 1 : index
    %c0_680 = arith.constant 0 : index
    %c0_681 = arith.constant 0 : index
    %914 = vector.load %arg9[%c1_679, %c0_680, %c0_681] : memref<4x64x512xbf16, #tpu.memory_space<vmem>>, vector<1x64x512xbf16>
    %915 = vector.shape_cast %914 : vector<1x64x512xbf16> to vector<64x512xbf16>
    %cst_682 = arith.constant dense<0.000000e+00> : vector<1x512xf32>
    %916 = tpu.matmul %913, %915, %cst_682 {dimension_numbers = #tpu.dot_dimension_numbers<[1], [0], [0], [1], [0, 0, 1, 1], [], []>} : vector<1x64xbf16>, vector<64x512xbf16>, vector<1x512xf32> -> vector<1x512xf32>
    %917 = arith.addf %912, %916 : vector<1x512xf32>
    %918 = vector.extract_strided_slice %908 {offsets = [0, 0], sizes = [1, 64], strides = [1, 1]} : vector<2x64xbf16> to vector<1x64xbf16>
    %c2_683 = arith.constant 2 : index
    %c0_684 = arith.constant 0 : index
    %c0_685 = arith.constant 0 : index
    %919 = vector.load %arg9[%c2_683, %c0_684, %c0_685] : memref<4x64x512xbf16, #tpu.memory_space<vmem>>, vector<1x64x512xbf16>
    %920 = vector.shape_cast %919 : vector<1x64x512xbf16> to vector<64x512xbf16>
    %cst_686 = arith.constant dense<0.000000e+00> : vector<1x512xf32>
    %921 = tpu.matmul %918, %920, %cst_686 {dimension_numbers = #tpu.dot_dimension_numbers<[1], [0], [0], [1], [0, 0, 1, 1], [], []>} : vector<1x64xbf16>, vector<64x512xbf16>, vector<1x512xf32> -> vector<1x512xf32>
    %922 = arith.addf %917, %921 : vector<1x512xf32>
    %923 = vector.extract_strided_slice %908 {offsets = [1, 0], sizes = [1, 64], strides = [1, 1]} : vector<2x64xbf16> to vector<1x64xbf16>
    %c3_687 = arith.constant 3 : index
    %c0_688 = arith.constant 0 : index
    %c0_689 = arith.constant 0 : index
    %924 = vector.load %arg9[%c3_687, %c0_688, %c0_689] : memref<4x64x512xbf16, #tpu.memory_space<vmem>>, vector<1x64x512xbf16>
    %925 = vector.shape_cast %924 : vector<1x64x512xbf16> to vector<64x512xbf16>
    %cst_690 = arith.constant dense<0.000000e+00> : vector<1x512xf32>
    %926 = tpu.matmul %923, %925, %cst_690 {dimension_numbers = #tpu.dot_dimension_numbers<[1], [0], [0], [1], [0, 0, 1, 1], [], []>} : vector<1x64xbf16>, vector<64x512xbf16>, vector<1x512xf32> -> vector<1x512xf32>
    %927 = arith.addf %922, %926 : vector<1x512xf32>
    %928 = arith.addf %927, %7 : vector<1x512xf32>
    %cst_691 = arith.constant 0.000000e+00 : f32
    %929 = vector.broadcast %cst_691 : f32 to vector<1x512xf32>
    %930 = arith.maximumf %928, %929 : vector<1x512xf32>
    %931 = arith.truncf %930 : vector<1x512xf32> to vector<1x512xbf16>
    %c0_692 = arith.constant 0 : index
    %c0_693 = arith.constant 0 : index
    %932 = vector.load %arg11[%c0_692, %c0_693] : memref<512x6xbf16, #tpu.memory_space<vmem>>, vector<512x6xbf16>
    %cst_694 = arith.constant dense<0.000000e+00> : vector<1x6xf32>
    %933 = tpu.matmul %931, %932, %cst_694 {dimension_numbers = #tpu.dot_dimension_numbers<[1], [0], [0], [1], [0, 0, 1, 1], [], []>} : vector<1x512xbf16>, vector<512x6xbf16>, vector<1x6xf32> -> vector<1x6xf32>
    %934 = arith.addf %933, %8 : vector<1x6xf32>
    %c0_695 = arith.constant 0 : index
    %c0_696 = arith.constant 0 : index
    %c0_697 = arith.constant 0 : index
    %935 = vector.load %arg13[%c0_695, %c0_696, %c0_697] : memref<1x1x6xf32, #tpu.memory_space<vmem>>, vector<1x1x6xf32>
    %936 = vector.shape_cast %935 : vector<1x1x6xf32> to vector<1x6xf32>
    %937 = vector.shape_cast %934 : vector<1x6xf32> to vector<1x1x6xf32>
    tpu.vector_store %arg13[%c0_695, %c0_696, %c0_697], %937 {strides = array<i32>} : memref<1x1x6xf32, #tpu.memory_space<vmem>>, vector<1x1x6xf32>,
    return
  }
  func.func @transform_0(%arg0: i32) -> (i32, i32, i32, i32) {
    %c0_i32 = arith.constant 0 : i32
    %c0_i32_0 = arith.constant 0 : i32
    %c0_i32_1 = arith.constant 0 : i32
    %c0_i32_2 = arith.constant 0 : i32
    return %arg0, %c0_i32, %c0_i32_0, %c0_i32_1 : i32, i32, i32, i32
  }
  func.func @transform_1(%arg0: i32) -> (i32, i32, i32, i32) {
    %c0_i32 = arith.constant 0 : i32
    %c0_i32_0 = arith.constant 0 : i32
    %c0_i32_1 = arith.constant 0 : i32
    %c0_i32_2 = arith.constant 0 : i32
    return %arg0, %c0_i32, %c0_i32_0, %c0_i32_1 : i32, i32, i32, i32
  }
  func.func @transform_2(%arg0: i32) -> (i32, i32, i32) {
    %c0_i32 = arith.constant 0 : i32
    %c0_i32_0 = arith.constant 0 : i32
    %c0_i32_1 = arith.constant 0 : i32
    %c0_i32_2 = arith.constant 0 : i32
    return %c0_i32, %c0_i32_0, %c0_i32_1 : i32, i32, i32
  }
  func.func @transform_3(%arg0: i32) -> (i32, i32) {
    %c0_i32 = arith.constant 0 : i32
    %c0_i32_0 = arith.constant 0 : i32
    %c0_i32_1 = arith.constant 0 : i32
    return %c0_i32, %c0_i32_0 : i32, i32
  }
  func.func @transform_4(%arg0: i32) -> (i32, i32, i32) {
    %c0_i32 = arith.constant 0 : i32
    %c0_i32_0 = arith.constant 0 : i32
    %c0_i32_1 = arith.constant 0 : i32
    %c0_i32_2 = arith.constant 0 : i32
    return %c0_i32, %c0_i32_0, %c0_i32_1 : i32, i32, i32
  }
  func.func @transform_5(%arg0: i32) -> (i32, i32) {
    %c0_i32 = arith.constant 0 : i32
    %c0_i32_0 = arith.constant 0 : i32
    %c0_i32_1 = arith.constant 0 : i32
    return %c0_i32, %c0_i32_0 : i32, i32
  }
  func.func @transform_6(%arg0: i32) -> (i32, i32, i32) {
    %c0_i32 = arith.constant 0 : i32
    %c0_i32_0 = arith.constant 0 : i32
    %c0_i32_1 = arith.constant 0 : i32
    %c0_i32_2 = arith.constant 0 : i32
    return %c0_i32, %c0_i32_0, %c0_i32_1 : i32, i32, i32
  }
  func.func @transform_7(%arg0: i32) -> (i32, i32) {
    %c0_i32 = arith.constant 0 : i32
    %c0_i32_0 = arith.constant 0 : i32
    %c0_i32_1 = arith.constant 0 : i32
    return %c0_i32, %c0_i32_0 : i32, i32
  }
  func.func @transform_8(%arg0: i32) -> (i32, i32, i32) {
    %c0_i32 = arith.constant 0 : i32
    %c0_i32_0 = arith.constant 0 : i32
    %c0_i32_1 = arith.constant 0 : i32
    %c0_i32_2 = arith.constant 0 : i32
    return %c0_i32, %c0_i32_0, %c0_i32_1 : i32, i32, i32
  }
  func.func @transform_9(%arg0: i32) -> (i32, i32) {
    %c0_i32 = arith.constant 0 : i32
    %c0_i32_0 = arith.constant 0 : i32
    %c0_i32_1 = arith.constant 0 : i32
    return %c0_i32, %c0_i32_0 : i32, i32
  }
  func.func @transform_10(%arg0: i32) -> (i32, i32) {
    %c0_i32 = arith.constant 0 : i32
    %c0_i32_0 = arith.constant 0 : i32
    %c0_i32_1 = arith.constant 0 : i32
    return %c0_i32, %c0_i32_0 : i32, i32
  }
  func.func @transform_11(%arg0: i32) -> (i32, i32) {
    %c0_i32 = arith.constant 0 : i32
    %c0_i32_0 = arith.constant 0 : i32
    %c0_i32_1 = arith.constant 0 : i32
    return %c0_i32, %c0_i32_0 : i32, i32
  }
  func.func @transform_12(%arg0: i32) -> (i32, i32, i32) {
    %c0_i32 = arith.constant 0 : i32
    %c0_i32_0 = arith.constant 0 : i32
    %c0_i32_1 = arith.constant 0 : i32
    return %arg0, %c0_i32, %c0_i32_0 : i32, i32, i32
  }
}

</mosaic_0001>

<bundles_post_ra>
// kernel: qnetwork_forward.1
= control target key start
LH: loop header
LB: loop body
LE: loop exit
PB: predicated region body
PF: predicated region fallthrough
CT: control target
= control target key end

     0   :  { %s8773_s0 = inlined_call_operand.vmem [shape: bf16[2,11,6,64], index: 0, kind: input, shape index: {}]   ;;  %s8774_s1 = inlined_call_operand.vmem [shape: bf16[2,11,5,64], index: 1, kind: input, shape index: {}]   ;;  %s8775_s2 = inlined_call_operand.vmem [shape: bf16[4,64,32], index: 2, kind: input, shape index: {}]   ;;  %s8776_s3 = inlined_call_operand.vmem [shape: f32[1,32], index: 3, kind: input, shape index: {}]   ;;  %s8777_s4 = inlined_call_operand.vmem [shape: bf16[16,32,64], index: 4, kind: input, shape index: {}]   ;;  %s8778_s5 = inlined_call_operand.vmem [shape: f32[1,64], index: 5, kind: input, shape index: {}]   ;;  %s8779_s6 = inlined_call_operand.vmem [shape: bf16[9,64,64], index: 6, kind: input, shape index: {}]   ;;  %s8780_s7 = inlined_call_operand.vmem [shape: f32[1,64], index: 7, kind: input, shape index: {}]   ;;  %s8781_s8 = inlined_call_operand.vmem [shape: bf16[4,64,512], index: 8, kind: input, shape index: {}]   ;;  %s8782_s9 = inlined_call_operand.vmem [shape: f32[1,512], index: 9, kind: input, shape index: {}]   ;;  %s8783_s10 = inlined_call_operand.vmem [shape: bf16[512,6], index: 10, kind: input, shape index: {}]   ;;  %s8784_s11 = inlined_call_operand.vmem [shape: f32[1,6], index: 11, kind: input, shape index: {}]   ;;  %s8785_s12 = inlined_call_operand.hbm [shape: f32[2,1,6], index: 12, kind: output, shape index: {}]  }
   0x1   :  { %8786 = sst [smem:[#allocation8_spill]] %s8773_s0 }
   0x2   :  { %17 = vsyncpa [#allocation3], 0 }
   0x3   :  { %19 = vsyncpa [#allocation3 + $0x1], 0  ;;  %s6580_s21 = smov 0   ;;  %s6582_s22 = smov 0  }
   0x4   :  { %s6584_s23 = smov 0   ;;  %s6586_s24 = smov 0  }
   0x5 LB: > { %s6601_s25 = sadd.s32 4294967295, %s6513_s24   ;;  %s5109_s26 = sadd.s32 4294967294, %s6513_s24   ;;  %s6513_s24 = sphi %s6586_s24, %s8799_s24   ;;  %s6509_s23 = sphi %s6584_s23, %s8798_s23   ;;  %s6505_s22 = sphi %s6582_s22, %s8797_s22   ;;  %s6501_s21 = sphi %s6580_s21, %s8796_s21  }
   0x6   : > { %s6605_s27 = sadd.s32 1, %s6513_s24   ;;  %s294_s28 = sadd.s32 1, %s6509_s23 }
   0x7   : > { %s291_s29 = ssub.s32 %s6513_s24, %s6605_s27  ;;  %p304_p0 = scmp.ne.s32.totalorder %s6509_s23, %s6505_s22 }
   0x8   : > { %p292_p1 = scmp.eq.s32.totalorder %s291_s29, 0  ;;  %p305_p2 = scmp.eq.s32.totalorder %s6601_s25, 1 }
   0x9   : > { %p310_p3 = scmp.ne.s32.totalorder %s6505_s22, %s6501_s21  ;;  %p311_p4 = scmp.eq.s32.totalorder %s5109_s26, 1 }
   0xa   : > { %s6616_s30 = scalar_select %p292_p1, %s6509_s23, %s294_s28  }
   0xb   : > { %p6618_p5 = por %p305_p2, %p304_p0  ;;  %p6622_p6 = por %p311_p4, %p310_p3 }
   0xc   : > { %8787 = sst [smem:[#allocation5_spill]] %s6616_s30  ;;  %p5112_p7 = scmp.ge.s32.totalorder %s6513_s24, 1 }
   0xd   : > { %p375_p8 = scmp.lt.s32.totalorder %s6513_s24, 3 }
   0xf   : > { %p376_p9 = pnand %p5112_p7, %p375_p8 }
  0x11   : > { %379 = sbr.rel (%p376_p9) target bundleno = 1197 (0x4ad), region = 68 }
  0x16   : > { %v6631_v0 = vld [vmem:[%s8775_s2 + $0x38] sm:$0xff]  ;;  %p421_p10 = scmp.lt.s32.totalorder %s6601_s25, 1  ;;  %v6654_v4 = vld [vmem:[%s8775_s2 + $0x30] sm:$0xff]  ;;  %v6679_v8 = vld [vmem:[%s8775_s2 + $0x28] sm:$0xff]  ;;  %s8790_s0 = sld [smem:[#allocation8_spill]]  ;;  %vm500_vm0 = vcmask 523264  }
  0x17   : > { %v6636_v1 = vld [vmem:[%s8775_s2 + $0x18] sm:$0xff]  ;;  %508 = vmatpush.bf16.msra.mxu0 %v6631_v0  ;;  %v6659_v5 = vld [vmem:[%s8775_s2 + $0x10] sm:$0xff]  ;;  %v6684_v9 = vld [vmem:[%s8775_s2 + $0x8] sm:$0xff]  ;;  %vm1974_vm1 = vcmask 261120   ;;  %vm5027_vm2 = vcmask 40960   ;;  %s6471_s17 = scalar_lea.hbm %s8785_s12, 2 }
  0x18   : > { %v6641_v2 = vld [vmem:[%s8775_s2 + $0x58] sm:$0xff]  ;;  %548 = vmatpush.bf16.msra.mxu1 %v6636_v1  ;;  %s422_s18 = scalar_select %p421_p10, %s6601_s25, 1  ;;  %v6667_v6 = vld [vmem:[%s8775_s2 + $0x50] sm:$0xff]  ;;  %v6691_v10 = vld [vmem:[%s8775_s2 + $0x48] sm:$0xff] }
  0x19   : > { %v6647_v3 = vld [vmem:[%s8775_s2 + $0x78] sm:$0xff]  ;;  %597 = vmatpush.bf16.msra.mxu2 %v6641_v2  ;;  %v6672_v7 = vld [vmem:[%s8775_s2 + $0x70] sm:$0xff]  ;;  %v6696_v11 = vld [vmem:[%s8775_s2 + $0x68] sm:$0xff] }
  0x1a   : > { %647 = vmatpush.bf16.msra.mxu3 %v6647_v3  ;;  %s6391_s29 = smul.u32 44, %s422_s18  ;;  %v6708_v12 = vld [vmem:[%s8775_s2 + $0x20] sm:$0xff]  ;;  %s5038_s18 = scalar_lea.hbm %s8785_s12, %s6601_s25 }
  0x1b   : > { %509 = vmatpush.bf16.msra.mxu0 %v6654_v4  ;;  %v6713_v13 = vld [vmem:[%s8775_s2] sm:$0xff] }
  0x1c   : > { %549 = vmatpush.bf16.msra.mxu1 %v6659_v5  ;;  %s6701_s30 = scalar_lea.vmem %s8790_s0, %s6391_s29  ;;  %v6720_v14 = vld [vmem:[%s8775_s2 + $0x40] sm:$0xff]  ;;  %s6730_s19 = scalar_lea.vmem %s8774_s1, %s6391_s29 }
  0x1d   : > { %598 = vmatpush.bf16.msra.mxu2 %v6667_v6  ;;  %v6725_v15 = vld [vmem:[%s8775_s2 + $0x60] sm:$0xff]  ;;  %v434_v32 = vld [vmem:[%s6701_s30 + $0x8] sm:$0x7]  ;;  %v435_v40 = vld [vmem:[%s6701_s30 + $0xc] sm:$0x7]  ;;  %s419_s0 = sand.u32 1, %s6505_s22  }
  0x1e   : > { %648 = vmatpush.bf16.msra.mxu3 %v6672_v7  ;;  %v432_v16 = vld [vmem:[%s6701_s30] sm:$0x7]  ;;  %v6737_v19 = vld [vmem:[%s6701_s30 + $0x4] sm:$0x7]  ;;  %v850_v33 = vunpack.c.l.b16 %v434_v32  ;;  %v6795_v34 = vld [vmem:[%s6730_s19 + $0x8] sm:$0x7]  ;;  %v983_v41 = vunpack.c.l.b16 %v435_v40 }
  0x1f   : > { %510 = vmatpush.bf16.msra.mxu0 %v6679_v8  ;;  %v664_v17 = vunpack.c.l.b16 %v432_v16  ;;  %v443_v18 = vld [vmem:[%s6730_s19] sm:$0x7]  ;;  %v717_v20 = vunpack.c.l.b16 %v6737_v19  ;;  %v6743_v21 = vld [vmem:[%s6730_s19 + $0x4] sm:$0x7]  ;;  %v6847_v42 = vld [vmem:[%s6730_s19 + $0xc] sm:$0x7] }
  0x20   : > { %550 = vmatpush.bf16.msra.mxu1 %v6684_v9  ;;  %v851_v35 = vpack.c.b16 %v850_v33, %v850_v33  ;;  %v984_v43 = vpack.c.b16 %v983_v41, %v983_v41  ;;  %v436_v48 = vld [vmem:[%s6701_s30 + $0x10] sm:$0x7]  ;;  %v6947_v58 = vld [vmem:[%s6701_s30 + $0x14] sm:$0x7]  ;;  %s420_s20 = scalar_lea.vmem [#allocation2], %s419_s0  ;;  %s5030_s28 = scalar_lea.sflag [#allocation3], %s419_s0 }
  0x21   : > { %599 = vmatpush.bf16.msra.mxu2 %v6691_v10  ;;  %v665_v22 = vpack.c.b16 %v664_v17, %v664_v17  ;;  %v718_v23 = vpack.c.b16 %v717_v20, %v717_v20  ;;  %v1116_v49 = vunpack.c.l.b16 %v436_v48  ;;  %v6897_v50 = vld [vmem:[%s6730_s19 + $0x10] sm:$0x7]  ;;  %v1249_v60 = vunpack.c.l.b16 %v6947_v58  ;;  %v6953_v61 = vld [vmem:[%s6730_s19 + $0x14] sm:$0x7]  ;;  %s5040_s26 = sshll.u32 %s420_s20, 4  ;;  %s5041_s26 = int_to_ptr.vmem [resolvable:$true] %s5040_s26 }
  0x22   : > { %649 = vmatpush.bf16.msra.mxu3 %v6696_v11  ;;  %v855_v36 = vshll.u32 %v851_v35, 16  ;;  %v853_v37 = vshrl.u32 %v851_v35, 16  ;;  %v988_v44 = vshll.u32 %v984_v43, 16  ;;  %v986_v45 = vshrl.u32 %v984_v43, 16  ;;  %v7013_v43 = vld [vmem:[%s6730_s19 + $0x18] sm:$0x7] }
  0x23   : > { %511 = vmatpush.bf16.msra.mxu0 %v6708_v12  ;;  %v669_v24 = vshll.u32 %v665_v22, 16  ;;  %v722_v25 = vshll.u32 %v718_v23, 16  ;;  %v667_v26 = vshrl.u32 %v665_v22, 16  ;;  %v720_v28 = vshrl.u32 %v718_v23, 16 }
  0x24   : > { %551 = vmatpush.bf16.msra.mxu1 %v6713_v13  ;;  %v857_v38 = vrot.slane %v855_v36, 1  ;;  %v990_v46 = vrot.slane %v988_v44, 1  ;;  %v1117_v51 = vpack.c.b16 %v1116_v49, %v1116_v49  ;;  %v1250_v62 = vpack.c.b16 %v1249_v60, %v1249_v60 }
  0x25   : > { %600 = vmatpush.bf16.msra.mxu2 %v6720_v14  ;;  %v671_v27 = vrot.slane %v669_v24, 1  ;;  %v724_v29 = vrot.slane %v722_v25, 1 }
  0x26   : > { %650 = vmatpush.bf16.msra.mxu3 %v6725_v15  ;;  %5139 = vmatmul.msk.bf16.vlgmr.msra.gmra.mxu0 %vm500_vm0, %v443_v18  ;;  %v858_v39 = vor.u32 %v857_v38, %v853_v37  ;;  %v991_v47 = vor.u32 %v990_v46, %v986_v45  ;;  %v1121_v52 = vshll.u32 %v1117_v51, 16  ;;  %v1119_v53 = vshrl.u32 %v1117_v51, 16 }
  0x27   : > { %680 = vmatpush.bf16.msrb.mxu0 %v6631_v0  ;;  %5156 = vmatmul.msk.bf16.vlgmr.msra.gmra.mxu1 %vm500_vm0, %v432_v16  ;;  %v672_v30 = vor.u32 %v671_v27, %v667_v26  ;;  %v725_v31 = vor.u32 %v724_v29, %v720_v28  ;;  %v1254_v20 = vshll.u32 %v1250_v62, 16  ;;  %v1252_v22 = vshrl.u32 %v1250_v62, 16 }
  0x28   : > { %5181 = vmatmul.msk.bf16.vlgmr.msra.gmra.mxu2 %vm500_vm0, %v6737_v19  ;;  %693 = vmatpush.bf16.msrb.mxu1 %v6636_v1  ;;  %v1123_v54 = vrot.slane %v1121_v52, 1 }
  0x29   : > { %706 = vmatpush.bf16.msrb.mxu2 %v6641_v2  ;;  %5206 = vmatmul.msk.bf16.vlgmr.msra.gmra.mxu3 %vm500_vm0, %v6743_v21  ;;  %v1256_v23 = vrot.slane %v1254_v20, 1 }
  0x2a   : > { %733 = vmatpush.bf16.msrb.mxu3 %v6647_v3  ;;  %v6922_v55 = vor.u32 %v1123_v54, %v1119_v53 }
  0x2b   : > { %681 = vmatpush.bf16.msrb.mxu0 %v6654_v4  ;;  %v6980_v28 = vor.u32 %v1256_v23, %v1252_v22  ;;  %v7068_v22 = vld [vmem:[%s6701_s30 + $0x1c] sm:$0x7] }
  0x2c   : > { %694 = vmatpush.bf16.msrb.mxu1 %v6659_v5 }
  0x2d   : > { %707 = vmatpush.bf16.msrb.mxu2 %v6667_v6 }
  0x2e   : > { %734 = vmatpush.bf16.msrb.mxu3 %v6672_v7 }
  0x2f   : > { %682 = vmatpush.bf16.msrb.mxu0 %v6679_v8 }
  0x30   : > { %695 = vmatpush.bf16.msrb.mxu1 %v6684_v9 }
  0x31   : > { %708 = vmatpush.bf16.msrb.mxu2 %v6691_v10 }
  0x32   : > { %735 = vmatpush.bf16.msrb.mxu3 %v6696_v11 }
  0x33   : > { %683 = vmatpush.bf16.msrb.mxu0 %v6708_v12 }
  0x34   : > { %696 = vmatpush.bf16.msrb.mxu1 %v6713_v13 }
  0x35   : > { %709 = vmatpush.bf16.msrb.mxu2 %v6720_v14 }
  0x36   : > { %736 = vmatpush.bf16.msrb.mxu3 %v6725_v15  ;;  %5207 = vmatmul.msk.bf16.vlgmr.msrb.gmra.mxu0 %vm500_vm0, %v672_v30 }
  0x37   : > { %750 = vmatpush.bf16.msra.mxu0 %v6631_v0  ;;  %5208 = vmatmul.msk.bf16.vlgmr.msrb.gmra.mxu1 %vm500_vm0, %v443_v18 }
  0x38   : > { %763 = vmatpush.bf16.msra.mxu1 %v6636_v1  ;;  %5209 = vmatmul.msk.bf16.vlgmr.msrb.gmra.mxu2 %vm500_vm0, %v6743_v21 }
  0x39   : > { %779 = vmatpush.bf16.msra.mxu2 %v6641_v2  ;;  %5210 = vmatmul.msk.bf16.vlgmr.msrb.gmra.mxu3 %vm500_vm0, %v725_v31 }
  0x3a   : > { %796 = vmatpush.bf16.msra.mxu3 %v6647_v3 }
  0x3b   : > { %751 = vmatpush.bf16.msra.mxu0 %v6654_v4 }
  0x3c   : > { %764 = vmatpush.bf16.msra.mxu1 %v6659_v5 }
  0x3d   : > { %780 = vmatpush.bf16.msra.mxu2 %v6667_v6 }
  0x3e   : > { %797 = vmatpush.bf16.msra.mxu3 %v6672_v7 }
  0x3f   : > { %752 = vmatpush.bf16.msra.mxu0 %v6679_v8 }
  0x40   : > { %765 = vmatpush.bf16.msra.mxu1 %v6684_v9 }
  0x41   : > { %781 = vmatpush.bf16.msra.mxu2 %v6691_v10 }
  0x42   : > { %798 = vmatpush.bf16.msra.mxu3 %v6696_v11 }
  0x43   : > { %753 = vmatpush.bf16.msra.mxu0 %v6708_v12 }
  0x44   : > { %766 = vmatpush.bf16.msra.mxu1 %v6713_v13 }
  0x45   : > { %782 = vmatpush.bf16.msra.mxu2 %v6720_v14 }
  0x46   : > { %799 = vmatpush.bf16.msra.mxu3 %v6725_v15  ;;  %5211 = vmatmul.msk.bf16.vlgmr.msra.gmra.mxu0 %vm500_vm0, %v6743_v21 }
  0x47   : > { %813 = vmatpush.bf16.msrb.mxu0 %v6631_v0  ;;  %5212 = vmatmul.msk.bf16.vlgmr.msra.gmra.mxu1 %vm500_vm0, %v6737_v19 }
  0x48   : > { %826 = vmatpush.bf16.msrb.mxu1 %v6636_v1  ;;  %5213 = vmatmul.msk.bf16.vlgmr.msra.gmra.mxu2 %vm500_vm0, %v434_v32 }
  0x49   : > { %839 = vmatpush.bf16.msrb.mxu2 %v6641_v2  ;;  %5214 = vmatmul.msk.bf16.vlgmr.msra.gmra.mxu3 %vm500_vm0, %v6795_v34 }
  0x4a   : > { %866 = vmatpush.bf16.msrb.mxu3 %v6647_v3 }
  0x4b   : > { %814 = vmatpush.bf16.msrb.mxu0 %v6654_v4 }
  0x4c   : > { %827 = vmatpush.bf16.msrb.mxu1 %v6659_v5 }
  0x4d   : > { %840 = vmatpush.bf16.msrb.mxu2 %v6667_v6 }
  0x4e   : > { %867 = vmatpush.bf16.msrb.mxu3 %v6672_v7 }
  0x4f   : > { %815 = vmatpush.bf16.msrb.mxu0 %v6679_v8 }
  0x50   : > { %828 = vmatpush.bf16.msrb.mxu1 %v6684_v9 }
  0x51   : > { %841 = vmatpush.bf16.msrb.mxu2 %v6691_v10 }
  0x52   : > { %868 = vmatpush.bf16.msrb.mxu3 %v6696_v11 }
  0x53   : > { %816 = vmatpush.bf16.msrb.mxu0 %v6708_v12 }
  0x54   : > { %829 = vmatpush.bf16.msrb.mxu1 %v6713_v13 }
  0x55   : > { %842 = vmatpush.bf16.msrb.mxu2 %v6720_v14 }
  0x56   : > { %869 = vmatpush.bf16.msrb.mxu3 %v6725_v15  ;;  %5215 = vmatmul.msk.bf16.vlgmr.msrb.gmra.mxu0 %vm500_vm0, %v725_v31 }
  0x57   : > { %883 = vmatpush.bf16.msra.mxu0 %v6631_v0  ;;  %5216 = vmatmul.msk.bf16.vlgmr.msrb.gmra.mxu1 %vm500_vm0, %v6743_v21 }
  0x58   : > { %896 = vmatpush.bf16.msra.mxu1 %v6636_v1  ;;  %5217 = vmatmul.msk.bf16.vlgmr.msrb.gmra.mxu2 %vm500_vm0, %v6795_v34 }
  0x59   : > { %912 = vmatpush.bf16.msra.mxu2 %v6641_v2  ;;  %5218 = vmatmul.msk.bf16.vlgmr.msrb.gmra.mxu3 %vm500_vm0, %v858_v39 }
  0x5a   : > { %929 = vmatpush.bf16.msra.mxu3 %v6647_v3 }
  0x5b   : > { %884 = vmatpush.bf16.msra.mxu0 %v6654_v4 }
  0x5c   : > { %897 = vmatpush.bf16.msra.mxu1 %v6659_v5 }
  0x5d   : > { %913 = vmatpush.bf16.msra.mxu2 %v6667_v6 }
  0x5e   : > { %930 = vmatpush.bf16.msra.mxu3 %v6672_v7 }
  0x5f   : > { %885 = vmatpush.bf16.msra.mxu0 %v6679_v8 }
  0x60   : > { %898 = vmatpush.bf16.msra.mxu1 %v6684_v9 }
  0x61   : > { %914 = vmatpush.bf16.msra.mxu2 %v6691_v10 }
  0x62   : > { %931 = vmatpush.bf16.msra.mxu3 %v6696_v11 }
  0x63   : > { %886 = vmatpush.bf16.msra.mxu0 %v6708_v12 }
  0x64   : > { %899 = vmatpush.bf16.msra.mxu1 %v6713_v13 }
  0x65   : > { %915 = vmatpush.bf16.msra.mxu2 %v6720_v14 }
  0x66   : > { %932 = vmatpush.bf16.msra.mxu3 %v6725_v15  ;;  %5219 = vmatmul.msk.bf16.vlgmr.msra.gmra.mxu0 %vm500_vm0, %v6795_v34 }
  0x67   : > { %946 = vmatpush.bf16.msrb.mxu0 %v6631_v0  ;;  %5220 = vmatmul.msk.bf16.vlgmr.msra.gmra.mxu1 %vm500_vm0, %v434_v32 }
  0x68   : > { %959 = vmatpush.bf16.msrb.mxu1 %v6636_v1  ;;  %5221 = vmatmul.msk.bf16.vlgmr.msra.gmra.mxu2 %vm500_vm0, %v435_v40 }
  0x69   : > { %972 = vmatpush.bf16.msrb.mxu2 %v6641_v2  ;;  %5222 = vmatmul.msk.bf16.vlgmr.msra.gmra.mxu3 %vm500_vm0, %v6847_v42 }
  0x6a   : > { %999 = vmatpush.bf16.msrb.mxu3 %v6647_v3 }
  0x6b   : > { %947 = vmatpush.bf16.msrb.mxu0 %v6654_v4 }
  0x6c   : > { %960 = vmatpush.bf16.msrb.mxu1 %v6659_v5 }
  0x6d   : > { %973 = vmatpush.bf16.msrb.mxu2 %v6667_v6 }
  0x6e   : > { %1000 = vmatpush.bf16.msrb.mxu3 %v6672_v7 }
  0x6f   : > { %948 = vmatpush.bf16.msrb.mxu0 %v6679_v8 }
  0x70   : > { %961 = vmatpush.bf16.msrb.mxu1 %v6684_v9 }
  0x71   : > { %974 = vmatpush.bf16.msrb.mxu2 %v6691_v10 }
  0x72   : > { %1001 = vmatpush.bf16.msrb.mxu3 %v6696_v11 }
  0x73   : > { %949 = vmatpush.bf16.msrb.mxu0 %v6708_v12 }
  0x74   : > { %962 = vmatpush.bf16.msrb.mxu1 %v6713_v13 }
  0x75   : > { %975 = vmatpush.bf16.msrb.mxu2 %v6720_v14 }
  0x76   : > { %1002 = vmatpush.bf16.msrb.mxu3 %v6725_v15  ;;  %5223 = vmatmul.msk.bf16.vlgmr.msrb.gmra.mxu0 %vm500_vm0, %v858_v39  ;;  %v7007_v39 = vld [vmem:[%s6701_s30 + $0x18] sm:$0x7] }
  0x77   : > { %1016 = vmatpush.bf16.msra.mxu0 %v6631_v0  ;;  %5224 = vmatmul.msk.bf16.vlgmr.msrb.gmra.mxu1 %vm500_vm0, %v6795_v34  ;;  %v1382_v41 = vunpack.c.l.b16 %v7007_v39 }
  0x78   : > { %1029 = vmatpush.bf16.msra.mxu1 %v6636_v1  ;;  %5225 = vmatmul.msk.bf16.vlgmr.msrb.gmra.mxu2 %vm500_vm0, %v6847_v42 }
  0x79   : > { %1045 = vmatpush.bf16.msra.mxu2 %v6641_v2  ;;  %5226 = vmatmul.msk.bf16.vlgmr.msrb.gmra.mxu3 %vm500_vm0, %v991_v47  ;;  %v1383_v44 = vpack.c.b16 %v1382_v41, %v1382_v41 }
  0x7a   : > { %1062 = vmatpush.bf16.msra.mxu3 %v6647_v3 }
  0x7b   : > { %1017 = vmatpush.bf16.msra.mxu0 %v6654_v4  ;;  %v1387_v49 = vshll.u32 %v1383_v44, 16  ;;  %v1385_v52 = vshrl.u32 %v1383_v44, 16 }
  0x7c   : > { %1030 = vmatpush.bf16.msra.mxu1 %v6659_v5 }
  0x7d   : > { %1046 = vmatpush.bf16.msra.mxu2 %v6667_v6  ;;  %v1389_v53 = vrot.slane %v1387_v49, 1 }
  0x7e   : > { %1063 = vmatpush.bf16.msra.mxu3 %v6672_v7 }
  0x7f   : > { %1018 = vmatpush.bf16.msra.mxu0 %v6679_v8 }
  0x80   : > { %1031 = vmatpush.bf16.msra.mxu1 %v6684_v9 }
  0x81   : > { %1047 = vmatpush.bf16.msra.mxu2 %v6691_v10 }
  0x82   : > { %1064 = vmatpush.bf16.msra.mxu3 %v6696_v11 }
  0x83   : > { %1019 = vmatpush.bf16.msra.mxu0 %v6708_v12 }
  0x84   : > { %1032 = vmatpush.bf16.msra.mxu1 %v6713_v13 }
  0x85   : > { %1048 = vmatpush.bf16.msra.mxu2 %v6720_v14 }
  0x86   : > { %1065 = vmatpush.bf16.msra.mxu3 %v6725_v15  ;;  %5227 = vmatmul.msk.bf16.vlgmr.msra.gmra.mxu0 %vm500_vm0, %v6847_v42 }
  0x87   : > { %1079 = vmatpush.bf16.msrb.mxu0 %v6631_v0  ;;  %5228 = vmatmul.msk.bf16.vlgmr.msra.gmra.mxu1 %vm500_vm0, %v435_v40 }
  0x88   : > { %1092 = vmatpush.bf16.msrb.mxu1 %v6636_v1  ;;  %5229 = vmatmul.msk.bf16.vlgmr.msra.gmra.mxu2 %vm500_vm0, %v436_v48 }
  0x89   : > { %1105 = vmatpush.bf16.msrb.mxu2 %v6641_v2  ;;  %5230 = vmatmul.msk.bf16.vlgmr.msra.gmra.mxu3 %vm500_vm0, %v6897_v50 }
  0x8a   : > { %1132 = vmatpush.bf16.msrb.mxu3 %v6647_v3 }
  0x8b   : > { %1080 = vmatpush.bf16.msrb.mxu0 %v6654_v4 }
  0x8c   : > { %1093 = vmatpush.bf16.msrb.mxu1 %v6659_v5 }
  0x8d   : > { %1106 = vmatpush.bf16.msrb.mxu2 %v6667_v6 }
  0x8e   : > { %1133 = vmatpush.bf16.msrb.mxu3 %v6672_v7 }
  0x8f   : > { %1081 = vmatpush.bf16.msrb.mxu0 %v6679_v8 }
  0x90   : > { %1094 = vmatpush.bf16.msrb.mxu1 %v6684_v9 }
  0x91   : > { %1107 = vmatpush.bf16.msrb.mxu2 %v6691_v10 }
  0x92   : > { %1134 = vmatpush.bf16.msrb.mxu3 %v6696_v11 }
  0x93   : > { %1082 = vmatpush.bf16.msrb.mxu0 %v6708_v12 }
  0x94   : > { %1095 = vmatpush.bf16.msrb.mxu1 %v6713_v13 }
  0x95   : > { %1108 = vmatpush.bf16.msrb.mxu2 %v6720_v14 }
  0x96   : > { %1135 = vmatpush.bf16.msrb.mxu3 %v6725_v15  ;;  %5231 = vmatmul.msk.bf16.vlgmr.msrb.gmra.mxu0 %vm500_vm0, %v991_v47 }
  0x97   : > { %1149 = vmatpush.bf16.msra.mxu0 %v6631_v0  ;;  %5232 = vmatmul.msk.bf16.vlgmr.msrb.gmra.mxu1 %vm500_vm0, %v6847_v42 }
  0x98   : > { %1162 = vmatpush.bf16.msra.mxu1 %v6636_v1  ;;  %5233 = vmatmul.msk.bf16.vlgmr.msrb.gmra.mxu2 %vm500_vm0, %v6897_v50 }
  0x99   : > { %1178 = vmatpush.bf16.msra.mxu2 %v6641_v2  ;;  %5234 = vmatmul.msk.bf16.vlgmr.msrb.gmra.mxu3 %vm500_vm0, %v6922_v55 }
  0x9a   : > { %1195 = vmatpush.bf16.msra.mxu3 %v6647_v3 }
  0x9b   : > { %1150 = vmatpush.bf16.msra.mxu0 %v6654_v4 }
  0x9c   : > { %1163 = vmatpush.bf16.msra.mxu1 %v6659_v5 }
  0x9d   : > { %1179 = vmatpush.bf16.msra.mxu2 %v6667_v6 }
  0x9e   : > { %1196 = vmatpush.bf16.msra.mxu3 %v6672_v7 }
  0x9f   : > { %1151 = vmatpush.bf16.msra.mxu0 %v6679_v8 }
  0xa0   : > { %1164 = vmatpush.bf16.msra.mxu1 %v6684_v9 }
  0xa1   : > { %1180 = vmatpush.bf16.msra.mxu2 %v6691_v10 }
  0xa2   : > { %1197 = vmatpush.bf16.msra.mxu3 %v6696_v11 }
  0xa3   : > { %1152 = vmatpush.bf16.msra.mxu0 %v6708_v12  ;;  %v513_v56 = vpop.f32.mrf.mxu0 }
  0xa4   : > { %1165 = vmatpush.bf16.msra.mxu1 %v6713_v13  ;;  %v553_v57 = vpop.f32.mrf.mxu1 }
  0xa5   : > { %1181 = vmatpush.bf16.msra.mxu2 %v6720_v14  ;;  %v554_v59 = vadd.f32 %v553_v57, %v513_v56 }
  0xa6   : > { %1198 = vmatpush.bf16.msra.mxu3 %v6725_v15  ;;  %5235 = vmatmul.msk.bf16.vlgmr.msra.gmra.mxu0 %vm500_vm0, %v6897_v50 }
  0xa7   : > { %1212 = vmatpush.bf16.msrb.mxu0 %v6631_v0  ;;  %5236 = vmatmul.msk.bf16.vlgmr.msra.gmra.mxu1 %vm500_vm0, %v436_v48 }
  0xa8   : > { %1225 = vmatpush.bf16.msrb.mxu1 %v6636_v1  ;;  %5237 = vmatmul.msk.bf16.vlgmr.msra.gmra.mxu2 %vm500_vm0, %v6947_v58 }
  0xa9   : > { %1238 = vmatpush.bf16.msrb.mxu2 %v6641_v2  ;;  %5238 = vmatmul.msk.bf16.vlgmr.msra.gmra.mxu3 %vm500_vm0, %v6953_v61 }
  0xaa   : > { %1265 = vmatpush.bf16.msrb.mxu3 %v6647_v3 }
  0xab   : > { %1213 = vmatpush.bf16.msrb.mxu0 %v6654_v4  ;;  %v602_v63 = vpop.f32.mrf.mxu2  ;;  %v515_v18 = vpop.f32.mrf.mxu0 }
  0xac   : > { %1226 = vmatpush.bf16.msrb.mxu1 %v6659_v5  ;;  %v652_v16 = vpop.f32.mrf.mxu3  ;;  %v606_v17 = vadd.f32 %v602_v63, %v554_v59  ;;  %v555_v19 = vpop.f32.mrf.mxu1 }
  0xad   : > { %1239 = vmatpush.bf16.msrb.mxu2 %v6667_v6 }
  0xae   : > { %1266 = vmatpush.bf16.msrb.mxu3 %v6672_v7  ;;  %v6970_v21 = vadd.f32 %v652_v16, %v606_v17 }
  0xaf   : > { %1214 = vmatpush.bf16.msrb.mxu0 %v6679_v8 }
  0xb0   : > { %1227 = vmatpush.bf16.msrb.mxu1 %v6684_v9 }
  0xb1   : > { %1240 = vmatpush.bf16.msrb.mxu2 %v6691_v10 }
  0xb2   : > { %1267 = vmatpush.bf16.msrb.mxu3 %v6696_v11 }
  0xb3   : > { %1215 = vmatpush.bf16.msrb.mxu0 %v6708_v12  ;;  %v604_v24 = vpop.f32.mrf.mxu2  ;;  %v685_v26 = vpop.f32.mrf.mxu0 }
  0xb4   : > { %1228 = vmatpush.bf16.msrb.mxu1 %v6713_v13  ;;  %v654_v25 = vpop.f32.mrf.mxu3  ;;  %v698_v27 = vpop.f32.mrf.mxu1  ;;  %v1515_v24 = vunpack.c.l.b16 %v7068_v22 }
  0xb5   : > { %1241 = vmatpush.bf16.msrb.mxu2 %v6720_v14  ;;  %v699_v29 = vadd.f32 %v698_v27, %v685_v26  ;;  %v7074_v26 = vld [vmem:[%s6730_s19 + $0x1c] sm:$0x7] }
  0xb6   : > { %1268 = vmatpush.bf16.msrb.mxu3 %v6725_v15  ;;  %5239 = vmatmul.msk.bf16.vlgmr.msrb.gmra.mxu0 %vm500_vm0, %v6922_v55  ;;  %v1516_v27 = vpack.c.b16 %v1515_v24, %v1515_v24 }
  0xb7   : > { %1282 = vmatpush.bf16.msra.mxu0 %v6631_v0  ;;  %5240 = vmatmul.msk.bf16.vlgmr.msrb.gmra.mxu1 %vm500_vm0, %v6897_v50 }
  0xb8   : > { %1295 = vmatpush.bf16.msra.mxu1 %v6636_v1  ;;  %5241 = vmatmul.msk.bf16.vlgmr.msrb.gmra.mxu2 %vm500_vm0, %v6953_v61 }
  0xb9   : > { %1311 = vmatpush.bf16.msra.mxu2 %v6641_v2  ;;  %5242 = vmatmul.msk.bf16.vlgmr.msrb.gmra.mxu3 %vm500_vm0, %v6980_v28 }
  0xba   : > { %1328 = vmatpush.bf16.msra.mxu3 %v6647_v3 }
  0xbb   : > { %1283 = vmatpush.bf16.msra.mxu0 %v6654_v4  ;;  %v711_v30 = vpop.f32.mrf.mxu2  ;;  %v687_v33 = vpop.f32.mrf.mxu0 }
  0xbc   : > { %1296 = vmatpush.bf16.msra.mxu1 %v6659_v5  ;;  %v715_v31 = vadd.f32 %v711_v30, %v699_v29  ;;  %v738_v32 = vpop.f32.mrf.mxu3  ;;  %v700_v34 = vpop.f32.mrf.mxu1 }
  0xbd   : > { %1312 = vmatpush.bf16.msra.mxu2 %v6667_v6 }
  0xbe   : > { %1329 = vmatpush.bf16.msra.mxu3 %v6672_v7  ;;  %v6998_v35 = vadd.f32 %v738_v32, %v715_v31  ;;  %v1520_v32 = vshll.u32 %v1516_v27, 16 }
  0xbf   : > { %1284 = vmatpush.bf16.msra.mxu0 %v6679_v8 }
  0xc0   : > { %1297 = vmatpush.bf16.msra.mxu1 %v6684_v9 }
  0xc1   : > { %1313 = vmatpush.bf16.msra.mxu2 %v6691_v10 }
  0xc2   : > { %1330 = vmatpush.bf16.msra.mxu3 %v6696_v11 }
  0xc3   : > { %1285 = vmatpush.bf16.msra.mxu0 %v6708_v12  ;;  %v713_v36 = vpop.f32.mrf.mxu2  ;;  %v755_v38 = vpop.f32.mrf.mxu0 }
  0xc4   : > { %1298 = vmatpush.bf16.msra.mxu1 %v6713_v13  ;;  %v740_v37 = vpop.f32.mrf.mxu3  ;;  %v768_v40 = vpop.f32.mrf.mxu1  ;;  %v1518_v36 = vshrl.u32 %v1516_v27, 16 }
  0xc5   : > { %1314 = vmatpush.bf16.msra.mxu2 %v6720_v14  ;;  %v769_v42 = vadd.f32 %v768_v40, %v755_v38  ;;  %v1522_v37 = vrot.slane %v1520_v32, 1 }
  0xc6   : > { %1331 = vmatpush.bf16.msra.mxu3 %v6725_v15  ;;  %5243 = vmatmul.msk.bf16.vlgmr.msra.gmra.mxu0 %vm500_vm0, %v6953_v61 }
  0xc7   : > { %1345 = vmatpush.bf16.msrb.mxu0 %v6631_v0  ;;  %5244 = vmatmul.msk.bf16.vlgmr.msra.gmra.mxu1 %vm500_vm0, %v6947_v58  ;;  %v7041_v58 = vor.u32 %v1389_v53, %v1385_v52  ;;  %v7102_v41 = vor.u32 %v1522_v37, %v1518_v36  ;;  %v7230_v36 = vld [vmem:[%s8775_s2 + $0x8] sm:$0xff] }
  0xc8   : > { %1358 = vmatpush.bf16.msrb.mxu1 %v6636_v1  ;;  %5245 = vmatmul.msk.bf16.vlgmr.msra.gmra.mxu2 %vm500_vm0, %v7007_v39 }
  0xc9   : > { %1371 = vmatpush.bf16.msrb.mxu2 %v6641_v2  ;;  %5246 = vmatmul.msk.bf16.vlgmr.msra.gmra.mxu3 %vm500_vm0, %v7013_v43 }
  0xca   : > { %1398 = vmatpush.bf16.msrb.mxu3 %v6647_v3 }
  0xcb   : > { %1346 = vmatpush.bf16.msrb.mxu0 %v6654_v4  ;;  %v784_v45 = vpop.f32.mrf.mxu2  ;;  %v757_v48 = vpop.f32.mrf.mxu0 }
  0xcc   : > { %1359 = vmatpush.bf16.msrb.mxu1 %v6659_v5  ;;  %v788_v46 = vadd.f32 %v784_v45, %v769_v42  ;;  %v801_v47 = vpop.f32.mrf.mxu3  ;;  %v770_v50 = vpop.f32.mrf.mxu1 }
  0xcd   : > { %1372 = vmatpush.bf16.msrb.mxu2 %v6667_v6 }
  0xce   : > { %1399 = vmatpush.bf16.msrb.mxu3 %v6672_v7  ;;  %v7031_v51 = vadd.f32 %v801_v47, %v788_v46 }
  0xcf   : > { %1347 = vmatpush.bf16.msrb.mxu0 %v6679_v8 }
  0xd0   : > { %1360 = vmatpush.bf16.msrb.mxu1 %v6684_v9 }
  0xd1   : > { %1373 = vmatpush.bf16.msrb.mxu2 %v6691_v10 }
  0xd2   : > { %1400 = vmatpush.bf16.msrb.mxu3 %v6696_v11 }
  0xd3   : > { %1348 = vmatpush.bf16.msrb.mxu0 %v6708_v12  ;;  %v786_v54 = vpop.f32.mrf.mxu2  ;;  %v818_v56 = vpop.f32.mrf.mxu0 }
  0xd4   : > { %1361 = vmatpush.bf16.msrb.mxu1 %v6713_v13  ;;  %v803_v55 = vpop.f32.mrf.mxu3  ;;  %v831_v57 = vpop.f32.mrf.mxu1  ;;  %v7129_v54 = vld [vmem:[%s6701_s30 + $0x20] sm:$0x7] }
  0xd5   : > { %1374 = vmatpush.bf16.msrb.mxu2 %v6720_v14  ;;  %v832_v59 = vadd.f32 %v831_v57, %v818_v56  ;;  %v1648_v56 = vunpack.c.l.b16 %v7129_v54 }
  0xd6   : > { %1401 = vmatpush.bf16.msrb.mxu3 %v6725_v15  ;;  %5247 = vmatmul.msk.bf16.vlgmr.msrb.gmra.mxu0 %vm500_vm0, %v6980_v28 }
  0xd7   : > { %1415 = vmatpush.bf16.msra.mxu0 %v6631_v0  ;;  %5248 = vmatmul.msk.bf16.vlgmr.msrb.gmra.mxu1 %vm500_vm0, %v6953_v61 }
  0xd8   : > { %1428 = vmatpush.bf16.msra.mxu1 %v6636_v1  ;;  %5249 = vmatmul.msk.bf16.vlgmr.msrb.gmra.mxu2 %vm500_vm0, %v7013_v43 }
  0xd9   : > { %1444 = vmatpush.bf16.msra.mxu2 %v6641_v2  ;;  %5250 = vmatmul.msk.bf16.vlgmr.msrb.gmra.mxu3 %vm500_vm0, %v7041_v58 }
  0xda   : > { %1461 = vmatpush.bf16.msra.mxu3 %v6647_v3 }
  0xdb   : > { %1416 = vmatpush.bf16.msra.mxu0 %v6654_v4  ;;  %v844_v60 = vpop.f32.mrf.mxu2  ;;  %v820_v63 = vpop.f32.mrf.mxu0 }
  0xdc   : > { %1429 = vmatpush.bf16.msra.mxu1 %v6659_v5  ;;  %v848_v62 = vadd.f32 %v844_v60, %v832_v59  ;;  %v871_v61 = vpop.f32.mrf.mxu3  ;;  %v833_v16 = vpop.f32.mrf.mxu1  ;;  %v1649_v59 = vpack.c.b16 %v1648_v56, %v1648_v56 }
  0xdd   : > { %1445 = vmatpush.bf16.msra.mxu2 %v6667_v6 }
  0xde   : > { %1462 = vmatpush.bf16.msra.mxu3 %v6672_v7  ;;  %v7059_v17 = vadd.f32 %v871_v61, %v848_v62  ;;  %v1653_v16 = vshll.u32 %v1649_v59, 16 }
  0xdf   : > { %1417 = vmatpush.bf16.msra.mxu0 %v6679_v8 }
  0xe0   : > { %1430 = vmatpush.bf16.msra.mxu1 %v6684_v9 }
  0xe1   : > { %1446 = vmatpush.bf16.msra.mxu2 %v6691_v10 }
  0xe2   : > { %1463 = vmatpush.bf16.msra.mxu3 %v6696_v11 }
  0xe3   : > { %1418 = vmatpush.bf16.msra.mxu0 %v6708_v12  ;;  %v846_v18 = vpop.f32.mrf.mxu2  ;;  %v888_v20 = vpop.f32.mrf.mxu0 }
  0xe4   : > { %1431 = vmatpush.bf16.msra.mxu1 %v6713_v13  ;;  %v873_v19 = vpop.f32.mrf.mxu3  ;;  %v901_v23 = vpop.f32.mrf.mxu1 }
  0xe5   : > { %1447 = vmatpush.bf16.msra.mxu2 %v6720_v14  ;;  %v902_v25 = vadd.f32 %v901_v23, %v888_v20 }
  0xe6   : > { %1464 = vmatpush.bf16.msra.mxu3 %v6725_v15  ;;  %5251 = vmatmul.msk.bf16.vlgmr.msra.gmra.mxu0 %vm500_vm0, %v7013_v43 }
  0xe7   : > { %1478 = vmatpush.bf16.msrb.mxu0 %v6631_v0  ;;  %5252 = vmatmul.msk.bf16.vlgmr.msra.gmra.mxu1 %vm500_vm0, %v7007_v39 }
  0xe8   : > { %1491 = vmatpush.bf16.msrb.mxu1 %v6636_v1  ;;  %5253 = vmatmul.msk.bf16.vlgmr.msra.gmra.mxu2 %vm500_vm0, %v7068_v22 }
  0xe9   : > { %1504 = vmatpush.bf16.msrb.mxu2 %v6641_v2  ;;  %5254 = vmatmul.msk.bf16.vlgmr.msra.gmra.mxu3 %vm500_vm0, %v7074_v26 }
  0xea   : > { %1531 = vmatpush.bf16.msrb.mxu3 %v6647_v3 }
  0xeb   : > { %1479 = vmatpush.bf16.msrb.mxu0 %v6654_v4  ;;  %v917_v28 = vpop.f32.mrf.mxu2  ;;  %v890_v31 = vpop.f32.mrf.mxu0 }
  0xec   : > { %1492 = vmatpush.bf16.msrb.mxu1 %v6659_v5  ;;  %v921_v29 = vadd.f32 %v917_v28, %v902_v25  ;;  %v934_v30 = vpop.f32.mrf.mxu3  ;;  %v903_v33 = vpop.f32.mrf.mxu1  ;;  %v7198_v25 = vld [vmem:[%s8775_s2 + $0x78] sm:$0xff]  ;;  %v7207_v28 = vld [vmem:[%s8775_s2 + $0x30] sm:$0xff] }
  0xed   : > { %1505 = vmatpush.bf16.msrb.mxu2 %v6667_v6  ;;  %v7225_v33 = vld [vmem:[%s6701_s30 + $0x24] sm:$0x7] }
  0xee   : > { %1532 = vmatpush.bf16.msrb.mxu3 %v6672_v7  ;;  %v7092_v34 = vadd.f32 %v934_v30, %v921_v29  ;;  %v7213_v29 = vld [vmem:[%s8775_s2 + $0x10] sm:$0xff] }
  0xef   : > { %1480 = vmatpush.bf16.msrb.mxu0 %v6679_v8  ;;  %v7219_v30 = vld [vmem:[%s8775_s2 + $0x70] sm:$0xff] }
  0xf0   : > { %1493 = vmatpush.bf16.msrb.mxu1 %v6684_v9 }
  0xf1   : > { %1506 = vmatpush.bf16.msrb.mxu2 %v6691_v10 }
  0xf2   : > { %1533 = vmatpush.bf16.msrb.mxu3 %v6696_v11 }
  0xf3   : > { %1481 = vmatpush.bf16.msrb.mxu0 %v6708_v12  ;;  %v919_v38 = vpop.f32.mrf.mxu2  ;;  %v951_v40 = vpop.f32.mrf.mxu0 }
  0xf4   : > { %1494 = vmatpush.bf16.msrb.mxu1 %v6713_v13  ;;  %v936_v39 = vpop.f32.mrf.mxu3  ;;  %v964_v42 = vpop.f32.mrf.mxu1  ;;  %v1781_v38 = vunpack.c.l.b16 %v7225_v33 }
  0xf5   : > { %1507 = vmatpush.bf16.msrb.mxu2 %v6720_v14  ;;  %v965_v44 = vadd.f32 %v964_v42, %v951_v40  ;;  %v7262_v40 = vld [vmem:[%s8775_s2 + $0x60] sm:$0xff] }
  0xf6   : > { %1534 = vmatpush.bf16.msrb.mxu3 %v6725_v15  ;;  %5255 = vmatmul.msk.bf16.vlgmr.msrb.gmra.mxu0 %vm500_vm0, %v7041_v58  ;;  %v7135_v58 = vld [vmem:[%s6730_s19 + $0x20] sm:$0x7] }
  0xf7   : > { %1548 = vmatpush.bf16.msra.mxu0 %v6631_v0  ;;  %5256 = vmatmul.msk.bf16.vlgmr.msrb.gmra.mxu1 %vm500_vm0, %v7013_v43 }
  0xf8   : > { %1561 = vmatpush.bf16.msra.mxu1 %v6636_v1  ;;  %5257 = vmatmul.msk.bf16.vlgmr.msrb.gmra.mxu2 %vm500_vm0, %v7074_v26 }
  0xf9   : > { %1577 = vmatpush.bf16.msra.mxu2 %v6641_v2  ;;  %5258 = vmatmul.msk.bf16.vlgmr.msrb.gmra.mxu3 %vm500_vm0, %v7102_v41 }
  0xfa   : > { %1594 = vmatpush.bf16.msra.mxu3 %v6647_v3 }
  0xfb   : > { %1549 = vmatpush.bf16.msra.mxu0 %v6654_v4  ;;  %v977_v45 = vpop.f32.mrf.mxu2  ;;  %v953_v47 = vpop.f32.mrf.mxu0 }
  0xfc   : > { %1562 = vmatpush.bf16.msra.mxu1 %v6659_v5  ;;  %v981_v46 = vadd.f32 %v977_v45, %v965_v44  ;;  %v1004_v43 = vpop.f32.mrf.mxu3  ;;  %v966_v48 = vpop.f32.mrf.mxu1 }
  0xfd   : > { %1578 = vmatpush.bf16.msra.mxu2 %v6667_v6  ;;  %v6445_v48 = vld [vmem:[%s8775_s2 + $0x50] sm:$0xff] }
  0xfe   : > { %1595 = vmatpush.bf16.msra.mxu3 %v6672_v7  ;;  %v7120_v49 = vadd.f32 %v1004_v43, %v981_v46 }
  0xff   : > { %1550 = vmatpush.bf16.msra.mxu0 %v6679_v8 }
 0x100   : > { %1563 = vmatpush.bf16.msra.mxu1 %v6684_v9 }
 0x101   : > { %1579 = vmatpush.bf16.msra.mxu2 %v6691_v10 }
 0x102   : > { %1596 = vmatpush.bf16.msra.mxu3 %v6696_v11 }
 0x103   : > { %1551 = vmatpush.bf16.msra.mxu0 %v6708_v12  ;;  %v979_v50 = vpop.f32.mrf.mxu2  ;;  %v1021_v53 = vpop.f32.mrf.mxu0 }
 0x104   : > { %1564 = vmatpush.bf16.msra.mxu1 %v6713_v13  ;;  %v1006_v52 = vpop.f32.mrf.mxu3  ;;  %v1034_v55 = vpop.f32.mrf.mxu1 }
 0x105   : > { %1580 = vmatpush.bf16.msra.mxu2 %v6720_v14  ;;  %v1035_v57 = vadd.f32 %v1034_v55, %v1021_v53  ;;  %v6447_v55 = vld [vmem:[%s8775_s2 + $0x28] sm:$0xff] }
 0x106   : > { %1597 = vmatpush.bf16.msra.mxu3 %v6725_v15  ;;  %5259 = vmatmul.msk.bf16.vlgmr.msra.gmra.mxu0 %vm500_vm0, %v7074_v26 }
 0x107   : > { %1611 = vmatpush.bf16.msrb.mxu0 %v6631_v0  ;;  %5260 = vmatmul.msk.bf16.vlgmr.msra.gmra.mxu1 %vm500_vm0, %v7068_v22 }
 0x108   : > { %1624 = vmatpush.bf16.msrb.mxu1 %v6636_v1  ;;  %5261 = vmatmul.msk.bf16.vlgmr.msra.gmra.mxu2 %vm500_vm0, %v7129_v54 }
 0x109   : > { %1637 = vmatpush.bf16.msrb.mxu2 %v6641_v2  ;;  %5262 = vmatmul.msk.bf16.vlgmr.msra.gmra.mxu3 %vm500_vm0, %v7135_v58 }
 0x10a   : > { %1664 = vmatpush.bf16.msrb.mxu3 %v6647_v3 }
 0x10b   : > { %1612 = vmatpush.bf16.msrb.mxu0 %v6654_v4  ;;  %v1050_v60 = vpop.f32.mrf.mxu2  ;;  %v1023_v63 = vpop.f32.mrf.mxu0 }
 0x10c   : > { %1625 = vmatpush.bf16.msrb.mxu1 %v6659_v5  ;;  %v1054_v62 = vadd.f32 %v1050_v60, %v1035_v57  ;;  %v1067_v61 = vpop.f32.mrf.mxu3  ;;  %v1036_v18 = vpop.f32.mrf.mxu1  ;;  %v6449_v63 = vld [vmem:[%s8775_s2 + $0x40] sm:$0xff] }
 0x10d   : > { %1638 = vmatpush.bf16.msrb.mxu2 %v6667_v6 }
 0x10e   : > { %1665 = vmatpush.bf16.msrb.mxu3 %v6672_v7  ;;  %v7153_v19 = vadd.f32 %v1067_v61, %v1054_v62 }
 0x10f   : > { %1613 = vmatpush.bf16.msrb.mxu0 %v6679_v8 }
 0x110   : > { %1626 = vmatpush.bf16.msrb.mxu1 %v6684_v9 }
 0x111   : > { %1639 = vmatpush.bf16.msrb.mxu2 %v6691_v10 }
 0x112   : > { %1666 = vmatpush.bf16.msrb.mxu3 %v6696_v11 }
 0x113   : > { %1614 = vmatpush.bf16.msrb.mxu0 %v6708_v12  ;;  %v1052_v20 = vpop.f32.mrf.mxu2 }
 0x114   : > { %1627 = vmatpush.bf16.msrb.mxu1 %v6713_v13 }
 0x115   : > { %1640 = vmatpush.bf16.msrb.mxu2 %v6720_v14 }
 0x116   : > { %1667 = vmatpush.bf16.msrb.mxu3 %v6725_v15  ;;  %5263 = vmatmul.msk.bf16.vlgmr.msrb.gmra.mxu0 %vm500_vm0, %v7102_v41 }
 0x117   : > { %1681 = vmatpush.bf16.msra.mxu0 %v6631_v0  ;;  %v1651_v0 = vshrl.u32 %v1649_v59, 16  ;;  %5264 = vmatmul.msk.bf16.vlgmr.msrb.gmra.mxu1 %vm500_vm0, %v7074_v26  ;;  %v6448_v59 = vld [vmem:[%s8775_s2 + $0x68] sm:$0xff] }
 0x118   : > { %1694 = vmatpush.bf16.msra.mxu1 %v6636_v1  ;;  %v1069_v1 = vpop.f32.mrf.mxu3  ;;  %5265 = vmatmul.msk.bf16.vlgmr.msrb.gmra.mxu2 %vm500_vm0, %v7135_v58 }
 0x119   : > { %1710 = vmatpush.bf16.msra.mxu2 %v6641_v2  ;;  %v1655_v2 = vrot.slane %v1653_v16, 1 }
 0x11a   : > { %1727 = vmatpush.bf16.msra.mxu3 %v6647_v3  ;;  %v1084_v3 = vpop.f32.mrf.mxu0 }
 0x11b   : > { %1682 = vmatpush.bf16.msra.mxu0 %v6654_v4  ;;  %v7163_v22 = vor.u32 %v1655_v2, %v1651_v0  ;;  %v1097_v4 = vpop.f32.mrf.mxu1 }
 0x11c   : > { %1695 = vmatpush.bf16.msra.mxu1 %v6659_v5  ;;  %v1098_v23 = vadd.f32 %v1097_v4, %v1084_v3  ;;  %v1110_v5 = vpop.f32.mrf.mxu2  ;;  %v442_v4 = vld [vmem:[%s6701_s30 + $0x28] sm:$0x7]  ;;  %s5042_s30 = sshll.u32 %s5038_s18, 4  ;;  %s5043_s30 = int_to_ptr.hbm [resolvable:$true] %s5042_s30 }
 0x11d   : > { %1711 = vmatpush.bf16.msra.mxu2 %v6667_v6  ;;  %5266 = vmatmul.msk.bf16.vlgmr.msrb.gmra.mxu3 %vm500_vm0, %v7163_v22 }
 0x11e   : > { %1728 = vmatpush.bf16.msra.mxu3 %v6672_v7  ;;  %v7180_v7 = vld [vmem:[%s8775_s2 + $0x58] sm:$0xff] }
 0x11f   : > { %1683 = vmatpush.bf16.msra.mxu0 %v6679_v8 }
 0x120   : > { %1696 = vmatpush.bf16.msra.mxu1 %v6684_v9  ;;  %v7186_v9 = vld [vmem:[%s8775_s2 + $0x38] sm:$0xff]  ;;  %v1137_v24 = vpop.f32.mrf.mxu3 }
 0x121   : > { %1712 = vmatpush.bf16.msra.mxu2 %v6691_v10 }
 0x122   : > { %1729 = vmatpush.bf16.msra.mxu3 %v6696_v11 }
 0x123   : > { %1684 = vmatpush.bf16.msra.mxu0 %v6708_v12  ;;  %v1114_v12 = vadd.f32 %v1110_v5, %v1098_v23  ;;  %v1099_v26 = vpop.f32.mrf.mxu1  ;;  %v7317_v23 = vld [vmem:[%s8776_s3] ss:$0 sm:$0xff] }
 0x124   : > { %1697 = vmatpush.bf16.msra.mxu1 %v6713_v13  ;;  %v1086_v13 = vpop.f32.mrf.mxu0  ;;  %v660_v26 = vadd.f32 %v7317_v23, %v6970_v21  ;;  %v7358_v21 = vld [vmem:[%s8777_s4 + $0x20] sm:$0xff] }
 0x125   : > { %1713 = vmatpush.bf16.msra.mxu2 %v6720_v14  ;;  %v7201_v27 = vadd.f32 %v1137_v24, %v1114_v12  ;;  %v453_v12 = vld [vmem:[%s6730_s19 + $0x28] sm:$0x7]  ;;  %v7330_v13 = vld [vmem:[%s8777_s4 + $0x18] sm:$0xff] }
 0x126   : > { %1730 = vmatpush.bf16.msra.mxu3 %v6725_v15  ;;  %v7192_v15 = vld [vmem:[%s8775_s2 + $0x18] sm:$0xff]  ;;  %5267 = vmatmul.msk.bf16.vlgmr.msra.gmra.mxu0 %vm500_vm0, %v7135_v58  ;;  %v7325_v24 = vld [vmem:[%s8777_s4 + $0x28] sm:$0xff] }
 0x127   : > { %1744 = vmatpush.bf16.msrb.mxu0 %v7186_v9  ;;  %5268 = vmatmul.msk.bf16.vlgmr.msra.gmra.mxu1 %vm500_vm0, %v7129_v54  ;;  %v6446_v54 = vld [vmem:[%s8775_s2 + $0x48] sm:$0xff] }
 0x128   : > { %1757 = vmatpush.bf16.msrb.mxu1 %v7192_v15  ;;  %v1139_v31 = vpop.f32.mrf.mxu3  ;;  %5269 = vmatmul.msk.bf16.vlgmr.msra.gmra.mxu2 %vm500_vm0, %v7225_v33 }
 0x129   : > { %1770 = vmatpush.bf16.msrb.mxu2 %v7180_v7 }
 0x12a   : > { %1797 = vmatpush.bf16.msrb.mxu3 %v7198_v25 }
 0x12b   : > { %1745 = vmatpush.bf16.msrb.mxu0 %v7207_v28  ;;  %v1167_v37 = vpop.f32.mrf.mxu1 }
 0x12c   : > { %1758 = vmatpush.bf16.msrb.mxu1 %v7213_v29  ;;  %v1154_v32 = vpop.f32.mrf.mxu0 }
 0x12d   : > { %1771 = vmatpush.bf16.msrb.mxu2 %v6667_v6  ;;  %v1112_v6 = vpop.f32.mrf.mxu2  ;;  %v1168_v39 = vadd.f32 %v1167_v37, %v1154_v32  ;;  %v661_v37 = vmax.f32 %v660_v26, 0.0 }
 0x12e   : > { %1798 = vmatpush.bf16.msrb.mxu3 %v7219_v30  ;;  %v7363_v6 = vld [vmem:[%s8777_s4 + $0x10] sm:$0xff] }
 0x12f   : > { %1746 = vmatpush.bf16.msrb.mxu0 %v6679_v8  ;;  %v1782_v8 = vpack.c.b16 %v1781_v38, %v1781_v38 }
 0x130   : > { %1759 = vmatpush.bf16.msrb.mxu1 %v7230_v36  ;;  %v1200_v44 = vpop.f32.mrf.mxu3 }
 0x131   : > { %1772 = vmatpush.bf16.msrb.mxu2 %v6691_v10  ;;  %v7236_v10 = vld [vmem:[%s6730_s19 + $0x24] sm:$0x7]  ;;  %v1786_v46 = vshll.u32 %v1782_v8, 16  ;;  %v1784_v50 = vshrl.u32 %v1782_v8, 16  ;;  %s6465_s19 = sshra.s32 %s5043_s30, 4  ;;  %s6466_s19 = int_to_ptr.hbm [resolvable:$true] %s6465_s19 }
 0x132   : > { %1799 = vmatpush.bf16.msrb.mxu3 %v6696_v11  ;;  %v7250_v11 = vld [vmem:[%s8775_s2 + $0x20] sm:$0xff]  ;;  %s6467_s15 = scalar_lea.hbm %s6466_s19, 1  ;;  %p6472_p0 = scmp.lt.s32.totalorder %s6466_s19, %s8785_s12 }
 0x133   : > { %5270 = vmatmul.msk.bf16.vlgmr.msra.gmra.mxu3 %vm500_vm0, %v7236_v10  ;;  %1747 = vmatpush.bf16.msrb.mxu0 %v7250_v11  ;;  %v1169_v43 = vpop.f32.mrf.mxu1  ;;  %v1788_v52 = vrot.slane %v1786_v46, 1  ;;  %p6468_p11 = scmp.ne.s32.totalorder %s6466_s19, %s6467_s15  ;;  %p6473_p1 = scmp.lt.s32.totalorder %s6471_s17, %s6467_s15 }
 0x134   : > { %v1156_v45 = vpop.f32.mrf.mxu0 }
 0x135   : > { %1773 = vmatpush.bf16.msrb.mxu2 %v6720_v14  ;;  %v7256_v14 = vld [vmem:[%s8775_s2] sm:$0xff]  ;;  %v1183_v41 = vpop.f32.mrf.mxu2  ;;  %v7287_v60 = vor.u32 %v1788_v52, %v1784_v50  ;;  %v7391_v52 = vld [vmem:[%s8777_s4 + $0x68] sm:$0xff]  ;;  %p6469_p12 = pnand %p6468_p11, %p6618_p5  ;;  %p6474_p2 = por %p6473_p1, %p6472_p0 }
 0x136   : > { %1760 = vmatpush.bf16.msrb.mxu1 %v7256_v14  ;;  %1800 = vmatpush.bf16.msrb.mxu3 %v7262_v40  ;;  %v1187_v42 = vadd.f32 %v1183_v41, %v1168_v39 }
 0x137   : > { %1814 = vmatpush.bf16.msra.mxu0 %v7186_v9  ;;  %p6470_p13 = pneg %p6469_p12 }
 0x138   : > { %v7269_v47 = vadd.f32 %v1200_v44, %v1187_v42  ;;  %v1202_v56 = vpop.f32.mrf.mxu3  ;;  %5271 = vmatmul.msk.bf16.vlgmr.msrb.gmra.mxu0 %vm500_vm0, %v7163_v22  ;;  %5273 = vmatmul.msk.bf16.vlgmr.msrb.gmra.mxu2 %vm500_vm0, %v7236_v10 }
 0x139   : > { %1843 = vmatpush.bf16.msra.mxu2 %v7180_v7  ;;  %5272 = vmatmul.msk.bf16.vlgmr.msrb.gmra.mxu1 %vm500_vm0, %v7135_v58  ;;  %p6475_p3 = pnand %p6474_p2, %p6470_p13 }
 0x13a   : > { %1827 = vmatpush.bf16.msra.mxu1 %v7192_v15  ;;  %1860 = vmatpush.bf16.msra.mxu3 %v7198_v25 }
 0x13b   : > { %1815 = vmatpush.bf16.msra.mxu0 %v7207_v28  ;;  %v1230_v62 = vpop.f32.mrf.mxu1 }
 0x13c   : > { %v1217_v57 = vpop.f32.mrf.mxu0 }
 0x13d   : > { %1844 = vmatpush.bf16.msra.mxu2 %v6445_v48  ;;  %v1185_v53 = vpop.f32.mrf.mxu2  ;;  %v1231_v61 = vadd.f32 %v1230_v62, %v1217_v57  ;;  %v7409_v57 = vld [vmem:[%s8777_s4 + $0x58] sm:$0xff]  ;;  %v7419_v62 = vld [vmem:[%s8777_s4 + $0x60] sm:$0xff] }
 0x13e   : > { %1828 = vmatpush.bf16.msra.mxu1 %v7213_v29  ;;  %1861 = vmatpush.bf16.msra.mxu3 %v7219_v30 }
 0x13f   : > { %1816 = vmatpush.bf16.msra.mxu0 %v6447_v55 }
 0x140   : > { %v1270_v58 = vpop.f32.mrf.mxu3 }
 0x141   : > { %1845 = vmatpush.bf16.msra.mxu2 %v6446_v54 }
 0x142   : > { %1829 = vmatpush.bf16.msra.mxu1 %v7230_v36  ;;  %1862 = vmatpush.bf16.msra.mxu3 %v6448_v59 }
 0x143   : > { %5274 = vmatmul.msk.bf16.vlgmr.msrb.gmra.mxu3 %vm500_vm0, %v7287_v60  ;;  %1817 = vmatpush.bf16.msra.mxu0 %v7250_v11  ;;  %v1232_v2 = vpop.f32.mrf.mxu1 }
 0x144   : > { %v1219_v0 = vpop.f32.mrf.mxu0 }
 0x145   : > { %1846 = vmatpush.bf16.msra.mxu2 %v6449_v63  ;;  %v1243_v16 = vpop.f32.mrf.mxu2 }
 0x146   : > { %1830 = vmatpush.bf16.msra.mxu1 %v7256_v14  ;;  %1863 = vmatpush.bf16.msra.mxu3 %v7262_v40  ;;  %v1247_v18 = vadd.f32 %v1243_v16, %v1231_v61  ;;  %v7433_v61 = vld [vmem:[%s8777_s4 + $0x70] sm:$0xff]  ;;  %v1009_v16 = vadd.f32 %v7317_v23, %v7120_v49 }
 0x147   : > { %1877 = vmatpush.bf16.msrb.mxu0 %v7186_v9 }
 0x148   : > { %v7307_v20 = vadd.f32 %v1270_v58, %v1247_v18  ;;  %v1272_v3 = vpop.f32.mrf.mxu3  ;;  %5275 = vmatmul.msk.bf16.vlgmr.msra.gmra.mxu0 %vm500_vm0, %v7236_v10  ;;  %5277 = vmatmul.msk.bf16.vlgmr.msra.gmra.mxu2 %vm500_vm0, %v442_v4 }
 0x149   : > { %1903 = vmatpush.bf16.msrb.mxu2 %v7180_v7  ;;  %v1914_v7 = vunpack.c.l.b16 %v442_v4  ;;  %5276 = vmatmul.msk.bf16.vlgmr.msra.gmra.mxu1 %vm500_vm0, %v7225_v33 }
 0x14a   : > { %1890 = vmatpush.bf16.msrb.mxu1 %v7192_v15  ;;  %1930 = vmatpush.bf16.msrb.mxu3 %v7198_v25  ;;  %v7338_v15 = vld [vmem:[%s8777_s4 + $0x38] sm:$0xff]  ;;  %v7343_v25 = vld [vmem:[%s8777_s4 + $0x8] sm:$0xff] }
 0x14b   : > { %1878 = vmatpush.bf16.msrb.mxu0 %v7207_v28  ;;  %v1300_v5 = vpop.f32.mrf.mxu1  ;;  %v1915_v28 = vpack.c.b16 %v1914_v7, %v1914_v7 }
 0x14c   : > { %v1287_v22 = vpop.f32.mrf.mxu0 }
 0x14d   : > { %1904 = vmatpush.bf16.msrb.mxu2 %v6445_v48  ;;  %v1245_v1 = vpop.f32.mrf.mxu2  ;;  %v1301_v9 = vadd.f32 %v1300_v5, %v1287_v22  ;;  %v1919_v38 = vshll.u32 %v1915_v28, 16  ;;  %v1010_v5 = vmax.f32 %v1009_v16, 0.0 }
 0x14e   : > { %1891 = vmatpush.bf16.msrb.mxu1 %v7213_v29  ;;  %1931 = vmatpush.bf16.msrb.mxu3 %v7219_v30  ;;  %v939_v29 = vadd.f32 %v7317_v23, %v7092_v34  ;;  %v7370_v34 = vld [vmem:[%s8777_s4 + $0x30] sm:$0xff] }
 0x14f   : > { %1879 = vmatpush.bf16.msrb.mxu0 %v6447_v55  ;;  %v1921_v41 = vrot.slane %v1919_v38, 1  ;;  %v7401_v55 = vld [vmem:[%s8777_s4 + $0x78] sm:$0xff]  ;;  %v7456_v38 = vld [vmem:[%s8777_s4 + $0xa8] sm:$0xff] }
 0x150   : > { %v1333_v32 = vpop.f32.mrf.mxu3 }
 0x151   : > { %1905 = vmatpush.bf16.msrb.mxu2 %v6446_v54  ;;  %v7396_v54 = vld [vmem:[%s8777_s4 + $0x48] sm:$0xff] }
 0x152   : > { %1892 = vmatpush.bf16.msrb.mxu1 %v7230_v36  ;;  %1932 = vmatpush.bf16.msrb.mxu3 %v6448_v59  ;;  %v7375_v36 = vld [vmem:[%s8777_s4] sm:$0xff] }
 0x153   : > { %5278 = vmatmul.msk.bf16.vlgmr.msra.gmra.mxu3 %vm500_vm0, %v453_v12  ;;  %1880 = vmatpush.bf16.msrb.mxu0 %v7250_v11  ;;  %v1302_v39 = vpop.f32.mrf.mxu1  ;;  %v940_v11 = vmax.f32 %v939_v29, 0.0 }
 0x154   : > { %v1289_v33 = vpop.f32.mrf.mxu0 }
 0x155   : > { %1906 = vmatpush.bf16.msrb.mxu2 %v6449_v63  ;;  %v1316_v30 = vpop.f32.mrf.mxu2  ;;  %v7385_v42 = vpack.c.bf16 %v940_v11, %v940_v11 }
 0x156   : > { %1893 = vmatpush.bf16.msrb.mxu1 %v7256_v14  ;;  %1933 = vmatpush.bf16.msrb.mxu3 %v7262_v40  ;;  %v1320_v31 = vadd.f32 %v1316_v30, %v1301_v9  ;;  %v7383_v14 = vpack.c.bf16 %v661_v37, %v661_v37  ;;  %v1917_v40 = vshrl.u32 %v1915_v28, 16  ;;  %v7451_v28 = vpack.c.bf16 %v1010_v5, %v1010_v5 }
 0x157   : > { %1984 = vmatpush.bf16.msra.mxu0 %v7330_v13  ;;  %v2059_v56 = vunpack.c.l.b16 %v7385_v42 }
 0x158   : > { %v7377_v8 = vadd.f32 %v1333_v32, %v1320_v31  ;;  %v1335_v45 = vpop.f32.mrf.mxu3  ;;  %v1953_v43 = vunpack.c.l.b16 %v7383_v14  ;;  %v1922_v48 = vor.u32 %v1921_v41, %v1917_v40  ;;  %5279 = vmatmul.msk.bf16.vlgmr.msrb.gmra.mxu0 %vm500_vm0, %v7287_v60  ;;  %5281 = vmatmul.msk.bf16.vlgmr.msrb.gmra.mxu2 %vm500_vm0, %v453_v12  ;;  %v743_v60 = vadd.f32 %v7317_v23, %v6998_v35  ;;  %v7441_v35 = vld [vmem:[%s8777_s4 + $0x50] sm:$0xff]  ;;  %v7462_v40 = vld [vmem:[%s8777_s4 + $0x88] sm:$0xff]  ;;  %v7467_v41 = vld [vmem:[%s8777_s4 + $0xb8] sm:$0xff] }
 0x159   : > { %2045 = vmatpush.bf16.msra.mxu2 %v7325_v24  ;;  %5280 = vmatmul.msk.bf16.vlgmr.msrb.gmra.mxu1 %vm500_vm0, %v7236_v10  ;;  %v7428_v10 = vld [vmem:[%s8777_s4 + $0x40] sm:$0xff]  ;;  %v2060_v63 = vpack.c.b16 %v2059_v56, %v2059_v56  ;;  %v2215_v45 = vunpack.c.l.b16 %v7451_v28 }
 0x15a   : > { %2089 = vmatpush.bf16.msra.mxu3 %v7338_v15  ;;  %2012 = vmatpush.bf16.msra.mxu1 %v7343_v25  ;;  %v1954_v59 = vpack.c.b16 %v1953_v43, %v1953_v43  ;;  %v744_v22 = vmax.f32 %v743_v60, 0.0  ;;  %v7488_v43 = vld [vmem:[%s8777_s4 + $0xa0] sm:$0xff] }
 0x15b   : > { %1985 = vmatpush.bf16.msra.mxu0 %v7363_v6  ;;  %v1363_v50 = vpop.f32.mrf.mxu1  ;;  %v2064_v49 = vshll.u32 %v2060_v63, 16  ;;  %v2062_v33 = vshrl.u32 %v2060_v63, 16  ;;  %v2216_v56 = vpack.c.b16 %v2215_v45, %v2215_v45  ;;  %v7531_v45 = vld [vmem:[%s8777_s4 + $0xc8] sm:$0xff] }
 0x15c   : > { %v1350_v46 = vpop.f32.mrf.mxu0  ;;  %v1958_v1 = vshll.u32 %v1954_v59, 16  ;;  %v7449_v9 = vpack.c.bf16 %v744_v22, %v744_v22  ;;  %v1956_v12 = vshrl.u32 %v1954_v59, 16  ;;  %v1072_v59 = vadd.f32 %v7317_v23, %v7153_v19 }
 0x15d   : > { %2046 = vmatpush.bf16.msra.mxu2 %v7358_v21  ;;  %v1318_v44 = vpop.f32.mrf.mxu2  ;;  %v1364_v53 = vadd.f32 %v1363_v50, %v1350_v46  ;;  %v2066_v26 = vrot.slane %v2064_v49, 1  ;;  %v7476_v46 = vld [vmem:[%s8777_s4 + $0x98] sm:$0xff]  ;;  %v806_v50 = vadd.f32 %v7317_v23, %v7031_v51  ;;  %v7510_v51 = vld [vmem:[%s8777_s4 + $0x90] sm:$0xff]  ;;  %v2220_v19 = vshll.u32 %v2216_v56, 16 }
 0x15e   : > { %2090 = vmatpush.bf16.msra.mxu3 %v7370_v34  ;;  %2013 = vmatpush.bf16.msra.mxu1 %v7375_v36  ;;  %v1960_v7 = vrot.slane %v1958_v1, 1  ;;  %v2137_v39 = vunpack.c.l.b16 %v7449_v9 }
 0x15f   : > { %2123 = vmatpush.bf16.msrb.mxu0 %v7396_v54  ;;  %v7469_v44 = vor.u32 %v2066_v26, %v2062_v33  ;;  %v2222_v5 = vrot.slane %v2220_v19, 1  ;;  %v7525_v33 = vld [vmem:[%s8777_s4 + $0xe8] sm:$0xff] }
 0x160   : > { %v1403_v0 = vpop.f32.mrf.mxu3  ;;  %v1961_v32 = vor.u32 %v1960_v7, %v1956_v12 }
 0x161   : > { %2201 = vmatpush.bf16.msrb.mxu2 %v7391_v52 }
 0x162   : > { %2167 = vmatpush.bf16.msrb.mxu1 %v7409_v57 }
 0x163   : > { %5282 = vmatmul.msk.bf16.vlgmr.msrb.gmra.mxu3 %vm500_vm0, %v1922_v48  ;;  %v1365_v3 = vpop.f32.mrf.mxu1  ;;  %2124 = vmatpush.bf16.msrb.mxu0 %v7428_v10  ;;  %v2138_v48 = vpack.c.b16 %v2137_v39, %v2137_v39 }
 0x164   : > { %2245 = vmatpush.bf16.msrb.mxu3 %v7401_v55  ;;  %v1352_v2 = vpop.f32.mrf.mxu0  ;;  %v1073_v3 = vmax.f32 %v1072_v59, 0.0  ;;  %v7546_v59 = vld [vmem:[%s8777_s4 + $0xd8] sm:$0xff] }
 0x165   : > { %v1376_v18 = vpop.f32.mrf.mxu2  ;;  %2202 = vmatpush.bf16.msrb.mxu2 %v7419_v62  ;;  %v807_v2 = vmax.f32 %v806_v50, 0.0  ;;  %v2140_v26 = vshrl.u32 %v2138_v48, 16 }
 0x166   : > { %v1380_v58 = vadd.f32 %v1376_v18, %v1364_v53  ;;  %2168 = vmatpush.bf16.msrb.mxu1 %v7441_v35  ;;  %v7502_v53 = vld [vmem:[%s8777_s4 + $0xb0] sm:$0xff]  ;;  %v7520_v7 = vpack.c.bf16 %v1073_v3, %v1073_v3 }
 0x167   : > { %v7518_v49 = vpack.c.bf16 %v807_v2, %v807_v2 }
 0x168   : > { %v7444_v4 = vadd.f32 %v1403_v0, %v1380_v58  ;;  %2246 = vmatpush.bf16.msrb.mxu3 %v7433_v61  ;;  %v1405_v30 = vpop.f32.mrf.mxu3  ;;  %5295 = vmatmul.msk.bf16.vlgmr.msra.gmra.mxu0 %vm1974_vm1, %v1961_v32  ;;  %v2142_v0 = vshll.u32 %v2138_v48, 16  ;;  %v7536_v48 = vld [vmem:[%s8777_s4 + $0xf8] sm:$0xff] }
 0x169   : > { %5304 = vmatmul.msk.bf16.vlgmr.msra.gmra.mxu1 %vm1974_vm1, %v7383_v14  ;;  %5317 = vmatmul.msk.bf16.vlgmr.msra.gmra.mxu2 %vm1974_vm1, %v7385_v42  ;;  %v7497_v14 = vld [vmem:[%s8777_s4 + $0x80] sm:$0xff]  ;;  %v2293_v39 = vunpack.c.l.b16 %v7518_v49 }
 0x16a   : > { %2357 = vmatpush.bf16.msra.mxu2 %v7456_v38  ;;  %2279 = vmatpush.bf16.msra.mxu0 %v7462_v40  ;;  %v2144_v22 = vrot.slane %v2142_v0, 1  ;;  %v1142_v0 = vadd.f32 %v7317_v23, %v7201_v27 }
 0x16b   : > { %v1433_v37 = vpop.f32.mrf.mxu1  ;;  %2323 = vmatpush.bf16.msra.mxu1 %v7476_v46 }
 0x16c   : > { %v1420_v31 = vpop.f32.mrf.mxu0 }
 0x16d   : > { %v1378_v29 = vpop.f32.mrf.mxu2  ;;  %v1434_v11 = vadd.f32 %v1433_v37, %v1420_v31  ;;  %v2218_v31 = vshrl.u32 %v2216_v56, 16  ;;  %v2145_v37 = vor.u32 %v2144_v22, %v2140_v26  ;;  %v2371_v56 = vunpack.c.l.b16 %v7520_v7 }
 0x16e   : > { %2358 = vmatpush.bf16.msra.mxu2 %v7488_v43  ;;  %2280 = vmatpush.bf16.msra.mxu0 %v7497_v14 }
 0x16f   : > { %2324 = vmatpush.bf16.msra.mxu1 %v7510_v51  ;;  %v7538_v50 = vor.u32 %v2222_v5, %v2218_v31 }
 0x170   : > { %v1466_v16 = vpop.f32.mrf.mxu3 }
 0x173   : > { %5330 = vmatmul.msk.bf16.vlgmr.msra.gmra.mxu3 %vm1974_vm1, %v7469_v44  ;;  %v1435_v58 = vpop.f32.mrf.mxu1 }
 0x174   : > { %2401 = vmatpush.bf16.msra.mxu3 %v7467_v41  ;;  %v1422_v18 = vpop.f32.mrf.mxu0  ;;  %v2372_v58 = vpack.c.b16 %v2371_v56, %v2371_v56 }
 0x175   : > { %v1449_v60 = vpop.f32.mrf.mxu2  ;;  %v7571_v18 = vld [vmem:[%s8777_s4 + $0xf0] sm:$0xff] }
 0x176   : > { %v1453_v63 = vadd.f32 %v1449_v60, %v1434_v11  ;;  %v7557_v60 = vld [vmem:[%s8777_s4 + $0xe0] sm:$0xff]  ;;  %v2376_v27 = vshll.u32 %v2372_v58, 16 }
 0x178   : > { %v7513_v1 = vadd.f32 %v1466_v16, %v1453_v63  ;;  %2402 = vmatpush.bf16.msra.mxu3 %v7502_v53  ;;  %v1468_v29 = vpop.f32.mrf.mxu3  ;;  %5343 = vmatmul.msk.bf16.vlgmr.msrb.gmra.mxu0 %vm1974_vm1, %v7449_v9  ;;  %v2294_v9 = vpack.c.b16 %v2293_v39, %v2293_v39  ;;  %v876_v63 = vadd.f32 %v7317_v23, %v7059_v17  ;;  %v7566_v16 = vld [vmem:[%s8777_s4 + $0xc0] sm:$0xff]  ;;  %v7579_v17 = vld [vmem:[%s8777_s4 + $0xd0] sm:$0xff] }
 0x179   : > { %5356 = vmatmul.msk.bf16.vlgmr.msrb.gmra.mxu1 %vm1974_vm1, %v2145_v37  ;;  %5369 = vmatmul.msk.bf16.vlgmr.msrb.gmra.mxu2 %vm1974_vm1, %v7451_v28  ;;  %v2378_v37 = vrot.slane %v2376_v27, 1 }
 0x17a   : > { %8791 = vst [vmem:[#allocation6_spill] sm:$0xff] %v7513_v1  ;;  %2513 = vmatpush.bf16.msrb.mxu2 %v7525_v33  ;;  %2435 = vmatpush.bf16.msrb.mxu0 %v7531_v45  ;;  %v877_v26 = vmax.f32 %v876_v63, 0.0  ;;  %v2296_v56 = vshrl.u32 %v2294_v9, 16  ;;  %v2374_v63 = vshrl.u32 %v2372_v58, 16 }
 0x17b   : > { %v1496_v32 = vpop.f32.mrf.mxu1  ;;  %2479 = vmatpush.bf16.msrb.mxu1 %v7546_v59 }
 0x17c   : > { %v1483_v30 = vpop.f32.mrf.mxu0  ;;  %v7589_v1 = vor.u32 %v2378_v37, %v2374_v63 }
 0x17d   : > { %v1451_v12 = vpop.f32.mrf.mxu2  ;;  %v1497_v11 = vadd.f32 %v1496_v32, %v1483_v30  ;;  %v1143_v30 = vmax.f32 %v1142_v0, 0.0  ;;  %v878_v32 = vpack.c.bf16 %v877_v26, %v877_v26 }
 0x17e   : > { %2514 = vmatpush.bf16.msrb.mxu2 %v7557_v60  ;;  %v2298_v12 = vshll.u32 %v2294_v9, 16  ;;  %2436 = vmatpush.bf16.msrb.mxu0 %v7566_v16 }
 0x17f   : > { %2480 = vmatpush.bf16.msrb.mxu1 %v7579_v17  ;;  %v7587_v39 = vpack.c.bf16 %v1143_v30, %v1143_v30 }
 0x180   : > { %v1536_v3 = vpop.f32.mrf.mxu3  ;;  %v2300_v31 = vrot.slane %v2298_v12, 1  ;;  %v1205_v12 = vadd.f32 %v7317_v23, %v7269_v47 }
 0x181   : > { %v2527_v0 = vunpack.c.l.b16 %v7587_v39 }
 0x183   : > { %5382 = vmatmul.msk.bf16.vlgmr.msrb.gmra.mxu3 %vm1974_vm1, %v7538_v50  ;;  %v1498_v5 = vpop.f32.mrf.mxu1  ;;  %v2528_v58 = vpack.c.b16 %v2527_v0, %v2527_v0 }
 0x184   : > { %2557 = vmatpush.bf16.msrb.mxu3 %v7536_v48  ;;  %v1485_v22 = vpop.f32.mrf.mxu0  ;;  %v2449_v5 = vunpack.c.l.b16 %v878_v32 }
 0x185   : > { %v1509_v2 = vpop.f32.mrf.mxu2  ;;  %v2530_v0 = vshrl.u32 %v2528_v58, 16 }
 0x186   : > { %v1513_v19 = vadd.f32 %v1509_v2, %v1497_v11  ;;  %v2450_v9 = vpack.c.b16 %v2449_v5, %v2449_v5 }
 0x188   : > { %v7582_v29 = vadd.f32 %v1536_v3, %v1513_v19  ;;  %2558 = vmatpush.bf16.msrb.mxu3 %v7571_v18  ;;  %v1538_v2 = vpop.f32.mrf.mxu3  ;;  %v2301_v3 = vor.u32 %v2300_v31, %v2296_v56  ;;  %5395 = vmatmul.msk.bf16.vlgmr.msra.gmra.mxu0 %vm1974_vm1, %v7518_v49  ;;  %v2454_v37 = vshll.u32 %v2450_v9, 16  ;;  %v2532_v56 = vshll.u32 %v2528_v58, 16 }
 0x189   : > { %5421 = vmatmul.msk.bf16.vlgmr.msra.gmra.mxu2 %vm1974_vm1, %v7520_v7  ;;  %2577 = vmatpush.bf16.msra.mxu0 %v7330_v13  ;;  %v1206_v2 = vmax.f32 %v1205_v12, 0.0  ;;  %v1275_v58 = vadd.f32 %v7317_v23, %v7307_v20 }
 0x18a   : > { %8792 = vst [vmem:[#allocation7_spill] sm:$0xff] %v7582_v29  ;;  %5408 = vmatmul.msk.bf16.vlgmr.msra.gmra.mxu1 %vm1974_vm1, %v2301_v3  ;;  %2606 = vmatpush.bf16.msra.mxu2 %v7325_v24  ;;  %v2456_v47 = vrot.slane %v2454_v37, 1 }
 0x18b   : > { %v1566_v19 = vpop.f32.mrf.mxu1  ;;  %2590 = vmatpush.bf16.msra.mxu1 %v7343_v25  ;;  %v7611_v63 = vpack.c.bf16 %v1206_v2, %v1206_v2 }
 0x18c   : > { %v1553_v22 = vpop.f32.mrf.mxu0 }
 0x18d   : > { %v1511_v11 = vpop.f32.mrf.mxu2  ;;  %v1567_v29 = vadd.f32 %v1566_v19, %v1553_v22  ;;  %2578 = vmatpush.bf16.msra.mxu0 %v7363_v6  ;;  %v2534_v22 = vrot.slane %v2532_v56, 1  ;;  %v2452_v19 = vshrl.u32 %v2450_v9, 16 }
 0x18e   : > { %2607 = vmatpush.bf16.msra.mxu2 %v7358_v21 }
 0x18f   : > { %2591 = vmatpush.bf16.msra.mxu1 %v7375_v36 }
 0x190   : > { %v1599_v27 = vpop.f32.mrf.mxu3 }
 0x193   : > { %5434 = vmatmul.msk.bf16.vlgmr.msra.gmra.mxu3 %vm1974_vm1, %v7589_v1  ;;  %v1568_v31 = vpop.f32.mrf.mxu1 }
 0x194   : > { %2633 = vmatpush.bf16.msra.mxu3 %v7338_v15  ;;  %v1555_v30 = vpop.f32.mrf.mxu0  ;;  %v2615_v31 = vunpack.c.l.b16 %v7611_v63 }
 0x195   : > { %v1582_v49 = vpop.f32.mrf.mxu2  ;;  %v7613_v30 = vor.u32 %v2534_v22, %v2530_v0 }
 0x196   : > { %v1586_v26 = vadd.f32 %v1582_v49, %v1567_v29  ;;  %v2616_v9 = vpack.c.b16 %v2615_v31, %v2615_v31 }
 0x198   : > { %v7606_v11 = vadd.f32 %v1599_v27, %v1586_v26  ;;  %2634 = vmatpush.bf16.msra.mxu3 %v7370_v34  ;;  %v1601_v3 = vpop.f32.mrf.mxu3  ;;  %v2457_v26 = vor.u32 %v2456_v47, %v2452_v19  ;;  %5447 = vmatmul.msk.bf16.vlgmr.msrb.gmra.mxu0 %vm1974_vm1, %v878_v32  ;;  %v2620_v22 = vshll.u32 %v2616_v9, 16 }
 0x199   : > { %5473 = vmatmul.msk.bf16.vlgmr.msrb.gmra.mxu2 %vm1974_vm1, %v7587_v39  ;;  %2647 = vmatpush.bf16.msrb.mxu0 %v7396_v54 }
 0x19a   : > { %5460 = vmatmul.msk.bf16.vlgmr.msrb.gmra.mxu1 %vm1974_vm1, %v2457_v26  ;;  %2678 = vmatpush.bf16.msrb.mxu2 %v7391_v52  ;;  %v2622_v20 = vrot.slane %v2620_v22, 1 }
 0x19b   : > { %v1629_v49 = vpop.f32.mrf.mxu1  ;;  %2661 = vmatpush.bf16.msrb.mxu1 %v7409_v57 }
 0x19c   : > { %v1616_v5 = vpop.f32.mrf.mxu0 }
 0x19d   : > { %v1584_v29 = vpop.f32.mrf.mxu2  ;;  %v1630_v27 = vadd.f32 %v1629_v49, %v1616_v5  ;;  %2648 = vmatpush.bf16.msrb.mxu0 %v7428_v10  ;;  %v2618_v49 = vshrl.u32 %v2616_v9, 16 }
 0x19e   : > { %2679 = vmatpush.bf16.msrb.mxu2 %v7419_v62  ;;  %v1276_v29 = vmax.f32 %v1275_v58, 0.0  ;;  %v1338_v58 = vadd.f32 %v7317_v23, %v7377_v8 }
 0x19f   : > { %2662 = vmatpush.bf16.msrb.mxu1 %v7441_v35  ;;  %v7636_v31 = vor.u32 %v2622_v20, %v2618_v49 }
 0x1a0   : > { %v1669_v37 = vpop.f32.mrf.mxu3  ;;  %v7634_v19 = vpack.c.bf16 %v1276_v29, %v1276_v29  ;;  %v1339_v29 = vmax.f32 %v1338_v58, 0.0  ;;  %v1408_v58 = vadd.f32 %v7317_v23, %v7444_v4 }
 0x1a2   : > { %v7659_v20 = vpack.c.bf16 %v1339_v29, %v1339_v29  ;;  %v1409_v29 = vmax.f32 %v1408_v58, 0.0  ;;  %v8793_v58 = vld [vmem:[#allocation6_spill] sm:$0xff] }
 0x1a3   : > { %5486 = vmatmul.msk.bf16.vlgmr.msrb.gmra.mxu3 %vm1974_vm1, %v7613_v30  ;;  %v1631_v2 = vpop.f32.mrf.mxu1 }
 0x1a4   : > { %2705 = vmatpush.bf16.msrb.mxu3 %v7401_v55  ;;  %v1618_v56 = vpop.f32.mrf.mxu0 }
 0x1a5   : > { %v1642_v12 = vpop.f32.mrf.mxu2 }
 0x1a6   : > { %v1646_v32 = vadd.f32 %v1642_v12, %v1630_v27  ;;  %v2687_v12 = vunpack.c.l.b16 %v7634_v19 }
 0x1a8   : > { %v7629_v47 = vadd.f32 %v1669_v37, %v1646_v32  ;;  %2706 = vmatpush.bf16.msrb.mxu3 %v7433_v61  ;;  %v1671_v5 = vpop.f32.mrf.mxu3  ;;  %5487 = vmatmul.msk.bf16.vlgmr.msra.gmra.mxu0 %vm1974_vm1, %v7469_v44  ;;  %v2688_v9 = vpack.c.b16 %v2687_v12, %v2687_v12 }
 0x1a9   : > { %5489 = vmatmul.msk.bf16.vlgmr.msra.gmra.mxu2 %vm1974_vm1, %v7611_v63  ;;  %2719 = vmatpush.bf16.msra.mxu0 %v7462_v40 }
 0x1aa   : > { %5488 = vmatmul.msk.bf16.vlgmr.msra.gmra.mxu1 %vm1974_vm1, %v7385_v42  ;;  %2750 = vmatpush.bf16.msra.mxu2 %v7456_v38  ;;  %v2692_v22 = vshll.u32 %v2688_v9, 16  ;;  %v2690_v49 = vshrl.u32 %v2688_v9, 16 }
 0x1ab   : > { %v1699_v26 = vpop.f32.mrf.mxu1  ;;  %2733 = vmatpush.bf16.msra.mxu1 %v7476_v46 }
 0x1ac   : > { %v1686_v0 = vpop.f32.mrf.mxu0  ;;  %v2694_v8 = vrot.slane %v2692_v22, 1 }
 0x1ad   : > { %v1644_v3 = vpop.f32.mrf.mxu2  ;;  %v1700_v27 = vadd.f32 %v1699_v26, %v1686_v0  ;;  %2720 = vmatpush.bf16.msra.mxu0 %v7497_v14 }
 0x1ae   : > { %2751 = vmatpush.bf16.msra.mxu2 %v7488_v43  ;;  %v7661_v12 = vor.u32 %v2694_v8, %v2690_v49  ;;  %v7684_v8 = vpack.c.bf16 %v1409_v29, %v1409_v29 }
 0x1af   : > { %2734 = vmatpush.bf16.msra.mxu1 %v7510_v51 }
 0x1b3   : > { %5490 = vmatmul.msk.bf16.vlgmr.msra.gmra.mxu3 %vm1974_vm1, %v7636_v31  ;;  %v1701_v56 = vpop.f32.mrf.mxu1 }
 0x1b4   : > { %2777 = vmatpush.bf16.msra.mxu3 %v7467_v41  ;;  %v1688_v37 = vpop.f32.mrf.mxu0 }
 0x1b5   : > { %v1715_v44 = vpop.f32.mrf.mxu2 }
 0x1b6   : > { %v1719_v42 = vadd.f32 %v1715_v44, %v1700_v27  ;;  %v1732_v32 = vpop.f32.mrf.mxu3  ;;  %v2759_v44 = vunpack.c.l.b16 %v7659_v20 }
 0x1b8   : > { %v7654_v2 = vadd.f32 %v1732_v32, %v1719_v42  ;;  %2778 = vmatpush.bf16.msra.mxu3 %v7502_v53  ;;  %5491 = vmatmul.msk.bf16.vlgmr.msrb.gmra.mxu0 %vm1974_vm1, %v7451_v28  ;;  %v2760_v9 = vpack.c.b16 %v2759_v44, %v2759_v44 }
 0x1b9   : > { %5493 = vmatmul.msk.bf16.vlgmr.msrb.gmra.mxu2 %vm1974_vm1, %v7634_v19  ;;  %2791 = vmatpush.bf16.msrb.mxu0 %v7531_v45 }
 0x1ba   : > { %5492 = vmatmul.msk.bf16.vlgmr.msrb.gmra.mxu1 %vm1974_vm1, %v7538_v50  ;;  %2822 = vmatpush.bf16.msrb.mxu2 %v7525_v33  ;;  %v2764_v22 = vshll.u32 %v2760_v9, 16  ;;  %v2762_v49 = vshrl.u32 %v2760_v9, 16 }
 0x1bb   : > { %v1762_v26 = vpop.f32.mrf.mxu1  ;;  %2805 = vmatpush.bf16.msrb.mxu1 %v7546_v59 }
 0x1bc   : > { %v1749_v0 = vpop.f32.mrf.mxu0  ;;  %v2766_v4 = vrot.slane %v2764_v22, 1 }
 0x1bd   : > { %v1717_v3 = vpop.f32.mrf.mxu2  ;;  %v1763_v27 = vadd.f32 %v1762_v26, %v1749_v0  ;;  %2792 = vmatpush.bf16.msrb.mxu0 %v7566_v16 }
 0x1be   : > { %v1734_v5 = vpop.f32.mrf.mxu3  ;;  %2823 = vmatpush.bf16.msrb.mxu2 %v7557_v60  ;;  %v7686_v44 = vor.u32 %v2766_v4, %v2762_v49 }
 0x1bf   : > { %2806 = vmatpush.bf16.msrb.mxu1 %v7579_v17 }
 0x1c3   : > { %5494 = vmatmul.msk.bf16.vlgmr.msrb.gmra.mxu3 %vm1974_vm1, %v7661_v12  ;;  %v1764_v37 = vpop.f32.mrf.mxu1 }
 0x1c4   : > { %2849 = vmatpush.bf16.msrb.mxu3 %v7536_v48  ;;  %v1751_v32 = vpop.f32.mrf.mxu0 }
 0x1c5   : > { %v1775_v28 = vpop.f32.mrf.mxu2 }
 0x1c6   : > { %v1779_v50 = vadd.f32 %v1775_v28, %v1763_v27  ;;  %v1802_v42 = vpop.f32.mrf.mxu3  ;;  %v2831_v28 = vunpack.c.l.b16 %v7684_v8 }
 0x1c8   : > { %v7679_v56 = vadd.f32 %v1802_v42, %v1779_v50  ;;  %2850 = vmatpush.bf16.msrb.mxu3 %v7571_v18  ;;  %5495 = vmatmul.msk.bf16.vlgmr.msra.gmra.mxu0 %vm1974_vm1, %v7520_v7  ;;  %v2832_v9 = vpack.c.b16 %v2831_v28, %v2831_v28  ;;  %v1471_v50 = vadd.f32 %v7317_v23, %v8793_v58 }
 0x1c9   : > { %5497 = vmatmul.msk.bf16.vlgmr.msra.gmra.mxu2 %vm1974_vm1, %v7659_v20  ;;  %2866 = vmatpush.bf16.msra.mxu0 %v7330_v13 }
 0x1ca   : > { %5496 = vmatmul.msk.bf16.vlgmr.msra.gmra.mxu1 %vm1974_vm1, %v7589_v1  ;;  %2895 = vmatpush.bf16.msra.mxu2 %v7325_v24  ;;  %v2836_v29 = vshll.u32 %v2832_v9, 16  ;;  %v1472_v4 = vmax.f32 %v1471_v50, 0.0  ;;  %v8794_v50 = vld [vmem:[#allocation7_spill] sm:$0xff] }
 0x1cb   : > { %v1832_v26 = vpop.f32.mrf.mxu1  ;;  %2879 = vmatpush.bf16.msra.mxu1 %v7343_v25 }
 0x1cc   : > { %v1819_v0 = vpop.f32.mrf.mxu0 }
 0x1cd   : > { %v1777_v3 = vpop.f32.mrf.mxu2  ;;  %v1833_v27 = vadd.f32 %v1832_v26, %v1819_v0  ;;  %2867 = vmatpush.bf16.msra.mxu0 %v7363_v6 }
 0x1ce   : > { %v1804_v5 = vpop.f32.mrf.mxu3  ;;  %2896 = vmatpush.bf16.msra.mxu2 %v7358_v21  ;;  %v2838_v3 = vrot.slane %v2836_v29, 1 }
 0x1cf   : > { %2880 = vmatpush.bf16.msra.mxu1 %v7375_v36  ;;  %v7709_v5 = vpack.c.bf16 %v1472_v4, %v1472_v4 }
 0x1d3   : > { %5498 = vmatmul.msk.bf16.vlgmr.msra.gmra.mxu3 %vm1974_vm1, %v7686_v44  ;;  %v1834_v37 = vpop.f32.mrf.mxu1 }
 0x1d4   : > { %2922 = vmatpush.bf16.msra.mxu3 %v7338_v15  ;;  %v1821_v32 = vpop.f32.mrf.mxu0 }
 0x1d5   : > { %v1848_v7 = vpop.f32.mrf.mxu2 }
 0x1d6   : > { %v1852_v1 = vadd.f32 %v1848_v7, %v1833_v27  ;;  %v1865_v42 = vpop.f32.mrf.mxu3  ;;  %v2834_v27 = vshrl.u32 %v2832_v9, 16 }
 0x1d8   : > { %v7704_v22 = vadd.f32 %v1865_v42, %v1852_v1  ;;  %2923 = vmatpush.bf16.msra.mxu3 %v7370_v34  ;;  %v7711_v7 = vor.u32 %v2838_v3, %v2834_v27  ;;  %v2904_v1 = vunpack.c.l.b16 %v7709_v5  ;;  %5499 = vmatmul.msk.bf16.vlgmr.msrb.gmra.mxu0 %vm1974_vm1, %v7587_v39  ;;  %v1541_v42 = vadd.f32 %v7317_v23, %v8794_v50 }
 0x1d9   : > { %5501 = vmatmul.msk.bf16.vlgmr.msrb.gmra.mxu2 %vm1974_vm1, %v7684_v8  ;;  %2936 = vmatpush.bf16.msrb.mxu0 %v7396_v54 }
 0x1da   : > { %5500 = vmatmul.msk.bf16.vlgmr.msrb.gmra.mxu1 %vm1974_vm1, %v7613_v30  ;;  %2967 = vmatpush.bf16.msrb.mxu2 %v7391_v52  ;;  %v2905_v9 = vpack.c.b16 %v2904_v1, %v2904_v1 }
 0x1db   : > { %v1895_v28 = vpop.f32.mrf.mxu1  ;;  %2950 = vmatpush.bf16.msrb.mxu1 %v7409_v57 }
 0x1dc   : > { %v1882_v26 = vpop.f32.mrf.mxu0  ;;  %v2909_v3 = vshll.u32 %v2905_v9, 16  ;;  %v2907_v1 = vshrl.u32 %v2905_v9, 16 }
 0x1dd   : > { %v1850_v0 = vpop.f32.mrf.mxu2  ;;  %v1896_v58 = vadd.f32 %v1895_v28, %v1882_v26  ;;  %2937 = vmatpush.bf16.msrb.mxu0 %v7428_v10 }
 0x1de   : > { %v1867_v49 = vpop.f32.mrf.mxu3  ;;  %2968 = vmatpush.bf16.msrb.mxu2 %v7419_v62  ;;  %v1542_v0 = vmax.f32 %v1541_v42, 0.0  ;;  %v1604_v42 = vadd.f32 %v7317_v23, %v7606_v11 }
 0x1df   : > { %2951 = vmatpush.bf16.msrb.mxu1 %v7441_v35  ;;  %v2911_v49 = vrot.slane %v2909_v3, 1 }
 0x1e0   : > { %v7734_v26 = vpack.c.bf16 %v1542_v0, %v1542_v0 }
 0x1e3   : > { %5502 = vmatmul.msk.bf16.vlgmr.msrb.gmra.mxu3 %vm1974_vm1, %v7711_v7  ;;  %v1897_v29 = vpop.f32.mrf.mxu1 }
 0x1e4   : > { %2994 = vmatpush.bf16.msrb.mxu3 %v7401_v55  ;;  %v1884_v37 = vpop.f32.mrf.mxu0 }
 0x1e5   : > { %v1908_v39 = vpop.f32.mrf.mxu2  ;;  %v7736_v37 = vor.u32 %v2911_v49, %v2907_v1 }
 0x1e6   : > { %v1912_v30 = vadd.f32 %v1908_v39, %v1896_v58  ;;  %v1935_v32 = vpop.f32.mrf.mxu3 }
 0x1e8   : > { %v7729_v4 = vadd.f32 %v1935_v32, %v1912_v30  ;;  %2995 = vmatpush.bf16.msrb.mxu3 %v7433_v61  ;;  %v2976_v30 = vunpack.c.l.b16 %v7734_v26  ;;  %5503 = vmatmul.msk.bf16.vlgmr.msra.gmra.mxu0 %vm1974_vm1, %v7636_v31 }
 0x1e9   : > { %5505 = vmatmul.msk.bf16.vlgmr.msra.gmra.mxu2 %vm1974_vm1, %v7709_v5  ;;  %3008 = vmatpush.bf16.msra.mxu0 %v7462_v40 }
 0x1ea   : > { %5504 = vmatmul.msk.bf16.vlgmr.msra.gmra.mxu1 %vm1974_vm1, %v7611_v63  ;;  %3039 = vmatpush.bf16.msra.mxu2 %v7456_v38  ;;  %v2977_v9 = vpack.c.b16 %v2976_v30, %v2976_v30 }
 0x1eb   : > { %v2015_v50 = vpop.f32.mrf.mxu1  ;;  %3022 = vmatpush.bf16.msra.mxu1 %v7476_v46 }
 0x1ec   : > { %v1987_v58 = vpop.f32.mrf.mxu0  ;;  %v2981_v49 = vshll.u32 %v2977_v9, 16 }
 0x1ed   : > { %v1910_v27 = vpop.f32.mrf.mxu2  ;;  %v2016_v39 = vadd.f32 %v2015_v50, %v1987_v58  ;;  %3009 = vmatpush.bf16.msra.mxu0 %v7497_v14 }
 0x1ee   : > { %v1937_v28 = vpop.f32.mrf.mxu3  ;;  %3040 = vmatpush.bf16.msra.mxu2 %v7488_v43  ;;  %v1605_v27 = vmax.f32 %v1604_v42, 0.0  ;;  %v1674_v42 = vadd.f32 %v7317_v23, %v7629_v47 }
 0x1ef   : > { %3023 = vmatpush.bf16.msra.mxu1 %v7510_v51  ;;  %v2983_v28 = vrot.slane %v2981_v49, 1 }
 0x1f0   : > { %v7757_v11 = vpack.c.bf16 %v1605_v27, %v1605_v27 }
 0x1f3   : > { %5506 = vmatmul.msk.bf16.vlgmr.msra.gmra.mxu3 %vm1974_vm1, %v7736_v37  ;;  %v2017_v3 = vpop.f32.mrf.mxu1 }
 0x1f4   : > { %3066 = vmatpush.bf16.msra.mxu3 %v7467_v41  ;;  %v1989_v29 = vpop.f32.mrf.mxu0 }
 0x1f5   : > { %v2048_v31 = vpop.f32.mrf.mxu2 }
 0x1f6   : > { %v2052_v63 = vadd.f32 %v2048_v31, %v2016_v39  ;;  %v2092_v32 = vpop.f32.mrf.mxu3  ;;  %v2979_v39 = vshrl.u32 %v2977_v9, 16 }
 0x1f8   : > { %v2096_v0 = vadd.f32 %v2092_v32, %v2052_v63  ;;  %3067 = vmatpush.bf16.msra.mxu3 %v7502_v53  ;;  %v7759_v29 = vor.u32 %v2983_v28, %v2979_v39  ;;  %v3048_v63 = vunpack.c.l.b16 %v7757_v11  ;;  %5507 = vmatmul.msk.bf16.vlgmr.msrb.gmra.mxu0 %vm1974_vm1, %v7634_v19 }
 0x1f9   : > { %5509 = vmatmul.msk.bf16.vlgmr.msrb.gmra.mxu2 %vm1974_vm1, %v7734_v26  ;;  %3080 = vmatpush.bf16.msrb.mxu0 %v7531_v45 }
 0x1fa   : > { %5508 = vmatmul.msk.bf16.vlgmr.msrb.gmra.mxu1 %vm1974_vm1, %v7661_v12  ;;  %3111 = vmatpush.bf16.msrb.mxu2 %v7525_v33  ;;  %v3049_v9 = vpack.c.b16 %v3048_v63, %v3048_v63 }
 0x1fb   : > { %v2170_v31 = vpop.f32.mrf.mxu1  ;;  %3094 = vmatpush.bf16.msrb.mxu1 %v7546_v59 }
 0x1fc   : > { %v2126_v50 = vpop.f32.mrf.mxu0  ;;  %v3053_v28 = vshll.u32 %v3049_v9, 16 }
 0x1fd   : > { %v2050_v58 = vpop.f32.mrf.mxu2  ;;  %v2130_v30 = vadd.f32 %v2126_v50, %v2096_v0  ;;  %3081 = vmatpush.bf16.msrb.mxu0 %v7566_v16 }
 0x1fe   : > { %v2094_v1 = vpop.f32.mrf.mxu3  ;;  %3112 = vmatpush.bf16.msrb.mxu2 %v7557_v60  ;;  %v1675_v58 = vmax.f32 %v1674_v42, 0.0  ;;  %v1737_v42 = vadd.f32 %v7317_v23, %v7654_v2 }
 0x1ff   : > { %v2174_v32 = vadd.f32 %v2170_v31, %v2130_v30  ;;  %3095 = vmatpush.bf16.msrb.mxu1 %v7579_v17  ;;  %v3055_v1 = vrot.slane %v3053_v28, 1  ;;  %v3051_v31 = vshrl.u32 %v3049_v9, 16 }
 0x200   : > { %v7780_v47 = vpack.c.bf16 %v1675_v58, %v1675_v58 }
 0x203   : > { %5510 = vmatmul.msk.bf16.vlgmr.msrb.gmra.mxu3 %vm1974_vm1, %v7759_v29  ;;  %v2172_v49 = vpop.f32.mrf.mxu1 }
 0x204   : > { %3138 = vmatpush.bf16.msrb.mxu3 %v7536_v48  ;;  %v2128_v0 = vpop.f32.mrf.mxu0 }
 0x205   : > { %v2204_v19 = vpop.f32.mrf.mxu2 }
 0x206   : > { %v2208_v12 = vadd.f32 %v2204_v19, %v2174_v32  ;;  %v2248_v3 = vpop.f32.mrf.mxu3  ;;  %v7782_v19 = vor.u32 %v3055_v1, %v3051_v31 }
 0x208   : > { %v2252_v27 = vadd.f32 %v2248_v3, %v2208_v12  ;;  %3139 = vmatpush.bf16.msrb.mxu3 %v7571_v18  ;;  %v3120_v12 = vunpack.c.l.b16 %v7780_v47  ;;  %5511 = vmatmul.msk.bf16.vlgmr.msra.gmra.mxu0 %vm1974_vm1, %v7659_v20 }
 0x209   : > { %5513 = vmatmul.msk.bf16.vlgmr.msra.gmra.mxu2 %vm1974_vm1, %v7757_v11  ;;  %3155 = vmatpush.bf16.msra.mxu0 %v7330_v13  ;;  %v1738_v13 = vmax.f32 %v1737_v42, 0.0 }
 0x20a   : > { %5512 = vmatmul.msk.bf16.vlgmr.msra.gmra.mxu1 %vm1974_vm1, %v7686_v44  ;;  %3184 = vmatpush.bf16.msra.mxu2 %v7325_v24  ;;  %v3121_v9 = vpack.c.b16 %v3120_v12, %v3120_v12 }
 0x20b   : > { %v2326_v32 = vpop.f32.mrf.mxu1  ;;  %3168 = vmatpush.bf16.msra.mxu1 %v7343_v25  ;;  %v1739_v2 = vpack.c.bf16 %v1738_v13, %v1738_v13 }
 0x20c   : > { %v2282_v30 = vpop.f32.mrf.mxu0  ;;  %v3125_v24 = vshll.u32 %v3121_v9, 16 }
 0x20d   : > { %v2206_v50 = vpop.f32.mrf.mxu2  ;;  %v2286_v63 = vadd.f32 %v2282_v30, %v2252_v27  ;;  %3156 = vmatpush.bf16.msra.mxu0 %v7363_v6  ;;  %v3193_v30 = vunpack.c.l.b16 %v1739_v2 }
 0x20e   : > { %v2250_v39 = vpop.f32.mrf.mxu3  ;;  %3185 = vmatpush.bf16.msra.mxu2 %v7358_v21  ;;  %v3123_v50 = vshrl.u32 %v3121_v9, 16 }
 0x20f   : > { %v2330_v3 = vadd.f32 %v2326_v32, %v2286_v63  ;;  %3169 = vmatpush.bf16.msra.mxu1 %v7375_v36  ;;  %v3194_v6 = vpack.c.b16 %v3193_v30, %v3193_v30 }
 0x213   : > { %5514 = vmatmul.msk.bf16.vlgmr.msra.gmra.mxu3 %vm1974_vm1, %v7782_v19  ;;  %v2328_v27 = vpop.f32.mrf.mxu1 }
 0x214   : > { %3211 = vmatpush.bf16.msra.mxu3 %v7338_v15  ;;  %v2284_v49 = vpop.f32.mrf.mxu0  ;;  %v3127_v15 = vrot.slane %v3125_v24, 1 }
 0x215   : > { %v2360_v20 = vpop.f32.mrf.mxu2 }
 0x216   : > { %v2364_v44 = vadd.f32 %v2360_v20, %v2330_v3  ;;  %v2404_v0 = vpop.f32.mrf.mxu3  ;;  %v7809_v21 = vor.u32 %v3127_v15, %v3123_v50 }
 0x218   : > { %v7800_v28 = vadd.f32 %v2404_v0, %v2364_v44  ;;  %3212 = vmatpush.bf16.msra.mxu3 %v7370_v34  ;;  %5515 = vmatmul.msk.bf16.vlgmr.msrb.gmra.mxu0 %vm1974_vm1, %v7684_v8  ;;  %v1807_v34 = vadd.f32 %v7317_v23, %v7679_v56 }
 0x219   : > { %5517 = vmatmul.msk.bf16.vlgmr.msrb.gmra.mxu2 %vm1974_vm1, %v7780_v47  ;;  %3225 = vmatpush.bf16.msrb.mxu0 %v7396_v54 }
 0x21a   : > { %5516 = vmatmul.msk.bf16.vlgmr.msrb.gmra.mxu1 %vm1974_vm1, %v7711_v7  ;;  %3256 = vmatpush.bf16.msrb.mxu2 %v7391_v52  ;;  %v3198_v52 = vshll.u32 %v3194_v6, 16  ;;  %v1808_v54 = vmax.f32 %v1807_v34, 0.0 }
 0x21b   : > { %v7807_v39 = vpop.f32.mrf.mxu1  ;;  %3239 = vmatpush.bf16.msrb.mxu1 %v7409_v57  ;;  %v3196_v57 = vshrl.u32 %v3194_v6, 16 }
 0x21c   : > { %v7805_v1 = vpop.f32.mrf.mxu0  ;;  %v1809_v23 = vpack.c.bf16 %v1808_v54, %v1808_v54 }
 0x21d   : > { %v2362_v58 = vpop.f32.mrf.mxu2  ;;  %3226 = vmatpush.bf16.msrb.mxu0 %v7428_v10  ;;  %v6450_v10 = vld [vmem:[%s8776_s3] ss:$0 sm:$0xff] }
 0x21e   : > { %v2406_v25 = vpop.f32.mrf.mxu3  ;;  %3257 = vmatpush.bf16.msrb.mxu2 %v7419_v62  ;;  %v3265_v9 = vunpack.c.l.b16 %v1809_v23 }
 0x21f   : > { %3240 = vmatpush.bf16.msrb.mxu1 %v7441_v35 }
 0x220   : > { %v3266_v62 = vpack.c.b16 %v3265_v9, %v3265_v9 }
 0x222   : > { %v3268_v49 = vshrl.u32 %v3266_v62, 16 }
 0x223   : > { %5518 = vmatmul.msk.bf16.vlgmr.msrb.gmra.mxu3 %vm1974_vm1, %v7809_v21  ;;  %v2484_v31 = vpop.f32.mrf.mxu1 }
 0x224   : > { %3283 = vmatpush.bf16.msrb.mxu3 %v7401_v55  ;;  %v2440_v7 = vpop.f32.mrf.mxu0  ;;  %v3200_v55 = vrot.slane %v3198_v52, 1  ;;  %v7899_v52 = vld [vmem:[%s8779_s6 + $0x78] sm:$0xff] }
 0x225   : > { %v7824_v36 = vpop.f32.mrf.mxu2 }
 0x226   : > { %v7827_v8 = vpop.f32.mrf.mxu3  ;;  %v3201_v3 = vor.u32 %v3200_v55, %v3196_v57  ;;  %v7928_v57 = vld [vmem:[%s8779_s6 + $0x70] sm:$0xff] }
 0x228   : > { %3284 = vmatpush.bf16.msrb.mxu3 %v7433_v61  ;;  %5519 = vmatmul.msk.bf16.vlgmr.msra.gmra.mxu0 %vm1974_vm1, %v7736_v37  ;;  %v1870_v61 = vadd.f32 %v6450_v10, %v7704_v22 }
 0x229   : > { %5521 = vmatmul.msk.bf16.vlgmr.msra.gmra.mxu2 %vm1974_vm1, %v1739_v2  ;;  %3297 = vmatpush.bf16.msra.mxu0 %v7462_v40 }
 0x22a   : > { %5520 = vmatmul.msk.bf16.vlgmr.msra.gmra.mxu1 %vm1974_vm1, %v7709_v5  ;;  %3328 = vmatpush.bf16.msra.mxu2 %v7456_v38  ;;  %v3270_v38 = vshll.u32 %v3266_v62, 16  ;;  %v1871_v40 = vmax.f32 %v1870_v61, 0.0 }
 0x22b   : > { %v2593_v12 = vpop.f32.mrf.mxu1  ;;  %3311 = vmatpush.bf16.msra.mxu1 %v7476_v46 }
 0x22c   : > { %v2580_v32 = vpop.f32.mrf.mxu0  ;;  %v1872_v20 = vpack.c.bf16 %v1871_v40, %v1871_v40 }
 0x22d   : > { %v2518_v56 = vpop.f32.mrf.mxu2  ;;  %3298 = vmatpush.bf16.msra.mxu0 %v7497_v14  ;;  %v2594_v27 = vadd.f32 %v2593_v12, %v2580_v32 }
 0x22e   : > { %v2562_v63 = vpop.f32.mrf.mxu3  ;;  %3329 = vmatpush.bf16.msra.mxu2 %v7488_v43  ;;  %v3337_v13 = vunpack.c.l.b16 %v1872_v20  ;;  %v7922_v56 = vld [vmem:[%s8779_s6 + $0x50] sm:$0xff] }
 0x22f   : > { %3312 = vmatpush.bf16.msra.mxu1 %v7510_v51  ;;  %v2442_v51 = vadd.f32 %v7805_v1, %v7800_v28 }
 0x230   : > { %v3338_v14 = vpack.c.b16 %v3337_v13, %v3337_v13 }
 0x232   : > { %v3340_v34 = vshrl.u32 %v3338_v14, 16 }
 0x233   : > { %5522 = vmatmul.msk.bf16.vlgmr.msra.gmra.mxu3 %vm1974_vm1, %v3201_v3  ;;  %v2595_v42 = vpop.f32.mrf.mxu1 }
 0x234   : > { %3355 = vmatpush.bf16.msra.mxu3 %v7467_v41  ;;  %v2582_v37 = vpop.f32.mrf.mxu0  ;;  %v3272_v41 = vrot.slane %v3270_v38, 1  ;;  %v7952_v42 = vld [vmem:[%s8779_s6 + $0x68] sm:$0xff] }
 0x235   : > { %v2609_v35 = vpop.f32.mrf.mxu2 }
 0x236   : > { %v2636_v5 = vpop.f32.mrf.mxu3  ;;  %v3273_v24 = vor.u32 %v3272_v41, %v3268_v49  ;;  %v2613_v43 = vadd.f32 %v2609_v35, %v2594_v27  ;;  %v7941_v35 = vld [vmem:[%s8779_s6 + $0x8] sm:$0xff]  ;;  %v7960_v41 = vld [vmem:[%s8779_s6 + $0x20] sm:$0xff] }
 0x237   : > { %v7978_v49 = vld [vmem:[%s8779_s6 + $0x60] sm:$0xff] }
 0x238   : > { %3356 = vmatpush.bf16.msra.mxu3 %v7502_v53  ;;  %5523 = vmatmul.msk.bf16.vlgmr.msrb.gmra.mxu0 %vm1974_vm1, %v7734_v26  ;;  %v1940_v53 = vadd.f32 %v6450_v10, %v7729_v4  ;;  %v2486_v4 = vadd.f32 %v7807_v39, %v2442_v51  ;;  %v7934_v10 = vld [vmem:[%s8779_s6 + $0x28] sm:$0xff] }
 0x239   : > { %5525 = vmatmul.msk.bf16.vlgmr.msrb.gmra.mxu2 %vm1974_vm1, %v1809_v23  ;;  %3369 = vmatpush.bf16.msrb.mxu0 %v7531_v45  ;;  %v3342_v45 = vshll.u32 %v3338_v14, 16 }
 0x23a   : > { %5524 = vmatmul.msk.bf16.vlgmr.msrb.gmra.mxu1 %vm1974_vm1, %v7759_v29  ;;  %3400 = vmatpush.bf16.msrb.mxu2 %v7525_v33  ;;  %v2640_v29 = vadd.f32 %v2636_v5, %v2613_v43  ;;  %v2520_v28 = vadd.f32 %v7824_v36, %v2486_v4  ;;  %v7886_v36 = vld [vmem:[%s8779_s6 + $0x18] sm:$0xff]  ;;  %v7946_v5 = vld [vmem:[%s8779_s6 + $0x48] sm:$0xff] }
 0x23b   : > { %v2664_v46 = vpop.f32.mrf.mxu1  ;;  %3383 = vmatpush.bf16.msrb.mxu1 %v7546_v59  ;;  %v3344_v25 = vrot.slane %v3342_v45, 1 }
 0x23c   : > { %v2650_v0 = vpop.f32.mrf.mxu0 }
 0x23d   : > { %v2611_v44 = vpop.f32.mrf.mxu2  ;;  %v2654_v33 = vadd.f32 %v2650_v0, %v2640_v29  ;;  %3370 = vmatpush.bf16.msrb.mxu0 %v7566_v16  ;;  %v2564_v16 = vadd.f32 %v7827_v8, %v2520_v28  ;;  %v7891_v8 = vld [vmem:[%s8779_s6 + $0x58] sm:$0xff]  ;;  %v3345_v7 = vor.u32 %v3344_v25, %v3340_v34  ;;  %v8037_v34 = vld [vmem:[%s8779_s6 + $0xa0] sm:$0xff] }
 0x23e   : > { %v2638_v22 = vpop.f32.mrf.mxu3  ;;  %3401 = vmatpush.bf16.msrb.mxu2 %v7557_v60  ;;  %v7972_v44 = vld [vmem:[%s8779_s6 + $0x40] sm:$0xff] }
 0x23f   : > { %3384 = vmatpush.bf16.msrb.mxu1 %v7579_v17  ;;  %v2668_v59 = vadd.f32 %v2664_v46, %v2654_v33  ;;  %v7881_v17 = vld [vmem:[%s8779_s6 + $0x38] sm:$0xff] }
 0x243   : > { %5526 = vmatmul.msk.bf16.vlgmr.msrb.gmra.mxu3 %vm1974_vm1, %v3273_v24  ;;  %v2666_v58 = vpop.f32.mrf.mxu1 }
 0x244   : > { %3427 = vmatpush.bf16.msrb.mxu3 %v7536_v48  ;;  %v2652_v2 = vpop.f32.mrf.mxu0  ;;  %v1941_v48 = vmax.f32 %v1940_v53, 0.0  ;;  %v7985_v53 = vld [vmem:[%s8779_s6 + $0x98] sm:$0xff] }
 0x245   : > { %v2681_v26 = vpop.f32.mrf.mxu2  ;;  %v8006_v2 = vld [vmem:[%s8779_s6 + $0x90] sm:$0xff] }
 0x246   : > { %v2708_v15 = vpop.f32.mrf.mxu3  ;;  %v7870_v1 = vpack.c.bf16 %v1941_v48, %v1941_v48  ;;  %v2685_v30 = vadd.f32 %v2681_v26, %v2668_v59  ;;  %v7992_v26 = vld [vmem:[%s8779_s6 + $0xb8] sm:$0xff]  ;;  %v8018_v59 = vld [vmem:[%s8779_s6 + $0x88] sm:$0xff] }
 0x248   : > { %3428 = vmatpush.bf16.msrb.mxu3 %v7571_v18  ;;  %v7876_v18 = vld [vmem:[%s8778_s5] ss:$0 sm:$0xff]  ;;  %v3409_v31 = vunpack.c.l.b16 %v7870_v1  ;;  %5527 = vmatmul.msk.bf16.vlgmr.msra.gmra.mxu0 %vm1974_vm1, %v7757_v11  ;;  %v2712_v54 = vadd.f32 %v2708_v15, %v2685_v30  ;;  %v7910_v11 = vld [vmem:[%s8779_s6 + $0x30] sm:$0xff] }
 0x249   : > { %5529 = vmatmul.msk.bf16.vlgmr.msra.gmra.mxu2 %vm1974_vm1, %v1872_v20  ;;  %v2568_v55 = vadd.f32 %v7876_v18, %v2564_v16  ;;  %3496 = vmatpush.bf16.msra.mxu0 %v7881_v17  ;;  %v7967_v20 = vld [vmem:[%s8779_s6] sm:$0xff] }
 0x24a   : > { %5528 = vmatmul.msk.bf16.vlgmr.msra.gmra.mxu1 %vm1974_vm1, %v7782_v19  ;;  %3586 = vmatpush.bf16.msra.mxu2 %v7891_v8  ;;  %v7917_v19 = vld [vmem:[%s8779_s6 + $0x10] sm:$0xff]  ;;  %v3410_v63 = vpack.c.b16 %v3409_v31, %v3409_v31 }
 0x24b   : > { %v2736_v39 = vpop.f32.mrf.mxu1  ;;  %3536 = vmatpush.bf16.msra.mxu1 %v7886_v36  ;;  %v2569_v9 = vmax.f32 %v2568_v55, 0.0 }
 0x24c   : > { %v2722_v6 = vpop.f32.mrf.mxu0  ;;  %v3414_v37 = vshll.u32 %v3410_v63, 16  ;;  %v3412_v13 = vshrl.u32 %v3410_v63, 16 }
 0x24d   : > { %v2683_v50 = vpop.f32.mrf.mxu2  ;;  %v2726_v23 = vadd.f32 %v2722_v6, %v2712_v54  ;;  %3497 = vmatpush.bf16.msra.mxu0 %v7910_v11  ;;  %v7954_v40 = vpack.c.bf16 %v2569_v9, %v2569_v9 }
 0x24e   : > { %v2710_v60 = vpop.f32.mrf.mxu3  ;;  %3587 = vmatpush.bf16.msra.mxu2 %v7922_v56  ;;  %v3416_v22 = vrot.slane %v3414_v37, 1 }
 0x24f   : > { %v2740_v61 = vadd.f32 %v2736_v39, %v2726_v23  ;;  %3537 = vmatpush.bf16.msra.mxu1 %v7917_v19  ;;  %v3456_v43 = vunpack.c.l.b16 %v7954_v40  ;;  %v8031_v60 = vld [vmem:[%s8779_s6 + $0x80] sm:$0xff] }
 0x250   : > { %v3417_v29 = vor.u32 %v3416_v22, %v3412_v13 }
 0x251   : > { %3498 = vmatpush.bf16.msra.mxu0 %v7934_v10  ;;  %v3457_v15 = vpack.c.b16 %v3456_v43, %v3456_v43  ;;  %v8062_v43 = vld [vmem:[%s8779_s6 + $0xd8] sm:$0xff] }
 0x252   : > { %3588 = vmatpush.bf16.msra.mxu2 %v7946_v5 }
 0x253   : > { %5530 = vmatmul.msk.bf16.vlgmr.msra.gmra.mxu3 %vm1974_vm1, %v3345_v7  ;;  %v2738_v62 = vpop.f32.mrf.mxu1  ;;  %3538 = vmatpush.bf16.msra.mxu1 %v7941_v35  ;;  %v3461_v4 = vshll.u32 %v3457_v15, 16  ;;  %v3459_v16 = vshrl.u32 %v3457_v15, 16  ;;  %v3554_v63 = vrot.slane %v3457_v15, 1  ;;  %v6294_v15 = vld [vmem:[%s8779_s6 + $0x118] sm:$0xff] }
 0x254   : > { %3636 = vmatpush.bf16.msra.mxu3 %v7899_v52  ;;  %v2724_v3 = vpop.f32.mrf.mxu0 }
 0x255   : > { %v2753_v32 = vpop.f32.mrf.mxu2  ;;  %3499 = vmatpush.bf16.msra.mxu0 %v7960_v41  ;;  %v3463_v30 = vrot.slane %v3461_v4, 1 }
 0x256   : > { %v2780_v12 = vpop.f32.mrf.mxu3  ;;  %v2757_v38 = vadd.f32 %v2753_v32, %v2740_v61  ;;  %3589 = vmatpush.bf16.msra.mxu2 %v7972_v44 }
 0x257   : > { %3539 = vmatpush.bf16.msra.mxu1 %v7967_v20  ;;  %v3464_v55 = vor.u32 %v3463_v30, %v3459_v16  ;;  %v8105_v30 = vld [vmem:[%s8779_s6 + $0xf0] sm:$0xff] }
 0x258   : > { %3637 = vmatpush.bf16.msra.mxu3 %v7928_v57  ;;  %v2784_v46 = vadd.f32 %v2780_v12, %v2757_v38  ;;  %5531 = vmatmul.msk.bf16.vlgmr.msrb.gmra.mxu0 %vm1974_vm1, %v7780_v47  ;;  %v8012_v47 = vld [vmem:[%s8779_s6 + $0xb0] sm:$0xff] }
 0x259   : > { %5533 = vmatmul.msk.bf16.vlgmr.msrb.gmra.mxu2 %vm1974_vm1, %v7870_v1  ;;  %3696 = vmatpush.bf16.msrb.mxu0 %v7985_v53  ;;  %v8024_v1 = vld [vmem:[%s8779_s6 + $0xa8] sm:$0xff] }
 0x25a   : > { %5532 = vmatmul.msk.bf16.vlgmr.msrb.gmra.mxu1 %vm1974_vm1, %v7809_v21  ;;  %3797 = vmatpush.bf16.msrb.mxu2 %v8062_v43 }
 0x25b   : > { %v2808_v14 = vpop.f32.mrf.mxu1  ;;  %3747 = vmatpush.bf16.msrb.mxu1 %v7992_v26 }
 0x25c   : > { %3638 = vmatpush.bf16.msra.mxu3 %v7952_v42  ;;  %v2794_v24 = vpop.f32.mrf.mxu0 }
 0x25d   : > { %v2755_v0 = vpop.f32.mrf.mxu2  ;;  %v2798_v51 = vadd.f32 %v2794_v24, %v2784_v46  ;;  %3697 = vmatpush.bf16.msrb.mxu0 %v8006_v2 }
 0x25e   : > { %v2782_v27 = vpop.f32.mrf.mxu3 }
 0x25f   : > { %v2812_v58 = vadd.f32 %v2808_v14, %v2798_v51  ;;  %3748 = vmatpush.bf16.msrb.mxu1 %v8012_v47 }
 0x260   : > { %3639 = vmatpush.bf16.msra.mxu3 %v7978_v49 }
 0x261   : > { %3698 = vmatpush.bf16.msrb.mxu0 %v8018_v59 }
 0x263   : > { %5534 = vmatmul.msk.bf16.vlgmr.msrb.gmra.mxu3 %vm1974_vm1, %v3417_v29  ;;  %v2810_v28 = vpop.f32.mrf.mxu1  ;;  %3749 = vmatpush.bf16.msrb.mxu1 %v8024_v1 }
 0x264   : > { %v2796_v48 = vpop.f32.mrf.mxu0 }
 0x265   : > { %v2825_v21 = vpop.f32.mrf.mxu2  ;;  %3699 = vmatpush.bf16.msrb.mxu0 %v8031_v60  ;;  %v8099_v48 = vld [vmem:[%s8779_s6 + $0xc0] sm:$0xff] }
 0x266   : > { %v2829_v33 = vadd.f32 %v2825_v21, %v2812_v58  ;;  %v2852_v45 = vpop.f32.mrf.mxu3 }
 0x267   : > { %3750 = vmatpush.bf16.msrb.mxu1 %v8037_v34 }
 0x268   : > { %v2856_v25 = vadd.f32 %v2852_v45, %v2829_v33  ;;  %5559 = vmatmul.msk.bf16.vlgmr.msra.gmra.mxu0 %vm500_vm0, %v3464_v55  ;;  %v8089_v33 = vld [vmem:[%s8779_s6 + $0xf8] sm:$0xff]  ;;  %v6293_v45 = vld [vmem:[%s8779_s6 + $0x110] sm:$0xff] }
 0x269   : > { %5601 = vmatmul.msk.bf16.vlgmr.msra.gmra.mxu2 %vm500_vm0, %v3554_v63  ;;  %3908 = vmatpush.bf16.msra.mxu0 %v6294_v15 }
 0x26a   : > { %v2857_v50 = vadd.f32 %v7876_v18, %v2856_v25  ;;  %5576 = vmatmul.msk.bf16.vlgmr.msra.gmra.mxu1 %vm500_vm0, %v7954_v40  ;;  %3857 = vmatpush.bf16.msrb.mxu3 %v8089_v33 }
 0x26b   : > { %v2882_v23 = vpop.f32.mrf.mxu1  ;;  %3928 = vmatpush.bf16.msra.mxu1 %v7881_v17 }
 0x26c   : > { %v2858_v6 = vmax.f32 %v2857_v50, 0.0  ;;  %v2869_v54 = vpop.f32.mrf.mxu0 }
 0x26d   : > { %v2827_v39 = vpop.f32.mrf.mxu2  ;;  %v2883_v13 = vadd.f32 %v2882_v23, %v2869_v54  ;;  %3909 = vmatpush.bf16.msra.mxu0 %v6293_v45  ;;  %v8128_v23 = vld [vmem:[%s8779_s6 + $0xe0] sm:$0xff] }
 0x26e   : > { %v8039_v7 = vpack.c.bf16 %v2858_v6, %v2858_v6  ;;  %v2854_v31 = vpop.f32.mrf.mxu3  ;;  %3858 = vmatpush.bf16.msrb.mxu3 %v8105_v30  ;;  %v8117_v39 = vld [vmem:[%s8779_s6 + $0xe8] sm:$0xff] }
 0x26f   : > { %3929 = vmatpush.bf16.msra.mxu1 %v7910_v11  ;;  %v6291_v31 = vld [vmem:[%s8779_s6 + $0x100] sm:$0xff] }
 0x270   : > { %v3656_v32 = vunpack.c.l.b16 %v8039_v7 }
 0x272   : > { %v8048_v12 = vpack.c.b16 %v3656_v32, %v3656_v32  ;;  %3859 = vmatpush.bf16.msrb.mxu3 %v8117_v39 }
 0x273   : > { %5626 = vmatmul.msk.bf16.vlgmr.msra.gmra.mxu3 %vm500_vm0, %v8039_v7  ;;  %v2884_v37 = vpop.f32.mrf.mxu1  ;;  %3930 = vmatpush.bf16.msra.mxu1 %v7934_v10  ;;  %v8073_v10 = vld [vmem:[%s8779_s6 + $0xd0] sm:$0xff] }
 0x274   : > { %v2871_v62 = vpop.f32.mrf.mxu0  ;;  %v3661_v61 = vshll.u32 %v8048_v12, 16  ;;  %v3659_v40 = vshrl.u32 %v8048_v12, 16  ;;  %v3715_v17 = vrot.slane %v8048_v12, 1  ;;  %3798 = vmatpush.bf16.msrb.mxu2 %v8073_v10 }
 0x275   : > { %v2898_v3 = vpop.f32.mrf.mxu2 }
 0x276   : > { %v2925_v9 = vpop.f32.mrf.mxu3  ;;  %v3663_v38 = vrot.slane %v3661_v61, 1  ;;  %v2902_v11 = vadd.f32 %v2898_v3, %v2883_v13  ;;  %3860 = vmatpush.bf16.msrb.mxu3 %v8128_v23 }
 0x277   : > { %3931 = vmatpush.bf16.msra.mxu1 %v7960_v41 }
 0x278   : > { %v3664_v27 = vor.u32 %v3663_v38, %v3659_v40  ;;  %v2929_v14 = vadd.f32 %v2925_v9, %v2902_v11 }
 0x27a   : > { %5651 = vmatmul.msk.bf16.vlgmr.msrb.gmra.mxu0 %vm500_vm0, %v3664_v27  ;;  %5676 = vmatmul.msk.bf16.vlgmr.msrb.gmra.mxu1 %vm500_vm0, %v3715_v17 }
 0x27b   : > { %v2953_v24 = vpop.f32.mrf.mxu1  ;;  %3982 = vmatpush.bf16.msrb.mxu1 %v7985_v53  ;;  %v8083_v53 = vld [vmem:[%s8779_s6 + $0xc8] sm:$0xff]  ;;  %3954 = vmatpush.bf16.msra.mxu3 %v7891_v8 }
 0x27c   : > { %v2939_v46 = vpop.f32.mrf.mxu0  ;;  %3799 = vmatpush.bf16.msrb.mxu2 %v8083_v53 }
 0x27d   : > { %v2900_v22 = vpop.f32.mrf.mxu2  ;;  %v2943_v21 = vadd.f32 %v2939_v46, %v2929_v14 }
 0x27e   : > { %v2927_v0 = vpop.f32.mrf.mxu3 }
 0x27f   : > { %3983 = vmatpush.bf16.msrb.mxu1 %v8006_v2  ;;  %v2957_v2 = vadd.f32 %v2953_v24, %v2943_v21  ;;  %3955 = vmatpush.bf16.msra.mxu3 %v7922_v56 }
 0x280   : > { %3800 = vmatpush.bf16.msrb.mxu2 %v8099_v48 }
 0x283   : > { %v2955_v58 = vpop.f32.mrf.mxu1  ;;  %3984 = vmatpush.bf16.msrb.mxu1 %v8018_v59  ;;  %v6292_v59 = vld [vmem:[%s8779_s6 + $0x108] sm:$0xff]  ;;  %3956 = vmatpush.bf16.msra.mxu3 %v7946_v5 }
 0x284   : > { %v2941_v29 = vpop.f32.mrf.mxu0  ;;  %3941 = vmatpush.bf16.msra.mxu2 %v7886_v36  ;;  %3910 = vmatpush.bf16.msra.mxu0 %v6292_v59 }
 0x285   : > { %v2970_v41 = vpop.f32.mrf.mxu2 }
 0x286   : > { %v2997_v51 = vpop.f32.mrf.mxu3  ;;  %v2974_v28 = vadd.f32 %v2970_v41, %v2957_v2 }
 0x287   : > { %3985 = vmatpush.bf16.msrb.mxu1 %v8031_v60  ;;  %3957 = vmatpush.bf16.msra.mxu3 %v7972_v44 }
 0x288   : > { %v3001_v16 = vadd.f32 %v2997_v51, %v2974_v28  ;;  %3942 = vmatpush.bf16.msra.mxu2 %v7917_v19  ;;  %3911 = vmatpush.bf16.msra.mxu0 %v6291_v31 }
 0x28a   : > { %5752 = vmatmul.msk.bf16.vlgmr.msra.gmra.mxu1 %vm500_vm0, %v3664_v27 }
 0x28b   : > { %v3025_v6 = vpop.f32.mrf.mxu1  ;;  %4058 = vmatpush.bf16.msra.mxu1 %v6294_v15 }
 0x28c   : > { %v3011_v50 = vpop.f32.mrf.mxu0  ;;  %3968 = vmatpush.bf16.msrb.mxu0 %v7899_v52  ;;  %3943 = vmatpush.bf16.msra.mxu2 %v7941_v35 }
 0x28d   : > { %v2972_v4 = vpop.f32.mrf.mxu2  ;;  %v3015_v36 = vadd.f32 %v3011_v50, %v3001_v16 }
 0x28e   : > { %v2999_v25 = vpop.f32.mrf.mxu3 }
 0x28f   : > { %4059 = vmatpush.bf16.msra.mxu1 %v6293_v45  ;;  %v3029_v19 = vadd.f32 %v3025_v6, %v3015_v36 }
 0x290   : > { %3969 = vmatpush.bf16.msrb.mxu0 %v7928_v57  ;;  %3944 = vmatpush.bf16.msra.mxu2 %v7967_v20 }
 0x293   : > { %v3027_v63 = vpop.f32.mrf.mxu1  ;;  %4060 = vmatpush.bf16.msra.mxu1 %v6292_v59 }
 0x294   : > { %v3013_v55 = vpop.f32.mrf.mxu0  ;;  %3970 = vmatpush.bf16.msrb.mxu0 %v7952_v42 }
 0x295   : > { %v3042_v60 = vpop.f32.mrf.mxu2 }
 0x296   : > { %v3069_v54 = vpop.f32.mrf.mxu3  ;;  %v3046_v32 = vadd.f32 %v3042_v60, %v3029_v19 }
 0x297   : > { %4061 = vmatpush.bf16.msra.mxu1 %v6291_v31 }
 0x298   : > { %v3073_v3 = vadd.f32 %v3069_v54, %v3046_v32  ;;  %3971 = vmatpush.bf16.msrb.mxu0 %v7978_v49 }
 0x29b   : > { %v3097_v62 = vpop.f32.mrf.mxu1 }
 0x29c   : > { %v3083_v35 = vpop.f32.mrf.mxu0 }
 0x29d   : > { %v3044_v52 = vpop.f32.mrf.mxu2  ;;  %v3087_v61 = vadd.f32 %v3083_v35, %v3073_v3 }
 0x29e   : > { %v3071_v9 = vpop.f32.mrf.mxu3 }
 0x29f   : > { %v3101_v8 = vadd.f32 %v3097_v62, %v3087_v61 }
 0x2a3   : > { %v3099_v56 = vpop.f32.mrf.mxu1 }
 0x2a4   : > { %v3085_v38 = vpop.f32.mrf.mxu0 }
 0x2a5   : > { %v3114_v57 = vpop.f32.mrf.mxu2 }
 0x2a6   : > { %v3118_v20 = vadd.f32 %v3114_v57, %v3101_v8  ;;  %v3141_v37 = vpop.f32.mrf.mxu3 }
 0x2a8   : > { %v3145_v40 = vadd.f32 %v3141_v37, %v3118_v20 }
 0x2aa   : > { %v3146_v42 = vadd.f32 %v7876_v18, %v3145_v40 }
 0x2ab   : > { %v3171_v13 = vpop.f32.mrf.mxu1 }
 0x2ac   : > { %v3147_v22 = vmax.f32 %v3146_v42, 0.0  ;;  %v3158_v24 = vpop.f32.mrf.mxu0 }
 0x2ad   : > { %v3116_v0 = vpop.f32.mrf.mxu2 }
 0x2ae   : > { %v3148_v46 = vpack.c.bf16 %v3147_v22, %v3147_v22  ;;  %v3143_v27 = vpop.f32.mrf.mxu3 }
 0x2b0   : > { %v3817_v5 = vunpack.c.l.b16 %v3148_v46  ;;  %5701 = vmatmul.msk.bf16.vlgmr.msrb.gmra.mxu2 %vm500_vm0, %v3148_v46 }
 0x2b1   : > { %3996 = vmatpush.bf16.msrb.mxu2 %v7992_v26 }
 0x2b2   : > { %v3818_v49 = vpack.c.b16 %v3817_v5, %v3817_v5 }
 0x2b3   : > { %v3173_v58 = vpop.f32.mrf.mxu1 }
 0x2b4   : > { %v3822_v44 = vshll.u32 %v3818_v49, 16  ;;  %v3876_v11 = vrot.slane %v3818_v49, 1  ;;  %v3820_v14 = vshrl.u32 %v3818_v49, 16  ;;  %v3160_v15 = vpop.f32.mrf.mxu0 }
 0x2b5   : > { %v3187_v41 = vpop.f32.mrf.mxu2  ;;  %3997 = vmatpush.bf16.msrb.mxu2 %v8012_v47 }
 0x2b6   : > { %v3824_v51 = vrot.slane %v3822_v44, 1  ;;  %v3214_v29 = vpop.f32.mrf.mxu3  ;;  %5751 = vmatmul.msk.bf16.vlgmr.msra.gmra.mxu0 %vm500_vm0, %v3876_v11 }
 0x2b7   : > { %4040 = vmatpush.bf16.msra.mxu0 %v8089_v33  ;;  %v3172_v33 = vadd.f32 %v3171_v13, %v3158_v24 }
 0x2b8   : > { %v3825_v21 = vor.u32 %v3824_v51, %v3820_v14 }
 0x2b9   : > { %3998 = vmatpush.bf16.msrb.mxu2 %v8024_v1  ;;  %v3191_v1 = vadd.f32 %v3187_v41, %v3172_v33  ;;  %v6323_v33 = vld [vmem:[%s8781_s8 + $0xe4] sm:$0xf] }
 0x2ba   : > { %5726 = vmatmul.msk.bf16.vlgmr.msrb.gmra.mxu3 %vm500_vm0, %v3825_v21  ;;  %5756 = vmatmul.msk.bf16.vlgmr.msrb.gmra.mxu1 %vm500_vm0, %v3825_v21 }
 0x2bb   : > { %4013 = vmatpush.bf16.msrb.mxu3 %v8062_v43  ;;  %4041 = vmatpush.bf16.msra.mxu0 %v8105_v30  ;;  %v3242_v2 = vpop.f32.mrf.mxu1  ;;  %v3218_v4 = vadd.f32 %v3214_v29, %v3191_v1 }
 0x2bc   : > { %v3228_v45 = vpop.f32.mrf.mxu0 }
 0x2bd   : > { %v3189_v26 = vpop.f32.mrf.mxu2  ;;  %3999 = vmatpush.bf16.msrb.mxu2 %v8037_v34 }
 0x2be   : > { %v3216_v47 = vpop.f32.mrf.mxu3 }
 0x2bf   : > { %4014 = vmatpush.bf16.msrb.mxu3 %v8073_v10  ;;  %4042 = vmatpush.bf16.msra.mxu0 %v8117_v39  ;;  %v3232_v10 = vadd.f32 %v3228_v45, %v3218_v4  ;;  %v5827_v45 = vld [vmem:[%s8781_s8 + $0xe0] sm:$0xf]  ;;  %v5835_v4 = vld [vmem:[%s8781_s8 + $0xe8] sm:$0xf] }
 0x2c0   : > { %5753 = vmatmul.msk.bf16.vlgmr.msra.gmra.mxu2 %vm500_vm0, %v8039_v7 }
 0x2c1   : > { %v3246_v7 = vadd.f32 %v3242_v2, %v3232_v10  ;;  %v6325_v2 = vld [vmem:[%s8781_s8 + $0xec] sm:$0xf0]  ;;  %v6324_v10 = vld [vmem:[%s8781_s8 + $0xec] sm:$0xf] }
 0x2c2   : > { %v5828_v1 = vor.u32 %v6325_v2, %v5827_v45  ;;  %v5905_v45 = vld [vmem:[%s8781_s8 + $0x78] sm:$0xf0] }
 0x2c3   : > { %4015 = vmatpush.bf16.msrb.mxu3 %v8083_v53  ;;  %4043 = vmatpush.bf16.msra.mxu0 %v8128_v23  ;;  %v3244_v25 = vpop.f32.mrf.mxu1 }
 0x2c4   : > { %v3230_v34 = vpop.f32.mrf.mxu0  ;;  %4197 = vmatpush.bf16.msra.mxu2 %v5828_v1  ;;  %v5879_v1 = vld [vmem:[%s8781_s8 + $0x40] sm:$0xf] }
 0x2c5   : > { %v3259_v43 = vpop.f32.mrf.mxu2 }
 0x2c6   : > { %v3286_v28 = vpop.f32.mrf.mxu3  ;;  %5755 = vmatmul.msk.bf16.vlgmr.msrb.gmra.mxu0 %vm500_vm0, %v3148_v46  ;;  %v3263_v30 = vadd.f32 %v3259_v43, %v3246_v7  ;;  %v5829_v43 = vld [vmem:[%s8781_s8 + $0xf0] sm:$0xf0]  ;;  %v5837_v7 = vld [vmem:[%s8781_s8 + $0xf8] sm:$0xf0] }
 0x2c7   : > { %4016 = vmatpush.bf16.msrb.mxu3 %v8099_v48  ;;  %v5832_v34 = vor.u32 %v6323_v33, %v5829_v43  ;;  %v6305_v43 = vld [vmem:[%s8781_s8 + $0x4c] sm:$0xf0] }
 0x2c8   : > { %v3290_v16 = vadd.f32 %v3286_v28, %v3263_v30  ;;  %v6326_v28 = vld [vmem:[%s8781_s8 + $0xf4] sm:$0xf0]  ;;  %v5811_v30 = vld [vmem:[%s8781_s8 + $0xc0] sm:$0xf] }
 0x2c9   : > { %v5836_v25 = vor.u32 %v6326_v28, %v5835_v4  ;;  %v6303_v4 = vld [vmem:[%s8781_s8 + $0x44] sm:$0xf]  ;;  %v5880_v28 = vor.u32 %v6305_v43, %v5879_v1 }
 0x2ca   : > { %5754 = vmatmul.msk.bf16.vlgmr.msra.gmra.mxu3 %vm500_vm0, %v3715_v17 }
 0x2cb   : > { %v3314_v6 = vpop.f32.mrf.mxu1  ;;  %4210 = vmatpush.bf16.msra.mxu3 %v5832_v34  ;;  %4223 = vmatpush.bf16.msrb.mxu0 %v5836_v25  ;;  %v6306_v34 = vld [vmem:[%s8781_s8 + $0x54] sm:$0xf0] }
 0x2cc   : > { %v3300_v59 = vpop.f32.mrf.mxu0 }
 0x2cd   : > { %v3261_v50 = vpop.f32.mrf.mxu2  ;;  %v3304_v39 = vadd.f32 %v3300_v59, %v3290_v16  ;;  %v6319_v59 = vld [vmem:[%s8781_s8 + $0xc4] sm:$0xf]  ;;  %v5813_v16 = vld [vmem:[%s8781_s8 + $0xd0] sm:$0xf0] }
 0x2ce   : > { %v3288_v53 = vpop.f32.mrf.mxu3  ;;  %v5840_v50 = vor.u32 %v6324_v10, %v5837_v7 }
 0x2cf   : > { %v3318_v48 = vadd.f32 %v3314_v6, %v3304_v39  ;;  %v6321_v53 = vld [vmem:[%s8781_s8 + $0xcc] sm:$0xf0]  ;;  %v5819_v39 = vld [vmem:[%s8781_s8 + $0xc8] sm:$0xf] }
 0x2d0   : > { %5757 = vmatmul.msk.bf16.vlgmr.msrb.gmra.mxu2 %vm500_vm0, %v3876_v11  ;;  %4236 = vmatpush.bf16.msrb.mxu1 %v5840_v50  ;;  %v5812_v6 = vor.u32 %v6321_v53, %v5811_v30  ;;  %v6304_v30 = vld [vmem:[%s8781_s8 + $0x4c] sm:$0xf]  ;;  %v5889_v53 = vld [vmem:[%s8781_s8 + $0x58] sm:$0xf0] }
 0x2d2   : > { %4198 = vmatpush.bf16.msra.mxu2 %v5812_v6  ;;  %v5892_v6 = vor.u32 %v6304_v30, %v5889_v53  ;;  %v5963_v53 = vld [vmem:[%s8781_s8 + $0x140] sm:$0xf] }
 0x2d3   : > { %v3316_v54 = vpop.f32.mrf.mxu1 }
 0x2d4   : > { %v3302_v60 = vpop.f32.mrf.mxu0  ;;  %v6320_v54 = vld [vmem:[%s8781_s8 + $0xcc] sm:$0xf] }
 0x2d5   : > { %v3331_v31 = vpop.f32.mrf.mxu2 }
 0x2d6   : > { %v3358_v36 = vpop.f32.mrf.mxu3  ;;  %v3335_v55 = vadd.f32 %v3331_v31, %v3318_v48  ;;  %v6322_v31 = vld [vmem:[%s8781_s8 + $0xd4] sm:$0xf0]  ;;  %v5821_v48 = vld [vmem:[%s8781_s8 + $0xd8] sm:$0xf0] }
 0x2d7   : > { %v5820_v60 = vor.u32 %v6322_v31, %v5819_v39  ;;  %v6301_v39 = vld [vmem:[%s8781_s8 + $0x2c] sm:$0xf0]  ;;  %v6299_v31 = vld [vmem:[%s8781_s8 + $0x24] sm:$0xf] }
 0x2d8   : > { %v3362_v12 = vadd.f32 %v3358_v36, %v3335_v55  ;;  %v5816_v36 = vor.u32 %v6319_v59, %v5813_v16  ;;  %v5824_v55 = vor.u32 %v6320_v54, %v5821_v48  ;;  %v5863_v16 = vld [vmem:[%s8781_s8 + $0x20] sm:$0xf]  ;;  %v5871_v54 = vld [vmem:[%s8781_s8 + $0x28] sm:$0xf]  ;;  %v6302_v48 = vld [vmem:[%s8781_s8 + $0x34] sm:$0xf0] }
 0x2d9   : > { %4224 = vmatpush.bf16.msrb.mxu0 %v5820_v60  ;;  %v5865_v60 = vld [vmem:[%s8781_s8 + $0x30] sm:$0xf0] }
 0x2da   : > { %4211 = vmatpush.bf16.msra.mxu3 %v5816_v36  ;;  %4237 = vmatpush.bf16.msrb.mxu1 %v5824_v55 }
 0x2db   : > { %v3386_v19 = vpop.f32.mrf.mxu1 }
 0x2dc   : > { %v3372_v17 = vpop.f32.mrf.mxu0 }
 0x2dd   : > { %v3333_v23 = vpop.f32.mrf.mxu2  ;;  %v3376_v32 = vadd.f32 %v3372_v17, %v3362_v12  ;;  %v6317_v12 = vld [vmem:[%s8781_s8 + $0xac] sm:$0xf0] }
 0x2de   : > { %v3360_v63 = vpop.f32.mrf.mxu3  ;;  %v5795_v23 = vld [vmem:[%s8781_s8 + $0xa0] sm:$0xf] }
 0x2df   : > { %v3390_v52 = vadd.f32 %v3386_v19, %v3376_v32  ;;  %v6315_v63 = vld [vmem:[%s8781_s8 + $0xa4] sm:$0xf]  ;;  %v5796_v17 = vor.u32 %v6317_v12, %v5795_v23  ;;  %v5797_v19 = vld [vmem:[%s8781_s8 + $0xb0] sm:$0xf0]  ;;  %v5803_v32 = vld [vmem:[%s8781_s8 + $0xa8] sm:$0xf]  ;;  %v5868_v23 = vor.u32 %v6299_v31, %v5865_v60  ;;  %v5872_v12 = vor.u32 %v6302_v48, %v5871_v54 }
 0x2e0   : > { %v5965_v31 = vld [vmem:[%s8781_s8 + $0x150] sm:$0xf0]  ;;  %v6338_v60 = vld [vmem:[%s8781_s8 + $0x154] sm:$0xf0]  ;;  %v6336_v54 = vld [vmem:[%s8781_s8 + $0x14c] sm:$0xf] }
 0x2e1   : > { %4199 = vmatpush.bf16.msra.mxu2 %v5796_v17  ;;  %v5973_v48 = vld [vmem:[%s8781_s8 + $0x158] sm:$0xf0] }
 0x2e3   : > { %v3388_v61 = vpop.f32.mrf.mxu1 }
 0x2e4   : > { %v3374_v62 = vpop.f32.mrf.mxu0 }
 0x2e5   : > { %v3403_v3 = vpop.f32.mrf.mxu2  ;;  %v5805_v62 = vld [vmem:[%s8781_s8 + $0xb8] sm:$0xf0] }
 0x2e6   : > { %v3407_v9 = vadd.f32 %v3403_v3, %v3390_v52  ;;  %v3430_v35 = vpop.f32.mrf.mxu3  ;;  %v6318_v52 = vld [vmem:[%s8781_s8 + $0xb4] sm:$0xf0]  ;;  %v5800_v3 = vor.u32 %v6315_v63, %v5797_v19  ;;  %v5873_v63 = vld [vmem:[%s8781_s8 + $0x38] sm:$0xf0]  ;;  %v5847_v19 = vld [vmem:[%s8781_s8] sm:$0xf] }
 0x2e8   : > { %v3434_v8 = vadd.f32 %v3430_v35, %v3407_v9  ;;  %v5804_v9 = vor.u32 %v6318_v52, %v5803_v32  ;;  %v6316_v35 = vld [vmem:[%s8781_s8 + $0xac] sm:$0xf]  ;;  %4212 = vmatpush.bf16.msra.mxu3 %v5800_v3  ;;  %v6297_v32 = vld [vmem:[%s8781_s8 + $0xc] sm:$0xf0]  ;;  %v6295_v52 = vld [vmem:[%s8781_s8 + $0x4] sm:$0xf] }
 0x2e9   : > { %v5808_v61 = vor.u32 %v6316_v35, %v5805_v62  ;;  %v5849_v35 = vld [vmem:[%s8781_s8 + $0x10] sm:$0xf0]  ;;  %v5855_v62 = vld [vmem:[%s8781_s8 + $0x8] sm:$0xf] }
 0x2ea   : > { %v3435_v57 = vadd.f32 %v7876_v18, %v3434_v8  ;;  %4225 = vmatpush.bf16.msrb.mxu0 %v5804_v9  ;;  %v5779_v8 = vld [vmem:[%s8781_s8 + $0x80] sm:$0xf]  ;;  %v5848_v9 = vor.u32 %v6297_v32, %v5847_v19  ;;  %v5949_v32 = vld [vmem:[%s8781_s8 + $0x130] sm:$0xf0] }
 0x2eb   : > { %v3541_v42 = vpop.f32.mrf.mxu1  ;;  %4238 = vmatpush.bf16.msrb.mxu1 %v5808_v61  ;;  %v6298_v61 = vld [vmem:[%s8781_s8 + $0x14] sm:$0xf0] }
 0x2ec   : > { %v3436_v20 = vmax.f32 %v3435_v57, 0.0  ;;  %v3501_v40 = vpop.f32.mrf.mxu0  ;;  %v6313_v57 = vld [vmem:[%s8781_s8 + $0x8c] sm:$0xf0] }
 0x2ed   : > { %v3405_v37 = vpop.f32.mrf.mxu2  ;;  %v8165_v0 = vadd.f32 %v3541_v42, %v3501_v40  ;;  %v6314_v40 = vld [vmem:[%s8781_s8 + $0x94] sm:$0xf0] }
 0x2ee   : > { %v3437_v38 = vpack.c.bf16 %v3436_v20, %v3436_v20  ;;  %v3432_v56 = vpop.f32.mrf.mxu3  ;;  %v6311_v20 = vld [vmem:[%s8781_s8 + $0x84] sm:$0xf]  ;;  %v5780_v37 = vor.u32 %v6313_v57, %v5779_v8 }
 0x2ef   : > { %v5787_v56 = vld [vmem:[%s8781_s8 + $0x88] sm:$0xf] }
 0x2f0   : > { %v4024_v22 = vunpack.c.l.b16 %v3437_v38  ;;  %5758 = vmatmul.msk.bf16.vlgmr.msrb.gmra.mxu3 %vm500_vm0, %v3437_v38  ;;  %v5781_v38 = vld [vmem:[%s8781_s8 + $0x90] sm:$0xf0]  ;;  %4200 = vmatpush.bf16.msra.mxu2 %v5780_v37  ;;  %v5856_v37 = vor.u32 %v6298_v61, %v5855_v62  ;;  %v6332_v61 = vld [vmem:[%s8781_s8 + $0x12c] sm:$0xf] }
 0x2f1   : > { %v5784_v42 = vor.u32 %v6311_v20, %v5781_v38  ;;  %v5852_v20 = vor.u32 %v6295_v52, %v5849_v35  ;;  %v5857_v38 = vld [vmem:[%s8781_s8 + $0x18] sm:$0xf0]  ;;  %v5955_v52 = vld [vmem:[%s8781_s8 + $0x128] sm:$0xf] }
 0x2f2   : > { %v4025_v46 = vpack.c.b16 %v4024_v22, %v4024_v22  ;;  %v5788_v22 = vor.u32 %v6314_v40, %v5787_v56 }
 0x2f3   : > { %v3543_v11 = vpop.f32.mrf.mxu1  ;;  %4213 = vmatpush.bf16.msra.mxu3 %v5784_v42 }
 0x2f4   : > { %v4029_v27 = vshll.u32 %v4025_v46, 16  ;;  %v4050_v24 = vrot.slane %v4025_v46, 1  ;;  %v4027_v5 = vshrl.u32 %v4025_v46, 16  ;;  %v3503_v18 = vpop.f32.mrf.mxu0  ;;  %v6312_v46 = vld [vmem:[%s8781_s8 + $0x8c] sm:$0xf]  ;;  %4226 = vmatpush.bf16.msrb.mxu0 %v5788_v22 }
 0x2f5   : > { %v8168_v13 = vpop.f32.mrf.mxu2  ;;  %v6307_v18 = vld [vmem:[%s8781_s8 + $0x64] sm:$0xf] }
 0x2f6   : > { %v4031_v49 = vrot.slane %v4029_v27, 1  ;;  %v8170_v44 = vpop.f32.mrf.mxu3  ;;  %5760 = vmatmul.msk.bf16.vlgmr.msra.gmra.mxu1 %vm500_vm0, %v4050_v24  ;;  %v5789_v27 = vld [vmem:[%s8781_s8 + $0x98] sm:$0xf0]  ;;  %v3595_v2 = vadd.f32 %v8168_v13, %v8165_v0  ;;  %v5881_v0 = vld [vmem:[%s8781_s8 + $0x50] sm:$0xf0] }
 0x2f7   : > { %v5792_v24 = vor.u32 %v6312_v46, %v5789_v27  ;;  %v5887_v13 = vld [vmem:[%s8781_s8 + $0x48] sm:$0xf]  ;;  %v5884_v7 = vor.u32 %v6303_v4, %v5881_v0  ;;  %v8382_v46 = vld [vmem:[%s8780_s7] ss:$0 sm:$0xff]  ;;  %v6339_v4 = vld [vmem:[%s8781_s8 + $0x164] sm:$0xf] }
 0x2f8   : > { %v4032_v41 = vor.u32 %v4031_v49, %v4027_v5  ;;  %v5895_v5 = vld [vmem:[%s8781_s8 + $0x60] sm:$0xf]  ;;  %v6309_v49 = vld [vmem:[%s8781_s8 + $0x6c] sm:$0xf0]  ;;  %v5888_v50 = vor.u32 %v6306_v34, %v5887_v13  ;;  %v3645_v59 = vadd.f32 %v8170_v44, %v3595_v2  ;;  %v5864_v44 = vor.u32 %v6301_v39, %v5863_v16  ;;  %v5987_v0 = vld [vmem:[%s8781_s8 + $0x168] sm:$0xf] }
 0x2f9   : > { %4239 = vmatpush.bf16.msrb.mxu1 %v5792_v24  ;;  %v5896_v11 = vor.u32 %v6309_v49, %v5895_v5  ;;  %v6342_v34 = vld [vmem:[%s8781_s8 + $0x174] sm:$0xf0]  ;;  %v6335_v39 = vld [vmem:[%s8781_s8 + $0x144] sm:$0xf] }
 0x2fa   : > { %5759 = vmatmul.msk.bf16.vlgmr.msra.gmra.mxu0 %vm500_vm0, %v4032_v41  ;;  %v5897_v41 = vld [vmem:[%s8781_s8 + $0x70] sm:$0xf0] }
 0x2fb   : > { %v8176_v15 = vpop.f32.mrf.mxu1  ;;  %4332 = vmatpush.bf16.msrb.mxu2 %v5896_v11 }
 0x2fc   : > { %v8174_v29 = vpop.f32.mrf.mxu0 }
 0x2fd   : > { %v3593_v14 = vpop.f32.mrf.mxu2  ;;  %v3705_v36 = vadd.f32 %v8174_v29, %v3645_v59  ;;  %v6300_v29 = vld [vmem:[%s8781_s8 + $0x2c] sm:$0xf]  ;;  %v6337_v59 = vld [vmem:[%s8781_s8 + $0x14c] sm:$0xf0] }
 0x2fe   : > { %v3643_v51 = vpop.f32.mrf.mxu3  ;;  %v5903_v14 = vld [vmem:[%s8781_s8 + $0x68] sm:$0xf]  ;;  %v5876_v17 = vor.u32 %v6300_v29, %v5873_v63  ;;  %v5964_v16 = vor.u32 %v6337_v59, %v5963_v53  ;;  %v5947_v29 = vld [vmem:[%s8781_s8 + $0x120] sm:$0xf]  ;;  %v6333_v63 = vld [vmem:[%s8781_s8 + $0x12c] sm:$0xf0] }
 0x2ff   : > { %v6310_v51 = vld [vmem:[%s8781_s8 + $0x74] sm:$0xf0]  ;;  %4333 = vmatpush.bf16.msrb.mxu2 %v5880_v28  ;;  %v3756_v3 = vadd.f32 %v8176_v15, %v3705_v36  ;;  %v6296_v15 = vld [vmem:[%s8781_s8 + $0xc] sm:$0xf]  ;;  %v5981_v28 = vld [vmem:[%s8781_s8 + $0x170] sm:$0xf0]  ;;  %v5948_v19 = vor.u32 %v6333_v63, %v5947_v29 }
 0x300   : > { %v5860_v40 = vor.u32 %v6296_v15, %v5857_v38  ;;  %v5984_v13 = vor.u32 %v6339_v4, %v5981_v28  ;;  %v5971_v36 = vld [vmem:[%s8781_s8 + $0x148] sm:$0xf]  ;;  %v6327_v15 = vld [vmem:[%s8781_s8 + $0x104] sm:$0xf]  ;;  %v6073_v4 = vld [vmem:[%s8781_s8 + $0x1f8] sm:$0xf0] }
 0x301   : > { %v6047_v28 = vld [vmem:[%s8781_s8 + $0x1c0] sm:$0xf]  ;;  %v6354_v53 = vld [vmem:[%s8781_s8 + $0x1d4] sm:$0xf0]  ;;  %v6352_v59 = vld [vmem:[%s8781_s8 + $0x1cc] sm:$0xf] }
 0x302   : > { %v6041_v29 = vld [vmem:[%s8781_s8 + $0x1b8] sm:$0xf0] }
 0x303   : > { %v3754_v21 = vpop.f32.mrf.mxu1  ;;  %4334 = vmatpush.bf16.msrb.mxu2 %v5864_v44  ;;  %v5968_v44 = vor.u32 %v6335_v39, %v5965_v31  ;;  %v6057_v39 = vld [vmem:[%s8781_s8 + $0x1d8] sm:$0xf0]  ;;  %v6031_v31 = vld [vmem:[%s8781_s8 + $0x1a0] sm:$0xf] }
 0x304   : > { %v3703_v58 = vpop.f32.mrf.mxu0  ;;  %v5904_v21 = vor.u32 %v6310_v51, %v5903_v14 }
 0x305   : > { %v5900_v58 = vor.u32 %v6307_v18, %v5897_v41 }
 0x306   : > { %4358 = vmatpush.bf16.msra.mxu0 %v5904_v21  ;;  %v6341_v21 = vld [vmem:[%s8781_s8 + $0x16c] sm:$0xf0] }
 0x307   : > { %4345 = vmatpush.bf16.msrb.mxu3 %v5900_v58  ;;  %4335 = vmatpush.bf16.msrb.mxu2 %v5848_v9  ;;  %v5979_v58 = vld [vmem:[%s8781_s8 + $0x160] sm:$0xf] }
 0x308   : > { %v5980_v1 = vor.u32 %v6341_v21, %v5979_v58  ;;  %v6065_v21 = vld [vmem:[%s8781_s8 + $0x1f0] sm:$0xf0] }
 0x30a   : > { %4359 = vmatpush.bf16.msra.mxu0 %v5888_v50  ;;  %v5988_v50 = vor.u32 %v6342_v34, %v5987_v0  ;;  %v6351_v34 = vld [vmem:[%s8781_s8 + $0x1c4] sm:$0xf] }
 0x30b   : > { %v8178_v26 = vpop.f32.mrf.mxu1  ;;  %4346 = vmatpush.bf16.msrb.mxu3 %v5884_v7 }
 0x30e   : > { %4360 = vmatpush.bf16.msra.mxu0 %v5872_v12  ;;  %v5976_v12 = vor.u32 %v6336_v54, %v5973_v48 }
 0x30f   : > { %4347 = vmatpush.bf16.msrb.mxu3 %v5868_v23  ;;  %v5972_v23 = vor.u32 %v6338_v60, %v5971_v36  ;;  %v6349_v36 = vld [vmem:[%s8781_s8 + $0x1ac] sm:$0xf0]  ;;  %v6347_v60 = vld [vmem:[%s8781_s8 + $0x1a4] sm:$0xf] }
 0x310   : > { %v6032_v48 = vor.u32 %v6349_v36, %v6031_v31  ;;  %v6365_v31 = vld [vmem:[%s8783_s10 + $0x30] sm:$0xff] }
 0x311   : > { %v6373_v36 = vld [vmem:[%s8783_s10 + $0x70] sm:$0xff] }
 0x312   : > { %4361 = vmatpush.bf16.msra.mxu0 %v5856_v37  ;;  %v6329_v37 = vld [vmem:[%s8781_s8 + $0x10c] sm:$0xf0] }
 0x313   : > { %v3935_v47 = vpop.f32.mrf.mxu1  ;;  %4348 = vmatpush.bf16.msrb.mxu3 %v5852_v20  ;;  %v5931_v20 = vld [vmem:[%s8781_s8 + $0x100] sm:$0xf] }
 0x314   : > { %v6308_v47 = vld [vmem:[%s8781_s8 + $0x6c] sm:$0xf]  ;;  %v5932_v38 = vor.u32 %v6329_v37, %v5931_v20 }
 0x315   : > { %v5908_v33 = vor.u32 %v6308_v47, %v5905_v45 }
 0x317   : > { %4371 = vmatpush.bf16.msra.mxu1 %v5908_v33 }
 0x31b   : > { %4372 = vmatpush.bf16.msra.mxu1 %v5892_v6 }
 0x31f   : > { %4373 = vmatpush.bf16.msra.mxu1 %v5876_v17  ;;  %v6331_v17 = vld [vmem:[%s8781_s8 + $0x124] sm:$0xf] }
 0x320   : > { %v5952_v35 = vor.u32 %v6331_v17, %v5949_v32  ;;  %v6343_v32 = vld [vmem:[%s8781_s8 + $0x184] sm:$0xf] }
 0x323   : > { %4374 = vmatpush.bf16.msra.mxu1 %v5860_v40  ;;  %v5939_v40 = vld [vmem:[%s8781_s8 + $0x108] sm:$0xf] }
 0x333   : > { %v3802_v25 = vpop.f32.mrf.mxu2  ;;  %v3913_v10 = vpop.f32.mrf.mxu0 }
 0x334   : > { %v3806_v56 = vadd.f32 %v3802_v25, %v3756_v3  ;;  %v6340_v25 = vld [vmem:[%s8781_s8 + $0x16c] sm:$0xf]  ;;  %v6334_v3 = vld [vmem:[%s8781_s8 + $0x134] sm:$0xf0] }
 0x335   : > { %v5956_v62 = vor.u32 %v6334_v3, %v5955_v52  ;;  %v6017_v3 = vld [vmem:[%s8781_s8 + $0x190] sm:$0xf0] }
 0x336   : > { %v6020_v20 = vor.u32 %v6343_v32, %v6017_v3  ;;  %v6385_v32 = vld [vmem:[%s8783_s10 + $0xd0] sm:$0xff]  ;;  %v6370_v3 = vld [vmem:[%s8783_s10 + $0x58] sm:$0xff] }
 0x337   : > { %v8346_v55 = vpop.f32.mrf.mxu1 }
 0x33b   : > { %v3804_v8 = vpop.f32.mrf.mxu2  ;;  %v3915_v57 = vpop.f32.mrf.mxu0 }
 0x33c   : > { %v5957_v8 = vld [vmem:[%s8781_s8 + $0x138] sm:$0xf0] }
 0x33d   : > { %v3862_v42 = vpop.f32.mrf.mxu3  ;;  %v5960_v57 = vor.u32 %v6332_v61, %v5957_v8  ;;  %v6025_v61 = vld [vmem:[%s8781_s8 + $0x198] sm:$0xf0] }
 0x33e   : > { %v3866_v22 = vadd.f32 %v3862_v42, %v3806_v56  ;;  %v5933_v56 = vld [vmem:[%s8781_s8 + $0x110] sm:$0xf0]  ;;  %v6330_v42 = vld [vmem:[%s8781_s8 + $0x114] sm:$0xf0] }
 0x33f   : > { %v3989_v27 = vpop.f32.mrf.mxu1 }
 0x340   : > { %v3917_v24 = vadd.f32 %v3913_v10, %v3866_v22  ;;  %v5989_v10 = vld [vmem:[%s8781_s8 + $0x178] sm:$0xf0]  ;;  %v5936_v22 = vor.u32 %v6327_v15, %v5933_v56  ;;  %v5940_v27 = vor.u32 %v6330_v42, %v5939_v40 }
 0x341   : > { %v5992_v30 = vor.u32 %v6340_v25, %v5989_v10  ;;  %v6049_v25 = vld [vmem:[%s8781_s8 + $0x1d0] sm:$0xf0] }
 0x342   : > { %v3921_v5 = vadd.f32 %v8382_v46, %v3917_v24  ;;  %v6328_v24 = vld [vmem:[%s8781_s8 + $0x10c] sm:$0xf] }
 0x343   : > { %v8385_v49 = vpop.f32.mrf.mxu2  ;;  %v8387_v18 = vpop.f32.mrf.mxu0 }
 0x344   : > { %v3922_v11 = vmax.f32 %v3921_v5, 0.0  ;;  %v5941_v5 = vld [vmem:[%s8781_s8 + $0x118] sm:$0xf0] }
 0x345   : > { %v3864_v41 = vpop.f32.mrf.mxu3 }
 0x346   : > { %v8389_v14 = vpack.c.bf16 %v3922_v11, %v3922_v11  ;;  %v5944_v11 = vor.u32 %v6328_v24, %v5941_v5  ;;  %v6063_v41 = vld [vmem:[%s8781_s8 + $0x1e0] sm:$0xf] }
 0x348   : > { %v4105_v51 = vunpack.c.l.b16 %v8389_v14 }
 0x34a   : > { %v4106_v47 = vpack.c.b16 %v4105_v51, %v4105_v51  ;;  %v6355_v51 = vld [vmem:[%s8781_s8 + $0x1e4] sm:$0xf] }
 0x34b   : > { %v3948_v45 = vpop.f32.mrf.mxu2  ;;  %v3975_v2 = vpop.f32.mrf.mxu0 }
 0x34c   : > { %v4108_v33 = vshrl.u32 %v4106_v47, 16  ;;  %v6071_v47 = vld [vmem:[%s8781_s8 + $0x1e8] sm:$0xf]  ;;  %v6358_v45 = vld [vmem:[%s8781_s8 + $0x1f4] sm:$0xf0]  ;;  %v6068_v2 = vor.u32 %v6355_v51, %v6065_v21 }
 0x34d   : > { %v8398_v43 = vpop.f32.mrf.mxu3 }
 0x34e   : > { %5841 = vmatmul.msk.bf16.vlgmr.msra.gmra.mxu2 %vm500_vm0, %v4108_v33  ;;  %5842 = vmatmul.msk.bf16.vlgmr.msra.gmra.mxu3 %vm500_vm0, %v4108_v33 }
 0x34f   : > { %5843 = vmatmul.msk.bf16.vlgmr.msrb.gmra.mxu0 %vm500_vm0, %v4108_v33  ;;  %5844 = vmatmul.msk.bf16.vlgmr.msrb.gmra.mxu1 %vm500_vm0, %v4108_v33  ;;  %v6072_v33 = vor.u32 %v6358_v45, %v6071_v47  ;;  %v6390_v47 = vld [vmem:[%s8783_s10 + $0xf8] sm:$0xff]  ;;  %v6381_v45 = vld [vmem:[%s8783_s10 + $0xb0] sm:$0xff] }
 0x350   : > { %4484 = vmatpush.bf16.msra.mxu2 %v5980_v1  ;;  %4497 = vmatpush.bf16.msra.mxu3 %v5984_v13  ;;  %v6356_v1 = vld [vmem:[%s8781_s8 + $0x1ec] sm:$0xf]  ;;  %v6353_v13 = vld [vmem:[%s8781_s8 + $0x1cc] sm:$0xf0] }
 0x351   : > { %4510 = vmatpush.bf16.msrb.mxu0 %v5988_v50  ;;  %4523 = vmatpush.bf16.msrb.mxu1 %v5992_v30  ;;  %v6076_v0 = vor.u32 %v6356_v1, %v6073_v4  ;;  %v6048_v10 = vor.u32 %v6353_v13, %v6047_v28  ;;  %v6052_v50 = vor.u32 %v6351_v34, %v6049_v25  ;;  %v6055_v30 = vld [vmem:[%s8781_s8 + $0x1c8] sm:$0xf] }
 0x353   : > { %v8422_v7 = vpop.f32.mrf.mxu2 }
 0x354   : > { %4485 = vmatpush.bf16.msra.mxu2 %v5964_v16  ;;  %4498 = vmatpush.bf16.msra.mxu3 %v5968_v44  ;;  %v6056_v16 = vor.u32 %v6354_v53, %v6055_v30  ;;  %v6060_v44 = vor.u32 %v6352_v59, %v6057_v39  ;;  %v6366_v30 = vld [vmem:[%s8783_s10 + $0x38] sm:$0xff]  ;;  %v6380_v59 = vld [vmem:[%s8783_s10 + $0xa8] sm:$0xff] }
 0x355   : > { %v3961_v6 = vpop.f32.mrf.mxu3  ;;  %4511 = vmatpush.bf16.msrb.mxu0 %v5972_v23  ;;  %4524 = vmatpush.bf16.msrb.mxu1 %v5976_v12  ;;  %v6350_v23 = vld [vmem:[%s8781_s8 + $0x1b4] sm:$0xf0]  ;;  %v6348_v12 = vld [vmem:[%s8781_s8 + $0x1ac] sm:$0xf] }
 0x356   : > { %v3947_v6 = vadd.f32 %v8385_v49, %v8178_v26  ;;  %v6033_v26 = vld [vmem:[%s8781_s8 + $0x1b0] sm:$0xf0]  ;;  %v6039_v49 = vld [vmem:[%s8781_s8 + $0x1a8] sm:$0xf]  ;;  %v6044_v52 = vor.u32 %v6348_v12, %v6041_v29  ;;  %v6374_v53 = vld [vmem:[%s8783_s10 + $0x78] sm:$0xff] }
 0x357   : > { %v6036_v63 = vor.u32 %v6347_v60, %v6033_v26  ;;  %v6040_v17 = vor.u32 %v6350_v23, %v6039_v49  ;;  %v6379_v26 = vld [vmem:[%s8783_s10 + $0xa0] sm:$0xff]  ;;  %v6378_v23 = vld [vmem:[%s8783_s10 + $0x98] sm:$0xff] }
 0x358   : > { %4486 = vmatpush.bf16.msra.mxu2 %v5948_v19  ;;  %4499 = vmatpush.bf16.msra.mxu3 %v5952_v35  ;;  %v3963_v54 = vadd.f32 %v8398_v43, %v3947_v6  ;;  %v6015_v43 = vld [vmem:[%s8781_s8 + $0x180] sm:$0xf]  ;;  %v6345_v19 = vld [vmem:[%s8781_s8 + $0x18c] sm:$0xf0]  ;;  %v6346_v35 = vld [vmem:[%s8781_s8 + $0x194] sm:$0xf0] }
 0x359   : > { %4512 = vmatpush.bf16.msrb.mxu0 %v5956_v62  ;;  %4525 = vmatpush.bf16.msrb.mxu1 %v5960_v57  ;;  %v6344_v62 = vld [vmem:[%s8781_s8 + $0x18c] sm:$0xf]  ;;  %v6016_v57 = vor.u32 %v6345_v19, %v6015_v43  ;;  %v6387_v49 = vld [vmem:[%s8783_s10 + $0xe0] sm:$0xff]  ;;  %v6386_v12 = vld [vmem:[%s8783_s10 + $0xd8] sm:$0xff] }
 0x35a   : > { %v3977_v8 = vadd.f32 %v8387_v18, %v3963_v54  ;;  %v6028_v15 = vor.u32 %v6344_v62, %v6025_v61  ;;  %v6388_v6 = vld [vmem:[%s8783_s10 + $0xe8] sm:$0xff]  ;;  %v6363_v29 = vld [vmem:[%s8783_s10 + $0x20] sm:$0xff]  ;;  %v6377_v19 = vld [vmem:[%s8783_s10 + $0x90] sm:$0xff] }
 0x35b   : > { %v4003_v9 = vpop.f32.mrf.mxu2  ;;  %v6364_v54 = vld [vmem:[%s8783_s10 + $0x28] sm:$0xff]  ;;  %v6371_v43 = vld [vmem:[%s8783_s10 + $0x60] sm:$0xff]  ;;  %v6361_v62 = vld [vmem:[%s8783_s10 + $0x10] sm:$0xff] }
 0x35c   : > { %4487 = vmatpush.bf16.msra.mxu2 %v5932_v38  ;;  %4500 = vmatpush.bf16.msra.mxu3 %v5936_v22  ;;  %v6023_v9 = vld [vmem:[%s8781_s8 + $0x188] sm:$0xf]  ;;  %v3991_v38 = vadd.f32 %v8346_v55, %v3977_v8  ;;  %v6369_v61 = vld [vmem:[%s8783_s10 + $0x50] sm:$0xff]  ;;  %v6375_v8 = vld [vmem:[%s8783_s10 + $0x80] sm:$0xff] }
 0x35d   : > { %4513 = vmatpush.bf16.msrb.mxu0 %v5940_v27  ;;  %4526 = vmatpush.bf16.msrb.mxu1 %v5944_v11  ;;  %v6024_v37 = vor.u32 %v6346_v35, %v6023_v9  ;;  %v6376_v9 = vld [vmem:[%s8783_s10 + $0x88] sm:$0xff] }
 0x35e   : > { %5909 = vmatmul.msk.bf16.vlgmr.msrb.gmra.mxu2 %vm500_vm0, %v8389_v14  ;;  %5910 = vmatmul.msk.bf16.vlgmr.msrb.gmra.mxu3 %vm500_vm0, %v8389_v14  ;;  %v4005_v42 = vadd.f32 %v8422_v7, %v3991_v38  ;;  %v6384_v35 = vld [vmem:[%s8783_s10 + $0xc8] sm:$0xff]  ;;  %v6367_v38 = vld [vmem:[%s8783_s10 + $0x40] sm:$0xff] }
 0x35f   : > { %5911 = vmatmul.msk.bf16.vlgmr.msra.gmra.mxu0 %vm500_vm0, %v8389_v14  ;;  %5912 = vmatmul.msk.bf16.vlgmr.msra.gmra.mxu1 %vm500_vm0, %v8389_v14  ;;  %v6357_v14 = vld [vmem:[%s8781_s8 + $0x1ec] sm:$0xf0] }
 0x360   : > { %v6064_v58 = vor.u32 %v6357_v14, %v6063_v41  ;;  %4659 = vmatpush.bf16.msrb.mxu3 %v6068_v2  ;;  %v6389_v2 = vld [vmem:[%s8783_s10 + $0xf0] sm:$0xff] }
 0x361   : > { %4672 = vmatpush.bf16.msra.mxu0 %v6072_v33  ;;  %4685 = vmatpush.bf16.msra.mxu1 %v6076_v0 }
 0x362   : > { %4646 = vmatpush.bf16.msrb.mxu2 %v6064_v58 }
 0x364   : > { %4660 = vmatpush.bf16.msrb.mxu3 %v6052_v50 }
 0x365   : > { %4673 = vmatpush.bf16.msra.mxu0 %v6056_v16  ;;  %4686 = vmatpush.bf16.msra.mxu1 %v6060_v44 }
 0x366   : > { %4647 = vmatpush.bf16.msrb.mxu2 %v6048_v10 }
 0x368   : > { %4661 = vmatpush.bf16.msrb.mxu3 %v6036_v63 }
 0x369   : > { %4674 = vmatpush.bf16.msra.mxu0 %v6040_v17  ;;  %4687 = vmatpush.bf16.msra.mxu1 %v6044_v52  ;;  %v6362_v52 = vld [vmem:[%s8783_s10 + $0x18] sm:$0xff] }
 0x36a   : > { %4648 = vmatpush.bf16.msrb.mxu2 %v6032_v48  ;;  %v6372_v48 = vld [vmem:[%s8783_s10 + $0x68] sm:$0xff] }
 0x36c   : > { %4662 = vmatpush.bf16.msrb.mxu3 %v6020_v20  ;;  %v6360_v20 = vld [vmem:[%s8783_s10 + $0x8] sm:$0xff] }
 0x36d   : > { %4675 = vmatpush.bf16.msra.mxu0 %v6024_v37  ;;  %4688 = vmatpush.bf16.msra.mxu1 %v6028_v15  ;;  %v6368_v37 = vld [vmem:[%s8783_s10 + $0x48] sm:$0xff]  ;;  %v6359_v15 = vld [vmem:[%s8783_s10] sm:$0xff] }
 0x36e   : > { %4649 = vmatpush.bf16.msrb.mxu2 %v6016_v57  ;;  %v6383_v57 = vld [vmem:[%s8783_s10 + $0xc0] sm:$0xff] }
 0x373   : > { %v4018_v56 = vpop.f32.mrf.mxu3  ;;  %v4063_v40 = vpop.f32.mrf.mxu1 }
 0x374   : > { %v4022_v22 = vadd.f32 %v4018_v56, %v4005_v42 }
 0x377   : > { %v4045_v18 = vpop.f32.mrf.mxu0 }
 0x378   : > { %v4049_v27 = vadd.f32 %v4045_v18, %v4022_v22 }
 0x37a   : > { %v4067_v24 = vadd.f32 %v4063_v40, %v4049_v27 }
 0x37b   : > { %v4020_v5 = vpop.f32.mrf.mxu3  ;;  %v4065_v11 = vpop.f32.mrf.mxu1 }
 0x37c   : > { %v4068_v41 = vadd.f32 %v8382_v46, %v4067_v24  ;;  %v6382_v46 = vld [vmem:[%s8783_s10 + $0xb8] sm:$0xff]  ;;  %v457_v24 = vld [vmem:[%s8782_s9] sm:$0xf] }
 0x37e   : > { %v4069_v14 = vmax.f32 %v4068_v41, 0.0 }
 0x37f   : > { %v4047_v51 = vpop.f32.mrf.mxu0 }
 0x380   : > { %v4070_v58 = vpack.c.bf16 %v4069_v14, %v4069_v14 }
 0x382   : > { %5993 = vmatmul.msk.bf16.vlgmr.msra.gmra.mxu2 %vm500_vm0, %v4070_v58  ;;  %5994 = vmatmul.msk.bf16.vlgmr.msra.gmra.mxu3 %vm500_vm0, %v4070_v58  ;;  %v4554_v55 = vunpack.c.l.b16 %v4070_v58 }
 0x383   : > { %5995 = vmatmul.msk.bf16.vlgmr.msrb.gmra.mxu0 %vm500_vm0, %v4070_v58  ;;  %5996 = vmatmul.msk.bf16.vlgmr.msrb.gmra.mxu1 %vm500_vm0, %v4070_v58 }
 0x384   : > { %v4555_v7 = vpack.c.b16 %v4554_v55, %v4554_v55  ;;  %5001 = vmatpush.bf16.msrb.mxu0 %v6382_v46  ;;  %5014 = vmatpush.bf16.msrb.mxu1 %v6390_v47  ;;  %v4701_v55 = vperm.slane %v457_v24, 2 }
 0x385   : > { %4975 = vmatpush.bf16.msra.mxu2 %v6366_v30  ;;  %4988 = vmatpush.bf16.msra.mxu3 %v6374_v53 }
 0x386   : > { %v4557_v21 = vshrl.u32 %v4555_v7, 16  ;;  %v4702_v7 = vperm.slane %v457_v24, 3 }
 0x388   : > { %5002 = vmatpush.bf16.msrb.mxu0 %v6381_v45  ;;  %5015 = vmatpush.bf16.msrb.mxu1 %v6389_v2 }
 0x389   : > { %4976 = vmatpush.bf16.msra.mxu2 %v6365_v31  ;;  %4989 = vmatpush.bf16.msra.mxu3 %v6373_v36 }
 0x38c   : > { %5003 = vmatpush.bf16.msrb.mxu0 %v6380_v59  ;;  %5016 = vmatpush.bf16.msrb.mxu1 %v6388_v6 }
 0x38d   : > { %4977 = vmatpush.bf16.msra.mxu2 %v6364_v54  ;;  %4990 = vmatpush.bf16.msra.mxu3 %v6372_v48 }
 0x390   : > { %5004 = vmatpush.bf16.msrb.mxu0 %v6379_v26  ;;  %5017 = vmatpush.bf16.msrb.mxu1 %v6387_v49 }
 0x391   : > { %4978 = vmatpush.bf16.msra.mxu2 %v6363_v29  ;;  %4991 = vmatpush.bf16.msra.mxu3 %v6371_v43  ;;  %v458_v43 = vld [vmem:[%s8784_s11] sm:$0x1] }
 0x392   : > { %6077 = vmatmul.msk.bf16.vlgmr.msrb.gmra.mxu2 %vm500_vm0, %v4557_v21  ;;  %6078 = vmatmul.msk.bf16.vlgmr.msrb.gmra.mxu3 %vm500_vm0, %v4557_v21 }
 0x393   : > { %6079 = vmatmul.msk.bf16.vlgmr.msra.gmra.mxu0 %vm500_vm0, %v4557_v21  ;;  %6080 = vmatmul.msk.bf16.vlgmr.msra.gmra.mxu1 %vm500_vm0, %v4557_v21 }
 0x394   : > { %5005 = vmatpush.bf16.msrb.mxu0 %v6378_v23  ;;  %5018 = vmatpush.bf16.msrb.mxu1 %v6386_v12 }
 0x395   : > { %4979 = vmatpush.bf16.msra.mxu2 %v6362_v52  ;;  %4992 = vmatpush.bf16.msra.mxu3 %v6370_v3 }
 0x398   : > { %5006 = vmatpush.bf16.msrb.mxu0 %v6377_v19  ;;  %5019 = vmatpush.bf16.msrb.mxu1 %v6385_v32 }
 0x399   : > { %4980 = vmatpush.bf16.msra.mxu2 %v6361_v62  ;;  %4993 = vmatpush.bf16.msra.mxu3 %v6369_v61 }
 0x39c   : > { %5007 = vmatpush.bf16.msrb.mxu0 %v6376_v9  ;;  %5020 = vmatpush.bf16.msrb.mxu1 %v6384_v35 }
 0x39d   : > { %4981 = vmatpush.bf16.msra.mxu2 %v6360_v20  ;;  %4994 = vmatpush.bf16.msra.mxu3 %v6368_v37 }
 0x3a0   : > { %5008 = vmatpush.bf16.msrb.mxu0 %v6375_v8  ;;  %5021 = vmatpush.bf16.msrb.mxu1 %v6383_v57 }
 0x3a1   : > { %4982 = vmatpush.bf16.msra.mxu2 %v6359_v15  ;;  %4995 = vmatpush.bf16.msra.mxu3 %v6367_v38 }
 0x3cc   : > { %v8627_v33 = vpop.f32.mrf.mxu0  ;;  %v8629_v1 = vpop.f32.mrf.mxu1 }
 0x3d1   : > { %v8631_v4 = vpop.f32.mrf.mxu2  ;;  %v8633_v28 = vpop.f32.mrf.mxu3 }
 0x3d4   : > { %v4230_v0 = vpop.f32.mrf.mxu0  ;;  %v4243_v13 = vpop.f32.mrf.mxu1 }
 0x3d9   : > { %v4204_v34 = vpop.f32.mrf.mxu2  ;;  %v4217_v25 = vpop.f32.mrf.mxu3 }
 0x3da   : > { %v4699_v25 = vperm.slane %v457_v24, 0 }
 0x3dc   : > { %v8635_v10 = vpop.f32.mrf.mxu0  ;;  %v8637_v50 = vpop.f32.mrf.mxu1 }
 0x3dd   : > { %v4364_v5 = vadd.f32 %v8635_v10, %v8627_v33  ;;  %v4377_v11 = vadd.f32 %v8637_v50, %v8629_v1  ;;  %v4700_v10 = vperm.slane %v457_v24, 1 }
 0x3e1   : > { %v8651_v16 = vpop.f32.mrf.mxu2  ;;  %v8653_v39 = vpop.f32.mrf.mxu3 }
 0x3e2   : > { %v4338_v2 = vadd.f32 %v8651_v16, %v8631_v4  ;;  %v4351_v0 = vadd.f32 %v8653_v39, %v8633_v28 }
 0x3e4   : > { %v4365_v44 = vpop.f32.mrf.mxu0  ;;  %v4378_v60 = vpop.f32.mrf.mxu1 }
 0x3e9   : > { %v4339_v63 = vpop.f32.mrf.mxu2  ;;  %v4352_v17 = vpop.f32.mrf.mxu3 }
 0x400   : > { %v4515_v56 = vpop.f32.mrf.mxu0  ;;  %v4528_v40 = vpop.f32.mrf.mxu1 }
 0x401   : > { %v4534_v51 = vadd.f32 %v4515_v56, %v4364_v5  ;;  %v4535_v58 = vadd.f32 %v4528_v40, %v4377_v11 }
 0x405   : > { %v4489_v42 = vpop.f32.mrf.mxu2  ;;  %v4502_v22 = vpop.f32.mrf.mxu3 }
 0x406   : > { %v4532_v34 = vadd.f32 %v4489_v42, %v4338_v2  ;;  %v4533_v1 = vadd.f32 %v4502_v22, %v4351_v0 }
 0x408   : > { %v4517_v18 = vpop.f32.mrf.mxu0  ;;  %v4530_v27 = vpop.f32.mrf.mxu1 }
 0x40d   : > { %v4491_v41 = vpop.f32.mrf.mxu2  ;;  %v4504_v14 = vpop.f32.mrf.mxu3 }
 0x410   : > { %v4677_v21 = vpop.f32.mrf.mxu0  ;;  %v4690_v46 = vpop.f32.mrf.mxu1 }
 0x411   : > { %v4696_v47 = vadd.f32 %v4677_v21, %v4534_v51  ;;  %v4697_v45 = vadd.f32 %v4690_v46, %v4535_v58 }
 0x413   : > { %v4709_v33 = vadd.f32 %v4701_v55, %v4696_v47  ;;  %v4710_v13 = vadd.f32 %v4702_v7, %v4697_v45 }
 0x415   : > { %v4713_v50 = vmax.f32 %v4709_v33, 0.0  ;;  %v4714_v30 = vmax.f32 %v4710_v13, 0.0  ;;  %v4651_v53 = vpop.f32.mrf.mxu2  ;;  %v4664_v59 = vpop.f32.mrf.mxu3 }
 0x416   : > { %v4694_v6 = vadd.f32 %v4651_v53, %v4532_v34  ;;  %v4695_v31 = vadd.f32 %v4664_v59, %v4533_v1 }
 0x417   : > { %v4717_v36 = vpack.c.bf16 %v4713_v50, %v4713_v50  ;;  %v4718_v44 = vpack.c.bf16 %v4714_v30, %v4714_v30 }
 0x418   : > { %v4707_v60 = vadd.f32 %v4699_v25, %v4694_v6  ;;  %v4708_v26 = vadd.f32 %v4700_v10, %v4695_v31  ;;  %v4679_v4 = vpop.f32.mrf.mxu0  ;;  %v4692_v16 = vpop.f32.mrf.mxu1 }
 0x419   : > { %5009 = vmatmul.bf16.vlgmr.msrb.gmra.mxu0 %v4717_v36  ;;  %5022 = vmatmul.bf16.vlgmr.msrb.gmra.mxu1 %v4718_v44 }
 0x41a   : > { %v4711_v28 = vmax.f32 %v4707_v60, 0.0  ;;  %v4712_v39 = vmax.f32 %v4708_v26, 0.0 }
 0x41c   : > { %v4715_v49 = vpack.c.bf16 %v4711_v28, %v4711_v28  ;;  %v4716_v54 = vpack.c.bf16 %v4712_v39, %v4712_v39 }
 0x41d   : > { %v4653_v48 = vpop.f32.mrf.mxu2  ;;  %v4666_v23 = vpop.f32.mrf.mxu3 }
 0x41e   : > { %4983 = vmatmul.bf16.vlgmr.msra.gmra.mxu2 %v4715_v49  ;;  %4996 = vmatmul.bf16.vlgmr.msra.gmra.mxu3 %v4716_v54 }
 0x496   : > { %v5010_v12 = vpop.f32.mrf.mxu0  ;;  %v5023_v29 = vpop.f32.mrf.mxu1 }
 0x49e   : > { %v5012_v63 = vpop.f32.mrf.mxu0  ;;  %v5025_v17 = vpop.f32.mrf.mxu1 }
 0x4a1   : > { %v4984_v19 = vpop.f32.mrf.mxu2  ;;  %v4997_v32 = vpop.f32.mrf.mxu3 }
 0x4a2   : > { %v4985_v52 = vadd.f32 %v4984_v19, %v458_v43 }
 0x4a4   : > { %v4998_v3 = vadd.f32 %v4997_v32, %v4985_v52 }
 0x4a6   : > { %v5011_v9 = vadd.f32 %v5010_v12, %v4998_v3 }
 0x4a8   : > { %v5024_v35 = vadd.f32 %v5023_v29, %v5011_v9 }
 0x4a9   : > { %v4986_v62 = vpop.f32.mrf.mxu2  ;;  %v4999_v61 = vpop.f32.mrf.mxu3 }
 0x4aa   : > { %5028 = vst.msk [vmem:[%s420_s20] sm:$0x1] %vm5027_vm2, %v5024_v35 }
 0x4ab   : > { %6478 = shalt.err (!%p6475_p3)
}
 0x4ac   : > { %6392 = dma.vmem_to_hbm [thread:$0]  (%p6618_p5), %s5041_s26, 16, %s5043_s30, %s5030_s28  }
 0x4ad PF: > { %p6398_p4 = scmp.ge.s32.totalorder %s6513_s24, 2  ;;  %s5054_s0 = sand.u32 1, %s6501_s21  }
 0x4ae   : > { %s5055_s20 = scalar_lea.sflag [#allocation3], %s5054_s0 }
 0x4af   : > { %p6395_p7 = pnand %p6398_p4, %p6622_p6 }
 0x4b1   : > { %p6396_p8 = pneg %p6395_p7 }
 0x4b3   : > { %6496 = dma.done.wait (%p6396_p8), %s5055_s20, 16  }
 0x4b4   : > { %6498 = vsyncadd (%p6396_p8), %s5055_s20, 4294967280  ;;  %s8795_s19 = sld [smem:[#allocation5_spill]]  ;;  %p22_p9 = scmp.ge.s32.totalorder %s6605_s27, 4  }
 0x4b5   : > { %s8796_s21 = smov %s6505_s22  ;;  %s8797_s22 = smov %s6509_s23 }
 0x4b6   : > { %s8799_s24 = smov %s6605_s27  ;;  %24 = sbr.rel (!%p22_p9) target bundleno = 5 (0x5), region = 135 }
 0x4ba   : > { %s8798_s23 = smov %s8795_s19 }
 0x4bb   :  { %5060 = vsyncpa [#allocation3], 1 }
 0x4bc   :  { %5062 = vsyncpa [#allocation3 + $0x1], 1 }

</bundles_post_ra>
